<compile_context>
chip_gen: v6e
topology: v6e:2x2x1
jax: 0.10.0
libtpu: 0.0.40
codegen_flags: <defaults>
</compile_context>

<pallas_src>
import functools

import jax
import jax.numpy as jnp
from jax import lax
from jax.experimental import pallas as pl
from jax.experimental.pallas import tpu as pltpu

LRELU_SLOPE = 0.2
IN_EPS = 1e-5
KW_CONV = 4
CONV_PAD = 1
VMEM_LIMIT = 32 * 1024 * 1024  # safe on v5e/v6e/v7x; blocks below are far under this.


def _round_up(x, m):
    return (x + m - 1) // m * m


def _pick_tile(size, candidates):
    for c in candidates:
        if size % c == 0:
            return c
    return None


# --------------------------- Pallas kernels ---------------------------

def _matmul_bias_kernel(apply_lrelu, fuse_instnorm, a_ref, b_ref, bias_ref, o_ref):
    """o = A @ B + bias (+ LeakyReLU) (+ fused InstanceNorm+LReLU when one M tile ==
    one image's spatial map).  Grid = (M tiles, K tiles); f32 accumulation happens
    directly in the resident output block (no scratch accumulator)."""
    k = pl.program_id(1)

    @pl.when(k == 0)
    def _():
        o_ref[...] = jnp.zeros_like(o_ref)

    o_ref[...] += jnp.dot(a_ref[...], b_ref[...],
                          preferred_element_type=jnp.float32)

    @pl.when(k == pl.num_programs(1) - 1)
    def _():
        y = o_ref[...] + bias_ref[...]
        if apply_lrelu:
            y = jnp.where(y >= 0, y, LRELU_SLOPE * y)
        if fuse_instnorm:
            inv_n = 1.0 / y.shape[0]
            mean = jnp.sum(y, axis=0, keepdims=True) * inv_n
            msq = jnp.sum(y * y, axis=0, keepdims=True) * inv_n
            var = jnp.maximum(msq - mean * mean, 0.0)
            y = (y - mean) * lax.rsqrt(var + IN_EPS)
            y = jnp.where(y >= 0, y, LRELU_SLOPE * y)
        o_ref[...] = y


def matmul_bias_act(a_bf16, b_bf16, bias_f32, apply_lrelu,
                    fuse_instnorm=False, force_tm=None):
    """(M,K)bf16 @ (K,Cout)bf16 + bias[Cout] (+epilogue) -> f32.
    M tiled (parallel axis), K tiled (arbitrary axis), Cout left unpadded.
    If force_tm is given (fused InstanceNorm), each M tile is exactly one image."""
    M, K = a_bf16.shape
    K2, cout = b_bf16.shape
    assert K == K2

    Mp = _round_up(M, 16)                      # bf16 sublane packing
    if Mp != M:                                # rare fallback; not hit for these shapes
        a_bf16 = jnp.pad(a_bf16, ((0, Mp - M), (0, 0)))
    if force_tm is not None:
        assert Mp % force_tm == 0 and force_tm % 16 == 0
        tm = force_tm
    else:
        tm = _pick_tile(Mp, (512, 256, 128, 64, 32, 16))
    tk = _pick_tile(K, (512, 256, 128)) or K   # tk=K -> single K block when K%128 != 0

    out = pl.pallas_call(
        functools.partial(_matmul_bias_kernel, apply_lrelu, fuse_instnorm),
        out_shape=jax.ShapeDtypeStruct((Mp, cout), jnp.float32),
        grid_spec=pltpu.PrefetchScalarGridSpec(
            num_scalar_prefetch=0,
            grid=(Mp // tm, K // tk),
            in_specs=[
                pl.BlockSpec((tm, tk), lambda i, k: (i, k)),
                pl.BlockSpec((tk, cout), lambda i, k: (k, 0)),
                pl.BlockSpec((1, cout), lambda i, k: (0, 0)),
            ],
            out_specs=pl.BlockSpec((tm, cout), lambda i, k: (i, 0)),
        ),
        compiler_params=pltpu.CompilerParams(
            dimension_semantics=("parallel", "arbitrary"),
            vmem_limit_bytes=VMEM_LIMIT,
        ),
    )(a_bf16, b_bf16, bias_f32)
    return out[:M] if Mp != M else out


def _conv_s1_kernel(kh, kw, oh_sz, ow_sz, apply_lrelu, fuse_instnorm,
                    x_ref, w_ref, b_ref, o_ref):
    """Direct stride-1 4x4 conv for one image (no im2col).
    x: (Hp,Wp,Cin) bf16, w: (kh*kw,Cin,Cout) bf16, b: (1,Cout) f32, o: (OH,OW,Cout) f32.
    Per output row, accumulate kh*kw small MXU dots; optionally fuse InstanceNorm+LReLU
    over the resident output block."""
    bias = b_ref[...]                                    # (1, Cout), hoisted

    def row_body(oh, carry):
        acc = jnp.zeros((ow_sz, o_ref.shape[-1]), jnp.float32)
        for di in range(kh):
            row = x_ref[oh + di]                         # (Wp, Cin)
            for dj in range(kw):
                acc = acc + jnp.dot(row[dj:dj + ow_sz, :], w_ref[di * kw + dj],
                                    preferred_element_type=jnp.float32)
        y = acc + bias
        if apply_lrelu:
            y = jnp.where(y >= 0, y, LRELU_SLOPE * y)
        o_ref[oh] = y
        return carry

    lax.fori_loop(0, oh_sz, row_body, 0)

    if fuse_instnorm:
        y = o_ref[...]                                   # full (OH, OW, C) still in VMEM
        inv_n = 1.0 / (oh_sz * ow_sz)
        mean = jnp.sum(jnp.sum(y, axis=1, keepdims=True), axis=0, keepdims=True) * inv_n
        msq = jnp.sum(jnp.sum(y * y, axis=1, keepdims=True), axis=0, keepdims=True) * inv_n
        var = jnp.maximum(msq - mean * mean, 0.0)
        yn = (y - mean) * lax.rsqrt(var + IN_EPS)
        o_ref[...] = jnp.where(yn >= 0, yn, LRELU_SLOPE * yn)


def _inorm_lrelu_kernel(x_ref, o_ref):
    """InstanceNorm2d (affine=False, eps=1e-5, biased var) + LeakyReLU(0.2), block (HW,C).
    Single pass: var = E[x^2] - mean^2.  Fallback path (normally fused into conv)."""
    x = x_ref[...]
    inv_n = 1.0 / x.shape[0]
    mean = jnp.sum(x, axis=0, keepdims=True) * inv_n
    msq = jnp.sum(x * x, axis=0, keepdims=True) * inv_n
    var = jnp.maximum(msq - mean * mean, 0.0)
    y = (x - mean) * lax.rsqrt(var + IN_EPS)
    o_ref[...] = jnp.where(y >= 0, y, LRELU_SLOPE * y)


def _avgpool_kernel(ah_ref, x_ref, awt_ref, o_ref):
    """AvgPool2d(3,2,1,count_include_pad=False) of one (Hp,Wp) plane as two small
    matmuls against static normalized row/col selection matrices."""
    t = jnp.dot(x_ref[...], awt_ref[...], preferred_element_type=jnp.float32)   # (Hp, OW)
    o_ref[...] = jnp.dot(ah_ref[...], t, preferred_element_type=jnp.float32)    # (OH, OW)


# --------------------------- JAX glue ---------------------------

def _im2col_bf16(x_nhwc, kh, kw, stride, pad):
    """(N,H,W,C) -> bf16 patch rows (N*OH*OW, kh*kw*C). Cast to bf16 before the 16-tap
    stack so the amplified tensor is only ever materialized in bf16."""
    N, H, W, C = x_nhwc.shape
    OH = (H + 2 * pad - kh) // stride + 1
    OW = (W + 2 * pad - kw) // stride + 1
    xp = jnp.pad(x_nhwc, ((0, 0), (pad, pad), (pad, pad), (0, 0))).astype(jnp.bfloat16)
    taps = []
    for i in range(kh):
        for j in range(kw):
            lim_h = i + (OH - 1) * stride + 1
            lim_w = j + (OW - 1) * stride + 1
            taps.append(lax.slice(xp, (0, i, j, 0), (N, lim_h, lim_w, C),
                                  (1, stride, stride, 1)))
    patches = jnp.stack(taps, axis=3)                         # (N, OH, OW, kh*kw, C) bf16
    return patches.reshape(N * OH * OW, kh * kw * C), OH, OW


def conv2d_s2(x_nhwc, p, apply_lrelu=False, fuse_instnorm=False):
    """Stride-2 4x4 conv via bf16 im2col + tiled MXU matmul.
    When fuse_instnorm, each M tile is one image's spatial map so IN+LReLU is computed
    in the matmul epilogue (no standalone norm kernel / HBM round trip)."""
    N = x_nhwc.shape[0]
    patches, OH, OW = _im2col_bf16(x_nhwc, KW_CONV, KW_CONV, 2, CONV_PAD)
    ohw = OH * OW
    fuse_ok = fuse_instnorm and (ohw % 16 == 0) and (ohw <= 2048)
    out = matmul_bias_act(patches, p["w"], p["b"], apply_lrelu,
                          fuse_instnorm=fuse_ok,
                          force_tm=ohw if fuse_ok else None)
    out = out.reshape(N, OH, OW, p["cout"])
    if fuse_instnorm and not fuse_ok:          # guarded fallback, not hit for these shapes
        out = instance_norm_lrelu(out)
    return out


def conv2d_s1(x_nhwc, p, apply_lrelu=False, fuse_instnorm=False):
    """Stride-1 4x4 conv, taps accumulated in-kernel (no im2col), one image per grid step."""
    N, H, W, cin = x_nhwc.shape
    cout = p["cout"]
    Hp, Wp = H + 2 * CONV_PAD, W + 2 * CONV_PAD
    OH, OW = Hp - KW_CONV + 1, Wp - KW_CONV + 1
    xp = jnp.pad(x_nhwc.astype(jnp.bfloat16),
                 ((0, 0), (CONV_PAD, CONV_PAD), (CONV_PAD, CONV_PAD), (0, 0)))
    return pl.pallas_call(
        functools.partial(_conv_s1_kernel, KW_CONV, KW_CONV, OH, OW,
                          apply_lrelu, fuse_instnorm),
        out_shape=jax.ShapeDtypeStruct((N, OH, OW, cout), jnp.float32),
        grid_spec=pltpu.PrefetchScalarGridSpec(
            num_scalar_prefetch=0,
            grid=(N,),
            in_specs=[
                pl.BlockSpec((None, Hp, Wp, cin), lambda n: (n, 0, 0, 0)),
                pl.BlockSpec((KW_CONV * KW_CONV, cin, cout), lambda n: (0, 0, 0)),
                pl.BlockSpec((1, cout), lambda n: (0, 0)),
            ],
            out_specs=pl.BlockSpec((None, OH, OW, cout), lambda n: (n, 0, 0, 0)),
        ),
        compiler_params=pltpu.CompilerParams(
            dimension_semantics=("parallel",),
            vmem_limit_bytes=VMEM_LIMIT,
        ),
    )(xp, p["w"], p["b"])


def instance_norm_lrelu(x_nhwc):
    """Standalone IN+LReLU (fallback only; normally fused into the conv epilogues)."""
    N, H, W, C = x_nhwc.shape
    x = x_nhwc.reshape(N, H * W, C)
    out = pl.pallas_call(
        _inorm_lrelu_kernel,
        out_shape=jax.ShapeDtypeStruct((N, H * W, C), jnp.float32),
        grid_spec=pltpu.PrefetchScalarGridSpec(
            num_scalar_prefetch=0,
            grid=(N,),
            in_specs=[pl.BlockSpec((None, H * W, C), lambda n: (n, 0, 0))],
            out_specs=pl.BlockSpec((None, H * W, C), lambda n: (n, 0, 0)),
        ),
        compiler_params=pltpu.CompilerParams(dimension_semantics=("parallel",)),
    )(x)
    return out.reshape(N, H, W, C)


def _pool_matrix(L, OL):
    """(OL, L+2): A[o,l] = 1/#valid if padded index l is in o's 3-window and is a real
    (non-pad) pixel, else 0.  count_include_pad=False factorizes per axis."""
    o = jnp.arange(OL)[:, None]
    l = jnp.arange(L + 2)[None, :]
    in_win = (l >= 2 * o) & (l <= 2 * o + 2)
    valid = (l >= 1) & (l <= L)
    sel = (in_win & valid).astype(jnp.float32)
    return sel / jnp.sum(sel, axis=1, keepdims=True)


def avg_pool_3x3_s2_p1_nchw(x_nchw):
    """nn.AvgPool2d(3, stride=2, padding=1, count_include_pad=False) on NCHW input."""
    N, C, H, W = x_nchw.shape
    OH = (H + 2 - 3) // 2 + 1
    OW = (W + 2 - 3) // 2 + 1
    Hp, Wp = H + 2, W + 2
    xp = jnp.pad(x_nchw, ((0, 0), (0, 0), (1, 1), (1, 1))).reshape(N * C, Hp, Wp)
    a_h = _pool_matrix(H, OH)          # (OH, Hp), static constants under jit
    a_wt = _pool_matrix(W, OW).T       # (Wp, OW)
    out = pl.pallas_call(
        _avgpool_kernel,
        out_shape=jax.ShapeDtypeStruct((N * C, OH, OW), jnp.float32),
        grid_spec=pltpu.PrefetchScalarGridSpec(
            num_scalar_prefetch=0,
            grid=(N * C,),
            in_specs=[
                pl.BlockSpec((OH, Hp), lambda r: (0, 0)),
                pl.BlockSpec((None, Hp, Wp), lambda r: (r, 0, 0)),
                pl.BlockSpec((Wp, OW), lambda r: (0, 0)),
            ],
            out_specs=pl.BlockSpec((None, OH, OW), lambda r: (r, 0, 0)),
        ),
        compiler_params=pltpu.CompilerParams(dimension_semantics=("parallel",)),
    )(a_h, xp, a_wt)
    return out.reshape(N, C, OH, OW)


# --------------------------- Model ---------------------------

def init_nlayer_params(key, input_nc, ndf, n_layers):
    """NLayerDiscriminator conv stack; weights pre-packed (transposed, bf16) at init."""
    cfgs = [(input_nc, ndf, 2)]
    nf = 1
    for n in range(1, n_layers):
        nf_prev, nf = nf, min(2 ** n, 8)
        cfgs.append((ndf * nf_prev, ndf * nf, 2))
    nf_prev, nf = nf, min(2 ** n_layers, 8)
    cfgs.append((ndf * nf_prev, ndf * nf, 1))
    cfgs.append((ndf * nf, 1, 1))

    params = []
    for cin, cout, stride in cfgs:
        key, k_w, k_b = jax.random.split(key, 3)
        w = 0.02 * jax.random.normal(k_w, (cout, cin, KW_CONV, KW_CONV), jnp.float32)
        b = 0.01 * jax.random.normal(k_b, (cout,), jnp.float32)
        w_kkio = jnp.transpose(w, (2, 3, 1, 0))                       # (kh, kw, cin, cout)
        if stride == 2:
            w_packed = w_kkio.reshape(KW_CONV * KW_CONV * cin, cout).astype(jnp.bfloat16)
        else:
            w_packed = w_kkio.reshape(KW_CONV * KW_CONV, cin, cout).astype(jnp.bfloat16)
        params.append({"w": w_packed, "b": b.reshape(1, cout),
                       "stride": stride, "cin": cin, "cout": cout})
    return params, key


def nlayer_discriminator(x_nhwc, params):
    """Conv->LReLU, [Conv->InstanceNorm->LReLU]*n, Conv  (kernel 4, pad 1)."""
    n = len(params)
    y = x_nhwc
    for i, p in enumerate(params):
        first = i == 0
        has_norm = 0 < i < n - 1
        if p["stride"] == 2:
            # IN+LReLU fused into the matmul epilogue (per-image M tiles) when present.
            y = conv2d_s2(y, p, apply_lrelu=first, fuse_instnorm=has_norm)
        else:
            # stride-1 layers: IN+LReLU fused into the conv kernel epilogue when present.
            y = conv2d_s1(y, p, apply_lrelu=first, fuse_instnorm=has_norm)
    return y


def discriminator_m_forward(x_nchw, all_params):
    """Discriminator_m.forward: per-scale outputs; AvgPool downsample between scales."""
    results = []
    num_d = len(all_params)
    x = x_nchw
    for i in range(num_d):
        x_nhwc = jnp.transpose(x, (0, 2, 3, 1))          # NCHW -> NHWC for the convs
        y = nlayer_discriminator(x_nhwc, all_params[i])
        results.append(jnp.transpose(y, (0, 3, 1, 2)))   # back to NCHW like PyTorch
        if i < num_d - 1:
            x = avg_pool_3x3_s2_p1_nchw(x)               # pool stays in NCHW layout
    return results


if __name__ == "__main__":
    NUM_D, N_LAYERS, NDF = 2, 3, 16
    INPUT_NC, BATCH, SPATIAL = 3, 2, 64

    key = jax.random.PRNGKey(0)
    all_params = []
    for _ in range(NUM_D):
        p, key = init_nlayer_params(key, INPUT_NC, NDF, N_LAYERS)
        all_params.append(p)

    key, kx = jax.random.split(key)
    x = jax.random.normal(kx, (BATCH, INPUT_NC, SPATIAL, SPATIAL), jnp.float32)

    fwd = jax.jit(lambda inp: discriminator_m_forward(inp, all_params))
    results = fwd(x)
    results = jax.block_until_ready(results)
    assert results[0].shape == (BATCH, 1, 6, 6)
    assert results[1].shape == (BATCH, 1, 2, 2)
    print("KERNEL_OK")
</pallas_src>

<mosaic_0001>
module attributes {stable_mosaic.version = 11 : i64} {
  func.func @_matmul_bias_kernel(%arg0: i32, %arg1: i32, %arg2: memref<512x48xbf16, #tpu.memory_space<vmem>>, %arg3: memref<48x16xbf16, #tpu.memory_space<vmem>>, %arg4: memref<1x16xf32, #tpu.memory_space<vmem>>, %arg5: memref<512x16xf32, #tpu.memory_space<vmem>>) attributes {dimension_semantics = [#tpu.dimension_semantics<parallel>, #tpu.dimension_semantics<arbitrary>], iteration_bounds = array<i64: 4, 1>, scalar_prefetch = 0 : i64, scratch_operands = 0 : i64, tpu.core_type = #tpu.core_type<tc>, window_params = [{transform_indices = @transform_0, window_bounds = array<i64: 512, 48>}, {transform_indices = @transform_1, window_bounds = array<i64: 48, 16>}, {pipeline_mode = #tpu.pipeline_mode<synchronous>, transform_indices = @transform_2, window_bounds = array<i64: 1, 16>}, {transform_indices = @transform_3, window_bounds = array<i64: 512, 16>}]} {
    %c0_i32 = arith.constant 0 : i32
    %0 = arith.cmpi eq, %arg1, %c0_i32 : i32
    %1 = arith.extui %0 : i1 to i32
    %c0_i32_0 = arith.constant 0 : i32
    %2 = arith.cmpi ne, %1, %c0_i32_0 : i32
    scf.if %2 {
      %cst_10 = arith.constant 0.000000e+00 : f32
      %12 = vector.broadcast %cst_10 : f32 to vector<512x16xf32>
      %c0_11 = arith.constant 0 : index
      %c0_12 = arith.constant 0 : index
      %13 = vector.load %arg5[%c0_11, %c0_12] : memref<512x16xf32, #tpu.memory_space<vmem>>, vector<512x16xf32>
      tpu.vector_store %arg5[%c0_11, %c0_12], %12 {strides = array<i32>} : memref<512x16xf32, #tpu.memory_space<vmem>>, vector<512x16xf32>,
    } else {
    }
    %c0 = arith.constant 0 : index
    %c0_1 = arith.constant 0 : index
    %3 = vector.load %arg5[%c0, %c0_1] : memref<512x16xf32, #tpu.memory_space<vmem>>, vector<512x16xf32>
    %c0_2 = arith.constant 0 : index
    %c0_3 = arith.constant 0 : index
    %4 = vector.load %arg2[%c0_2, %c0_3] : memref<512x48xbf16, #tpu.memory_space<vmem>>, vector<512x48xbf16>
    %c0_4 = arith.constant 0 : index
    %c0_5 = arith.constant 0 : index
    %5 = vector.load %arg3[%c0_4, %c0_5] : memref<48x16xbf16, #tpu.memory_space<vmem>>, vector<48x16xbf16>
    %cst = arith.constant dense<0.000000e+00> : vector<512x16xf32>
    %6 = tpu.matmul %4, %5, %cst {dimension_numbers = #tpu.dot_dimension_numbers<[1], [0], [0], [1], [0, 0, 1, 1], [], []>} : vector<512x48xbf16>, vector<48x16xbf16>, vector<512x16xf32> -> vector<512x16xf32>
    %7 = arith.addf %3, %6 : vector<512x16xf32>
    %c0_6 = arith.constant 0 : index
    %c0_7 = arith.constant 0 : index
    %8 = vector.load %arg5[%c0_6, %c0_7] : memref<512x16xf32, #tpu.memory_space<vmem>>, vector<512x16xf32>
    tpu.vector_store %arg5[%c0_6, %c0_7], %7 {strides = array<i32>} : memref<512x16xf32, #tpu.memory_space<vmem>>, vector<512x16xf32>,
    %c0_i32_8 = arith.constant 0 : i32
    %9 = arith.cmpi eq, %arg1, %c0_i32_8 : i32
    %10 = arith.extui %9 : i1 to i32
    %c0_i32_9 = arith.constant 0 : i32
    %11 = arith.cmpi ne, %10, %c0_i32_9 : i32
    scf.if %11 {
      %c0_10 = arith.constant 0 : index
      %c0_11 = arith.constant 0 : index
      %12 = vector.load %arg5[%c0_10, %c0_11] : memref<512x16xf32, #tpu.memory_space<vmem>>, vector<512x16xf32>
      %c0_12 = arith.constant 0 : index
      %c0_13 = arith.constant 0 : index
      %13 = vector.load %arg4[%c0_12, %c0_13] : memref<1x16xf32, #tpu.memory_space<vmem>>, vector<1x16xf32>
      %14 = vector.broadcast %13 : vector<1x16xf32> to vector<512x16xf32>
      %15 = arith.addf %12, %14 : vector<512x16xf32>
      %cst_14 = arith.constant 0.000000e+00 : f32
      %16 = vector.broadcast %cst_14 : f32 to vector<512x16xf32>
      %17 = arith.cmpf oge, %15, %16 : vector<512x16xf32>
      %cst_15 = arith.constant 2.000000e-01 : f32
      %18 = vector.broadcast %cst_15 : f32 to vector<512x16xf32>
      %19 = arith.mulf %18, %15 : vector<512x16xf32>
      %20 = arith.select %17, %15, %19 : vector<512x16xi1>, vector<512x16xf32>
      %c0_16 = arith.constant 0 : index
      %c0_17 = arith.constant 0 : index
      %21 = vector.load %arg5[%c0_16, %c0_17] : memref<512x16xf32, #tpu.memory_space<vmem>>, vector<512x16xf32>
      tpu.vector_store %arg5[%c0_16, %c0_17], %20 {strides = array<i32>} : memref<512x16xf32, #tpu.memory_space<vmem>>, vector<512x16xf32>,
    } else {
    }
    return
  }
  func.func @transform_0(%arg0: i32, %arg1: i32) -> (i32, i32) {
    %c0_i32 = arith.constant 0 : i32
    return %arg0, %arg1 : i32, i32
  }
  func.func @transform_1(%arg0: i32, %arg1: i32) -> (i32, i32) {
    %c0_i32 = arith.constant 0 : i32
    %c0_i32_0 = arith.constant 0 : i32
    return %arg1, %c0_i32 : i32, i32
  }
  func.func @transform_2(%arg0: i32, %arg1: i32) -> (i32, i32) {
    %c0_i32 = arith.constant 0 : i32
    %c0_i32_0 = arith.constant 0 : i32
    %c0_i32_1 = arith.constant 0 : i32
    return %c0_i32, %c0_i32_0 : i32, i32
  }
  func.func @transform_3(%arg0: i32, %arg1: i32) -> (i32, i32) {
    %c0_i32 = arith.constant 0 : i32
    %c0_i32_0 = arith.constant 0 : i32
    return %arg0, %c0_i32 : i32, i32
  }
}

module attributes {stable_mosaic.version = 11 : i64} {
  func.func @_matmul_bias_kernel(%arg0: i32, %arg1: i32, %arg2: memref<256x256xbf16, #tpu.memory_space<vmem>>, %arg3: memref<256x32xbf16, #tpu.memory_space<vmem>>, %arg4: memref<1x32xf32, #tpu.memory_space<vmem>>, %arg5: memref<256x32xf32, #tpu.memory_space<vmem>>) attributes {dimension_semantics = [#tpu.dimension_semantics<parallel>, #tpu.dimension_semantics<arbitrary>], iteration_bounds = array<i64: 2, 1>, scalar_prefetch = 0 : i64, scratch_operands = 0 : i64, tpu.core_type = #tpu.core_type<tc>, window_params = [{transform_indices = @transform_0, window_bounds = array<i64: 256, 256>}, {transform_indices = @transform_1, window_bounds = array<i64: 256, 32>}, {pipeline_mode = #tpu.pipeline_mode<synchronous>, transform_indices = @transform_2, window_bounds = array<i64: 1, 32>}, {transform_indices = @transform_3, window_bounds = array<i64: 256, 32>}]} {
    %c0_i32 = arith.constant 0 : i32
    %0 = arith.cmpi eq, %arg1, %c0_i32 : i32
    %1 = arith.extui %0 : i1 to i32
    %c0_i32_0 = arith.constant 0 : i32
    %2 = arith.cmpi ne, %1, %c0_i32_0 : i32
    scf.if %2 {
      %cst_10 = arith.constant 0.000000e+00 : f32
      %12 = vector.broadcast %cst_10 : f32 to vector<256x32xf32>
      %c0_11 = arith.constant 0 : index
      %c0_12 = arith.constant 0 : index
      %13 = vector.load %arg5[%c0_11, %c0_12] : memref<256x32xf32, #tpu.memory_space<vmem>>, vector<256x32xf32>
      tpu.vector_store %arg5[%c0_11, %c0_12], %12 {strides = array<i32>} : memref<256x32xf32, #tpu.memory_space<vmem>>, vector<256x32xf32>,
    } else {
    }
    %c0 = arith.constant 0 : index
    %c0_1 = arith.constant 0 : index
    %3 = vector.load %arg5[%c0, %c0_1] : memref<256x32xf32, #tpu.memory_space<vmem>>, vector<256x32xf32>
    %c0_2 = arith.constant 0 : index
    %c0_3 = arith.constant 0 : index
    %4 = vector.load %arg2[%c0_2, %c0_3] : memref<256x256xbf16, #tpu.memory_space<vmem>>, vector<256x256xbf16>
    %c0_4 = arith.constant 0 : index
    %c0_5 = arith.constant 0 : index
    %5 = vector.load %arg3[%c0_4, %c0_5] : memref<256x32xbf16, #tpu.memory_space<vmem>>, vector<256x32xbf16>
    %cst = arith.constant dense<0.000000e+00> : vector<256x32xf32>
    %6 = tpu.matmul %4, %5, %cst {dimension_numbers = #tpu.dot_dimension_numbers<[1], [0], [0], [1], [0, 0, 1, 1], [], []>} : vector<256x256xbf16>, vector<256x32xbf16>, vector<256x32xf32> -> vector<256x32xf32>
    %7 = arith.addf %3, %6 : vector<256x32xf32>
    %c0_6 = arith.constant 0 : index
    %c0_7 = arith.constant 0 : index
    %8 = vector.load %arg5[%c0_6, %c0_7] : memref<256x32xf32, #tpu.memory_space<vmem>>, vector<256x32xf32>
    tpu.vector_store %arg5[%c0_6, %c0_7], %7 {strides = array<i32>} : memref<256x32xf32, #tpu.memory_space<vmem>>, vector<256x32xf32>,
    %c0_i32_8 = arith.constant 0 : i32
    %9 = arith.cmpi eq, %arg1, %c0_i32_8 : i32
    %10 = arith.extui %9 : i1 to i32
    %c0_i32_9 = arith.constant 0 : i32
    %11 = arith.cmpi ne, %10, %c0_i32_9 : i32
    scf.if %11 {
      %c0_10 = arith.constant 0 : index
      %c0_11 = arith.constant 0 : index
      %12 = vector.load %arg5[%c0_10, %c0_11] : memref<256x32xf32, #tpu.memory_space<vmem>>, vector<256x32xf32>
      %c0_12 = arith.constant 0 : index
      %c0_13 = arith.constant 0 : index
      %13 = vector.load %arg4[%c0_12, %c0_13] : memref<1x32xf32, #tpu.memory_space<vmem>>, vector<1x32xf32>
      %14 = vector.broadcast %13 : vector<1x32xf32> to vector<256x32xf32>
      %15 = arith.addf %12, %14 : vector<256x32xf32>
      %cst_14 = arith.constant dense<0.000000e+00> : vector<32xf32>
      %16 = vector.multi_reduction <add>, %15, %cst_14 [0] : vector<256x32xf32> to vector<32xf32>
      %17 = vector.shape_cast %16 : vector<32xf32> to vector<1x32xf32>
      %cst_15 = arith.constant 3.906250e-03 : f32
      %18 = vector.broadcast %cst_15 : f32 to vector<1x32xf32>
      %19 = arith.mulf %17, %18 : vector<1x32xf32>
      %20 = arith.mulf %15, %15 : vector<256x32xf32>
      %cst_16 = arith.constant dense<0.000000e+00> : vector<32xf32>
      %21 = vector.multi_reduction <add>, %20, %cst_16 [0] : vector<256x32xf32> to vector<32xf32>
      %22 = vector.shape_cast %21 : vector<32xf32> to vector<1x32xf32>
      %cst_17 = arith.constant 3.906250e-03 : f32
      %23 = vector.broadcast %cst_17 : f32 to vector<1x32xf32>
      %24 = arith.mulf %22, %23 : vector<1x32xf32>
      %25 = arith.mulf %19, %19 : vector<1x32xf32>
      %26 = arith.subf %24, %25 : vector<1x32xf32>
      %cst_18 = arith.constant 0.000000e+00 : f32
      %27 = vector.broadcast %cst_18 : f32 to vector<1x32xf32>
      %28 = arith.maximumf %26, %27 : vector<1x32xf32>
      %29 = vector.broadcast %19 : vector<1x32xf32> to vector<256x32xf32>
      %30 = arith.subf %15, %29 : vector<256x32xf32>
      %cst_19 = arith.constant 9.99999974E-6 : f32
      %31 = vector.broadcast %cst_19 : f32 to vector<1x32xf32>
      %32 = arith.addf %28, %31 : vector<1x32xf32>
      %33 = math.rsqrt %32 : vector<1x32xf32>
      %34 = vector.broadcast %33 : vector<1x32xf32> to vector<256x32xf32>
      %35 = arith.mulf %30, %34 : vector<256x32xf32>
      %cst_20 = arith.constant 0.000000e+00 : f32
      %36 = vector.broadcast %cst_20 : f32 to vector<256x32xf32>
      %37 = arith.cmpf oge, %35, %36 : vector<256x32xf32>
      %cst_21 = arith.constant 2.000000e-01 : f32
      %38 = vector.broadcast %cst_21 : f32 to vector<256x32xf32>
      %39 = arith.mulf %38, %35 : vector<256x32xf32>
      %40 = arith.select %37, %35, %39 : vector<256x32xi1>, vector<256x32xf32>
      %c0_22 = arith.constant 0 : index
      %c0_23 = arith.constant 0 : index
      %41 = vector.load %arg5[%c0_22, %c0_23] : memref<256x32xf32, #tpu.memory_space<vmem>>, vector<256x32xf32>
      tpu.vector_store %arg5[%c0_22, %c0_23], %40 {strides = array<i32>} : memref<256x32xf32, #tpu.memory_space<vmem>>, vector<256x32xf32>,
    } else {
    }
    return
  }
  func.func @transform_0(%arg0: i32, %arg1: i32) -> (i32, i32) {
    %c0_i32 = arith.constant 0 : i32
    return %arg0, %arg1 : i32, i32
  }
  func.func @transform_1(%arg0: i32, %arg1: i32) -> (i32, i32) {
    %c0_i32 = arith.constant 0 : i32
    %c0_i32_0 = arith.constant 0 : i32
    return %arg1, %c0_i32 : i32, i32
  }
  func.func @transform_2(%arg0: i32, %arg1: i32) -> (i32, i32) {
    %c0_i32 = arith.constant 0 : i32
    %c0_i32_0 = arith.constant 0 : i32
    %c0_i32_1 = arith.constant 0 : i32
    return %c0_i32, %c0_i32_0 : i32, i32
  }
  func.func @transform_3(%arg0: i32, %arg1: i32) -> (i32, i32) {
    %c0_i32 = arith.constant 0 : i32
    %c0_i32_0 = arith.constant 0 : i32
    return %arg0, %c0_i32 : i32, i32
  }
}

module attributes {stable_mosaic.version = 11 : i64} {
  func.func @_matmul_bias_kernel(%arg0: i32, %arg1: i32, %arg2: memref<64x512xbf16, #tpu.memory_space<vmem>>, %arg3: memref<512x64xbf16, #tpu.memory_space<vmem>>, %arg4: memref<1x64xf32, #tpu.memory_space<vmem>>, %arg5: memref<64x64xf32, #tpu.memory_space<vmem>>) attributes {dimension_semantics = [#tpu.dimension_semantics<parallel>, #tpu.dimension_semantics<arbitrary>], iteration_bounds = array<i64: 2, 1>, scalar_prefetch = 0 : i64, scratch_operands = 0 : i64, tpu.core_type = #tpu.core_type<tc>, window_params = [{transform_indices = @transform_0, window_bounds = array<i64: 64, 512>}, {transform_indices = @transform_1, window_bounds = array<i64: 512, 64>}, {pipeline_mode = #tpu.pipeline_mode<synchronous>, transform_indices = @transform_2, window_bounds = array<i64: 1, 64>}, {transform_indices = @transform_3, window_bounds = array<i64: 64, 64>}]} {
    %c0_i32 = arith.constant 0 : i32
    %0 = arith.cmpi eq, %arg1, %c0_i32 : i32
    %1 = arith.extui %0 : i1 to i32
    %c0_i32_0 = arith.constant 0 : i32
    %2 = arith.cmpi ne, %1, %c0_i32_0 : i32
    scf.if %2 {
      %cst_10 = arith.constant 0.000000e+00 : f32
      %12 = vector.broadcast %cst_10 : f32 to vector<64x64xf32>
      %c0_11 = arith.constant 0 : index
      %c0_12 = arith.constant 0 : index
      %13 = vector.load %arg5[%c0_11, %c0_12] : memref<64x64xf32, #tpu.memory_space<vmem>>, vector<64x64xf32>
      tpu.vector_store %arg5[%c0_11, %c0_12], %12 {strides = array<i32>} : memref<64x64xf32, #tpu.memory_space<vmem>>, vector<64x64xf32>,
    } else {
    }
    %c0 = arith.constant 0 : index
    %c0_1 = arith.constant 0 : index
    %3 = vector.load %arg5[%c0, %c0_1] : memref<64x64xf32, #tpu.memory_space<vmem>>, vector<64x64xf32>
    %c0_2 = arith.constant 0 : index
    %c0_3 = arith.constant 0 : index
    %4 = vector.load %arg2[%c0_2, %c0_3] : memref<64x512xbf16, #tpu.memory_space<vmem>>, vector<64x512xbf16>
    %c0_4 = arith.constant 0 : index
    %c0_5 = arith.constant 0 : index
    %5 = vector.load %arg3[%c0_4, %c0_5] : memref<512x64xbf16, #tpu.memory_space<vmem>>, vector<512x64xbf16>
    %cst = arith.constant dense<0.000000e+00> : vector<64x64xf32>
    %6 = tpu.matmul %4, %5, %cst {dimension_numbers = #tpu.dot_dimension_numbers<[1], [0], [0], [1], [0, 0, 1, 1], [], []>} : vector<64x512xbf16>, vector<512x64xbf16>, vector<64x64xf32> -> vector<64x64xf32>
    %7 = arith.addf %3, %6 : vector<64x64xf32>
    %c0_6 = arith.constant 0 : index
    %c0_7 = arith.constant 0 : index
    %8 = vector.load %arg5[%c0_6, %c0_7] : memref<64x64xf32, #tpu.memory_space<vmem>>, vector<64x64xf32>
    tpu.vector_store %arg5[%c0_6, %c0_7], %7 {strides = array<i32>} : memref<64x64xf32, #tpu.memory_space<vmem>>, vector<64x64xf32>,
    %c0_i32_8 = arith.constant 0 : i32
    %9 = arith.cmpi eq, %arg1, %c0_i32_8 : i32
    %10 = arith.extui %9 : i1 to i32
    %c0_i32_9 = arith.constant 0 : i32
    %11 = arith.cmpi ne, %10, %c0_i32_9 : i32
    scf.if %11 {
      %c0_10 = arith.constant 0 : index
      %c0_11 = arith.constant 0 : index
      %12 = vector.load %arg5[%c0_10, %c0_11] : memref<64x64xf32, #tpu.memory_space<vmem>>, vector<64x64xf32>
      %c0_12 = arith.constant 0 : index
      %c0_13 = arith.constant 0 : index
      %13 = vector.load %arg4[%c0_12, %c0_13] : memref<1x64xf32, #tpu.memory_space<vmem>>, vector<1x64xf32>
      %14 = vector.broadcast %13 : vector<1x64xf32> to vector<64x64xf32>
      %15 = arith.addf %12, %14 : vector<64x64xf32>
      %cst_14 = arith.constant dense<0.000000e+00> : vector<64xf32>
      %16 = vector.multi_reduction <add>, %15, %cst_14 [0] : vector<64x64xf32> to vector<64xf32>
      %17 = vector.shape_cast %16 : vector<64xf32> to vector<1x64xf32>
      %cst_15 = arith.constant 1.562500e-02 : f32
      %18 = vector.broadcast %cst_15 : f32 to vector<1x64xf32>
      %19 = arith.mulf %17, %18 : vector<1x64xf32>
      %20 = arith.mulf %15, %15 : vector<64x64xf32>
      %cst_16 = arith.constant dense<0.000000e+00> : vector<64xf32>
      %21 = vector.multi_reduction <add>, %20, %cst_16 [0] : vector<64x64xf32> to vector<64xf32>
      %22 = vector.shape_cast %21 : vector<64xf32> to vector<1x64xf32>
      %cst_17 = arith.constant 1.562500e-02 : f32
      %23 = vector.broadcast %cst_17 : f32 to vector<1x64xf32>
      %24 = arith.mulf %22, %23 : vector<1x64xf32>
      %25 = arith.mulf %19, %19 : vector<1x64xf32>
      %26 = arith.subf %24, %25 : vector<1x64xf32>
      %cst_18 = arith.constant 0.000000e+00 : f32
      %27 = vector.broadcast %cst_18 : f32 to vector<1x64xf32>
      %28 = arith.maximumf %26, %27 : vector<1x64xf32>
      %29 = vector.broadcast %19 : vector<1x64xf32> to vector<64x64xf32>
      %30 = arith.subf %15, %29 : vector<64x64xf32>
      %cst_19 = arith.constant 9.99999974E-6 : f32
      %31 = vector.broadcast %cst_19 : f32 to vector<1x64xf32>
      %32 = arith.addf %28, %31 : vector<1x64xf32>
      %33 = math.rsqrt %32 : vector<1x64xf32>
      %34 = vector.broadcast %33 : vector<1x64xf32> to vector<64x64xf32>
      %35 = arith.mulf %30, %34 : vector<64x64xf32>
      %cst_20 = arith.constant 0.000000e+00 : f32
      %36 = vector.broadcast %cst_20 : f32 to vector<64x64xf32>
      %37 = arith.cmpf oge, %35, %36 : vector<64x64xf32>
      %cst_21 = arith.constant 2.000000e-01 : f32
      %38 = vector.broadcast %cst_21 : f32 to vector<64x64xf32>
      %39 = arith.mulf %38, %35 : vector<64x64xf32>
      %40 = arith.select %37, %35, %39 : vector<64x64xi1>, vector<64x64xf32>
      %c0_22 = arith.constant 0 : index
      %c0_23 = arith.constant 0 : index
      %41 = vector.load %arg5[%c0_22, %c0_23] : memref<64x64xf32, #tpu.memory_space<vmem>>, vector<64x64xf32>
      tpu.vector_store %arg5[%c0_22, %c0_23], %40 {strides = array<i32>} : memref<64x64xf32, #tpu.memory_space<vmem>>, vector<64x64xf32>,
    } else {
    }
    return
  }
  func.func @transform_0(%arg0: i32, %arg1: i32) -> (i32, i32) {
    %c0_i32 = arith.constant 0 : i32
    return %arg0, %arg1 : i32, i32
  }
  func.func @transform_1(%arg0: i32, %arg1: i32) -> (i32, i32) {
    %c0_i32 = arith.constant 0 : i32
    %c0_i32_0 = arith.constant 0 : i32
    return %arg1, %c0_i32 : i32, i32
  }
  func.func @transform_2(%arg0: i32, %arg1: i32) -> (i32, i32) {
    %c0_i32 = arith.constant 0 : i32
    %c0_i32_0 = arith.constant 0 : i32
    %c0_i32_1 = arith.constant 0 : i32
    return %c0_i32, %c0_i32_0 : i32, i32
  }
  func.func @transform_3(%arg0: i32, %arg1: i32) -> (i32, i32) {
    %c0_i32 = arith.constant 0 : i32
    %c0_i32_0 = arith.constant 0 : i32
    return %arg0, %c0_i32 : i32, i32
  }
}

module attributes {stable_mosaic.version = 11 : i64} {
  func.func @_conv_s1_kernel(%arg0: i32, %arg1: memref<1x10x10x64xbf16, #tpu.memory_space<vmem>>, %arg2: memref<16x64x128xbf16, #tpu.memory_space<vmem>>, %arg3: memref<1x128xf32, #tpu.memory_space<vmem>>, %arg4: memref<1x7x7x128xf32, #tpu.memory_space<vmem>>) attributes {dimension_semantics = [#tpu.dimension_semantics<parallel>], iteration_bounds = array<i64: 2>, scalar_prefetch = 0 : i64, scratch_operands = 0 : i64, tpu.core_type = #tpu.core_type<tc>, window_params = [{transform_indices = @transform_0, window_bounds = array<i64: 1, 10, 10, 64>}, {pipeline_mode = #tpu.pipeline_mode<synchronous>, transform_indices = @transform_1, window_bounds = array<i64: 16, 64, 128>}, {pipeline_mode = #tpu.pipeline_mode<synchronous>, transform_indices = @transform_2, window_bounds = array<i64: 1, 128>}, {transform_indices = @transform_3, window_bounds = array<i64: 1, 7, 7, 128>}]} {
    %c0 = arith.constant 0 : index
    %c0_0 = arith.constant 0 : index
    %0 = vector.load %arg3[%c0, %c0_0] : memref<1x128xf32, #tpu.memory_space<vmem>>, vector<1x128xf32>
    %c0_i32 = arith.constant 0 : i32
    %c7_i32 = arith.constant 7 : i32
    %1 = arith.addi %c0_i32, %c7_i32 : i32
    %c1_i32 = arith.constant 1 : i32
    scf.for %arg5 = %c0_i32 to %1 step %c1_i32  : i32 {
      %cst_19 = arith.constant 0.000000e+00 : f32
      %36 = vector.broadcast %cst_19 : f32 to vector<7x128xf32>
      %c0_i32_20 = arith.constant 0 : i32
      %37 = arith.addi %arg5, %c0_i32_20 : i32
      %c0_21 = arith.constant 0 : index
      %38 = arith.index_cast %37 : i32 to index
      %c0_22 = arith.constant 0 : index
      %c0_23 = arith.constant 0 : index
      %39 = vector.load %arg1[%c0_21, %38, %c0_22, %c0_23] : memref<1x10x10x64xbf16, #tpu.memory_space<vmem>>, vector<1x1x10x64xbf16>
      %40 = vector.shape_cast %39 : vector<1x1x10x64xbf16> to vector<10x64xbf16>
      %41 = vector.extract_strided_slice %40 {offsets = [0, 0], sizes = [7, 64], strides = [1, 1]} : vector<10x64xbf16> to vector<7x64xbf16>
      %c0_24 = arith.constant 0 : index
      %c0_25 = arith.constant 0 : index
      %c0_26 = arith.constant 0 : index
      %42 = vector.load %arg2[%c0_24, %c0_25, %c0_26] : memref<16x64x128xbf16, #tpu.memory_space<vmem>>, vector<1x64x128xbf16>
      %43 = vector.shape_cast %42 : vector<1x64x128xbf16> to vector<64x128xbf16>
      %cst_27 = arith.constant dense<0.000000e+00> : vector<7x128xf32>
      %44 = tpu.matmul %41, %43, %cst_27 {dimension_numbers = #tpu.dot_dimension_numbers<[1], [0], [0], [1], [0, 0, 1, 1], [], []>} : vector<7x64xbf16>, vector<64x128xbf16>, vector<7x128xf32> -> vector<7x128xf32>
      %45 = arith.addf %36, %44 : vector<7x128xf32>
      %46 = vector.extract_strided_slice %40 {offsets = [1, 0], sizes = [7, 64], strides = [1, 1]} : vector<10x64xbf16> to vector<7x64xbf16>
      %c1 = arith.constant 1 : index
      %c0_28 = arith.constant 0 : index
      %c0_29 = arith.constant 0 : index
      %47 = vector.load %arg2[%c1, %c0_28, %c0_29] : memref<16x64x128xbf16, #tpu.memory_space<vmem>>, vector<1x64x128xbf16>
      %48 = vector.shape_cast %47 : vector<1x64x128xbf16> to vector<64x128xbf16>
      %cst_30 = arith.constant dense<0.000000e+00> : vector<7x128xf32>
      %49 = tpu.matmul %46, %48, %cst_30 {dimension_numbers = #tpu.dot_dimension_numbers<[1], [0], [0], [1], [0, 0, 1, 1], [], []>} : vector<7x64xbf16>, vector<64x128xbf16>, vector<7x128xf32> -> vector<7x128xf32>
      %50 = arith.addf %45, %49 : vector<7x128xf32>
      %51 = vector.extract_strided_slice %40 {offsets = [2, 0], sizes = [7, 64], strides = [1, 1]} : vector<10x64xbf16> to vector<7x64xbf16>
      %c2 = arith.constant 2 : index
      %c0_31 = arith.constant 0 : index
      %c0_32 = arith.constant 0 : index
      %52 = vector.load %arg2[%c2, %c0_31, %c0_32] : memref<16x64x128xbf16, #tpu.memory_space<vmem>>, vector<1x64x128xbf16>
      %53 = vector.shape_cast %52 : vector<1x64x128xbf16> to vector<64x128xbf16>
      %cst_33 = arith.constant dense<0.000000e+00> : vector<7x128xf32>
      %54 = tpu.matmul %51, %53, %cst_33 {dimension_numbers = #tpu.dot_dimension_numbers<[1], [0], [0], [1], [0, 0, 1, 1], [], []>} : vector<7x64xbf16>, vector<64x128xbf16>, vector<7x128xf32> -> vector<7x128xf32>
      %55 = arith.addf %50, %54 : vector<7x128xf32>
      %56 = vector.extract_strided_slice %40 {offsets = [3, 0], sizes = [7, 64], strides = [1, 1]} : vector<10x64xbf16> to vector<7x64xbf16>
      %c3 = arith.constant 3 : index
      %c0_34 = arith.constant 0 : index
      %c0_35 = arith.constant 0 : index
      %57 = vector.load %arg2[%c3, %c0_34, %c0_35] : memref<16x64x128xbf16, #tpu.memory_space<vmem>>, vector<1x64x128xbf16>
      %58 = vector.shape_cast %57 : vector<1x64x128xbf16> to vector<64x128xbf16>
      %cst_36 = arith.constant dense<0.000000e+00> : vector<7x128xf32>
      %59 = tpu.matmul %56, %58, %cst_36 {dimension_numbers = #tpu.dot_dimension_numbers<[1], [0], [0], [1], [0, 0, 1, 1], [], []>} : vector<7x64xbf16>, vector<64x128xbf16>, vector<7x128xf32> -> vector<7x128xf32>
      %60 = arith.addf %55, %59 : vector<7x128xf32>
      %c1_i32_37 = arith.constant 1 : i32
      %61 = arith.addi %arg5, %c1_i32_37 : i32
      %c0_38 = arith.constant 0 : index
      %62 = arith.index_cast %61 : i32 to index
      %c0_39 = arith.constant 0 : index
      %c0_40 = arith.constant 0 : index
      %63 = vector.load %arg1[%c0_38, %62, %c0_39, %c0_40] : memref<1x10x10x64xbf16, #tpu.memory_space<vmem>>, vector<1x1x10x64xbf16>
      %64 = vector.shape_cast %63 : vector<1x1x10x64xbf16> to vector<10x64xbf16>
      %65 = vector.extract_strided_slice %64 {offsets = [0, 0], sizes = [7, 64], strides = [1, 1]} : vector<10x64xbf16> to vector<7x64xbf16>
      %c4 = arith.constant 4 : index
      %c0_41 = arith.constant 0 : index
      %c0_42 = arith.constant 0 : index
      %66 = vector.load %arg2[%c4, %c0_41, %c0_42] : memref<16x64x128xbf16, #tpu.memory_space<vmem>>, vector<1x64x128xbf16>
      %67 = vector.shape_cast %66 : vector<1x64x128xbf16> to vector<64x128xbf16>
      %cst_43 = arith.constant dense<0.000000e+00> : vector<7x128xf32>
      %68 = tpu.matmul %65, %67, %cst_43 {dimension_numbers = #tpu.dot_dimension_numbers<[1], [0], [0], [1], [0, 0, 1, 1], [], []>} : vector<7x64xbf16>, vector<64x128xbf16>, vector<7x128xf32> -> vector<7x128xf32>
      %69 = arith.addf %60, %68 : vector<7x128xf32>
      %70 = vector.extract_strided_slice %64 {offsets = [1, 0], sizes = [7, 64], strides = [1, 1]} : vector<10x64xbf16> to vector<7x64xbf16>
      %c5 = arith.constant 5 : index
      %c0_44 = arith.constant 0 : index
      %c0_45 = arith.constant 0 : index
      %71 = vector.load %arg2[%c5, %c0_44, %c0_45] : memref<16x64x128xbf16, #tpu.memory_space<vmem>>, vector<1x64x128xbf16>
      %72 = vector.shape_cast %71 : vector<1x64x128xbf16> to vector<64x128xbf16>
      %cst_46 = arith.constant dense<0.000000e+00> : vector<7x128xf32>
      %73 = tpu.matmul %70, %72, %cst_46 {dimension_numbers = #tpu.dot_dimension_numbers<[1], [0], [0], [1], [0, 0, 1, 1], [], []>} : vector<7x64xbf16>, vector<64x128xbf16>, vector<7x128xf32> -> vector<7x128xf32>
      %74 = arith.addf %69, %73 : vector<7x128xf32>
      %75 = vector.extract_strided_slice %64 {offsets = [2, 0], sizes = [7, 64], strides = [1, 1]} : vector<10x64xbf16> to vector<7x64xbf16>
      %c6 = arith.constant 6 : index
      %c0_47 = arith.constant 0 : index
      %c0_48 = arith.constant 0 : index
      %76 = vector.load %arg2[%c6, %c0_47, %c0_48] : memref<16x64x128xbf16, #tpu.memory_space<vmem>>, vector<1x64x128xbf16>
      %77 = vector.shape_cast %76 : vector<1x64x128xbf16> to vector<64x128xbf16>
      %cst_49 = arith.constant dense<0.000000e+00> : vector<7x128xf32>
      %78 = tpu.matmul %75, %77, %cst_49 {dimension_numbers = #tpu.dot_dimension_numbers<[1], [0], [0], [1], [0, 0, 1, 1], [], []>} : vector<7x64xbf16>, vector<64x128xbf16>, vector<7x128xf32> -> vector<7x128xf32>
      %79 = arith.addf %74, %78 : vector<7x128xf32>
      %80 = vector.extract_strided_slice %64 {offsets = [3, 0], sizes = [7, 64], strides = [1, 1]} : vector<10x64xbf16> to vector<7x64xbf16>
      %c7 = arith.constant 7 : index
      %c0_50 = arith.constant 0 : index
      %c0_51 = arith.constant 0 : index
      %81 = vector.load %arg2[%c7, %c0_50, %c0_51] : memref<16x64x128xbf16, #tpu.memory_space<vmem>>, vector<1x64x128xbf16>
      %82 = vector.shape_cast %81 : vector<1x64x128xbf16> to vector<64x128xbf16>
      %cst_52 = arith.constant dense<0.000000e+00> : vector<7x128xf32>
      %83 = tpu.matmul %80, %82, %cst_52 {dimension_numbers = #tpu.dot_dimension_numbers<[1], [0], [0], [1], [0, 0, 1, 1], [], []>} : vector<7x64xbf16>, vector<64x128xbf16>, vector<7x128xf32> -> vector<7x128xf32>
      %84 = arith.addf %79, %83 : vector<7x128xf32>
      %c2_i32 = arith.constant 2 : i32
      %85 = arith.addi %arg5, %c2_i32 : i32
      %c0_53 = arith.constant 0 : index
      %86 = arith.index_cast %85 : i32 to index
      %c0_54 = arith.constant 0 : index
      %c0_55 = arith.constant 0 : index
      %87 = vector.load %arg1[%c0_53, %86, %c0_54, %c0_55] : memref<1x10x10x64xbf16, #tpu.memory_space<vmem>>, vector<1x1x10x64xbf16>
      %88 = vector.shape_cast %87 : vector<1x1x10x64xbf16> to vector<10x64xbf16>
      %89 = vector.extract_strided_slice %88 {offsets = [0, 0], sizes = [7, 64], strides = [1, 1]} : vector<10x64xbf16> to vector<7x64xbf16>
      %c8 = arith.constant 8 : index
      %c0_56 = arith.constant 0 : index
      %c0_57 = arith.constant 0 : index
      %90 = vector.load %arg2[%c8, %c0_56, %c0_57] : memref<16x64x128xbf16, #tpu.memory_space<vmem>>, vector<1x64x128xbf16>
      %91 = vector.shape_cast %90 : vector<1x64x128xbf16> to vector<64x128xbf16>
      %cst_58 = arith.constant dense<0.000000e+00> : vector<7x128xf32>
      %92 = tpu.matmul %89, %91, %cst_58 {dimension_numbers = #tpu.dot_dimension_numbers<[1], [0], [0], [1], [0, 0, 1, 1], [], []>} : vector<7x64xbf16>, vector<64x128xbf16>, vector<7x128xf32> -> vector<7x128xf32>
      %93 = arith.addf %84, %92 : vector<7x128xf32>
      %94 = vector.extract_strided_slice %88 {offsets = [1, 0], sizes = [7, 64], strides = [1, 1]} : vector<10x64xbf16> to vector<7x64xbf16>
      %c9 = arith.constant 9 : index
      %c0_59 = arith.constant 0 : index
      %c0_60 = arith.constant 0 : index
      %95 = vector.load %arg2[%c9, %c0_59, %c0_60] : memref<16x64x128xbf16, #tpu.memory_space<vmem>>, vector<1x64x128xbf16>
      %96 = vector.shape_cast %95 : vector<1x64x128xbf16> to vector<64x128xbf16>
      %cst_61 = arith.constant dense<0.000000e+00> : vector<7x128xf32>
      %97 = tpu.matmul %94, %96, %cst_61 {dimension_numbers = #tpu.dot_dimension_numbers<[1], [0], [0], [1], [0, 0, 1, 1], [], []>} : vector<7x64xbf16>, vector<64x128xbf16>, vector<7x128xf32> -> vector<7x128xf32>
      %98 = arith.addf %93, %97 : vector<7x128xf32>
      %99 = vector.extract_strided_slice %88 {offsets = [2, 0], sizes = [7, 64], strides = [1, 1]} : vector<10x64xbf16> to vector<7x64xbf16>
      %c10 = arith.constant 10 : index
      %c0_62 = arith.constant 0 : index
      %c0_63 = arith.constant 0 : index
      %100 = vector.load %arg2[%c10, %c0_62, %c0_63] : memref<16x64x128xbf16, #tpu.memory_space<vmem>>, vector<1x64x128xbf16>
      %101 = vector.shape_cast %100 : vector<1x64x128xbf16> to vector<64x128xbf16>
      %cst_64 = arith.constant dense<0.000000e+00> : vector<7x128xf32>
      %102 = tpu.matmul %99, %101, %cst_64 {dimension_numbers = #tpu.dot_dimension_numbers<[1], [0], [0], [1], [0, 0, 1, 1], [], []>} : vector<7x64xbf16>, vector<64x128xbf16>, vector<7x128xf32> -> vector<7x128xf32>
      %103 = arith.addf %98, %102 : vector<7x128xf32>
      %104 = vector.extract_strided_slice %88 {offsets = [3, 0], sizes = [7, 64], strides = [1, 1]} : vector<10x64xbf16> to vector<7x64xbf16>
      %c11 = arith.constant 11 : index
      %c0_65 = arith.constant 0 : index
      %c0_66 = arith.constant 0 : index
      %105 = vector.load %arg2[%c11, %c0_65, %c0_66] : memref<16x64x128xbf16, #tpu.memory_space<vmem>>, vector<1x64x128xbf16>
      %106 = vector.shape_cast %105 : vector<1x64x128xbf16> to vector<64x128xbf16>
      %cst_67 = arith.constant dense<0.000000e+00> : vector<7x128xf32>
      %107 = tpu.matmul %104, %106, %cst_67 {dimension_numbers = #tpu.dot_dimension_numbers<[1], [0], [0], [1], [0, 0, 1, 1], [], []>} : vector<7x64xbf16>, vector<64x128xbf16>, vector<7x128xf32> -> vector<7x128xf32>
      %108 = arith.addf %103, %107 : vector<7x128xf32>
      %c3_i32 = arith.constant 3 : i32
      %109 = arith.addi %arg5, %c3_i32 : i32
      %c0_68 = arith.constant 0 : index
      %110 = arith.index_cast %109 : i32 to index
      %c0_69 = arith.constant 0 : index
      %c0_70 = arith.constant 0 : index
      %111 = vector.load %arg1[%c0_68, %110, %c0_69, %c0_70] : memref<1x10x10x64xbf16, #tpu.memory_space<vmem>>, vector<1x1x10x64xbf16>
      %112 = vector.shape_cast %111 : vector<1x1x10x64xbf16> to vector<10x64xbf16>
      %113 = vector.extract_strided_slice %112 {offsets = [0, 0], sizes = [7, 64], strides = [1, 1]} : vector<10x64xbf16> to vector<7x64xbf16>
      %c12 = arith.constant 12 : index
      %c0_71 = arith.constant 0 : index
      %c0_72 = arith.constant 0 : index
      %114 = vector.load %arg2[%c12, %c0_71, %c0_72] : memref<16x64x128xbf16, #tpu.memory_space<vmem>>, vector<1x64x128xbf16>
      %115 = vector.shape_cast %114 : vector<1x64x128xbf16> to vector<64x128xbf16>
      %cst_73 = arith.constant dense<0.000000e+00> : vector<7x128xf32>
      %116 = tpu.matmul %113, %115, %cst_73 {dimension_numbers = #tpu.dot_dimension_numbers<[1], [0], [0], [1], [0, 0, 1, 1], [], []>} : vector<7x64xbf16>, vector<64x128xbf16>, vector<7x128xf32> -> vector<7x128xf32>
      %117 = arith.addf %108, %116 : vector<7x128xf32>
      %118 = vector.extract_strided_slice %112 {offsets = [1, 0], sizes = [7, 64], strides = [1, 1]} : vector<10x64xbf16> to vector<7x64xbf16>
      %c13 = arith.constant 13 : index
      %c0_74 = arith.constant 0 : index
      %c0_75 = arith.constant 0 : index
      %119 = vector.load %arg2[%c13, %c0_74, %c0_75] : memref<16x64x128xbf16, #tpu.memory_space<vmem>>, vector<1x64x128xbf16>
      %120 = vector.shape_cast %119 : vector<1x64x128xbf16> to vector<64x128xbf16>
      %cst_76 = arith.constant dense<0.000000e+00> : vector<7x128xf32>
      %121 = tpu.matmul %118, %120, %cst_76 {dimension_numbers = #tpu.dot_dimension_numbers<[1], [0], [0], [1], [0, 0, 1, 1], [], []>} : vector<7x64xbf16>, vector<64x128xbf16>, vector<7x128xf32> -> vector<7x128xf32>
      %122 = arith.addf %117, %121 : vector<7x128xf32>
      %123 = vector.extract_strided_slice %112 {offsets = [2, 0], sizes = [7, 64], strides = [1, 1]} : vector<10x64xbf16> to vector<7x64xbf16>
      %c14 = arith.constant 14 : index
      %c0_77 = arith.constant 0 : index
      %c0_78 = arith.constant 0 : index
      %124 = vector.load %arg2[%c14, %c0_77, %c0_78] : memref<16x64x128xbf16, #tpu.memory_space<vmem>>, vector<1x64x128xbf16>
      %125 = vector.shape_cast %124 : vector<1x64x128xbf16> to vector<64x128xbf16>
      %cst_79 = arith.constant dense<0.000000e+00> : vector<7x128xf32>
      %126 = tpu.matmul %123, %125, %cst_79 {dimension_numbers = #tpu.dot_dimension_numbers<[1], [0], [0], [1], [0, 0, 1, 1], [], []>} : vector<7x64xbf16>, vector<64x128xbf16>, vector<7x128xf32> -> vector<7x128xf32>
      %127 = arith.addf %122, %126 : vector<7x128xf32>
      %128 = vector.extract_strided_slice %112 {offsets = [3, 0], sizes = [7, 64], strides = [1, 1]} : vector<10x64xbf16> to vector<7x64xbf16>
      %c15 = arith.constant 15 : index
      %c0_80 = arith.constant 0 : index
      %c0_81 = arith.constant 0 : index
      %129 = vector.load %arg2[%c15, %c0_80, %c0_81] : memref<16x64x128xbf16, #tpu.memory_space<vmem>>, vector<1x64x128xbf16>
      %130 = vector.shape_cast %129 : vector<1x64x128xbf16> to vector<64x128xbf16>
      %cst_82 = arith.constant dense<0.000000e+00> : vector<7x128xf32>
      %131 = tpu.matmul %128, %130, %cst_82 {dimension_numbers = #tpu.dot_dimension_numbers<[1], [0], [0], [1], [0, 0, 1, 1], [], []>} : vector<7x64xbf16>, vector<64x128xbf16>, vector<7x128xf32> -> vector<7x128xf32>
      %132 = arith.addf %127, %131 : vector<7x128xf32>
      %133 = vector.broadcast %0 : vector<1x128xf32> to vector<7x128xf32>
      %134 = arith.addf %132, %133 : vector<7x128xf32>
      %c0_83 = arith.constant 0 : index
      %135 = arith.index_cast %arg5 : i32 to index
      %c0_84 = arith.constant 0 : index
      %c0_85 = arith.constant 0 : index
      %136 = vector.load %arg4[%c0_83, %135, %c0_84, %c0_85] : memref<1x7x7x128xf32, #tpu.memory_space<vmem>>, vector<1x1x7x128xf32>
      %137 = vector.shape_cast %136 : vector<1x1x7x128xf32> to vector<7x128xf32>
      %138 = vector.shape_cast %134 : vector<7x128xf32> to vector<1x1x7x128xf32>
      tpu.vector_store %arg4[%c0_83, %135, %c0_84, %c0_85], %138 {strides = array<i32>} : memref<1x7x7x128xf32, #tpu.memory_space<vmem>>, vector<1x1x7x128xf32>,
    }
    %c7_i32_1 = arith.constant 7 : i32
    %c0_2 = arith.constant 0 : index
    %c0_3 = arith.constant 0 : index
    %c0_4 = arith.constant 0 : index
    %c0_5 = arith.constant 0 : index
    %2 = vector.load %arg4[%c0_2, %c0_3, %c0_4, %c0_5] : memref<1x7x7x128xf32, #tpu.memory_space<vmem>>, vector<1x7x7x128xf32>
    %3 = vector.shape_cast %2 : vector<1x7x7x128xf32> to vector<7x7x128xf32>
    %cst = arith.constant dense<0.000000e+00> : vector<7x128xf32>
    %4 = vector.multi_reduction <add>, %3, %cst [1] : vector<7x7x128xf32> to vector<7x128xf32>
    %5 = vector.shape_cast %4 : vector<7x128xf32> to vector<7x1x128xf32>
    %cst_6 = arith.constant dense<0.000000e+00> : vector<1x128xf32>
    %6 = vector.multi_reduction <add>, %5, %cst_6 [0] : vector<7x1x128xf32> to vector<1x128xf32>
    %7 = vector.shape_cast %6 : vector<1x128xf32> to vector<1x1x128xf32>
    %cst_7 = arith.constant 0.0204081628 : f32
    %8 = vector.broadcast %cst_7 : f32 to vector<1x1x128xf32>
    %9 = arith.mulf %7, %8 : vector<1x1x128xf32>
    %10 = arith.mulf %3, %3 : vector<7x7x128xf32>
    %cst_8 = arith.constant dense<0.000000e+00> : vector<7x128xf32>
    %11 = vector.multi_reduction <add>, %10, %cst_8 [1] : vector<7x7x128xf32> to vector<7x128xf32>
    %12 = vector.shape_cast %11 : vector<7x128xf32> to vector<7x1x128xf32>
    %cst_9 = arith.constant dense<0.000000e+00> : vector<1x128xf32>
    %13 = vector.multi_reduction <add>, %12, %cst_9 [0] : vector<7x1x128xf32> to vector<1x128xf32>
    %14 = vector.shape_cast %13 : vector<1x128xf32> to vector<1x1x128xf32>
    %cst_10 = arith.constant 0.0204081628 : f32
    %15 = vector.broadcast %cst_10 : f32 to vector<1x1x128xf32>
    %16 = arith.mulf %14, %15 : vector<1x1x128xf32>
    %17 = arith.mulf %9, %9 : vector<1x1x128xf32>
    %18 = arith.subf %16, %17 : vector<1x1x128xf32>
    %cst_11 = arith.constant 0.000000e+00 : f32
    %19 = vector.broadcast %cst_11 : f32 to vector<1x1x128xf32>
    %20 = arith.maximumf %18, %19 : vector<1x1x128xf32>
    %21 = vector.broadcast %9 : vector<1x1x128xf32> to vector<7x7x128xf32>
    %22 = arith.subf %3, %21 : vector<7x7x128xf32>
    %cst_12 = arith.constant 9.99999974E-6 : f32
    %23 = vector.broadcast %cst_12 : f32 to vector<1x1x128xf32>
    %24 = arith.addf %20, %23 : vector<1x1x128xf32>
    %25 = math.rsqrt %24 : vector<1x1x128xf32>
    %26 = vector.broadcast %25 : vector<1x1x128xf32> to vector<7x7x128xf32>
    %27 = arith.mulf %22, %26 : vector<7x7x128xf32>
    %cst_13 = arith.constant 0.000000e+00 : f32
    %28 = vector.broadcast %cst_13 : f32 to vector<7x7x128xf32>
    %29 = arith.cmpf oge, %27, %28 : vector<7x7x128xf32>
    %cst_14 = arith.constant 2.000000e-01 : f32
    %30 = vector.broadcast %cst_14 : f32 to vector<7x7x128xf32>
    %31 = arith.mulf %30, %27 : vector<7x7x128xf32>
    %32 = arith.select %29, %27, %31 : vector<7x7x128xi1>, vector<7x7x128xf32>
    %c0_15 = arith.constant 0 : index
    %c0_16 = arith.constant 0 : index
    %c0_17 = arith.constant 0 : index
    %c0_18 = arith.constant 0 : index
    %33 = vector.load %arg4[%c0_15, %c0_16, %c0_17, %c0_18] : memref<1x7x7x128xf32, #tpu.memory_space<vmem>>, vector<1x7x7x128xf32>
    %34 = vector.shape_cast %33 : vector<1x7x7x128xf32> to vector<7x7x128xf32>
    %35 = vector.shape_cast %32 : vector<7x7x128xf32> to vector<1x7x7x128xf32>
    tpu.vector_store %arg4[%c0_15, %c0_16, %c0_17, %c0_18], %35 {strides = array<i32>} : memref<1x7x7x128xf32, #tpu.memory_space<vmem>>, vector<1x7x7x128xf32>,
    return
  }
  func.func @transform_0(%arg0: i32) -> (i32, i32, i32, i32) {
    %c0_i32 = arith.constant 0 : i32
    %c0_i32_0 = arith.constant 0 : i32
    %c0_i32_1 = arith.constant 0 : i32
    %c0_i32_2 = arith.constant 0 : i32
    return %arg0, %c0_i32, %c0_i32_0, %c0_i32_1 : i32, i32, i32, i32
  }
  func.func @transform_1(%arg0: i32) -> (i32, i32, i32) {
    %c0_i32 = arith.constant 0 : i32
    %c0_i32_0 = arith.constant 0 : i32
    %c0_i32_1 = arith.constant 0 : i32
    %c0_i32_2 = arith.constant 0 : i32
    return %c0_i32, %c0_i32_0, %c0_i32_1 : i32, i32, i32
  }
  func.func @transform_2(%arg0: i32) -> (i32, i32) {
    %c0_i32 = arith.constant 0 : i32
    %c0_i32_0 = arith.constant 0 : i32
    %c0_i32_1 = arith.constant 0 : i32
    return %c0_i32, %c0_i32_0 : i32, i32
  }
  func.func @transform_3(%arg0: i32) -> (i32, i32, i32, i32) {
    %c0_i32 = arith.constant 0 : i32
    %c0_i32_0 = arith.constant 0 : i32
    %c0_i32_1 = arith.constant 0 : i32
    %c0_i32_2 = arith.constant 0 : i32
    return %arg0, %c0_i32, %c0_i32_0, %c0_i32_1 : i32, i32, i32, i32
  }
}

module attributes {stable_mosaic.version = 11 : i64} {
  func.func @_conv_s1_kernel(%arg0: i32, %arg1: memref<1x9x9x128xbf16, #tpu.memory_space<vmem>>, %arg2: memref<16x128x1xbf16, #tpu.memory_space<vmem>>, %arg3: memref<1x1xf32, #tpu.memory_space<vmem>>, %arg4: memref<1x6x6x1xf32, #tpu.memory_space<vmem>>) attributes {dimension_semantics = [#tpu.dimension_semantics<parallel>], iteration_bounds = array<i64: 2>, scalar_prefetch = 0 : i64, scratch_operands = 0 : i64, tpu.core_type = #tpu.core_type<tc>, window_params = [{transform_indices = @transform_0, window_bounds = array<i64: 1, 9, 9, 128>}, {pipeline_mode = #tpu.pipeline_mode<synchronous>, transform_indices = @transform_1, window_bounds = array<i64: 16, 128, 1>}, {pipeline_mode = #tpu.pipeline_mode<synchronous>, transform_indices = @transform_2, window_bounds = array<i64: 1, 1>}, {transform_indices = @transform_3, window_bounds = array<i64: 1, 6, 6, 1>}]} {
    %c0 = arith.constant 0 : index
    %c0_0 = arith.constant 0 : index
    %0 = vector.load %arg3[%c0, %c0_0] : memref<1x1xf32, #tpu.memory_space<vmem>>, vector<1x1xf32>
    %c0_i32 = arith.constant 0 : i32
    %c6_i32 = arith.constant 6 : i32
    %1 = arith.addi %c0_i32, %c6_i32 : i32
    %c1_i32 = arith.constant 1 : i32
    scf.for %arg5 = %c0_i32 to %1 step %c1_i32  : i32 {
      %cst = arith.constant 0.000000e+00 : f32
      %2 = vector.broadcast %cst : f32 to vector<6x1xf32>
      %c0_i32_2 = arith.constant 0 : i32
      %3 = arith.addi %arg5, %c0_i32_2 : i32
      %c0_3 = arith.constant 0 : index
      %4 = arith.index_cast %3 : i32 to index
      %c0_4 = arith.constant 0 : index
      %c0_5 = arith.constant 0 : index
      %5 = vector.load %arg1[%c0_3, %4, %c0_4, %c0_5] : memref<1x9x9x128xbf16, #tpu.memory_space<vmem>>, vector<1x1x9x128xbf16>
      %6 = vector.shape_cast %5 : vector<1x1x9x128xbf16> to vector<9x128xbf16>
      %7 = vector.extract_strided_slice %6 {offsets = [0, 0], sizes = [6, 128], strides = [1, 1]} : vector<9x128xbf16> to vector<6x128xbf16>
      %c0_6 = arith.constant 0 : index
      %c0_7 = arith.constant 0 : index
      %c0_8 = arith.constant 0 : index
      %8 = vector.load %arg2[%c0_6, %c0_7, %c0_8] : memref<16x128x1xbf16, #tpu.memory_space<vmem>>, vector<1x128x1xbf16>
      %9 = vector.shape_cast %8 : vector<1x128x1xbf16> to vector<128x1xbf16>
      %cst_9 = arith.constant dense<0.000000e+00> : vector<6x1xf32>
      %10 = tpu.matmul %7, %9, %cst_9 {dimension_numbers = #tpu.dot_dimension_numbers<[1], [0], [0], [1], [0, 0, 1, 1], [], []>} : vector<6x128xbf16>, vector<128x1xbf16>, vector<6x1xf32> -> vector<6x1xf32>
      %11 = arith.addf %2, %10 : vector<6x1xf32>
      %12 = vector.extract_strided_slice %6 {offsets = [1, 0], sizes = [6, 128], strides = [1, 1]} : vector<9x128xbf16> to vector<6x128xbf16>
      %c1 = arith.constant 1 : index
      %c0_10 = arith.constant 0 : index
      %c0_11 = arith.constant 0 : index
      %13 = vector.load %arg2[%c1, %c0_10, %c0_11] : memref<16x128x1xbf16, #tpu.memory_space<vmem>>, vector<1x128x1xbf16>
      %14 = vector.shape_cast %13 : vector<1x128x1xbf16> to vector<128x1xbf16>
      %cst_12 = arith.constant dense<0.000000e+00> : vector<6x1xf32>
      %15 = tpu.matmul %12, %14, %cst_12 {dimension_numbers = #tpu.dot_dimension_numbers<[1], [0], [0], [1], [0, 0, 1, 1], [], []>} : vector<6x128xbf16>, vector<128x1xbf16>, vector<6x1xf32> -> vector<6x1xf32>
      %16 = arith.addf %11, %15 : vector<6x1xf32>
      %17 = vector.extract_strided_slice %6 {offsets = [2, 0], sizes = [6, 128], strides = [1, 1]} : vector<9x128xbf16> to vector<6x128xbf16>
      %c2 = arith.constant 2 : index
      %c0_13 = arith.constant 0 : index
      %c0_14 = arith.constant 0 : index
      %18 = vector.load %arg2[%c2, %c0_13, %c0_14] : memref<16x128x1xbf16, #tpu.memory_space<vmem>>, vector<1x128x1xbf16>
      %19 = vector.shape_cast %18 : vector<1x128x1xbf16> to vector<128x1xbf16>
      %cst_15 = arith.constant dense<0.000000e+00> : vector<6x1xf32>
      %20 = tpu.matmul %17, %19, %cst_15 {dimension_numbers = #tpu.dot_dimension_numbers<[1], [0], [0], [1], [0, 0, 1, 1], [], []>} : vector<6x128xbf16>, vector<128x1xbf16>, vector<6x1xf32> -> vector<6x1xf32>
      %21 = arith.addf %16, %20 : vector<6x1xf32>
      %22 = vector.extract_strided_slice %6 {offsets = [3, 0], sizes = [6, 128], strides = [1, 1]} : vector<9x128xbf16> to vector<6x128xbf16>
      %c3 = arith.constant 3 : index
      %c0_16 = arith.constant 0 : index
      %c0_17 = arith.constant 0 : index
      %23 = vector.load %arg2[%c3, %c0_16, %c0_17] : memref<16x128x1xbf16, #tpu.memory_space<vmem>>, vector<1x128x1xbf16>
      %24 = vector.shape_cast %23 : vector<1x128x1xbf16> to vector<128x1xbf16>
      %cst_18 = arith.constant dense<0.000000e+00> : vector<6x1xf32>
      %25 = tpu.matmul %22, %24, %cst_18 {dimension_numbers = #tpu.dot_dimension_numbers<[1], [0], [0], [1], [0, 0, 1, 1], [], []>} : vector<6x128xbf16>, vector<128x1xbf16>, vector<6x1xf32> -> vector<6x1xf32>
      %26 = arith.addf %21, %25 : vector<6x1xf32>
      %c1_i32_19 = arith.constant 1 : i32
      %27 = arith.addi %arg5, %c1_i32_19 : i32
      %c0_20 = arith.constant 0 : index
      %28 = arith.index_cast %27 : i32 to index
      %c0_21 = arith.constant 0 : index
      %c0_22 = arith.constant 0 : index
      %29 = vector.load %arg1[%c0_20, %28, %c0_21, %c0_22] : memref<1x9x9x128xbf16, #tpu.memory_space<vmem>>, vector<1x1x9x128xbf16>
      %30 = vector.shape_cast %29 : vector<1x1x9x128xbf16> to vector<9x128xbf16>
      %31 = vector.extract_strided_slice %30 {offsets = [0, 0], sizes = [6, 128], strides = [1, 1]} : vector<9x128xbf16> to vector<6x128xbf16>
      %c4 = arith.constant 4 : index
      %c0_23 = arith.constant 0 : index
      %c0_24 = arith.constant 0 : index
      %32 = vector.load %arg2[%c4, %c0_23, %c0_24] : memref<16x128x1xbf16, #tpu.memory_space<vmem>>, vector<1x128x1xbf16>
      %33 = vector.shape_cast %32 : vector<1x128x1xbf16> to vector<128x1xbf16>
      %cst_25 = arith.constant dense<0.000000e+00> : vector<6x1xf32>
      %34 = tpu.matmul %31, %33, %cst_25 {dimension_numbers = #tpu.dot_dimension_numbers<[1], [0], [0], [1], [0, 0, 1, 1], [], []>} : vector<6x128xbf16>, vector<128x1xbf16>, vector<6x1xf32> -> vector<6x1xf32>
      %35 = arith.addf %26, %34 : vector<6x1xf32>
      %36 = vector.extract_strided_slice %30 {offsets = [1, 0], sizes = [6, 128], strides = [1, 1]} : vector<9x128xbf16> to vector<6x128xbf16>
      %c5 = arith.constant 5 : index
      %c0_26 = arith.constant 0 : index
      %c0_27 = arith.constant 0 : index
      %37 = vector.load %arg2[%c5, %c0_26, %c0_27] : memref<16x128x1xbf16, #tpu.memory_space<vmem>>, vector<1x128x1xbf16>
      %38 = vector.shape_cast %37 : vector<1x128x1xbf16> to vector<128x1xbf16>
      %cst_28 = arith.constant dense<0.000000e+00> : vector<6x1xf32>
      %39 = tpu.matmul %36, %38, %cst_28 {dimension_numbers = #tpu.dot_dimension_numbers<[1], [0], [0], [1], [0, 0, 1, 1], [], []>} : vector<6x128xbf16>, vector<128x1xbf16>, vector<6x1xf32> -> vector<6x1xf32>
      %40 = arith.addf %35, %39 : vector<6x1xf32>
      %41 = vector.extract_strided_slice %30 {offsets = [2, 0], sizes = [6, 128], strides = [1, 1]} : vector<9x128xbf16> to vector<6x128xbf16>
      %c6 = arith.constant 6 : index
      %c0_29 = arith.constant 0 : index
      %c0_30 = arith.constant 0 : index
      %42 = vector.load %arg2[%c6, %c0_29, %c0_30] : memref<16x128x1xbf16, #tpu.memory_space<vmem>>, vector<1x128x1xbf16>
      %43 = vector.shape_cast %42 : vector<1x128x1xbf16> to vector<128x1xbf16>
      %cst_31 = arith.constant dense<0.000000e+00> : vector<6x1xf32>
      %44 = tpu.matmul %41, %43, %cst_31 {dimension_numbers = #tpu.dot_dimension_numbers<[1], [0], [0], [1], [0, 0, 1, 1], [], []>} : vector<6x128xbf16>, vector<128x1xbf16>, vector<6x1xf32> -> vector<6x1xf32>
      %45 = arith.addf %40, %44 : vector<6x1xf32>
      %46 = vector.extract_strided_slice %30 {offsets = [3, 0], sizes = [6, 128], strides = [1, 1]} : vector<9x128xbf16> to vector<6x128xbf16>
      %c7 = arith.constant 7 : index
      %c0_32 = arith.constant 0 : index
      %c0_33 = arith.constant 0 : index
      %47 = vector.load %arg2[%c7, %c0_32, %c0_33] : memref<16x128x1xbf16, #tpu.memory_space<vmem>>, vector<1x128x1xbf16>
      %48 = vector.shape_cast %47 : vector<1x128x1xbf16> to vector<128x1xbf16>
      %cst_34 = arith.constant dense<0.000000e+00> : vector<6x1xf32>
      %49 = tpu.matmul %46, %48, %cst_34 {dimension_numbers = #tpu.dot_dimension_numbers<[1], [0], [0], [1], [0, 0, 1, 1], [], []>} : vector<6x128xbf16>, vector<128x1xbf16>, vector<6x1xf32> -> vector<6x1xf32>
      %50 = arith.addf %45, %49 : vector<6x1xf32>
      %c2_i32 = arith.constant 2 : i32
      %51 = arith.addi %arg5, %c2_i32 : i32
      %c0_35 = arith.constant 0 : index
      %52 = arith.index_cast %51 : i32 to index
      %c0_36 = arith.constant 0 : index
      %c0_37 = arith.constant 0 : index
      %53 = vector.load %arg1[%c0_35, %52, %c0_36, %c0_37] : memref<1x9x9x128xbf16, #tpu.memory_space<vmem>>, vector<1x1x9x128xbf16>
      %54 = vector.shape_cast %53 : vector<1x1x9x128xbf16> to vector<9x128xbf16>
      %55 = vector.extract_strided_slice %54 {offsets = [0, 0], sizes = [6, 128], strides = [1, 1]} : vector<9x128xbf16> to vector<6x128xbf16>
      %c8 = arith.constant 8 : index
      %c0_38 = arith.constant 0 : index
      %c0_39 = arith.constant 0 : index
      %56 = vector.load %arg2[%c8, %c0_38, %c0_39] : memref<16x128x1xbf16, #tpu.memory_space<vmem>>, vector<1x128x1xbf16>
      %57 = vector.shape_cast %56 : vector<1x128x1xbf16> to vector<128x1xbf16>
      %cst_40 = arith.constant dense<0.000000e+00> : vector<6x1xf32>
      %58 = tpu.matmul %55, %57, %cst_40 {dimension_numbers = #tpu.dot_dimension_numbers<[1], [0], [0], [1], [0, 0, 1, 1], [], []>} : vector<6x128xbf16>, vector<128x1xbf16>, vector<6x1xf32> -> vector<6x1xf32>
      %59 = arith.addf %50, %58 : vector<6x1xf32>
      %60 = vector.extract_strided_slice %54 {offsets = [1, 0], sizes = [6, 128], strides = [1, 1]} : vector<9x128xbf16> to vector<6x128xbf16>
      %c9 = arith.constant 9 : index
      %c0_41 = arith.constant 0 : index
      %c0_42 = arith.constant 0 : index
      %61 = vector.load %arg2[%c9, %c0_41, %c0_42] : memref<16x128x1xbf16, #tpu.memory_space<vmem>>, vector<1x128x1xbf16>
      %62 = vector.shape_cast %61 : vector<1x128x1xbf16> to vector<128x1xbf16>
      %cst_43 = arith.constant dense<0.000000e+00> : vector<6x1xf32>
      %63 = tpu.matmul %60, %62, %cst_43 {dimension_numbers = #tpu.dot_dimension_numbers<[1], [0], [0], [1], [0, 0, 1, 1], [], []>} : vector<6x128xbf16>, vector<128x1xbf16>, vector<6x1xf32> -> vector<6x1xf32>
      %64 = arith.addf %59, %63 : vector<6x1xf32>
      %65 = vector.extract_strided_slice %54 {offsets = [2, 0], sizes = [6, 128], strides = [1, 1]} : vector<9x128xbf16> to vector<6x128xbf16>
      %c10 = arith.constant 10 : index
      %c0_44 = arith.constant 0 : index
      %c0_45 = arith.constant 0 : index
      %66 = vector.load %arg2[%c10, %c0_44, %c0_45] : memref<16x128x1xbf16, #tpu.memory_space<vmem>>, vector<1x128x1xbf16>
      %67 = vector.shape_cast %66 : vector<1x128x1xbf16> to vector<128x1xbf16>
      %cst_46 = arith.constant dense<0.000000e+00> : vector<6x1xf32>
      %68 = tpu.matmul %65, %67, %cst_46 {dimension_numbers = #tpu.dot_dimension_numbers<[1], [0], [0], [1], [0, 0, 1, 1], [], []>} : vector<6x128xbf16>, vector<128x1xbf16>, vector<6x1xf32> -> vector<6x1xf32>
      %69 = arith.addf %64, %68 : vector<6x1xf32>
      %70 = vector.extract_strided_slice %54 {offsets = [3, 0], sizes = [6, 128], strides = [1, 1]} : vector<9x128xbf16> to vector<6x128xbf16>
      %c11 = arith.constant 11 : index
      %c0_47 = arith.constant 0 : index
      %c0_48 = arith.constant 0 : index
      %71 = vector.load %arg2[%c11, %c0_47, %c0_48] : memref<16x128x1xbf16, #tpu.memory_space<vmem>>, vector<1x128x1xbf16>
      %72 = vector.shape_cast %71 : vector<1x128x1xbf16> to vector<128x1xbf16>
      %cst_49 = arith.constant dense<0.000000e+00> : vector<6x1xf32>
      %73 = tpu.matmul %70, %72, %cst_49 {dimension_numbers = #tpu.dot_dimension_numbers<[1], [0], [0], [1], [0, 0, 1, 1], [], []>} : vector<6x128xbf16>, vector<128x1xbf16>, vector<6x1xf32> -> vector<6x1xf32>
      %74 = arith.addf %69, %73 : vector<6x1xf32>
      %c3_i32 = arith.constant 3 : i32
      %75 = arith.addi %arg5, %c3_i32 : i32
      %c0_50 = arith.constant 0 : index
      %76 = arith.index_cast %75 : i32 to index
      %c0_51 = arith.constant 0 : index
      %c0_52 = arith.constant 0 : index
      %77 = vector.load %arg1[%c0_50, %76, %c0_51, %c0_52] : memref<1x9x9x128xbf16, #tpu.memory_space<vmem>>, vector<1x1x9x128xbf16>
      %78 = vector.shape_cast %77 : vector<1x1x9x128xbf16> to vector<9x128xbf16>
      %79 = vector.extract_strided_slice %78 {offsets = [0, 0], sizes = [6, 128], strides = [1, 1]} : vector<9x128xbf16> to vector<6x128xbf16>
      %c12 = arith.constant 12 : index
      %c0_53 = arith.constant 0 : index
      %c0_54 = arith.constant 0 : index
      %80 = vector.load %arg2[%c12, %c0_53, %c0_54] : memref<16x128x1xbf16, #tpu.memory_space<vmem>>, vector<1x128x1xbf16>
      %81 = vector.shape_cast %80 : vector<1x128x1xbf16> to vector<128x1xbf16>
      %cst_55 = arith.constant dense<0.000000e+00> : vector<6x1xf32>
      %82 = tpu.matmul %79, %81, %cst_55 {dimension_numbers = #tpu.dot_dimension_numbers<[1], [0], [0], [1], [0, 0, 1, 1], [], []>} : vector<6x128xbf16>, vector<128x1xbf16>, vector<6x1xf32> -> vector<6x1xf32>
      %83 = arith.addf %74, %82 : vector<6x1xf32>
      %84 = vector.extract_strided_slice %78 {offsets = [1, 0], sizes = [6, 128], strides = [1, 1]} : vector<9x128xbf16> to vector<6x128xbf16>
      %c13 = arith.constant 13 : index
      %c0_56 = arith.constant 0 : index
      %c0_57 = arith.constant 0 : index
      %85 = vector.load %arg2[%c13, %c0_56, %c0_57] : memref<16x128x1xbf16, #tpu.memory_space<vmem>>, vector<1x128x1xbf16>
      %86 = vector.shape_cast %85 : vector<1x128x1xbf16> to vector<128x1xbf16>
      %cst_58 = arith.constant dense<0.000000e+00> : vector<6x1xf32>
      %87 = tpu.matmul %84, %86, %cst_58 {dimension_numbers = #tpu.dot_dimension_numbers<[1], [0], [0], [1], [0, 0, 1, 1], [], []>} : vector<6x128xbf16>, vector<128x1xbf16>, vector<6x1xf32> -> vector<6x1xf32>
      %88 = arith.addf %83, %87 : vector<6x1xf32>
      %89 = vector.extract_strided_slice %78 {offsets = [2, 0], sizes = [6, 128], strides = [1, 1]} : vector<9x128xbf16> to vector<6x128xbf16>
      %c14 = arith.constant 14 : index
      %c0_59 = arith.constant 0 : index
      %c0_60 = arith.constant 0 : index
      %90 = vector.load %arg2[%c14, %c0_59, %c0_60] : memref<16x128x1xbf16, #tpu.memory_space<vmem>>, vector<1x128x1xbf16>
      %91 = vector.shape_cast %90 : vector<1x128x1xbf16> to vector<128x1xbf16>
      %cst_61 = arith.constant dense<0.000000e+00> : vector<6x1xf32>
      %92 = tpu.matmul %89, %91, %cst_61 {dimension_numbers = #tpu.dot_dimension_numbers<[1], [0], [0], [1], [0, 0, 1, 1], [], []>} : vector<6x128xbf16>, vector<128x1xbf16>, vector<6x1xf32> -> vector<6x1xf32>
      %93 = arith.addf %88, %92 : vector<6x1xf32>
      %94 = vector.extract_strided_slice %78 {offsets = [3, 0], sizes = [6, 128], strides = [1, 1]} : vector<9x128xbf16> to vector<6x128xbf16>
      %c15 = arith.constant 15 : index
      %c0_62 = arith.constant 0 : index
      %c0_63 = arith.constant 0 : index
      %95 = vector.load %arg2[%c15, %c0_62, %c0_63] : memref<16x128x1xbf16, #tpu.memory_space<vmem>>, vector<1x128x1xbf16>
      %96 = vector.shape_cast %95 : vector<1x128x1xbf16> to vector<128x1xbf16>
      %cst_64 = arith.constant dense<0.000000e+00> : vector<6x1xf32>
      %97 = tpu.matmul %94, %96, %cst_64 {dimension_numbers = #tpu.dot_dimension_numbers<[1], [0], [0], [1], [0, 0, 1, 1], [], []>} : vector<6x128xbf16>, vector<128x1xbf16>, vector<6x1xf32> -> vector<6x1xf32>
      %98 = arith.addf %93, %97 : vector<6x1xf32>
      %99 = vector.broadcast %0 : vector<1x1xf32> to vector<6x1xf32>
      %100 = arith.addf %98, %99 : vector<6x1xf32>
      %c0_65 = arith.constant 0 : index
      %101 = arith.index_cast %arg5 : i32 to index
      %c0_66 = arith.constant 0 : index
      %c0_67 = arith.constant 0 : index
      %102 = vector.load %arg4[%c0_65, %101, %c0_66, %c0_67] : memref<1x6x6x1xf32, #tpu.memory_space<vmem>>, vector<1x1x6x1xf32>
      %103 = vector.shape_cast %102 : vector<1x1x6x1xf32> to vector<6x1xf32>
      %104 = vector.shape_cast %100 : vector<6x1xf32> to vector<1x1x6x1xf32>
      tpu.vector_store %arg4[%c0_65, %101, %c0_66, %c0_67], %104 {strides = array<i32>} : memref<1x6x6x1xf32, #tpu.memory_space<vmem>>, vector<1x1x6x1xf32>,
    }
    %c6_i32_1 = arith.constant 6 : i32
    return
  }
  func.func @transform_0(%arg0: i32) -> (i32, i32, i32, i32) {
    %c0_i32 = arith.constant 0 : i32
    %c0_i32_0 = arith.constant 0 : i32
    %c0_i32_1 = arith.constant 0 : i32
    %c0_i32_2 = arith.constant 0 : i32
    return %arg0, %c0_i32, %c0_i32_0, %c0_i32_1 : i32, i32, i32, i32
  }
  func.func @transform_1(%arg0: i32) -> (i32, i32, i32) {
    %c0_i32 = arith.constant 0 : i32
    %c0_i32_0 = arith.constant 0 : i32
    %c0_i32_1 = arith.constant 0 : i32
    %c0_i32_2 = arith.constant 0 : i32
    return %c0_i32, %c0_i32_0, %c0_i32_1 : i32, i32, i32
  }
  func.func @transform_2(%arg0: i32) -> (i32, i32) {
    %c0_i32 = arith.constant 0 : i32
    %c0_i32_0 = arith.constant 0 : i32
    %c0_i32_1 = arith.constant 0 : i32
    return %c0_i32, %c0_i32_0 : i32, i32
  }
  func.func @transform_3(%arg0: i32) -> (i32, i32, i32, i32) {
    %c0_i32 = arith.constant 0 : i32
    %c0_i32_0 = arith.constant 0 : i32
    %c0_i32_1 = arith.constant 0 : i32
    %c0_i32_2 = arith.constant 0 : i32
    return %arg0, %c0_i32, %c0_i32_0, %c0_i32_1 : i32, i32, i32, i32
  }
}

module attributes {stable_mosaic.version = 11 : i64} {
  func.func @_avgpool_kernel(%arg0: i32, %arg1: memref<32x66xf32, #tpu.memory_space<vmem>>, %arg2: memref<1x66x66xf32, #tpu.memory_space<vmem>>, %arg3: memref<66x32xf32, #tpu.memory_space<vmem>>, %arg4: memref<1x32x32xf32, #tpu.memory_space<vmem>>) attributes {dimension_semantics = [#tpu.dimension_semantics<parallel>], iteration_bounds = array<i64: 6>, scalar_prefetch = 0 : i64, scratch_operands = 0 : i64, tpu.core_type = #tpu.core_type<tc>, window_params = [{pipeline_mode = #tpu.pipeline_mode<synchronous>, transform_indices = @transform_0, window_bounds = array<i64: 32, 66>}, {transform_indices = @transform_1, window_bounds = array<i64: 1, 66, 66>}, {pipeline_mode = #tpu.pipeline_mode<synchronous>, transform_indices = @transform_2, window_bounds = array<i64: 66, 32>}, {transform_indices = @transform_3, window_bounds = array<i64: 1, 32, 32>}]} {
    %c0 = arith.constant 0 : index
    %c0_0 = arith.constant 0 : index
    %c0_1 = arith.constant 0 : index
    %0 = vector.load %arg2[%c0, %c0_0, %c0_1] : memref<1x66x66xf32, #tpu.memory_space<vmem>>, vector<1x66x66xf32>
    %1 = vector.shape_cast %0 : vector<1x66x66xf32> to vector<66x66xf32>
    %c0_2 = arith.constant 0 : index
    %c0_3 = arith.constant 0 : index
    %2 = vector.load %arg3[%c0_2, %c0_3] : memref<66x32xf32, #tpu.memory_space<vmem>>, vector<66x32xf32>
    %cst = arith.constant dense<0.000000e+00> : vector<66x32xf32>
    %3 = tpu.matmul %1, %2, %cst {dimension_numbers = #tpu.dot_dimension_numbers<[1], [0], [0], [1], [0, 0, 1, 1], [], []>} : vector<66x66xf32>, vector<66x32xf32>, vector<66x32xf32> -> vector<66x32xf32>
    %c0_4 = arith.constant 0 : index
    %c0_5 = arith.constant 0 : index
    %4 = vector.load %arg1[%c0_4, %c0_5] : memref<32x66xf32, #tpu.memory_space<vmem>>, vector<32x66xf32>
    %cst_6 = arith.constant dense<0.000000e+00> : vector<32x32xf32>
    %5 = tpu.matmul %4, %3, %cst_6 {dimension_numbers = #tpu.dot_dimension_numbers<[1], [0], [0], [1], [0, 0, 1, 1], [], []>} : vector<32x66xf32>, vector<66x32xf32>, vector<32x32xf32> -> vector<32x32xf32>
    %c0_7 = arith.constant 0 : index
    %c0_8 = arith.constant 0 : index
    %c0_9 = arith.constant 0 : index
    %6 = vector.load %arg4[%c0_7, %c0_8, %c0_9] : memref<1x32x32xf32, #tpu.memory_space<vmem>>, vector<1x32x32xf32>
    %7 = vector.shape_cast %6 : vector<1x32x32xf32> to vector<32x32xf32>
    %8 = vector.shape_cast %5 : vector<32x32xf32> to vector<1x32x32xf32>
    tpu.vector_store %arg4[%c0_7, %c0_8, %c0_9], %8 {strides = array<i32>} : memref<1x32x32xf32, #tpu.memory_space<vmem>>, vector<1x32x32xf32>,
    return
  }
  func.func @transform_0(%arg0: i32) -> (i32, i32) {
    %c0_i32 = arith.constant 0 : i32
    %c0_i32_0 = arith.constant 0 : i32
    %c0_i32_1 = arith.constant 0 : i32
    return %c0_i32, %c0_i32_0 : i32, i32
  }
  func.func @transform_1(%arg0: i32) -> (i32, i32, i32) {
    %c0_i32 = arith.constant 0 : i32
    %c0_i32_0 = arith.constant 0 : i32
    %c0_i32_1 = arith.constant 0 : i32
    return %arg0, %c0_i32, %c0_i32_0 : i32, i32, i32
  }
  func.func @transform_2(%arg0: i32) -> (i32, i32) {
    %c0_i32 = arith.constant 0 : i32
    %c0_i32_0 = arith.constant 0 : i32
    %c0_i32_1 = arith.constant 0 : i32
    return %c0_i32, %c0_i32_0 : i32, i32
  }
  func.func @transform_3(%arg0: i32) -> (i32, i32, i32) {
    %c0_i32 = arith.constant 0 : i32
    %c0_i32_0 = arith.constant 0 : i32
    %c0_i32_1 = arith.constant 0 : i32
    return %arg0, %c0_i32, %c0_i32_0 : i32, i32, i32
  }
}

module attributes {stable_mosaic.version = 11 : i64} {
  func.func @_matmul_bias_kernel(%arg0: i32, %arg1: i32, %arg2: memref<512x48xbf16, #tpu.memory_space<vmem>>, %arg3: memref<48x16xbf16, #tpu.memory_space<vmem>>, %arg4: memref<1x16xf32, #tpu.memory_space<vmem>>, %arg5: memref<512x16xf32, #tpu.memory_space<vmem>>) attributes {dimension_semantics = [#tpu.dimension_semantics<parallel>, #tpu.dimension_semantics<arbitrary>], iteration_bounds = array<i64: 1, 1>, scalar_prefetch = 0 : i64, scratch_operands = 0 : i64, tpu.core_type = #tpu.core_type<tc>, window_params = [{transform_indices = @transform_0, window_bounds = array<i64: 512, 48>}, {transform_indices = @transform_1, window_bounds = array<i64: 48, 16>}, {pipeline_mode = #tpu.pipeline_mode<synchronous>, transform_indices = @transform_2, window_bounds = array<i64: 1, 16>}, {transform_indices = @transform_3, window_bounds = array<i64: 512, 16>}]} {
    %c0_i32 = arith.constant 0 : i32
    %0 = arith.cmpi eq, %arg1, %c0_i32 : i32
    %1 = arith.extui %0 : i1 to i32
    %c0_i32_0 = arith.constant 0 : i32
    %2 = arith.cmpi ne, %1, %c0_i32_0 : i32
    scf.if %2 {
      %cst_10 = arith.constant 0.000000e+00 : f32
      %12 = vector.broadcast %cst_10 : f32 to vector<512x16xf32>
      %c0_11 = arith.constant 0 : index
      %c0_12 = arith.constant 0 : index
      %13 = vector.load %arg5[%c0_11, %c0_12] : memref<512x16xf32, #tpu.memory_space<vmem>>, vector<512x16xf32>
      tpu.vector_store %arg5[%c0_11, %c0_12], %12 {strides = array<i32>} : memref<512x16xf32, #tpu.memory_space<vmem>>, vector<512x16xf32>,
    } else {
    }
    %c0 = arith.constant 0 : index
    %c0_1 = arith.constant 0 : index
    %3 = vector.load %arg5[%c0, %c0_1] : memref<512x16xf32, #tpu.memory_space<vmem>>, vector<512x16xf32>
    %c0_2 = arith.constant 0 : index
    %c0_3 = arith.constant 0 : index
    %4 = vector.load %arg2[%c0_2, %c0_3] : memref<512x48xbf16, #tpu.memory_space<vmem>>, vector<512x48xbf16>
    %c0_4 = arith.constant 0 : index
    %c0_5 = arith.constant 0 : index
    %5 = vector.load %arg3[%c0_4, %c0_5] : memref<48x16xbf16, #tpu.memory_space<vmem>>, vector<48x16xbf16>
    %cst = arith.constant dense<0.000000e+00> : vector<512x16xf32>
    %6 = tpu.matmul %4, %5, %cst {dimension_numbers = #tpu.dot_dimension_numbers<[1], [0], [0], [1], [0, 0, 1, 1], [], []>} : vector<512x48xbf16>, vector<48x16xbf16>, vector<512x16xf32> -> vector<512x16xf32>
    %7 = arith.addf %3, %6 : vector<512x16xf32>
    %c0_6 = arith.constant 0 : index
    %c0_7 = arith.constant 0 : index
    %8 = vector.load %arg5[%c0_6, %c0_7] : memref<512x16xf32, #tpu.memory_space<vmem>>, vector<512x16xf32>
    tpu.vector_store %arg5[%c0_6, %c0_7], %7 {strides = array<i32>} : memref<512x16xf32, #tpu.memory_space<vmem>>, vector<512x16xf32>,
    %c0_i32_8 = arith.constant 0 : i32
    %9 = arith.cmpi eq, %arg1, %c0_i32_8 : i32
    %10 = arith.extui %9 : i1 to i32
    %c0_i32_9 = arith.constant 0 : i32
    %11 = arith.cmpi ne, %10, %c0_i32_9 : i32
    scf.if %11 {
      %c0_10 = arith.constant 0 : index
      %c0_11 = arith.constant 0 : index
      %12 = vector.load %arg5[%c0_10, %c0_11] : memref<512x16xf32, #tpu.memory_space<vmem>>, vector<512x16xf32>
      %c0_12 = arith.constant 0 : index
      %c0_13 = arith.constant 0 : index
      %13 = vector.load %arg4[%c0_12, %c0_13] : memref<1x16xf32, #tpu.memory_space<vmem>>, vector<1x16xf32>
      %14 = vector.broadcast %13 : vector<1x16xf32> to vector<512x16xf32>
      %15 = arith.addf %12, %14 : vector<512x16xf32>
      %cst_14 = arith.constant 0.000000e+00 : f32
      %16 = vector.broadcast %cst_14 : f32 to vector<512x16xf32>
      %17 = arith.cmpf oge, %15, %16 : vector<512x16xf32>
      %cst_15 = arith.constant 2.000000e-01 : f32
      %18 = vector.broadcast %cst_15 : f32 to vector<512x16xf32>
      %19 = arith.mulf %18, %15 : vector<512x16xf32>
      %20 = arith.select %17, %15, %19 : vector<512x16xi1>, vector<512x16xf32>
      %c0_16 = arith.constant 0 : index
      %c0_17 = arith.constant 0 : index
      %21 = vector.load %arg5[%c0_16, %c0_17] : memref<512x16xf32, #tpu.memory_space<vmem>>, vector<512x16xf32>
      tpu.vector_store %arg5[%c0_16, %c0_17], %20 {strides = array<i32>} : memref<512x16xf32, #tpu.memory_space<vmem>>, vector<512x16xf32>,
    } else {
    }
    return
  }
  func.func @transform_0(%arg0: i32, %arg1: i32) -> (i32, i32) {
    %c0_i32 = arith.constant 0 : i32
    return %arg0, %arg1 : i32, i32
  }
  func.func @transform_1(%arg0: i32, %arg1: i32) -> (i32, i32) {
    %c0_i32 = arith.constant 0 : i32
    %c0_i32_0 = arith.constant 0 : i32
    return %arg1, %c0_i32 : i32, i32
  }
  func.func @transform_2(%arg0: i32, %arg1: i32) -> (i32, i32) {
    %c0_i32 = arith.constant 0 : i32
    %c0_i32_0 = arith.constant 0 : i32
    %c0_i32_1 = arith.constant 0 : i32
    return %c0_i32, %c0_i32_0 : i32, i32
  }
  func.func @transform_3(%arg0: i32, %arg1: i32) -> (i32, i32) {
    %c0_i32 = arith.constant 0 : i32
    %c0_i32_0 = arith.constant 0 : i32
    return %arg0, %c0_i32 : i32, i32
  }
}

module attributes {stable_mosaic.version = 11 : i64} {
  func.func @_matmul_bias_kernel(%arg0: i32, %arg1: i32, %arg2: memref<64x256xbf16, #tpu.memory_space<vmem>>, %arg3: memref<256x32xbf16, #tpu.memory_space<vmem>>, %arg4: memref<1x32xf32, #tpu.memory_space<vmem>>, %arg5: memref<64x32xf32, #tpu.memory_space<vmem>>) attributes {dimension_semantics = [#tpu.dimension_semantics<parallel>, #tpu.dimension_semantics<arbitrary>], iteration_bounds = array<i64: 2, 1>, scalar_prefetch = 0 : i64, scratch_operands = 0 : i64, tpu.core_type = #tpu.core_type<tc>, window_params = [{transform_indices = @transform_0, window_bounds = array<i64: 64, 256>}, {transform_indices = @transform_1, window_bounds = array<i64: 256, 32>}, {pipeline_mode = #tpu.pipeline_mode<synchronous>, transform_indices = @transform_2, window_bounds = array<i64: 1, 32>}, {transform_indices = @transform_3, window_bounds = array<i64: 64, 32>}]} {
    %c0_i32 = arith.constant 0 : i32
    %0 = arith.cmpi eq, %arg1, %c0_i32 : i32
    %1 = arith.extui %0 : i1 to i32
    %c0_i32_0 = arith.constant 0 : i32
    %2 = arith.cmpi ne, %1, %c0_i32_0 : i32
    scf.if %2 {
      %cst_10 = arith.constant 0.000000e+00 : f32
      %12 = vector.broadcast %cst_10 : f32 to vector<64x32xf32>
      %c0_11 = arith.constant 0 : index
      %c0_12 = arith.constant 0 : index
      %13 = vector.load %arg5[%c0_11, %c0_12] : memref<64x32xf32, #tpu.memory_space<vmem>>, vector<64x32xf32>
      tpu.vector_store %arg5[%c0_11, %c0_12], %12 {strides = array<i32>} : memref<64x32xf32, #tpu.memory_space<vmem>>, vector<64x32xf32>,
    } else {
    }
    %c0 = arith.constant 0 : index
    %c0_1 = arith.constant 0 : index
    %3 = vector.load %arg5[%c0, %c0_1] : memref<64x32xf32, #tpu.memory_space<vmem>>, vector<64x32xf32>
    %c0_2 = arith.constant 0 : index
    %c0_3 = arith.constant 0 : index
    %4 = vector.load %arg2[%c0_2, %c0_3] : memref<64x256xbf16, #tpu.memory_space<vmem>>, vector<64x256xbf16>
    %c0_4 = arith.constant 0 : index
    %c0_5 = arith.constant 0 : index
    %5 = vector.load %arg3[%c0_4, %c0_5] : memref<256x32xbf16, #tpu.memory_space<vmem>>, vector<256x32xbf16>
    %cst = arith.constant dense<0.000000e+00> : vector<64x32xf32>
    %6 = tpu.matmul %4, %5, %cst {dimension_numbers = #tpu.dot_dimension_numbers<[1], [0], [0], [1], [0, 0, 1, 1], [], []>} : vector<64x256xbf16>, vector<256x32xbf16>, vector<64x32xf32> -> vector<64x32xf32>
    %7 = arith.addf %3, %6 : vector<64x32xf32>
    %c0_6 = arith.constant 0 : index
    %c0_7 = arith.constant 0 : index
    %8 = vector.load %arg5[%c0_6, %c0_7] : memref<64x32xf32, #tpu.memory_space<vmem>>, vector<64x32xf32>
    tpu.vector_store %arg5[%c0_6, %c0_7], %7 {strides = array<i32>} : memref<64x32xf32, #tpu.memory_space<vmem>>, vector<64x32xf32>,
    %c0_i32_8 = arith.constant 0 : i32
    %9 = arith.cmpi eq, %arg1, %c0_i32_8 : i32
    %10 = arith.extui %9 : i1 to i32
    %c0_i32_9 = arith.constant 0 : i32
    %11 = arith.cmpi ne, %10, %c0_i32_9 : i32
    scf.if %11 {
      %c0_10 = arith.constant 0 : index
      %c0_11 = arith.constant 0 : index
      %12 = vector.load %arg5[%c0_10, %c0_11] : memref<64x32xf32, #tpu.memory_space<vmem>>, vector<64x32xf32>
      %c0_12 = arith.constant 0 : index
      %c0_13 = arith.constant 0 : index
      %13 = vector.load %arg4[%c0_12, %c0_13] : memref<1x32xf32, #tpu.memory_space<vmem>>, vector<1x32xf32>
      %14 = vector.broadcast %13 : vector<1x32xf32> to vector<64x32xf32>
      %15 = arith.addf %12, %14 : vector<64x32xf32>
      %cst_14 = arith.constant dense<0.000000e+00> : vector<32xf32>
      %16 = vector.multi_reduction <add>, %15, %cst_14 [0] : vector<64x32xf32> to vector<32xf32>
      %17 = vector.shape_cast %16 : vector<32xf32> to vector<1x32xf32>
      %cst_15 = arith.constant 1.562500e-02 : f32
      %18 = vector.broadcast %cst_15 : f32 to vector<1x32xf32>
      %19 = arith.mulf %17, %18 : vector<1x32xf32>
      %20 = arith.mulf %15, %15 : vector<64x32xf32>
      %cst_16 = arith.constant dense<0.000000e+00> : vector<32xf32>
      %21 = vector.multi_reduction <add>, %20, %cst_16 [0] : vector<64x32xf32> to vector<32xf32>
      %22 = vector.shape_cast %21 : vector<32xf32> to vector<1x32xf32>
      %cst_17 = arith.constant 1.562500e-02 : f32
      %23 = vector.broadcast %cst_17 : f32 to vector<1x32xf32>
      %24 = arith.mulf %22, %23 : vector<1x32xf32>
      %25 = arith.mulf %19, %19 : vector<1x32xf32>
      %26 = arith.subf %24, %25 : vector<1x32xf32>
      %cst_18 = arith.constant 0.000000e+00 : f32
      %27 = vector.broadcast %cst_18 : f32 to vector<1x32xf32>
      %28 = arith.maximumf %26, %27 : vector<1x32xf32>
      %29 = vector.broadcast %19 : vector<1x32xf32> to vector<64x32xf32>
      %30 = arith.subf %15, %29 : vector<64x32xf32>
      %cst_19 = arith.constant 9.99999974E-6 : f32
      %31 = vector.broadcast %cst_19 : f32 to vector<1x32xf32>
      %32 = arith.addf %28, %31 : vector<1x32xf32>
      %33 = math.rsqrt %32 : vector<1x32xf32>
      %34 = vector.broadcast %33 : vector<1x32xf32> to vector<64x32xf32>
      %35 = arith.mulf %30, %34 : vector<64x32xf32>
      %cst_20 = arith.constant 0.000000e+00 : f32
      %36 = vector.broadcast %cst_20 : f32 to vector<64x32xf32>
      %37 = arith.cmpf oge, %35, %36 : vector<64x32xf32>
      %cst_21 = arith.constant 2.000000e-01 : f32
      %38 = vector.broadcast %cst_21 : f32 to vector<64x32xf32>
      %39 = arith.mulf %38, %35 : vector<64x32xf32>
      %40 = arith.select %37, %35, %39 : vector<64x32xi1>, vector<64x32xf32>
      %c0_22 = arith.constant 0 : index
      %c0_23 = arith.constant 0 : index
      %41 = vector.load %arg5[%c0_22, %c0_23] : memref<64x32xf32, #tpu.memory_space<vmem>>, vector<64x32xf32>
      tpu.vector_store %arg5[%c0_22, %c0_23], %40 {strides = array<i32>} : memref<64x32xf32, #tpu.memory_space<vmem>>, vector<64x32xf32>,
    } else {
    }
    return
  }
  func.func @transform_0(%arg0: i32, %arg1: i32) -> (i32, i32) {
    %c0_i32 = arith.constant 0 : i32
    return %arg0, %arg1 : i32, i32
  }
  func.func @transform_1(%arg0: i32, %arg1: i32) -> (i32, i32) {
    %c0_i32 = arith.constant 0 : i32
    %c0_i32_0 = arith.constant 0 : i32
    return %arg1, %c0_i32 : i32, i32
  }
  func.func @transform_2(%arg0: i32, %arg1: i32) -> (i32, i32) {
    %c0_i32 = arith.constant 0 : i32
    %c0_i32_0 = arith.constant 0 : i32
    %c0_i32_1 = arith.constant 0 : i32
    return %c0_i32, %c0_i32_0 : i32, i32
  }
  func.func @transform_3(%arg0: i32, %arg1: i32) -> (i32, i32) {
    %c0_i32 = arith.constant 0 : i32
    %c0_i32_0 = arith.constant 0 : i32
    return %arg0, %c0_i32 : i32, i32
  }
}

module attributes {stable_mosaic.version = 11 : i64} {
  func.func @_matmul_bias_kernel(%arg0: i32, %arg1: i32, %arg2: memref<16x512xbf16, #tpu.memory_space<vmem>>, %arg3: memref<512x64xbf16, #tpu.memory_space<vmem>>, %arg4: memref<1x64xf32, #tpu.memory_space<vmem>>, %arg5: memref<16x64xf32, #tpu.memory_space<vmem>>) attributes {dimension_semantics = [#tpu.dimension_semantics<parallel>, #tpu.dimension_semantics<arbitrary>], iteration_bounds = array<i64: 2, 1>, scalar_prefetch = 0 : i64, scratch_operands = 0 : i64, tpu.core_type = #tpu.core_type<tc>, window_params = [{transform_indices = @transform_0, window_bounds = array<i64: 16, 512>}, {transform_indices = @transform_1, window_bounds = array<i64: 512, 64>}, {pipeline_mode = #tpu.pipeline_mode<synchronous>, transform_indices = @transform_2, window_bounds = array<i64: 1, 64>}, {transform_indices = @transform_3, window_bounds = array<i64: 16, 64>}]} {
    %c0_i32 = arith.constant 0 : i32
    %0 = arith.cmpi eq, %arg1, %c0_i32 : i32
    %1 = arith.extui %0 : i1 to i32
    %c0_i32_0 = arith.constant 0 : i32
    %2 = arith.cmpi ne, %1, %c0_i32_0 : i32
    scf.if %2 {
      %cst_10 = arith.constant 0.000000e+00 : f32
      %12 = vector.broadcast %cst_10 : f32 to vector<16x64xf32>
      %c0_11 = arith.constant 0 : index
      %c0_12 = arith.constant 0 : index
      %13 = vector.load %arg5[%c0_11, %c0_12] : memref<16x64xf32, #tpu.memory_space<vmem>>, vector<16x64xf32>
      tpu.vector_store %arg5[%c0_11, %c0_12], %12 {strides = array<i32>} : memref<16x64xf32, #tpu.memory_space<vmem>>, vector<16x64xf32>,
    } else {
    }
    %c0 = arith.constant 0 : index
    %c0_1 = arith.constant 0 : index
    %3 = vector.load %arg5[%c0, %c0_1] : memref<16x64xf32, #tpu.memory_space<vmem>>, vector<16x64xf32>
    %c0_2 = arith.constant 0 : index
    %c0_3 = arith.constant 0 : index
    %4 = vector.load %arg2[%c0_2, %c0_3] : memref<16x512xbf16, #tpu.memory_space<vmem>>, vector<16x512xbf16>
    %c0_4 = arith.constant 0 : index
    %c0_5 = arith.constant 0 : index
    %5 = vector.load %arg3[%c0_4, %c0_5] : memref<512x64xbf16, #tpu.memory_space<vmem>>, vector<512x64xbf16>
    %cst = arith.constant dense<0.000000e+00> : vector<16x64xf32>
    %6 = tpu.matmul %4, %5, %cst {dimension_numbers = #tpu.dot_dimension_numbers<[1], [0], [0], [1], [0, 0, 1, 1], [], []>} : vector<16x512xbf16>, vector<512x64xbf16>, vector<16x64xf32> -> vector<16x64xf32>
    %7 = arith.addf %3, %6 : vector<16x64xf32>
    %c0_6 = arith.constant 0 : index
    %c0_7 = arith.constant 0 : index
    %8 = vector.load %arg5[%c0_6, %c0_7] : memref<16x64xf32, #tpu.memory_space<vmem>>, vector<16x64xf32>
    tpu.vector_store %arg5[%c0_6, %c0_7], %7 {strides = array<i32>} : memref<16x64xf32, #tpu.memory_space<vmem>>, vector<16x64xf32>,
    %c0_i32_8 = arith.constant 0 : i32
    %9 = arith.cmpi eq, %arg1, %c0_i32_8 : i32
    %10 = arith.extui %9 : i1 to i32
    %c0_i32_9 = arith.constant 0 : i32
    %11 = arith.cmpi ne, %10, %c0_i32_9 : i32
    scf.if %11 {
      %c0_10 = arith.constant 0 : index
      %c0_11 = arith.constant 0 : index
      %12 = vector.load %arg5[%c0_10, %c0_11] : memref<16x64xf32, #tpu.memory_space<vmem>>, vector<16x64xf32>
      %c0_12 = arith.constant 0 : index
      %c0_13 = arith.constant 0 : index
      %13 = vector.load %arg4[%c0_12, %c0_13] : memref<1x64xf32, #tpu.memory_space<vmem>>, vector<1x64xf32>
      %14 = vector.broadcast %13 : vector<1x64xf32> to vector<16x64xf32>
      %15 = arith.addf %12, %14 : vector<16x64xf32>
      %cst_14 = arith.constant dense<0.000000e+00> : vector<64xf32>
      %16 = vector.multi_reduction <add>, %15, %cst_14 [0] : vector<16x64xf32> to vector<64xf32>
      %17 = vector.shape_cast %16 : vector<64xf32> to vector<1x64xf32>
      %cst_15 = arith.constant 6.250000e-02 : f32
      %18 = vector.broadcast %cst_15 : f32 to vector<1x64xf32>
      %19 = arith.mulf %17, %18 : vector<1x64xf32>
      %20 = arith.mulf %15, %15 : vector<16x64xf32>
      %cst_16 = arith.constant dense<0.000000e+00> : vector<64xf32>
      %21 = vector.multi_reduction <add>, %20, %cst_16 [0] : vector<16x64xf32> to vector<64xf32>
      %22 = vector.shape_cast %21 : vector<64xf32> to vector<1x64xf32>
      %cst_17 = arith.constant 6.250000e-02 : f32
      %23 = vector.broadcast %cst_17 : f32 to vector<1x64xf32>
      %24 = arith.mulf %22, %23 : vector<1x64xf32>
      %25 = arith.mulf %19, %19 : vector<1x64xf32>
      %26 = arith.subf %24, %25 : vector<1x64xf32>
      %cst_18 = arith.constant 0.000000e+00 : f32
      %27 = vector.broadcast %cst_18 : f32 to vector<1x64xf32>
      %28 = arith.maximumf %26, %27 : vector<1x64xf32>
      %29 = vector.broadcast %19 : vector<1x64xf32> to vector<16x64xf32>
      %30 = arith.subf %15, %29 : vector<16x64xf32>
      %cst_19 = arith.constant 9.99999974E-6 : f32
      %31 = vector.broadcast %cst_19 : f32 to vector<1x64xf32>
      %32 = arith.addf %28, %31 : vector<1x64xf32>
      %33 = math.rsqrt %32 : vector<1x64xf32>
      %34 = vector.broadcast %33 : vector<1x64xf32> to vector<16x64xf32>
      %35 = arith.mulf %30, %34 : vector<16x64xf32>
      %cst_20 = arith.constant 0.000000e+00 : f32
      %36 = vector.broadcast %cst_20 : f32 to vector<16x64xf32>
      %37 = arith.cmpf oge, %35, %36 : vector<16x64xf32>
      %cst_21 = arith.constant 2.000000e-01 : f32
      %38 = vector.broadcast %cst_21 : f32 to vector<16x64xf32>
      %39 = arith.mulf %38, %35 : vector<16x64xf32>
      %40 = arith.select %37, %35, %39 : vector<16x64xi1>, vector<16x64xf32>
      %c0_22 = arith.constant 0 : index
      %c0_23 = arith.constant 0 : index
      %41 = vector.load %arg5[%c0_22, %c0_23] : memref<16x64xf32, #tpu.memory_space<vmem>>, vector<16x64xf32>
      tpu.vector_store %arg5[%c0_22, %c0_23], %40 {strides = array<i32>} : memref<16x64xf32, #tpu.memory_space<vmem>>, vector<16x64xf32>,
    } else {
    }
    return
  }
  func.func @transform_0(%arg0: i32, %arg1: i32) -> (i32, i32) {
    %c0_i32 = arith.constant 0 : i32
    return %arg0, %arg1 : i32, i32
  }
  func.func @transform_1(%arg0: i32, %arg1: i32) -> (i32, i32) {
    %c0_i32 = arith.constant 0 : i32
    %c0_i32_0 = arith.constant 0 : i32
    return %arg1, %c0_i32 : i32, i32
  }
  func.func @transform_2(%arg0: i32, %arg1: i32) -> (i32, i32) {
    %c0_i32 = arith.constant 0 : i32
    %c0_i32_0 = arith.constant 0 : i32
    %c0_i32_1 = arith.constant 0 : i32
    return %c0_i32, %c0_i32_0 : i32, i32
  }
  func.func @transform_3(%arg0: i32, %arg1: i32) -> (i32, i32) {
    %c0_i32 = arith.constant 0 : i32
    %c0_i32_0 = arith.constant 0 : i32
    return %arg0, %c0_i32 : i32, i32
  }
}

module attributes {stable_mosaic.version = 11 : i64} {
  func.func @_conv_s1_kernel(%arg0: i32, %arg1: memref<1x6x6x64xbf16, #tpu.memory_space<vmem>>, %arg2: memref<16x64x128xbf16, #tpu.memory_space<vmem>>, %arg3: memref<1x128xf32, #tpu.memory_space<vmem>>, %arg4: memref<1x3x3x128xf32, #tpu.memory_space<vmem>>) attributes {dimension_semantics = [#tpu.dimension_semantics<parallel>], iteration_bounds = array<i64: 2>, scalar_prefetch = 0 : i64, scratch_operands = 0 : i64, tpu.core_type = #tpu.core_type<tc>, window_params = [{transform_indices = @transform_0, window_bounds = array<i64: 1, 6, 6, 64>}, {pipeline_mode = #tpu.pipeline_mode<synchronous>, transform_indices = @transform_1, window_bounds = array<i64: 16, 64, 128>}, {pipeline_mode = #tpu.pipeline_mode<synchronous>, transform_indices = @transform_2, window_bounds = array<i64: 1, 128>}, {transform_indices = @transform_3, window_bounds = array<i64: 1, 3, 3, 128>}]} {
    %c0 = arith.constant 0 : index
    %c0_0 = arith.constant 0 : index
    %0 = vector.load %arg3[%c0, %c0_0] : memref<1x128xf32, #tpu.memory_space<vmem>>, vector<1x128xf32>
    %c0_i32 = arith.constant 0 : i32
    %c3_i32 = arith.constant 3 : i32
    %1 = arith.addi %c0_i32, %c3_i32 : i32
    %c1_i32 = arith.constant 1 : i32
    scf.for %arg5 = %c0_i32 to %1 step %c1_i32  : i32 {
      %cst_19 = arith.constant 0.000000e+00 : f32
      %36 = vector.broadcast %cst_19 : f32 to vector<3x128xf32>
      %c0_i32_20 = arith.constant 0 : i32
      %37 = arith.addi %arg5, %c0_i32_20 : i32
      %c0_21 = arith.constant 0 : index
      %38 = arith.index_cast %37 : i32 to index
      %c0_22 = arith.constant 0 : index
      %c0_23 = arith.constant 0 : index
      %39 = vector.load %arg1[%c0_21, %38, %c0_22, %c0_23] : memref<1x6x6x64xbf16, #tpu.memory_space<vmem>>, vector<1x1x6x64xbf16>
      %40 = vector.shape_cast %39 : vector<1x1x6x64xbf16> to vector<6x64xbf16>
      %41 = vector.extract_strided_slice %40 {offsets = [0, 0], sizes = [3, 64], strides = [1, 1]} : vector<6x64xbf16> to vector<3x64xbf16>
      %c0_24 = arith.constant 0 : index
      %c0_25 = arith.constant 0 : index
      %c0_26 = arith.constant 0 : index
      %42 = vector.load %arg2[%c0_24, %c0_25, %c0_26] : memref<16x64x128xbf16, #tpu.memory_space<vmem>>, vector<1x64x128xbf16>
      %43 = vector.shape_cast %42 : vector<1x64x128xbf16> to vector<64x128xbf16>
      %cst_27 = arith.constant dense<0.000000e+00> : vector<3x128xf32>
      %44 = tpu.matmul %41, %43, %cst_27 {dimension_numbers = #tpu.dot_dimension_numbers<[1], [0], [0], [1], [0, 0, 1, 1], [], []>} : vector<3x64xbf16>, vector<64x128xbf16>, vector<3x128xf32> -> vector<3x128xf32>
      %45 = arith.addf %36, %44 : vector<3x128xf32>
      %46 = vector.extract_strided_slice %40 {offsets = [1, 0], sizes = [3, 64], strides = [1, 1]} : vector<6x64xbf16> to vector<3x64xbf16>
      %c1 = arith.constant 1 : index
      %c0_28 = arith.constant 0 : index
      %c0_29 = arith.constant 0 : index
      %47 = vector.load %arg2[%c1, %c0_28, %c0_29] : memref<16x64x128xbf16, #tpu.memory_space<vmem>>, vector<1x64x128xbf16>
      %48 = vector.shape_cast %47 : vector<1x64x128xbf16> to vector<64x128xbf16>
      %cst_30 = arith.constant dense<0.000000e+00> : vector<3x128xf32>
      %49 = tpu.matmul %46, %48, %cst_30 {dimension_numbers = #tpu.dot_dimension_numbers<[1], [0], [0], [1], [0, 0, 1, 1], [], []>} : vector<3x64xbf16>, vector<64x128xbf16>, vector<3x128xf32> -> vector<3x128xf32>
      %50 = arith.addf %45, %49 : vector<3x128xf32>
      %51 = vector.extract_strided_slice %40 {offsets = [2, 0], sizes = [3, 64], strides = [1, 1]} : vector<6x64xbf16> to vector<3x64xbf16>
      %c2 = arith.constant 2 : index
      %c0_31 = arith.constant 0 : index
      %c0_32 = arith.constant 0 : index
      %52 = vector.load %arg2[%c2, %c0_31, %c0_32] : memref<16x64x128xbf16, #tpu.memory_space<vmem>>, vector<1x64x128xbf16>
      %53 = vector.shape_cast %52 : vector<1x64x128xbf16> to vector<64x128xbf16>
      %cst_33 = arith.constant dense<0.000000e+00> : vector<3x128xf32>
      %54 = tpu.matmul %51, %53, %cst_33 {dimension_numbers = #tpu.dot_dimension_numbers<[1], [0], [0], [1], [0, 0, 1, 1], [], []>} : vector<3x64xbf16>, vector<64x128xbf16>, vector<3x128xf32> -> vector<3x128xf32>
      %55 = arith.addf %50, %54 : vector<3x128xf32>
      %56 = vector.extract_strided_slice %40 {offsets = [3, 0], sizes = [3, 64], strides = [1, 1]} : vector<6x64xbf16> to vector<3x64xbf16>
      %c3 = arith.constant 3 : index
      %c0_34 = arith.constant 0 : index
      %c0_35 = arith.constant 0 : index
      %57 = vector.load %arg2[%c3, %c0_34, %c0_35] : memref<16x64x128xbf16, #tpu.memory_space<vmem>>, vector<1x64x128xbf16>
      %58 = vector.shape_cast %57 : vector<1x64x128xbf16> to vector<64x128xbf16>
      %cst_36 = arith.constant dense<0.000000e+00> : vector<3x128xf32>
      %59 = tpu.matmul %56, %58, %cst_36 {dimension_numbers = #tpu.dot_dimension_numbers<[1], [0], [0], [1], [0, 0, 1, 1], [], []>} : vector<3x64xbf16>, vector<64x128xbf16>, vector<3x128xf32> -> vector<3x128xf32>
      %60 = arith.addf %55, %59 : vector<3x128xf32>
      %c1_i32_37 = arith.constant 1 : i32
      %61 = arith.addi %arg5, %c1_i32_37 : i32
      %c0_38 = arith.constant 0 : index
      %62 = arith.index_cast %61 : i32 to index
      %c0_39 = arith.constant 0 : index
      %c0_40 = arith.constant 0 : index
      %63 = vector.load %arg1[%c0_38, %62, %c0_39, %c0_40] : memref<1x6x6x64xbf16, #tpu.memory_space<vmem>>, vector<1x1x6x64xbf16>
      %64 = vector.shape_cast %63 : vector<1x1x6x64xbf16> to vector<6x64xbf16>
      %65 = vector.extract_strided_slice %64 {offsets = [0, 0], sizes = [3, 64], strides = [1, 1]} : vector<6x64xbf16> to vector<3x64xbf16>
      %c4 = arith.constant 4 : index
      %c0_41 = arith.constant 0 : index
      %c0_42 = arith.constant 0 : index
      %66 = vector.load %arg2[%c4, %c0_41, %c0_42] : memref<16x64x128xbf16, #tpu.memory_space<vmem>>, vector<1x64x128xbf16>
      %67 = vector.shape_cast %66 : vector<1x64x128xbf16> to vector<64x128xbf16>
      %cst_43 = arith.constant dense<0.000000e+00> : vector<3x128xf32>
      %68 = tpu.matmul %65, %67, %cst_43 {dimension_numbers = #tpu.dot_dimension_numbers<[1], [0], [0], [1], [0, 0, 1, 1], [], []>} : vector<3x64xbf16>, vector<64x128xbf16>, vector<3x128xf32> -> vector<3x128xf32>
      %69 = arith.addf %60, %68 : vector<3x128xf32>
      %70 = vector.extract_strided_slice %64 {offsets = [1, 0], sizes = [3, 64], strides = [1, 1]} : vector<6x64xbf16> to vector<3x64xbf16>
      %c5 = arith.constant 5 : index
      %c0_44 = arith.constant 0 : index
      %c0_45 = arith.constant 0 : index
      %71 = vector.load %arg2[%c5, %c0_44, %c0_45] : memref<16x64x128xbf16, #tpu.memory_space<vmem>>, vector<1x64x128xbf16>
      %72 = vector.shape_cast %71 : vector<1x64x128xbf16> to vector<64x128xbf16>
      %cst_46 = arith.constant dense<0.000000e+00> : vector<3x128xf32>
      %73 = tpu.matmul %70, %72, %cst_46 {dimension_numbers = #tpu.dot_dimension_numbers<[1], [0], [0], [1], [0, 0, 1, 1], [], []>} : vector<3x64xbf16>, vector<64x128xbf16>, vector<3x128xf32> -> vector<3x128xf32>
      %74 = arith.addf %69, %73 : vector<3x128xf32>
      %75 = vector.extract_strided_slice %64 {offsets = [2, 0], sizes = [3, 64], strides = [1, 1]} : vector<6x64xbf16> to vector<3x64xbf16>
      %c6 = arith.constant 6 : index
      %c0_47 = arith.constant 0 : index
      %c0_48 = arith.constant 0 : index
      %76 = vector.load %arg2[%c6, %c0_47, %c0_48] : memref<16x64x128xbf16, #tpu.memory_space<vmem>>, vector<1x64x128xbf16>
      %77 = vector.shape_cast %76 : vector<1x64x128xbf16> to vector<64x128xbf16>
      %cst_49 = arith.constant dense<0.000000e+00> : vector<3x128xf32>
      %78 = tpu.matmul %75, %77, %cst_49 {dimension_numbers = #tpu.dot_dimension_numbers<[1], [0], [0], [1], [0, 0, 1, 1], [], []>} : vector<3x64xbf16>, vector<64x128xbf16>, vector<3x128xf32> -> vector<3x128xf32>
      %79 = arith.addf %74, %78 : vector<3x128xf32>
      %80 = vector.extract_strided_slice %64 {offsets = [3, 0], sizes = [3, 64], strides = [1, 1]} : vector<6x64xbf16> to vector<3x64xbf16>
      %c7 = arith.constant 7 : index
      %c0_50 = arith.constant 0 : index
      %c0_51 = arith.constant 0 : index
      %81 = vector.load %arg2[%c7, %c0_50, %c0_51] : memref<16x64x128xbf16, #tpu.memory_space<vmem>>, vector<1x64x128xbf16>
      %82 = vector.shape_cast %81 : vector<1x64x128xbf16> to vector<64x128xbf16>
      %cst_52 = arith.constant dense<0.000000e+00> : vector<3x128xf32>
      %83 = tpu.matmul %80, %82, %cst_52 {dimension_numbers = #tpu.dot_dimension_numbers<[1], [0], [0], [1], [0, 0, 1, 1], [], []>} : vector<3x64xbf16>, vector<64x128xbf16>, vector<3x128xf32> -> vector<3x128xf32>
      %84 = arith.addf %79, %83 : vector<3x128xf32>
      %c2_i32 = arith.constant 2 : i32
      %85 = arith.addi %arg5, %c2_i32 : i32
      %c0_53 = arith.constant 0 : index
      %86 = arith.index_cast %85 : i32 to index
      %c0_54 = arith.constant 0 : index
      %c0_55 = arith.constant 0 : index
      %87 = vector.load %arg1[%c0_53, %86, %c0_54, %c0_55] : memref<1x6x6x64xbf16, #tpu.memory_space<vmem>>, vector<1x1x6x64xbf16>
      %88 = vector.shape_cast %87 : vector<1x1x6x64xbf16> to vector<6x64xbf16>
      %89 = vector.extract_strided_slice %88 {offsets = [0, 0], sizes = [3, 64], strides = [1, 1]} : vector<6x64xbf16> to vector<3x64xbf16>
      %c8 = arith.constant 8 : index
      %c0_56 = arith.constant 0 : index
      %c0_57 = arith.constant 0 : index
      %90 = vector.load %arg2[%c8, %c0_56, %c0_57] : memref<16x64x128xbf16, #tpu.memory_space<vmem>>, vector<1x64x128xbf16>
      %91 = vector.shape_cast %90 : vector<1x64x128xbf16> to vector<64x128xbf16>
      %cst_58 = arith.constant dense<0.000000e+00> : vector<3x128xf32>
      %92 = tpu.matmul %89, %91, %cst_58 {dimension_numbers = #tpu.dot_dimension_numbers<[1], [0], [0], [1], [0, 0, 1, 1], [], []>} : vector<3x64xbf16>, vector<64x128xbf16>, vector<3x128xf32> -> vector<3x128xf32>
      %93 = arith.addf %84, %92 : vector<3x128xf32>
      %94 = vector.extract_strided_slice %88 {offsets = [1, 0], sizes = [3, 64], strides = [1, 1]} : vector<6x64xbf16> to vector<3x64xbf16>
      %c9 = arith.constant 9 : index
      %c0_59 = arith.constant 0 : index
      %c0_60 = arith.constant 0 : index
      %95 = vector.load %arg2[%c9, %c0_59, %c0_60] : memref<16x64x128xbf16, #tpu.memory_space<vmem>>, vector<1x64x128xbf16>
      %96 = vector.shape_cast %95 : vector<1x64x128xbf16> to vector<64x128xbf16>
      %cst_61 = arith.constant dense<0.000000e+00> : vector<3x128xf32>
      %97 = tpu.matmul %94, %96, %cst_61 {dimension_numbers = #tpu.dot_dimension_numbers<[1], [0], [0], [1], [0, 0, 1, 1], [], []>} : vector<3x64xbf16>, vector<64x128xbf16>, vector<3x128xf32> -> vector<3x128xf32>
      %98 = arith.addf %93, %97 : vector<3x128xf32>
      %99 = vector.extract_strided_slice %88 {offsets = [2, 0], sizes = [3, 64], strides = [1, 1]} : vector<6x64xbf16> to vector<3x64xbf16>
      %c10 = arith.constant 10 : index
      %c0_62 = arith.constant 0 : index
      %c0_63 = arith.constant 0 : index
      %100 = vector.load %arg2[%c10, %c0_62, %c0_63] : memref<16x64x128xbf16, #tpu.memory_space<vmem>>, vector<1x64x128xbf16>
      %101 = vector.shape_cast %100 : vector<1x64x128xbf16> to vector<64x128xbf16>
      %cst_64 = arith.constant dense<0.000000e+00> : vector<3x128xf32>
      %102 = tpu.matmul %99, %101, %cst_64 {dimension_numbers = #tpu.dot_dimension_numbers<[1], [0], [0], [1], [0, 0, 1, 1], [], []>} : vector<3x64xbf16>, vector<64x128xbf16>, vector<3x128xf32> -> vector<3x128xf32>
      %103 = arith.addf %98, %102 : vector<3x128xf32>
      %104 = vector.extract_strided_slice %88 {offsets = [3, 0], sizes = [3, 64], strides = [1, 1]} : vector<6x64xbf16> to vector<3x64xbf16>
      %c11 = arith.constant 11 : index
      %c0_65 = arith.constant 0 : index
      %c0_66 = arith.constant 0 : index
      %105 = vector.load %arg2[%c11, %c0_65, %c0_66] : memref<16x64x128xbf16, #tpu.memory_space<vmem>>, vector<1x64x128xbf16>
      %106 = vector.shape_cast %105 : vector<1x64x128xbf16> to vector<64x128xbf16>
      %cst_67 = arith.constant dense<0.000000e+00> : vector<3x128xf32>
      %107 = tpu.matmul %104, %106, %cst_67 {dimension_numbers = #tpu.dot_dimension_numbers<[1], [0], [0], [1], [0, 0, 1, 1], [], []>} : vector<3x64xbf16>, vector<64x128xbf16>, vector<3x128xf32> -> vector<3x128xf32>
      %108 = arith.addf %103, %107 : vector<3x128xf32>
      %c3_i32_68 = arith.constant 3 : i32
      %109 = arith.addi %arg5, %c3_i32_68 : i32
      %c0_69 = arith.constant 0 : index
      %110 = arith.index_cast %109 : i32 to index
      %c0_70 = arith.constant 0 : index
      %c0_71 = arith.constant 0 : index
      %111 = vector.load %arg1[%c0_69, %110, %c0_70, %c0_71] : memref<1x6x6x64xbf16, #tpu.memory_space<vmem>>, vector<1x1x6x64xbf16>
      %112 = vector.shape_cast %111 : vector<1x1x6x64xbf16> to vector<6x64xbf16>
      %113 = vector.extract_strided_slice %112 {offsets = [0, 0], sizes = [3, 64], strides = [1, 1]} : vector<6x64xbf16> to vector<3x64xbf16>
      %c12 = arith.constant 12 : index
      %c0_72 = arith.constant 0 : index
      %c0_73 = arith.constant 0 : index
      %114 = vector.load %arg2[%c12, %c0_72, %c0_73] : memref<16x64x128xbf16, #tpu.memory_space<vmem>>, vector<1x64x128xbf16>
      %115 = vector.shape_cast %114 : vector<1x64x128xbf16> to vector<64x128xbf16>
      %cst_74 = arith.constant dense<0.000000e+00> : vector<3x128xf32>
      %116 = tpu.matmul %113, %115, %cst_74 {dimension_numbers = #tpu.dot_dimension_numbers<[1], [0], [0], [1], [0, 0, 1, 1], [], []>} : vector<3x64xbf16>, vector<64x128xbf16>, vector<3x128xf32> -> vector<3x128xf32>
      %117 = arith.addf %108, %116 : vector<3x128xf32>
      %118 = vector.extract_strided_slice %112 {offsets = [1, 0], sizes = [3, 64], strides = [1, 1]} : vector<6x64xbf16> to vector<3x64xbf16>
      %c13 = arith.constant 13 : index
      %c0_75 = arith.constant 0 : index
      %c0_76 = arith.constant 0 : index
      %119 = vector.load %arg2[%c13, %c0_75, %c0_76] : memref<16x64x128xbf16, #tpu.memory_space<vmem>>, vector<1x64x128xbf16>
      %120 = vector.shape_cast %119 : vector<1x64x128xbf16> to vector<64x128xbf16>
      %cst_77 = arith.constant dense<0.000000e+00> : vector<3x128xf32>
      %121 = tpu.matmul %118, %120, %cst_77 {dimension_numbers = #tpu.dot_dimension_numbers<[1], [0], [0], [1], [0, 0, 1, 1], [], []>} : vector<3x64xbf16>, vector<64x128xbf16>, vector<3x128xf32> -> vector<3x128xf32>
      %122 = arith.addf %117, %121 : vector<3x128xf32>
      %123 = vector.extract_strided_slice %112 {offsets = [2, 0], sizes = [3, 64], strides = [1, 1]} : vector<6x64xbf16> to vector<3x64xbf16>
      %c14 = arith.constant 14 : index
      %c0_78 = arith.constant 0 : index
      %c0_79 = arith.constant 0 : index
      %124 = vector.load %arg2[%c14, %c0_78, %c0_79] : memref<16x64x128xbf16, #tpu.memory_space<vmem>>, vector<1x64x128xbf16>
      %125 = vector.shape_cast %124 : vector<1x64x128xbf16> to vector<64x128xbf16>
      %cst_80 = arith.constant dense<0.000000e+00> : vector<3x128xf32>
      %126 = tpu.matmul %123, %125, %cst_80 {dimension_numbers = #tpu.dot_dimension_numbers<[1], [0], [0], [1], [0, 0, 1, 1], [], []>} : vector<3x64xbf16>, vector<64x128xbf16>, vector<3x128xf32> -> vector<3x128xf32>
      %127 = arith.addf %122, %126 : vector<3x128xf32>
      %128 = vector.extract_strided_slice %112 {offsets = [3, 0], sizes = [3, 64], strides = [1, 1]} : vector<6x64xbf16> to vector<3x64xbf16>
      %c15 = arith.constant 15 : index
      %c0_81 = arith.constant 0 : index
      %c0_82 = arith.constant 0 : index
      %129 = vector.load %arg2[%c15, %c0_81, %c0_82] : memref<16x64x128xbf16, #tpu.memory_space<vmem>>, vector<1x64x128xbf16>
      %130 = vector.shape_cast %129 : vector<1x64x128xbf16> to vector<64x128xbf16>
      %cst_83 = arith.constant dense<0.000000e+00> : vector<3x128xf32>
      %131 = tpu.matmul %128, %130, %cst_83 {dimension_numbers = #tpu.dot_dimension_numbers<[1], [0], [0], [1], [0, 0, 1, 1], [], []>} : vector<3x64xbf16>, vector<64x128xbf16>, vector<3x128xf32> -> vector<3x128xf32>
      %132 = arith.addf %127, %131 : vector<3x128xf32>
      %133 = vector.broadcast %0 : vector<1x128xf32> to vector<3x128xf32>
      %134 = arith.addf %132, %133 : vector<3x128xf32>
      %c0_84 = arith.constant 0 : index
      %135 = arith.index_cast %arg5 : i32 to index
      %c0_85 = arith.constant 0 : index
      %c0_86 = arith.constant 0 : index
      %136 = vector.load %arg4[%c0_84, %135, %c0_85, %c0_86] : memref<1x3x3x128xf32, #tpu.memory_space<vmem>>, vector<1x1x3x128xf32>
      %137 = vector.shape_cast %136 : vector<1x1x3x128xf32> to vector<3x128xf32>
      %138 = vector.shape_cast %134 : vector<3x128xf32> to vector<1x1x3x128xf32>
      tpu.vector_store %arg4[%c0_84, %135, %c0_85, %c0_86], %138 {strides = array<i32>} : memref<1x3x3x128xf32, #tpu.memory_space<vmem>>, vector<1x1x3x128xf32>,
    }
    %c3_i32_1 = arith.constant 3 : i32
    %c0_2 = arith.constant 0 : index
    %c0_3 = arith.constant 0 : index
    %c0_4 = arith.constant 0 : index
    %c0_5 = arith.constant 0 : index
    %2 = vector.load %arg4[%c0_2, %c0_3, %c0_4, %c0_5] : memref<1x3x3x128xf32, #tpu.memory_space<vmem>>, vector<1x3x3x128xf32>
    %3 = vector.shape_cast %2 : vector<1x3x3x128xf32> to vector<3x3x128xf32>
    %cst = arith.constant dense<0.000000e+00> : vector<3x128xf32>
    %4 = vector.multi_reduction <add>, %3, %cst [1] : vector<3x3x128xf32> to vector<3x128xf32>
    %5 = vector.shape_cast %4 : vector<3x128xf32> to vector<3x1x128xf32>
    %cst_6 = arith.constant dense<0.000000e+00> : vector<1x128xf32>
    %6 = vector.multi_reduction <add>, %5, %cst_6 [0] : vector<3x1x128xf32> to vector<1x128xf32>
    %7 = vector.shape_cast %6 : vector<1x128xf32> to vector<1x1x128xf32>
    %cst_7 = arith.constant 0.111111112 : f32
    %8 = vector.broadcast %cst_7 : f32 to vector<1x1x128xf32>
    %9 = arith.mulf %7, %8 : vector<1x1x128xf32>
    %10 = arith.mulf %3, %3 : vector<3x3x128xf32>
    %cst_8 = arith.constant dense<0.000000e+00> : vector<3x128xf32>
    %11 = vector.multi_reduction <add>, %10, %cst_8 [1] : vector<3x3x128xf32> to vector<3x128xf32>
    %12 = vector.shape_cast %11 : vector<3x128xf32> to vector<3x1x128xf32>
    %cst_9 = arith.constant dense<0.000000e+00> : vector<1x128xf32>
    %13 = vector.multi_reduction <add>, %12, %cst_9 [0] : vector<3x1x128xf32> to vector<1x128xf32>
    %14 = vector.shape_cast %13 : vector<1x128xf32> to vector<1x1x128xf32>
    %cst_10 = arith.constant 0.111111112 : f32
    %15 = vector.broadcast %cst_10 : f32 to vector<1x1x128xf32>
    %16 = arith.mulf %14, %15 : vector<1x1x128xf32>
    %17 = arith.mulf %9, %9 : vector<1x1x128xf32>
    %18 = arith.subf %16, %17 : vector<1x1x128xf32>
    %cst_11 = arith.constant 0.000000e+00 : f32
    %19 = vector.broadcast %cst_11 : f32 to vector<1x1x128xf32>
    %20 = arith.maximumf %18, %19 : vector<1x1x128xf32>
    %21 = vector.broadcast %9 : vector<1x1x128xf32> to vector<3x3x128xf32>
    %22 = arith.subf %3, %21 : vector<3x3x128xf32>
    %cst_12 = arith.constant 9.99999974E-6 : f32
    %23 = vector.broadcast %cst_12 : f32 to vector<1x1x128xf32>
    %24 = arith.addf %20, %23 : vector<1x1x128xf32>
    %25 = math.rsqrt %24 : vector<1x1x128xf32>
    %26 = vector.broadcast %25 : vector<1x1x128xf32> to vector<3x3x128xf32>
    %27 = arith.mulf %22, %26 : vector<3x3x128xf32>
    %cst_13 = arith.constant 0.000000e+00 : f32
    %28 = vector.broadcast %cst_13 : f32 to vector<3x3x128xf32>
    %29 = arith.cmpf oge, %27, %28 : vector<3x3x128xf32>
    %cst_14 = arith.constant 2.000000e-01 : f32
    %30 = vector.broadcast %cst_14 : f32 to vector<3x3x128xf32>
    %31 = arith.mulf %30, %27 : vector<3x3x128xf32>
    %32 = arith.select %29, %27, %31 : vector<3x3x128xi1>, vector<3x3x128xf32>
    %c0_15 = arith.constant 0 : index
    %c0_16 = arith.constant 0 : index
    %c0_17 = arith.constant 0 : index
    %c0_18 = arith.constant 0 : index
    %33 = vector.load %arg4[%c0_15, %c0_16, %c0_17, %c0_18] : memref<1x3x3x128xf32, #tpu.memory_space<vmem>>, vector<1x3x3x128xf32>
    %34 = vector.shape_cast %33 : vector<1x3x3x128xf32> to vector<3x3x128xf32>
    %35 = vector.shape_cast %32 : vector<3x3x128xf32> to vector<1x3x3x128xf32>
    tpu.vector_store %arg4[%c0_15, %c0_16, %c0_17, %c0_18], %35 {strides = array<i32>} : memref<1x3x3x128xf32, #tpu.memory_space<vmem>>, vector<1x3x3x128xf32>,
    return
  }
  func.func @transform_0(%arg0: i32) -> (i32, i32, i32, i32) {
    %c0_i32 = arith.constant 0 : i32
    %c0_i32_0 = arith.constant 0 : i32
    %c0_i32_1 = arith.constant 0 : i32
    %c0_i32_2 = arith.constant 0 : i32
    return %arg0, %c0_i32, %c0_i32_0, %c0_i32_1 : i32, i32, i32, i32
  }
  func.func @transform_1(%arg0: i32) -> (i32, i32, i32) {
    %c0_i32 = arith.constant 0 : i32
    %c0_i32_0 = arith.constant 0 : i32
    %c0_i32_1 = arith.constant 0 : i32
    %c0_i32_2 = arith.constant 0 : i32
    return %c0_i32, %c0_i32_0, %c0_i32_1 : i32, i32, i32
  }
  func.func @transform_2(%arg0: i32) -> (i32, i32) {
    %c0_i32 = arith.constant 0 : i32
    %c0_i32_0 = arith.constant 0 : i32
    %c0_i32_1 = arith.constant 0 : i32
    return %c0_i32, %c0_i32_0 : i32, i32
  }
  func.func @transform_3(%arg0: i32) -> (i32, i32, i32, i32) {
    %c0_i32 = arith.constant 0 : i32
    %c0_i32_0 = arith.constant 0 : i32
    %c0_i32_1 = arith.constant 0 : i32
    %c0_i32_2 = arith.constant 0 : i32
    return %arg0, %c0_i32, %c0_i32_0, %c0_i32_1 : i32, i32, i32, i32
  }
}

module attributes {stable_mosaic.version = 11 : i64} {
  func.func @_conv_s1_kernel(%arg0: i32, %arg1: memref<1x5x5x128xbf16, #tpu.memory_space<vmem>>, %arg2: memref<16x128x1xbf16, #tpu.memory_space<vmem>>, %arg3: memref<1x1xf32, #tpu.memory_space<vmem>>, %arg4: memref<1x2x2x1xf32, #tpu.memory_space<vmem>>) attributes {dimension_semantics = [#tpu.dimension_semantics<parallel>], iteration_bounds = array<i64: 2>, scalar_prefetch = 0 : i64, scratch_operands = 0 : i64, tpu.core_type = #tpu.core_type<tc>, window_params = [{transform_indices = @transform_0, window_bounds = array<i64: 1, 5, 5, 128>}, {pipeline_mode = #tpu.pipeline_mode<synchronous>, transform_indices = @transform_1, window_bounds = array<i64: 16, 128, 1>}, {pipeline_mode = #tpu.pipeline_mode<synchronous>, transform_indices = @transform_2, window_bounds = array<i64: 1, 1>}, {transform_indices = @transform_3, window_bounds = array<i64: 1, 2, 2, 1>}]} {
    %c0 = arith.constant 0 : index
    %c0_0 = arith.constant 0 : index
    %0 = vector.load %arg3[%c0, %c0_0] : memref<1x1xf32, #tpu.memory_space<vmem>>, vector<1x1xf32>
    %c0_i32 = arith.constant 0 : i32
    %c2_i32 = arith.constant 2 : i32
    %1 = arith.addi %c0_i32, %c2_i32 : i32
    %c1_i32 = arith.constant 1 : i32
    scf.for %arg5 = %c0_i32 to %1 step %c1_i32  : i32 {
      %cst = arith.constant 0.000000e+00 : f32
      %2 = vector.broadcast %cst : f32 to vector<2x1xf32>
      %c0_i32_2 = arith.constant 0 : i32
      %3 = arith.addi %arg5, %c0_i32_2 : i32
      %c0_3 = arith.constant 0 : index
      %4 = arith.index_cast %3 : i32 to index
      %c0_4 = arith.constant 0 : index
      %c0_5 = arith.constant 0 : index
      %5 = vector.load %arg1[%c0_3, %4, %c0_4, %c0_5] : memref<1x5x5x128xbf16, #tpu.memory_space<vmem>>, vector<1x1x5x128xbf16>
      %6 = vector.shape_cast %5 : vector<1x1x5x128xbf16> to vector<5x128xbf16>
      %7 = vector.extract_strided_slice %6 {offsets = [0, 0], sizes = [2, 128], strides = [1, 1]} : vector<5x128xbf16> to vector<2x128xbf16>
      %c0_6 = arith.constant 0 : index
      %c0_7 = arith.constant 0 : index
      %c0_8 = arith.constant 0 : index
      %8 = vector.load %arg2[%c0_6, %c0_7, %c0_8] : memref<16x128x1xbf16, #tpu.memory_space<vmem>>, vector<1x128x1xbf16>
      %9 = vector.shape_cast %8 : vector<1x128x1xbf16> to vector<128x1xbf16>
      %cst_9 = arith.constant dense<0.000000e+00> : vector<2x1xf32>
      %10 = tpu.matmul %7, %9, %cst_9 {dimension_numbers = #tpu.dot_dimension_numbers<[1], [0], [0], [1], [0, 0, 1, 1], [], []>} : vector<2x128xbf16>, vector<128x1xbf16>, vector<2x1xf32> -> vector<2x1xf32>
      %11 = arith.addf %2, %10 : vector<2x1xf32>
      %12 = vector.extract_strided_slice %6 {offsets = [1, 0], sizes = [2, 128], strides = [1, 1]} : vector<5x128xbf16> to vector<2x128xbf16>
      %c1 = arith.constant 1 : index
      %c0_10 = arith.constant 0 : index
      %c0_11 = arith.constant 0 : index
      %13 = vector.load %arg2[%c1, %c0_10, %c0_11] : memref<16x128x1xbf16, #tpu.memory_space<vmem>>, vector<1x128x1xbf16>
      %14 = vector.shape_cast %13 : vector<1x128x1xbf16> to vector<128x1xbf16>
      %cst_12 = arith.constant dense<0.000000e+00> : vector<2x1xf32>
      %15 = tpu.matmul %12, %14, %cst_12 {dimension_numbers = #tpu.dot_dimension_numbers<[1], [0], [0], [1], [0, 0, 1, 1], [], []>} : vector<2x128xbf16>, vector<128x1xbf16>, vector<2x1xf32> -> vector<2x1xf32>
      %16 = arith.addf %11, %15 : vector<2x1xf32>
      %17 = vector.extract_strided_slice %6 {offsets = [2, 0], sizes = [2, 128], strides = [1, 1]} : vector<5x128xbf16> to vector<2x128xbf16>
      %c2 = arith.constant 2 : index
      %c0_13 = arith.constant 0 : index
      %c0_14 = arith.constant 0 : index
      %18 = vector.load %arg2[%c2, %c0_13, %c0_14] : memref<16x128x1xbf16, #tpu.memory_space<vmem>>, vector<1x128x1xbf16>
      %19 = vector.shape_cast %18 : vector<1x128x1xbf16> to vector<128x1xbf16>
      %cst_15 = arith.constant dense<0.000000e+00> : vector<2x1xf32>
      %20 = tpu.matmul %17, %19, %cst_15 {dimension_numbers = #tpu.dot_dimension_numbers<[1], [0], [0], [1], [0, 0, 1, 1], [], []>} : vector<2x128xbf16>, vector<128x1xbf16>, vector<2x1xf32> -> vector<2x1xf32>
      %21 = arith.addf %16, %20 : vector<2x1xf32>
      %22 = vector.extract_strided_slice %6 {offsets = [3, 0], sizes = [2, 128], strides = [1, 1]} : vector<5x128xbf16> to vector<2x128xbf16>
      %c3 = arith.constant 3 : index
      %c0_16 = arith.constant 0 : index
      %c0_17 = arith.constant 0 : index
      %23 = vector.load %arg2[%c3, %c0_16, %c0_17] : memref<16x128x1xbf16, #tpu.memory_space<vmem>>, vector<1x128x1xbf16>
      %24 = vector.shape_cast %23 : vector<1x128x1xbf16> to vector<128x1xbf16>
      %cst_18 = arith.constant dense<0.000000e+00> : vector<2x1xf32>
      %25 = tpu.matmul %22, %24, %cst_18 {dimension_numbers = #tpu.dot_dimension_numbers<[1], [0], [0], [1], [0, 0, 1, 1], [], []>} : vector<2x128xbf16>, vector<128x1xbf16>, vector<2x1xf32> -> vector<2x1xf32>
      %26 = arith.addf %21, %25 : vector<2x1xf32>
      %c1_i32_19 = arith.constant 1 : i32
      %27 = arith.addi %arg5, %c1_i32_19 : i32
      %c0_20 = arith.constant 0 : index
      %28 = arith.index_cast %27 : i32 to index
      %c0_21 = arith.constant 0 : index
      %c0_22 = arith.constant 0 : index
      %29 = vector.load %arg1[%c0_20, %28, %c0_21, %c0_22] : memref<1x5x5x128xbf16, #tpu.memory_space<vmem>>, vector<1x1x5x128xbf16>
      %30 = vector.shape_cast %29 : vector<1x1x5x128xbf16> to vector<5x128xbf16>
      %31 = vector.extract_strided_slice %30 {offsets = [0, 0], sizes = [2, 128], strides = [1, 1]} : vector<5x128xbf16> to vector<2x128xbf16>
      %c4 = arith.constant 4 : index
      %c0_23 = arith.constant 0 : index
      %c0_24 = arith.constant 0 : index
      %32 = vector.load %arg2[%c4, %c0_23, %c0_24] : memref<16x128x1xbf16, #tpu.memory_space<vmem>>, vector<1x128x1xbf16>
      %33 = vector.shape_cast %32 : vector<1x128x1xbf16> to vector<128x1xbf16>
      %cst_25 = arith.constant dense<0.000000e+00> : vector<2x1xf32>
      %34 = tpu.matmul %31, %33, %cst_25 {dimension_numbers = #tpu.dot_dimension_numbers<[1], [0], [0], [1], [0, 0, 1, 1], [], []>} : vector<2x128xbf16>, vector<128x1xbf16>, vector<2x1xf32> -> vector<2x1xf32>
      %35 = arith.addf %26, %34 : vector<2x1xf32>
      %36 = vector.extract_strided_slice %30 {offsets = [1, 0], sizes = [2, 128], strides = [1, 1]} : vector<5x128xbf16> to vector<2x128xbf16>
      %c5 = arith.constant 5 : index
      %c0_26 = arith.constant 0 : index
      %c0_27 = arith.constant 0 : index
      %37 = vector.load %arg2[%c5, %c0_26, %c0_27] : memref<16x128x1xbf16, #tpu.memory_space<vmem>>, vector<1x128x1xbf16>
      %38 = vector.shape_cast %37 : vector<1x128x1xbf16> to vector<128x1xbf16>
      %cst_28 = arith.constant dense<0.000000e+00> : vector<2x1xf32>
      %39 = tpu.matmul %36, %38, %cst_28 {dimension_numbers = #tpu.dot_dimension_numbers<[1], [0], [0], [1], [0, 0, 1, 1], [], []>} : vector<2x128xbf16>, vector<128x1xbf16>, vector<2x1xf32> -> vector<2x1xf32>
      %40 = arith.addf %35, %39 : vector<2x1xf32>
      %41 = vector.extract_strided_slice %30 {offsets = [2, 0], sizes = [2, 128], strides = [1, 1]} : vector<5x128xbf16> to vector<2x128xbf16>
      %c6 = arith.constant 6 : index
      %c0_29 = arith.constant 0 : index
      %c0_30 = arith.constant 0 : index
      %42 = vector.load %arg2[%c6, %c0_29, %c0_30] : memref<16x128x1xbf16, #tpu.memory_space<vmem>>, vector<1x128x1xbf16>
      %43 = vector.shape_cast %42 : vector<1x128x1xbf16> to vector<128x1xbf16>
      %cst_31 = arith.constant dense<0.000000e+00> : vector<2x1xf32>
      %44 = tpu.matmul %41, %43, %cst_31 {dimension_numbers = #tpu.dot_dimension_numbers<[1], [0], [0], [1], [0, 0, 1, 1], [], []>} : vector<2x128xbf16>, vector<128x1xbf16>, vector<2x1xf32> -> vector<2x1xf32>
      %45 = arith.addf %40, %44 : vector<2x1xf32>
      %46 = vector.extract_strided_slice %30 {offsets = [3, 0], sizes = [2, 128], strides = [1, 1]} : vector<5x128xbf16> to vector<2x128xbf16>
      %c7 = arith.constant 7 : index
      %c0_32 = arith.constant 0 : index
      %c0_33 = arith.constant 0 : index
      %47 = vector.load %arg2[%c7, %c0_32, %c0_33] : memref<16x128x1xbf16, #tpu.memory_space<vmem>>, vector<1x128x1xbf16>
      %48 = vector.shape_cast %47 : vector<1x128x1xbf16> to vector<128x1xbf16>
      %cst_34 = arith.constant dense<0.000000e+00> : vector<2x1xf32>
      %49 = tpu.matmul %46, %48, %cst_34 {dimension_numbers = #tpu.dot_dimension_numbers<[1], [0], [0], [1], [0, 0, 1, 1], [], []>} : vector<2x128xbf16>, vector<128x1xbf16>, vector<2x1xf32> -> vector<2x1xf32>
      %50 = arith.addf %45, %49 : vector<2x1xf32>
      %c2_i32_35 = arith.constant 2 : i32
      %51 = arith.addi %arg5, %c2_i32_35 : i32
      %c0_36 = arith.constant 0 : index
      %52 = arith.index_cast %51 : i32 to index
      %c0_37 = arith.constant 0 : index
      %c0_38 = arith.constant 0 : index
      %53 = vector.load %arg1[%c0_36, %52, %c0_37, %c0_38] : memref<1x5x5x128xbf16, #tpu.memory_space<vmem>>, vector<1x1x5x128xbf16>
      %54 = vector.shape_cast %53 : vector<1x1x5x128xbf16> to vector<5x128xbf16>
      %55 = vector.extract_strided_slice %54 {offsets = [0, 0], sizes = [2, 128], strides = [1, 1]} : vector<5x128xbf16> to vector<2x128xbf16>
      %c8 = arith.constant 8 : index
      %c0_39 = arith.constant 0 : index
      %c0_40 = arith.constant 0 : index
      %56 = vector.load %arg2[%c8, %c0_39, %c0_40] : memref<16x128x1xbf16, #tpu.memory_space<vmem>>, vector<1x128x1xbf16>
      %57 = vector.shape_cast %56 : vector<1x128x1xbf16> to vector<128x1xbf16>
      %cst_41 = arith.constant dense<0.000000e+00> : vector<2x1xf32>
      %58 = tpu.matmul %55, %57, %cst_41 {dimension_numbers = #tpu.dot_dimension_numbers<[1], [0], [0], [1], [0, 0, 1, 1], [], []>} : vector<2x128xbf16>, vector<128x1xbf16>, vector<2x1xf32> -> vector<2x1xf32>
      %59 = arith.addf %50, %58 : vector<2x1xf32>
      %60 = vector.extract_strided_slice %54 {offsets = [1, 0], sizes = [2, 128], strides = [1, 1]} : vector<5x128xbf16> to vector<2x128xbf16>
      %c9 = arith.constant 9 : index
      %c0_42 = arith.constant 0 : index
      %c0_43 = arith.constant 0 : index
      %61 = vector.load %arg2[%c9, %c0_42, %c0_43] : memref<16x128x1xbf16, #tpu.memory_space<vmem>>, vector<1x128x1xbf16>
      %62 = vector.shape_cast %61 : vector<1x128x1xbf16> to vector<128x1xbf16>
      %cst_44 = arith.constant dense<0.000000e+00> : vector<2x1xf32>
      %63 = tpu.matmul %60, %62, %cst_44 {dimension_numbers = #tpu.dot_dimension_numbers<[1], [0], [0], [1], [0, 0, 1, 1], [], []>} : vector<2x128xbf16>, vector<128x1xbf16>, vector<2x1xf32> -> vector<2x1xf32>
      %64 = arith.addf %59, %63 : vector<2x1xf32>
      %65 = vector.extract_strided_slice %54 {offsets = [2, 0], sizes = [2, 128], strides = [1, 1]} : vector<5x128xbf16> to vector<2x128xbf16>
      %c10 = arith.constant 10 : index
      %c0_45 = arith.constant 0 : index
      %c0_46 = arith.constant 0 : index
      %66 = vector.load %arg2[%c10, %c0_45, %c0_46] : memref<16x128x1xbf16, #tpu.memory_space<vmem>>, vector<1x128x1xbf16>
      %67 = vector.shape_cast %66 : vector<1x128x1xbf16> to vector<128x1xbf16>
      %cst_47 = arith.constant dense<0.000000e+00> : vector<2x1xf32>
      %68 = tpu.matmul %65, %67, %cst_47 {dimension_numbers = #tpu.dot_dimension_numbers<[1], [0], [0], [1], [0, 0, 1, 1], [], []>} : vector<2x128xbf16>, vector<128x1xbf16>, vector<2x1xf32> -> vector<2x1xf32>
      %69 = arith.addf %64, %68 : vector<2x1xf32>
      %70 = vector.extract_strided_slice %54 {offsets = [3, 0], sizes = [2, 128], strides = [1, 1]} : vector<5x128xbf16> to vector<2x128xbf16>
      %c11 = arith.constant 11 : index
      %c0_48 = arith.constant 0 : index
      %c0_49 = arith.constant 0 : index
      %71 = vector.load %arg2[%c11, %c0_48, %c0_49] : memref<16x128x1xbf16, #tpu.memory_space<vmem>>, vector<1x128x1xbf16>
      %72 = vector.shape_cast %71 : vector<1x128x1xbf16> to vector<128x1xbf16>
      %cst_50 = arith.constant dense<0.000000e+00> : vector<2x1xf32>
      %73 = tpu.matmul %70, %72, %cst_50 {dimension_numbers = #tpu.dot_dimension_numbers<[1], [0], [0], [1], [0, 0, 1, 1], [], []>} : vector<2x128xbf16>, vector<128x1xbf16>, vector<2x1xf32> -> vector<2x1xf32>
      %74 = arith.addf %69, %73 : vector<2x1xf32>
      %c3_i32 = arith.constant 3 : i32
      %75 = arith.addi %arg5, %c3_i32 : i32
      %c0_51 = arith.constant 0 : index
      %76 = arith.index_cast %75 : i32 to index
      %c0_52 = arith.constant 0 : index
      %c0_53 = arith.constant 0 : index
      %77 = vector.load %arg1[%c0_51, %76, %c0_52, %c0_53] : memref<1x5x5x128xbf16, #tpu.memory_space<vmem>>, vector<1x1x5x128xbf16>
      %78 = vector.shape_cast %77 : vector<1x1x5x128xbf16> to vector<5x128xbf16>
      %79 = vector.extract_strided_slice %78 {offsets = [0, 0], sizes = [2, 128], strides = [1, 1]} : vector<5x128xbf16> to vector<2x128xbf16>
      %c12 = arith.constant 12 : index
      %c0_54 = arith.constant 0 : index
      %c0_55 = arith.constant 0 : index
      %80 = vector.load %arg2[%c12, %c0_54, %c0_55] : memref<16x128x1xbf16, #tpu.memory_space<vmem>>, vector<1x128x1xbf16>
      %81 = vector.shape_cast %80 : vector<1x128x1xbf16> to vector<128x1xbf16>
      %cst_56 = arith.constant dense<0.000000e+00> : vector<2x1xf32>
      %82 = tpu.matmul %79, %81, %cst_56 {dimension_numbers = #tpu.dot_dimension_numbers<[1], [0], [0], [1], [0, 0, 1, 1], [], []>} : vector<2x128xbf16>, vector<128x1xbf16>, vector<2x1xf32> -> vector<2x1xf32>
      %83 = arith.addf %74, %82 : vector<2x1xf32>
      %84 = vector.extract_strided_slice %78 {offsets = [1, 0], sizes = [2, 128], strides = [1, 1]} : vector<5x128xbf16> to vector<2x128xbf16>
      %c13 = arith.constant 13 : index
      %c0_57 = arith.constant 0 : index
      %c0_58 = arith.constant 0 : index
      %85 = vector.load %arg2[%c13, %c0_57, %c0_58] : memref<16x128x1xbf16, #tpu.memory_space<vmem>>, vector<1x128x1xbf16>
      %86 = vector.shape_cast %85 : vector<1x128x1xbf16> to vector<128x1xbf16>
      %cst_59 = arith.constant dense<0.000000e+00> : vector<2x1xf32>
      %87 = tpu.matmul %84, %86, %cst_59 {dimension_numbers = #tpu.dot_dimension_numbers<[1], [0], [0], [1], [0, 0, 1, 1], [], []>} : vector<2x128xbf16>, vector<128x1xbf16>, vector<2x1xf32> -> vector<2x1xf32>
      %88 = arith.addf %83, %87 : vector<2x1xf32>
      %89 = vector.extract_strided_slice %78 {offsets = [2, 0], sizes = [2, 128], strides = [1, 1]} : vector<5x128xbf16> to vector<2x128xbf16>
      %c14 = arith.constant 14 : index
      %c0_60 = arith.constant 0 : index
      %c0_61 = arith.constant 0 : index
      %90 = vector.load %arg2[%c14, %c0_60, %c0_61] : memref<16x128x1xbf16, #tpu.memory_space<vmem>>, vector<1x128x1xbf16>
      %91 = vector.shape_cast %90 : vector<1x128x1xbf16> to vector<128x1xbf16>
      %cst_62 = arith.constant dense<0.000000e+00> : vector<2x1xf32>
      %92 = tpu.matmul %89, %91, %cst_62 {dimension_numbers = #tpu.dot_dimension_numbers<[1], [0], [0], [1], [0, 0, 1, 1], [], []>} : vector<2x128xbf16>, vector<128x1xbf16>, vector<2x1xf32> -> vector<2x1xf32>
      %93 = arith.addf %88, %92 : vector<2x1xf32>
      %94 = vector.extract_strided_slice %78 {offsets = [3, 0], sizes = [2, 128], strides = [1, 1]} : vector<5x128xbf16> to vector<2x128xbf16>
      %c15 = arith.constant 15 : index
      %c0_63 = arith.constant 0 : index
      %c0_64 = arith.constant 0 : index
      %95 = vector.load %arg2[%c15, %c0_63, %c0_64] : memref<16x128x1xbf16, #tpu.memory_space<vmem>>, vector<1x128x1xbf16>
      %96 = vector.shape_cast %95 : vector<1x128x1xbf16> to vector<128x1xbf16>
      %cst_65 = arith.constant dense<0.000000e+00> : vector<2x1xf32>
      %97 = tpu.matmul %94, %96, %cst_65 {dimension_numbers = #tpu.dot_dimension_numbers<[1], [0], [0], [1], [0, 0, 1, 1], [], []>} : vector<2x128xbf16>, vector<128x1xbf16>, vector<2x1xf32> -> vector<2x1xf32>
      %98 = arith.addf %93, %97 : vector<2x1xf32>
      %99 = vector.broadcast %0 : vector<1x1xf32> to vector<2x1xf32>
      %100 = arith.addf %98, %99 : vector<2x1xf32>
      %c0_66 = arith.constant 0 : index
      %101 = arith.index_cast %arg5 : i32 to index
      %c0_67 = arith.constant 0 : index
      %c0_68 = arith.constant 0 : index
      %102 = vector.load %arg4[%c0_66, %101, %c0_67, %c0_68] : memref<1x2x2x1xf32, #tpu.memory_space<vmem>>, vector<1x1x2x1xf32>
      %103 = vector.shape_cast %102 : vector<1x1x2x1xf32> to vector<2x1xf32>
      %104 = vector.shape_cast %100 : vector<2x1xf32> to vector<1x1x2x1xf32>
      tpu.vector_store %arg4[%c0_66, %101, %c0_67, %c0_68], %104 {strides = array<i32>} : memref<1x2x2x1xf32, #tpu.memory_space<vmem>>, vector<1x1x2x1xf32>,
    }
    %c2_i32_1 = arith.constant 2 : i32
    return
  }
  func.func @transform_0(%arg0: i32) -> (i32, i32, i32, i32) {
    %c0_i32 = arith.constant 0 : i32
    %c0_i32_0 = arith.constant 0 : i32
    %c0_i32_1 = arith.constant 0 : i32
    %c0_i32_2 = arith.constant 0 : i32
    return %arg0, %c0_i32, %c0_i32_0, %c0_i32_1 : i32, i32, i32, i32
  }
  func.func @transform_1(%arg0: i32) -> (i32, i32, i32) {
    %c0_i32 = arith.constant 0 : i32
    %c0_i32_0 = arith.constant 0 : i32
    %c0_i32_1 = arith.constant 0 : i32
    %c0_i32_2 = arith.constant 0 : i32
    return %c0_i32, %c0_i32_0, %c0_i32_1 : i32, i32, i32
  }
  func.func @transform_2(%arg0: i32) -> (i32, i32) {
    %c0_i32 = arith.constant 0 : i32
    %c0_i32_0 = arith.constant 0 : i32
    %c0_i32_1 = arith.constant 0 : i32
    return %c0_i32, %c0_i32_0 : i32, i32
  }
  func.func @transform_3(%arg0: i32) -> (i32, i32, i32, i32) {
    %c0_i32 = arith.constant 0 : i32
    %c0_i32_0 = arith.constant 0 : i32
    %c0_i32_1 = arith.constant 0 : i32
    %c0_i32_2 = arith.constant 0 : i32
    return %arg0, %c0_i32, %c0_i32_0, %c0_i32_1 : i32, i32, i32, i32
  }
}

</mosaic_0001>

<bundles_post_ra>
// kernel: _lambda_.11
= control target key start
LH: loop header
LB: loop body
LE: loop exit
PB: predicated region body
PF: predicated region fallthrough
CT: control target
= control target key end

     0   :  { %s1890_s12 = smov 0   ;;  %s1892_s13 = smov 0   ;;  %s2736_s0 = inlined_call_operand.vmem [shape: bf16[2048,48], index: 0, kind: input, shape index: {}]   ;;  %s2737_s1 = inlined_call_operand.vmem [shape: bf16[48,16], index: 1, kind: input, shape index: {}]   ;;  %s2738_s2 = inlined_call_operand.vmem [shape: f32[1,16], index: 2, kind: input, shape index: {}]   ;;  %s2739_s3 = inlined_call_operand.vmem [shape: f32[2048,16], index: 3, kind: output, shape index: {}]  }
   0x1   :  { %s1894_s14 = smov 0  }
   0x2 LB: > { %s25_s15 = sadd.s32 1, %s1863_s13  ;;  %p1598_p0 = scmp.ge.s32.totalorder %s1867_s14, 1  ;;  %s1867_s14 = sphi %s1894_s14, %s13_s14   ;;  %s1863_s13 = sphi %s1892_s13, %s2741_s13   ;;  %s1859_s12 = sphi %s1890_s12, %s2740_s12  }
   0x3   : > { %p27_p1 = scmp.ge.s32.totalorder %s25_s15, 4  ;;  %p166_p2 = scmp.lt.s32.totalorder %s1867_s14, 5 }
   0x5   : > { %s2743_s15 = smov (%p27_p1, %s25_s15), 0  ;;  %p167_p3 = pnand %p1598_p0, %p166_p2 }
   0x6   : > { %s1599_s18 = sshll.u32 (!%p167_p3), %s1859_s12, 6 }
   0x7   : > { %170 = sbr.rel (%p167_p3) target bundleno = 318 (0x13e), region = 32  ;;  %p199_p4 = scmp.lt.s32.totalorder (!%p167_p3), %s1599_s18, 255 }
   0xc   : > { %v1809_v0 = vld [vmem:[%s2737_s1 + $0x10] sm:$0xff]   ;;  %v1810_v1 = vld [vmem:[%s2737_s1 + $0x8] sm:$0xff]   ;;  %s2745_s18 = smov (!%p199_p4, %s1599_s18), 255  ;;  %v1917_v2 = vld [vmem:[%s2737_s1] sm:$0xff]   ;;  %vm224_vm0 = vcmask 130048   ;;  %vm601_vm1 = vcmask 392192  }
   0xd   : > { %1708 = vmatprep.subr.bf16.mxu0 %v1809_v0  ;;  %1778 = vmatprep.subr.bf16.mxu1 %v1809_v0  ;;  %s1600_s23 = sshll.u32 %s2745_s18, 2  ;;  %s1602_s24 = sshll.u32 %s2745_s18, 3  ;;  %v1869_v4 = vmov 0.0   ;;  %v2217_v62 = vld [vmem:[%s2738_s2] ss:$0 sm:$0xff] }
   0xe   : > { %1709 = vmatpush3.bf16.msra.mxu0 %v1809_v0  ;;  %1781 = vmatpush3.bf16.msra.mxu1 %v1809_v0  ;;  %s1922_s27 = scalar_lea.vmem %s2736_s0, %s1600_s23  ;;  %s1927_s30 = scalar_lea.vmem %s2739_s3, %s1602_s24 }
   0xf   : > { %1710 = vmatprep.subr.bf16.mxu0 %v1810_v1  ;;  %1779 = vmatprep.subr.bf16.mxu1 %v1810_v1  ;;  %v1930_v3 = vld [vmem:[%s1922_s27] sm:$0xff]   ;;  %227 = vst.msk [vmem:[%s1927_s30 + $0x10] sm:$0xff] %vm224_vm0, %v1869_v4  ;;  %225 = vst.msk [vmem:[%s1927_s30] sm:$0xff] %vm224_vm0, %v1869_v4  ;;  %v1814_v6 = vld [vmem:[%s1922_s27 + $0x8] sm:$0xff]  }
  0x10   : > { %226 = vst.msk [vmem:[%s1927_s30 + $0x8] sm:$0xff] %vm224_vm0, %v1869_v4  ;;  %228 = vst.msk [vmem:[%s1927_s30 + $0x18] sm:$0xff] %vm224_vm0, %v1869_v4  ;;  %v1813_v5 = vld [vmem:[%s1922_s27 + $0x80] sm:$0xff]   ;;  %1714 = vmatprep.mubr.msk.bf16.mxu0 %vm601_vm1, %v1930_v3  ;;  %v1815_v7 = vld [vmem:[%s1922_s27 + $0x88] sm:$0xff]  }
  0x11   : > { %229 = vst.msk [vmem:[%s1927_s30 + $0x20] sm:$0xff] %vm224_vm0, %v1869_v4  ;;  %230 = vst.msk [vmem:[%s1927_s30 + $0x28] sm:$0xff] %vm224_vm0, %v1869_v4  ;;  %1746 = vmatprep.mubr.msk.bf16.mxu1 %vm601_vm1, %v1813_v5  ;;  %v1816_v8 = vld [vmem:[%s1922_s27 + $0x10] sm:$0xff]   ;;  %v1818_v10 = vld [vmem:[%s1922_s27 + $0x18] sm:$0xff]  }
  0x12   : > { %1711 = vmatpush3.bf16.msra.mxu0 %v1810_v1  ;;  %1782 = vmatpush3.bf16.msra.mxu1 %v1810_v1  ;;  %231 = vst.msk [vmem:[%s1927_s30 + $0x30] sm:$0xff] %vm224_vm0, %v1869_v4  ;;  %232 = vst.msk [vmem:[%s1927_s30 + $0x38] sm:$0xff] %vm224_vm0, %v1869_v4  ;;  %v1817_v9 = vld [vmem:[%s1922_s27 + $0x90] sm:$0xff]   ;;  %v1819_v11 = vld [vmem:[%s1922_s27 + $0x98] sm:$0xff]  }
  0x13   : > { %233 = vst.msk [vmem:[%s1927_s30 + $0x40] sm:$0xff] %vm224_vm0, %v1869_v4  ;;  %234 = vst.msk [vmem:[%s1927_s30 + $0x48] sm:$0xff] %vm224_vm0, %v1869_v4  ;;  %1712 = vmatprep.subr.bf16.mxu0 %v1917_v2  ;;  %1780 = vmatprep.subr.bf16.mxu1 %v1917_v2  ;;  %v1820_v12 = vld [vmem:[%s1922_s27 + $0x20] sm:$0xff]   ;;  %v1822_v14 = vld [vmem:[%s1922_s27 + $0x28] sm:$0xff]  }
  0x14   : > { %235 = vst.msk [vmem:[%s1927_s30 + $0x50] sm:$0xff] %vm224_vm0, %v1869_v4  ;;  %236 = vst.msk [vmem:[%s1927_s30 + $0x58] sm:$0xff] %vm224_vm0, %v1869_v4  ;;  %v1821_v13 = vld [vmem:[%s1922_s27 + $0xa0] sm:$0xff]   ;;  %v1823_v15 = vld [vmem:[%s1922_s27 + $0xa8] sm:$0xff]  }
  0x15   : > { %237 = vst.msk [vmem:[%s1927_s30 + $0x60] sm:$0xff] %vm224_vm0, %v1869_v4  ;;  %238 = vst.msk [vmem:[%s1927_s30 + $0x68] sm:$0xff] %vm224_vm0, %v1869_v4  ;;  %v1824_v16 = vld [vmem:[%s1922_s27 + $0x30] sm:$0xff]   ;;  %v1826_v18 = vld [vmem:[%s1922_s27 + $0x38] sm:$0xff]  }
  0x16   : > { %239 = vst.msk [vmem:[%s1927_s30 + $0x70] sm:$0xff] %vm224_vm0, %v1869_v4  ;;  %240 = vst.msk [vmem:[%s1927_s30 + $0x78] sm:$0xff] %vm224_vm0, %v1869_v4  ;;  %1713 = vmatpush3.bf16.msra.mxu0 %v1917_v2  ;;  %1783 = vmatpush3.bf16.msra.mxu1 %v1917_v2  ;;  %v1825_v17 = vld [vmem:[%s1922_s27 + $0xb0] sm:$0xff]   ;;  %v1827_v19 = vld [vmem:[%s1922_s27 + $0xb8] sm:$0xff]  }
  0x17   : > { %241 = vst.msk [vmem:[%s1927_s30 + $0x80] sm:$0xff] %vm224_vm0, %v1869_v4  ;;  %242 = vst.msk [vmem:[%s1927_s30 + $0x88] sm:$0xff] %vm224_vm0, %v1869_v4  ;;  %v1828_v20 = vld [vmem:[%s1922_s27 + $0x40] sm:$0xff]   ;;  %v1830_v22 = vld [vmem:[%s1922_s27 + $0x48] sm:$0xff]  }
  0x18   : > { %243 = vst.msk [vmem:[%s1927_s30 + $0x90] sm:$0xff] %vm224_vm0, %v1869_v4  ;;  %244 = vst.msk [vmem:[%s1927_s30 + $0x98] sm:$0xff] %vm224_vm0, %v1869_v4  ;;  %v1829_v21 = vld [vmem:[%s1922_s27 + $0xc0] sm:$0xff]   ;;  %v1831_v23 = vld [vmem:[%s1922_s27 + $0xc8] sm:$0xff]  }
  0x19   : > { %245 = vst.msk [vmem:[%s1927_s30 + $0xa0] sm:$0xff] %vm224_vm0, %v1869_v4  ;;  %246 = vst.msk [vmem:[%s1927_s30 + $0xa8] sm:$0xff] %vm224_vm0, %v1869_v4  ;;  %1715 = vmatmul.mubr.msk.bf16.vlgmr.msra.gmra.mxu0 %vm601_vm1, %v1814_v6  ;;  %1747 = vmatmul.mubr.msk.bf16.vlgmr.msra.gmra.mxu1 %vm601_vm1, %v1815_v7  ;;  %v1832_v24 = vld [vmem:[%s1922_s27 + $0x50] sm:$0xff]   ;;  %v1834_v26 = vld [vmem:[%s1922_s27 + $0x58] sm:$0xff]  }
  0x1a   : > { %247 = vst.msk [vmem:[%s1927_s30 + $0xb0] sm:$0xff] %vm224_vm0, %v1869_v4  ;;  %248 = vst.msk [vmem:[%s1927_s30 + $0xb8] sm:$0xff] %vm224_vm0, %v1869_v4  ;;  %1718 = vmatprep.mubr.msk.bf16.mxu0 %vm601_vm1, %v1816_v8  ;;  %1750 = vmatprep.mubr.msk.bf16.mxu1 %vm601_vm1, %v1817_v9  ;;  %v1833_v25 = vld [vmem:[%s1922_s27 + $0xd0] sm:$0xff]   ;;  %v1835_v27 = vld [vmem:[%s1922_s27 + $0xd8] sm:$0xff]  }
  0x1b   : > { %249 = vst.msk [vmem:[%s1927_s30 + $0xc0] sm:$0xff] %vm224_vm0, %v1869_v4  ;;  %250 = vst.msk [vmem:[%s1927_s30 + $0xc8] sm:$0xff] %vm224_vm0, %v1869_v4  ;;  %v1836_v28 = vld [vmem:[%s1922_s27 + $0x60] sm:$0xff]   ;;  %v1838_v30 = vld [vmem:[%s1922_s27 + $0x68] sm:$0xff]  }
  0x1c   : > { %251 = vst.msk [vmem:[%s1927_s30 + $0xd0] sm:$0xff] %vm224_vm0, %v1869_v4  ;;  %252 = vst.msk [vmem:[%s1927_s30 + $0xd8] sm:$0xff] %vm224_vm0, %v1869_v4  ;;  %v1837_v29 = vld [vmem:[%s1922_s27 + $0xe0] sm:$0xff]   ;;  %v1839_v31 = vld [vmem:[%s1922_s27 + $0xe8] sm:$0xff]  }
  0x1d   : > { %253 = vst.msk [vmem:[%s1927_s30 + $0xe0] sm:$0xff] %vm224_vm0, %v1869_v4  ;;  %254 = vst.msk [vmem:[%s1927_s30 + $0xe8] sm:$0xff] %vm224_vm0, %v1869_v4  ;;  %v1840_v32 = vld [vmem:[%s1922_s27 + $0x70] sm:$0xff]   ;;  %v1842_v34 = vld [vmem:[%s1922_s27 + $0x78] sm:$0xff]  }
  0x1e   : > { %255 = vst.msk [vmem:[%s1927_s30 + $0xf0] sm:$0xff] %vm224_vm0, %v1869_v4  ;;  %256 = vst.msk [vmem:[%s1927_s30 + $0xf8] sm:$0xff] %vm224_vm0, %v1869_v4  ;;  %v1841_v33 = vld [vmem:[%s1922_s27 + $0xf0] sm:$0xff]   ;;  %v1843_v35 = vld [vmem:[%s1922_s27 + $0xf8] sm:$0xff]  }
  0x1f   : > { %257 = vst.msk [vmem:[%s1927_s30 + $0x100] sm:$0xff] %vm224_vm0, %v1869_v4  ;;  %258 = vst.msk [vmem:[%s1927_s30 + $0x108] sm:$0xff] %vm224_vm0, %v1869_v4  ;;  %v291_v36 = vld [vmem:[%s1927_s30 + $0x10] sm:$0xff]  ;;  %v289_v40 = vld [vmem:[%s1927_s30] sm:$0xff] }
  0x20   : > { %259 = vst.msk [vmem:[%s1927_s30 + $0x110] sm:$0xff] %vm224_vm0, %v1869_v4  ;;  %260 = vst.msk [vmem:[%s1927_s30 + $0x118] sm:$0xff] %vm224_vm0, %v1869_v4  ;;  %v292_v46 = vld [vmem:[%s1927_s30 + $0x18] sm:$0xff]  ;;  %v290_v52 = vld [vmem:[%s1927_s30 + $0x8] sm:$0xff] }
  0x21   : > { %261 = vst.msk [vmem:[%s1927_s30 + $0x120] sm:$0xff] %vm224_vm0, %v1869_v4  ;;  %262 = vst.msk [vmem:[%s1927_s30 + $0x128] sm:$0xff] %vm224_vm0, %v1869_v4  ;;  %1719 = vmatmul.mubr.msk.bf16.gmra.mxu0 %vm601_vm1, %v1818_v10  ;;  %1751 = vmatmul.mubr.msk.bf16.gmra.mxu1 %vm601_vm1, %v1819_v11  ;;  %v295_v58 = vld [vmem:[%s1927_s30 + $0x30] sm:$0xff]  ;;  %v293_v1 = vld [vmem:[%s1927_s30 + $0x20] sm:$0xff] }
  0x22   : > { %263 = vst.msk [vmem:[%s1927_s30 + $0x130] sm:$0xff] %vm224_vm0, %v1869_v4  ;;  %264 = vst.msk [vmem:[%s1927_s30 + $0x138] sm:$0xff] %vm224_vm0, %v1869_v4  ;;  %1722 = vmatprep.mubr.msk.bf16.mxu0 %vm601_vm1, %v1820_v12  ;;  %1754 = vmatprep.mubr.msk.bf16.mxu1 %vm601_vm1, %v1821_v13  ;;  %v296_v13 = vld [vmem:[%s1927_s30 + $0x38] sm:$0xff] }
  0x23   : > { %265 = vst.msk [vmem:[%s1927_s30 + $0x140] sm:$0xff] %vm224_vm0, %v1869_v4  ;;  %266 = vst.msk [vmem:[%s1927_s30 + $0x148] sm:$0xff] %vm224_vm0, %v1869_v4 }
  0x24   : > { %267 = vst.msk [vmem:[%s1927_s30 + $0x150] sm:$0xff] %vm224_vm0, %v1869_v4  ;;  %268 = vst.msk [vmem:[%s1927_s30 + $0x158] sm:$0xff] %vm224_vm0, %v1869_v4 }
  0x25   : > { %269 = vst.msk [vmem:[%s1927_s30 + $0x160] sm:$0xff] %vm224_vm0, %v1869_v4  ;;  %270 = vst.msk [vmem:[%s1927_s30 + $0x168] sm:$0xff] %vm224_vm0, %v1869_v4 }
  0x26   : > { %271 = vst.msk [vmem:[%s1927_s30 + $0x170] sm:$0xff] %vm224_vm0, %v1869_v4  ;;  %272 = vst.msk [vmem:[%s1927_s30 + $0x178] sm:$0xff] %vm224_vm0, %v1869_v4  ;;  %v321_v41 = vld [vmem:[%s1927_s30 + $0x100] sm:$0xff]  ;;  %v322_v53 = vld [vmem:[%s1927_s30 + $0x108] sm:$0xff] }
  0x27   : > { %273 = vst.msk [vmem:[%s1927_s30 + $0x180] sm:$0xff] %vm224_vm0, %v1869_v4  ;;  %274 = vst.msk [vmem:[%s1927_s30 + $0x188] sm:$0xff] %vm224_vm0, %v1869_v4  ;;  %v323_v37 = vld [vmem:[%s1927_s30 + $0x110] sm:$0xff]  ;;  %v324_v47 = vld [vmem:[%s1927_s30 + $0x118] sm:$0xff] }
  0x28   : > { %275 = vst.msk [vmem:[%s1927_s30 + $0x190] sm:$0xff] %vm224_vm0, %v1869_v4  ;;  %276 = vst.msk [vmem:[%s1927_s30 + $0x198] sm:$0xff] %vm224_vm0, %v1869_v4  ;;  %v325_v2 = vld [vmem:[%s1927_s30 + $0x120] sm:$0xff] }
  0x29   : > { %277 = vst.msk [vmem:[%s1927_s30 + $0x1a0] sm:$0xff] %vm224_vm0, %v1869_v4  ;;  %278 = vst.msk [vmem:[%s1927_s30 + $0x1a8] sm:$0xff] %vm224_vm0, %v1869_v4  ;;  %1723 = vmatmul.mubr.msk.bf16.gmra.mxu0 %vm601_vm1, %v1822_v14  ;;  %1755 = vmatmul.mubr.msk.bf16.gmra.mxu1 %vm601_vm1, %v1823_v15  ;;  %v327_v59 = vld [vmem:[%s1927_s30 + $0x130] sm:$0xff]  ;;  %v328_v14 = vld [vmem:[%s1927_s30 + $0x138] sm:$0xff] }
  0x2a   : > { %279 = vst.msk [vmem:[%s1927_s30 + $0x1b0] sm:$0xff] %vm224_vm0, %v1869_v4  ;;  %280 = vst.msk [vmem:[%s1927_s30 + $0x1b8] sm:$0xff] %vm224_vm0, %v1869_v4  ;;  %1726 = vmatprep.mubr.msk.bf16.mxu0 %vm601_vm1, %v1824_v16  ;;  %1758 = vmatprep.mubr.msk.bf16.mxu1 %vm601_vm1, %v1825_v17 }
  0x2b   : > { %281 = vst.msk [vmem:[%s1927_s30 + $0x1c0] sm:$0xff] %vm224_vm0, %v1869_v4  ;;  %282 = vst.msk [vmem:[%s1927_s30 + $0x1c8] sm:$0xff] %vm224_vm0, %v1869_v4 }
  0x2c   : > { %283 = vst.msk [vmem:[%s1927_s30 + $0x1d0] sm:$0xff] %vm224_vm0, %v1869_v4  ;;  %284 = vst.msk [vmem:[%s1927_s30 + $0x1d8] sm:$0xff] %vm224_vm0, %v1869_v4 }
  0x2d   : > { %285 = vst.msk [vmem:[%s1927_s30 + $0x1e0] sm:$0xff] %vm224_vm0, %v1869_v4  ;;  %286 = vst.msk [vmem:[%s1927_s30 + $0x1e8] sm:$0xff] %vm224_vm0, %v1869_v4 }
  0x2e   : > { %287 = vst.msk [vmem:[%s1927_s30 + $0x1f0] sm:$0xff] %vm224_vm0, %v1869_v4  ;;  %288 = vst.msk [vmem:[%s1927_s30 + $0x1f8] sm:$0xff] %vm224_vm0, %v1869_v4 }
  0x31   : > { %1727 = vmatmul.mubr.msk.bf16.gmra.mxu0 %vm601_vm1, %v1826_v18  ;;  %1759 = vmatmul.mubr.msk.bf16.gmra.mxu1 %vm601_vm1, %v1827_v19 }
  0x32   : > { %1730 = vmatprep.mubr.msk.bf16.mxu0 %vm601_vm1, %v1828_v20  ;;  %1762 = vmatprep.mubr.msk.bf16.mxu1 %vm601_vm1, %v1829_v21 }
  0x39   : > { %1731 = vmatmul.mubr.msk.bf16.gmra.mxu0 %vm601_vm1, %v1830_v22  ;;  %1763 = vmatmul.mubr.msk.bf16.gmra.mxu1 %vm601_vm1, %v1831_v23 }
  0x3a   : > { %1734 = vmatprep.mubr.msk.bf16.mxu0 %vm601_vm1, %v1832_v24  ;;  %1766 = vmatprep.mubr.msk.bf16.mxu1 %vm601_vm1, %v1833_v25 }
  0x41   : > { %1735 = vmatmul.mubr.msk.bf16.gmra.mxu0 %vm601_vm1, %v1834_v26  ;;  %1767 = vmatmul.mubr.msk.bf16.gmra.mxu1 %vm601_vm1, %v1835_v27  ;;  %v294_v27 = vld [vmem:[%s1927_s30 + $0x28] sm:$0xff] }
  0x42   : > { %1738 = vmatprep.mubr.msk.bf16.mxu0 %vm601_vm1, %v1836_v28  ;;  %1770 = vmatprep.mubr.msk.bf16.mxu1 %vm601_vm1, %v1837_v29 }
  0x49   : > { %1739 = vmatmul.mubr.msk.bf16.gmra.mxu0 %vm601_vm1, %v1838_v30  ;;  %1771 = vmatmul.mubr.msk.bf16.gmra.mxu1 %vm601_vm1, %v1839_v31 }
  0x4a   : > { %1742 = vmatprep.mubr.msk.bf16.mxu0 %vm601_vm1, %v1840_v32  ;;  %1774 = vmatprep.mubr.msk.bf16.mxu1 %vm601_vm1, %v1841_v33 }
  0x51   : > { %1743 = vmatmul.mubr.msk.bf16.gmra.mxu0 %vm601_vm1, %v1842_v34  ;;  %1775 = vmatmul.mubr.msk.bf16.gmra.mxu1 %vm601_vm1, %v1843_v35  ;;  %v326_v34 = vld [vmem:[%s1927_s30 + $0x128] sm:$0xff]  ;;  %v299_v35 = vld [vmem:[%s1927_s30 + $0x50] sm:$0xff] }
  0xd9   : > { %v1716_v38 = vpop.f32.mrf.mxu0  ;;  %v1748_v39 = vpop.f32.mrf.mxu1 }
  0xda   : > { %v989_v42 = vadd.f32 %v1716_v38, %v291_v36  ;;  %v1021_v43 = vadd.f32 %v1748_v39, %v323_v37  ;;  %v331_v36 = vld [vmem:[%s1927_s30 + $0x150] sm:$0xff] }
  0xdb   : > { %v732_v44 = vpop.f32.mrf.mxu0  ;;  %v860_v45 = vpop.f32.mrf.mxu1 }
  0xdc   : > { %1054 = vst.msk [vmem:[%s1927_s30 + $0x10] sm:$0xff] %vm224_vm0, %v989_v42  ;;  %1086 = vst.msk [vmem:[%s1927_s30 + $0x110] sm:$0xff] %vm224_vm0, %v1021_v43  ;;  %v987_v48 = vadd.f32 %v732_v44, %v289_v40  ;;  %v1019_v49 = vadd.f32 %v860_v45, %v321_v41 }
  0xdd   : > { %v1717_v50 = vpop.f32.mrf.mxu0  ;;  %v1749_v51 = vpop.f32.mrf.mxu1 }
  0xde   : > { %1052 = vst.msk [vmem:[%s1927_s30] sm:$0xff] %vm224_vm0, %v987_v48  ;;  %1084 = vst.msk [vmem:[%s1927_s30 + $0x100] sm:$0xff] %vm224_vm0, %v1019_v49  ;;  %v990_v54 = vadd.f32 %v1717_v50, %v292_v46  ;;  %v1022_v55 = vadd.f32 %v1749_v51, %v324_v47 }
  0xdf   : > { %v735_v56 = vpop.f32.mrf.mxu0  ;;  %v863_v57 = vpop.f32.mrf.mxu1 }
  0xe0   : > { %1055 = vst.msk [vmem:[%s1927_s30 + $0x18] sm:$0xff] %vm224_vm0, %v990_v54  ;;  %1087 = vst.msk [vmem:[%s1927_s30 + $0x118] sm:$0xff] %vm224_vm0, %v1022_v55  ;;  %v988_v60 = vadd.f32 %v735_v56, %v290_v52  ;;  %v1020_v61 = vadd.f32 %v863_v57, %v322_v53 }
  0xe1   : > { %v1720_v63 = vpop.f32.mrf.mxu0  ;;  %v1752_v0 = vpop.f32.mrf.mxu1 }
  0xe2   : > { %1053 = vst.msk [vmem:[%s1927_s30 + $0x8] sm:$0xff] %vm224_vm0, %v988_v60  ;;  %1085 = vst.msk [vmem:[%s1927_s30 + $0x108] sm:$0xff] %vm224_vm0, %v1020_v61  ;;  %v993_v3 = vadd.f32 %v1720_v63, %v295_v58  ;;  %v1025_v4 = vadd.f32 %v1752_v0, %v327_v59 }
  0xe3   : > { %v1121_v5 = vld [vmem:[%s1927_s30 + $0x10] sm:$0xff]  ;;  %v748_v7 = vpop.f32.mrf.mxu0  ;;  %v876_v8 = vpop.f32.mrf.mxu1 }
  0xe4   : > { %v1153_v6 = vld [vmem:[%s1927_s30 + $0x110] sm:$0xff]  ;;  %v1192_v9 = vadd.f32 %v2217_v62, %v1121_v5  ;;  %1058 = vst.msk [vmem:[%s1927_s30 + $0x30] sm:$0xff] %vm224_vm0, %v993_v3  ;;  %1090 = vst.msk [vmem:[%s1927_s30 + $0x130] sm:$0xff] %vm224_vm0, %v1025_v4  ;;  %v991_v11 = vadd.f32 %v748_v7, %v293_v1  ;;  %v1023_v12 = vadd.f32 %v876_v8, %v325_v2 }
  0xe5   : > { %v1224_v10 = vadd.f32 %v2217_v62, %v1153_v6  ;;  %v1119_v15 = vld [vmem:[%s1927_s30] sm:$0xff]  ;;  %v1721_v17 = vpop.f32.mrf.mxu0  ;;  %v1753_v18 = vpop.f32.mrf.mxu1 }
  0xe6   : > { %v1151_v16 = vld [vmem:[%s1927_s30 + $0x100] sm:$0xff]  ;;  %vm1256_vm2 = vcmp.ge.f32.partialorder %v1192_v9, 0.0  ;;  %v1320_v19 = vmul.f32 0.2, %v1192_v9  ;;  %1056 = vst.msk [vmem:[%s1927_s30 + $0x20] sm:$0xff] %vm224_vm0, %v991_v11  ;;  %1088 = vst.msk [vmem:[%s1927_s30 + $0x120] sm:$0xff] %vm224_vm0, %v1023_v12  ;;  %v1190_v21 = vadd.f32 %v2217_v62, %v1119_v15  ;;  %v994_v25 = vadd.f32 %v1721_v17, %v296_v13 }
  0xe7   : > { %vm1288_vm3 = vcmp.ge.f32.partialorder %v1224_v10, 0.0  ;;  %v1352_v20 = vmul.f32 0.2, %v1224_v10  ;;  %v1222_v22 = vadd.f32 %v2217_v62, %v1151_v16  ;;  %v1122_v23 = vld [vmem:[%s1927_s30 + $0x18] sm:$0xff]  ;;  %v1026_v26 = vadd.f32 %v1753_v18, %v328_v14  ;;  %v751_v28 = vpop.f32.mrf.mxu0  ;;  %v879_v29 = vpop.f32.mrf.mxu1  ;;  %v297_v6 = vld [vmem:[%s1927_s30 + $0x40] sm:$0xff] }
  0xe8   : > { %v1154_v24 = vld [vmem:[%s1927_s30 + $0x118] sm:$0xff]  ;;  %v1384_v30 = vsel %vm1256_vm2, %v1192_v9, %v1320_v19  ;;  %v1193_v32 = vadd.f32 %v2217_v62, %v1122_v23  ;;  %vm1254_vm4 = vcmp.ge.f32.partialorder %v1190_v21, 0.0  ;;  %v1318_v37 = vmul.f32 0.2, %v1190_v21  ;;  %1059 = vst.msk [vmem:[%s1927_s30 + $0x38] sm:$0xff] %vm224_vm0, %v994_v25  ;;  %v329_v15 = vld [vmem:[%s1927_s30 + $0x140] sm:$0xff] }
  0xe9   : > { %v1416_v31 = vsel %vm1288_vm3, %v1224_v10, %v1352_v20  ;;  %v1225_v33 = vadd.f32 %v2217_v62, %v1154_v24  ;;  %1448 = vst.msk [vmem:[%s1927_s30 + $0x10] sm:$0xff] %vm224_vm0, %v1384_v30  ;;  %vm1286_vm5 = vcmp.ge.f32.partialorder %v1222_v22, 0.0  ;;  %v1350_v38 = vmul.f32 0.2, %v1222_v22  ;;  %1091 = vst.msk [vmem:[%s1927_s30 + $0x138] sm:$0xff] %vm224_vm0, %v1026_v26  ;;  %v1724_v39 = vpop.f32.mrf.mxu0  ;;  %v1756_v40 = vpop.f32.mrf.mxu1  ;;  %v1120_v45 = vld [vmem:[%s1927_s30 + $0x8] sm:$0xff] }
  0xea   : > { %1480 = vst.msk [vmem:[%s1927_s30 + $0x110] sm:$0xff] %vm224_vm0, %v1416_v31  ;;  %vm1257_vm6 = vcmp.ge.f32.partialorder %v1193_v32, 0.0  ;;  %v1321_v41 = vmul.f32 0.2, %v1193_v32  ;;  %v1382_v43 = vsel %vm1254_vm4, %v1190_v21, %v1318_v37  ;;  %v1152_v46 = vld [vmem:[%s1927_s30 + $0x108] sm:$0xff]  ;;  %v992_v48 = vadd.f32 %v751_v28, %v294_v27  ;;  %v300_v20 = vld [vmem:[%s1927_s30 + $0x58] sm:$0xff] }
  0xeb   : > { %vm1289_vm7 = vcmp.ge.f32.partialorder %v1225_v33, 0.0  ;;  %v1353_v42 = vmul.f32 0.2, %v1225_v33  ;;  %v1414_v44 = vsel %vm1286_vm5, %v1222_v22, %v1350_v38  ;;  %v1125_v47 = vld [vmem:[%s1927_s30 + $0x30] sm:$0xff]  ;;  %v1024_v49 = vadd.f32 %v879_v29, %v326_v34  ;;  %v2262_v50 = vpop.f32.mrf.mxu0  ;;  %v2264_v51 = vpop.f32.mrf.mxu1  ;;  %1446 = vst.msk [vmem:[%s1927_s30] sm:$0xff] %vm224_vm0, %v1382_v43  ;;  %v332_v21 = vld [vmem:[%s1927_s30 + $0x158] sm:$0xff] }
  0xec   : > { %1478 = vst.msk [vmem:[%s1927_s30 + $0x100] sm:$0xff] %vm224_vm0, %v1414_v44  ;;  %v1385_v52 = vsel %vm1257_vm6, %v1193_v32, %v1321_v41  ;;  %v1191_v54 = vadd.f32 %v2217_v62, %v1120_v45  ;;  %v1223_v55 = vadd.f32 %v2217_v62, %v1152_v46  ;;  %v1157_v56 = vld [vmem:[%s1927_s30 + $0x130] sm:$0xff]  ;;  %v1196_v57 = vadd.f32 %v2217_v62, %v1125_v47  ;;  %v298_v22 = vld [vmem:[%s1927_s30 + $0x48] sm:$0xff]  ;;  %v301_v44 = vld [vmem:[%s1927_s30 + $0x60] sm:$0xff] }
  0xed   : > { %v1417_v53 = vsel %vm1289_vm7, %v1225_v33, %v1353_v42  ;;  %1449 = vst.msk [vmem:[%s1927_s30 + $0x18] sm:$0xff] %vm224_vm0, %v1385_v52  ;;  %v1228_v58 = vadd.f32 %v2217_v62, %v1157_v56  ;;  %v1123_v59 = vld [vmem:[%s1927_s30 + $0x20] sm:$0xff]  ;;  %1057 = vst.msk [vmem:[%s1927_s30 + $0x28] sm:$0xff] %vm224_vm0, %v992_v48  ;;  %v997_v61 = vadd.f32 %v1724_v39, %v299_v35  ;;  %v2285_v0 = vpop.f32.mrf.mxu0  ;;  %v2287_v1 = vpop.f32.mrf.mxu1  ;;  %v330_v23 = vld [vmem:[%s1927_s30 + $0x148] sm:$0xff] }
  0xee   : > { %1481 = vst.msk [vmem:[%s1927_s30 + $0x118] sm:$0xff] %vm224_vm0, %v1417_v53  ;;  %v1155_v60 = vld [vmem:[%s1927_s30 + $0x120] sm:$0xff]  ;;  %1089 = vst.msk [vmem:[%s1927_s30 + $0x128] sm:$0xff] %vm224_vm0, %v1024_v49  ;;  %v1029_v63 = vadd.f32 %v1756_v40, %v331_v36  ;;  %vm1255_vm8 = vcmp.ge.f32.partialorder %v1191_v54, 0.0  ;;  %v1319_v2 = vmul.f32 0.2, %v1191_v54  ;;  %v1194_v11 = vadd.f32 %v2217_v62, %v1123_v59 }
  0xef   : > { %vm1287_vm9 = vcmp.ge.f32.partialorder %v1223_v55, 0.0  ;;  %v1351_v3 = vmul.f32 0.2, %v1223_v55  ;;  %vm1260_vm10 = vcmp.ge.f32.partialorder %v1196_v57, 0.0  ;;  %v1324_v4 = vmul.f32 0.2, %v1196_v57  ;;  %v767_v7 = vpop.f32.mrf.mxu0  ;;  %v895_v8 = vpop.f32.mrf.mxu1 }
  0xf0   : > { %vm1292_vm11 = vcmp.ge.f32.partialorder %v1228_v58, 0.0  ;;  %v1356_v5 = vmul.f32 0.2, %v1228_v58  ;;  %1062 = vst.msk [vmem:[%s1927_s30 + $0x50] sm:$0xff] %vm224_vm0, %v997_v61  ;;  %1094 = vst.msk [vmem:[%s1927_s30 + $0x150] sm:$0xff] %vm224_vm0, %v1029_v63  ;;  %v1383_v9 = vsel %vm1255_vm8, %v1191_v54, %v1319_v2  ;;  %v1226_v12 = vadd.f32 %v2217_v62, %v1155_v60  ;;  %v1126_v13 = vld [vmem:[%s1927_s30 + $0x38] sm:$0xff] }
  0xf1   : > { %v1415_v10 = vsel %vm1287_vm9, %v1223_v55, %v1351_v3  ;;  %v1158_v14 = vld [vmem:[%s1927_s30 + $0x138] sm:$0xff]  ;;  %1447 = vst.msk [vmem:[%s1927_s30 + $0x8] sm:$0xff] %vm224_vm0, %v1383_v9  ;;  %v1388_v16 = vsel %vm1260_vm10, %v1196_v57, %v1324_v4  ;;  %v1197_v18 = vadd.f32 %v2217_v62, %v1126_v13  ;;  %v1728_v24 = vpop.f32.mrf.mxu0  ;;  %v1760_v25 = vpop.f32.mrf.mxu1  ;;  %vm1258_vm12 = vcmp.ge.f32.partialorder %v1194_v11, 0.0  ;;  %v303_v38 = vld [vmem:[%s1927_s30 + $0x70] sm:$0xff]  ;;  %v333_v45 = vld [vmem:[%s1927_s30 + $0x160] sm:$0xff] }
  0xf2   : > { %1479 = vst.msk [vmem:[%s1927_s30 + $0x108] sm:$0xff] %vm224_vm0, %v1415_v10  ;;  %v1420_v17 = vsel %vm1292_vm11, %v1228_v58, %v1356_v5  ;;  %v1229_v19 = vadd.f32 %v2217_v62, %v1158_v14  ;;  %1452 = vst.msk [vmem:[%s1927_s30 + $0x30] sm:$0xff] %vm224_vm0, %v1388_v16  ;;  %v1322_v26 = vmul.f32 0.2, %v1194_v11  ;;  %vm1290_vm13 = vcmp.ge.f32.partialorder %v1226_v12, 0.0  ;;  %v335_v43 = vld [vmem:[%s1927_s30 + $0x170] sm:$0xff] }
  0xf3   : > { %1484 = vst.msk [vmem:[%s1927_s30 + $0x130] sm:$0xff] %vm224_vm0, %v1420_v17  ;;  %v1354_v27 = vmul.f32 0.2, %v1226_v12  ;;  %vm1261_vm14 = vcmp.ge.f32.partialorder %v1197_v18, 0.0  ;;  %v1325_v28 = vmul.f32 0.2, %v1197_v18  ;;  %v780_v30 = vpop.f32.mrf.mxu0  ;;  %v908_v31 = vpop.f32.mrf.mxu1  ;;  %v995_v36 = vadd.f32 %v2262_v50, %v297_v6 }
  0xf4   : > { %vm1293_vm15 = vcmp.ge.f32.partialorder %v1229_v19, 0.0  ;;  %v1357_v29 = vmul.f32 0.2, %v1229_v19  ;;  %v1386_v32 = vsel %vm1258_vm12, %v1194_v11, %v1322_v26  ;;  %v1124_v34 = vld [vmem:[%s1927_s30 + $0x28] sm:$0xff]  ;;  %v1027_v37 = vadd.f32 %v2264_v51, %v329_v15  ;;  %v304_v54 = vld [vmem:[%s1927_s30 + $0x78] sm:$0xff]  ;;  %v307_v3 = vld [vmem:[%s1927_s30 + $0x90] sm:$0xff] }
  0xf5   : > { %v1418_v33 = vsel %vm1290_vm13, %v1226_v12, %v1354_v27  ;;  %v1156_v35 = vld [vmem:[%s1927_s30 + $0x128] sm:$0xff]  ;;  %1450 = vst.msk [vmem:[%s1927_s30 + $0x20] sm:$0xff] %vm224_vm0, %v1386_v32  ;;  %v1389_v39 = vsel %vm1261_vm14, %v1197_v18, %v1325_v28  ;;  %v1195_v41 = vadd.f32 %v2217_v62, %v1124_v34  ;;  %v1729_v46 = vpop.f32.mrf.mxu0  ;;  %v1761_v47 = vpop.f32.mrf.mxu1  ;;  %1060 = vst.msk [vmem:[%s1927_s30 + $0x40] sm:$0xff] %vm224_vm0, %v995_v36  ;;  %v336_v55 = vld [vmem:[%s1927_s30 + $0x178] sm:$0xff] }
  0xf6   : > { %1482 = vst.msk [vmem:[%s1927_s30 + $0x120] sm:$0xff] %vm224_vm0, %v1418_v33  ;;  %v1421_v40 = vsel %vm1293_vm15, %v1229_v19, %v1357_v29  ;;  %v1227_v42 = vadd.f32 %v2217_v62, %v1156_v35  ;;  %1453 = vst.msk [vmem:[%s1927_s30 + $0x38] sm:$0xff] %vm224_vm0, %v1389_v39  ;;  %v998_v50 = vadd.f32 %v2285_v0, %v300_v20  ;;  %v334_v2 = vld [vmem:[%s1927_s30 + $0x168] sm:$0xff]  ;;  %v339_v9 = vld [vmem:[%s1927_s30 + $0x190] sm:$0xff] }
  0xf7   : > { %1485 = vst.msk [vmem:[%s1927_s30 + $0x138] sm:$0xff] %vm224_vm0, %v1421_v40  ;;  %v1129_v48 = vld [vmem:[%s1927_s30 + $0x50] sm:$0xff]  ;;  %1092 = vst.msk [vmem:[%s1927_s30 + $0x140] sm:$0xff] %vm224_vm0, %v1027_v37  ;;  %v1030_v51 = vadd.f32 %v2287_v1, %v332_v21  ;;  %v996_v52 = vadd.f32 %v767_v7, %v298_v22  ;;  %v1028_v53 = vadd.f32 %v895_v8, %v330_v23  ;;  %vm1259_vm1 = vcmp.ge.f32.partialorder %v1195_v41, 0.0  ;;  %v783_v58 = vpop.f32.mrf.mxu0  ;;  %v911_v59 = vpop.f32.mrf.mxu1  ;;  %v302_v1 = vld [vmem:[%s1927_s30 + $0x68] sm:$0xff] }
  0xf8   : > { %v1161_v49 = vld [vmem:[%s1927_s30 + $0x150] sm:$0xff]  ;;  %v1323_v56 = vmul.f32 0.2, %v1195_v41  ;;  %vm1291_vm2 = vcmp.ge.f32.partialorder %v1227_v42, 0.0  ;;  %v1355_v57 = vmul.f32 0.2, %v1227_v42  ;;  %v1200_v60 = vadd.f32 %v2217_v62, %v1129_v48 }
  0xf9   : > { %v1232_v61 = vadd.f32 %v2217_v62, %v1161_v49  ;;  %1063 = vst.msk [vmem:[%s1927_s30 + $0x58] sm:$0xff] %vm224_vm0, %v998_v50  ;;  %1095 = vst.msk [vmem:[%s1927_s30 + $0x158] sm:$0xff] %vm224_vm0, %v1030_v51  ;;  %v1001_v63 = vadd.f32 %v1728_v24, %v303_v38  ;;  %v1033_v0 = vadd.f32 %v1760_v25, %v335_v43  ;;  %v1732_v8 = vpop.f32.mrf.mxu0  ;;  %v1764_v10 = vpop.f32.mrf.mxu1  ;;  %v305_v11 = vld [vmem:[%s1927_s30 + $0x80] sm:$0xff]  ;;  %v308_v21 = vld [vmem:[%s1927_s30 + $0x98] sm:$0xff] }
  0xfa   : > { %1061 = vst.msk [vmem:[%s1927_s30 + $0x48] sm:$0xff] %vm224_vm0, %v996_v52  ;;  %1093 = vst.msk [vmem:[%s1927_s30 + $0x148] sm:$0xff] %vm224_vm0, %v1028_v53  ;;  %v1387_v4 = vsel %vm1259_vm1, %v1195_v41, %v1323_v56  ;;  %v1419_v5 = vsel %vm1291_vm2, %v1227_v42, %v1355_v57  ;;  %v999_v6 = vadd.f32 %v780_v30, %v301_v44  ;;  %v337_v12 = vld [vmem:[%s1927_s30 + $0x180] sm:$0xff]  ;;  %vm1264_vm3 = vcmp.ge.f32.partialorder %v1200_v60, 0.0  ;;  %v340_v22 = vld [vmem:[%s1927_s30 + $0x198] sm:$0xff] }
  0xfb   : > { %v1031_v7 = vadd.f32 %v908_v31, %v333_v45  ;;  %1451 = vst.msk [vmem:[%s1927_s30 + $0x28] sm:$0xff] %vm224_vm0, %v1387_v4  ;;  %1483 = vst.msk [vmem:[%s1927_s30 + $0x128] sm:$0xff] %vm224_vm0, %v1419_v5  ;;  %v1328_v13 = vmul.f32 0.2, %v1200_v60  ;;  %vm1296_vm4 = vcmp.ge.f32.partialorder %v1232_v61, 0.0  ;;  %v1002_v15 = vadd.f32 %v1729_v46, %v304_v54  ;;  %v796_v19 = vpop.f32.mrf.mxu0  ;;  %v924_v20 = vpop.f32.mrf.mxu1  ;;  %v306_v37 = vld [vmem:[%s1927_s30 + $0x88] sm:$0xff] }
  0xfc   : > { %v1360_v14 = vmul.f32 0.2, %v1232_v61  ;;  %1066 = vst.msk [vmem:[%s1927_s30 + $0x70] sm:$0xff] %vm224_vm0, %v1001_v63  ;;  %1098 = vst.msk [vmem:[%s1927_s30 + $0x170] sm:$0xff] %vm224_vm0, %v1033_v0  ;;  %v1034_v16 = vadd.f32 %v1761_v47, %v336_v55  ;;  %v1000_v17 = vadd.f32 %v783_v58, %v302_v1  ;;  %v1032_v18 = vadd.f32 %v911_v59, %v334_v2  ;;  %v1127_v27 = vld [vmem:[%s1927_s30 + $0x40] sm:$0xff] }
  0xfd   : > { %1064 = vst.msk [vmem:[%s1927_s30 + $0x60] sm:$0xff] %vm224_vm0, %v999_v6  ;;  %1096 = vst.msk [vmem:[%s1927_s30 + $0x160] sm:$0xff] %vm224_vm0, %v1031_v7  ;;  %v1392_v23 = vsel %vm1264_vm3, %v1200_v60, %v1328_v13  ;;  %v1005_v25 = vadd.f32 %v1732_v8, %v307_v3  ;;  %v1037_v26 = vadd.f32 %v1764_v10, %v339_v9  ;;  %v1733_v31 = vpop.f32.mrf.mxu0  ;;  %v1765_v32 = vpop.f32.mrf.mxu1 }
  0xfe   : > { %v1424_v24 = vsel %vm1296_vm4, %v1232_v61, %v1360_v14  ;;  %1456 = vst.msk [vmem:[%s1927_s30 + $0x50] sm:$0xff] %vm224_vm0, %v1392_v23  ;;  %v1159_v28 = vld [vmem:[%s1927_s30 + $0x140] sm:$0xff]  ;;  %1067 = vst.msk [vmem:[%s1927_s30 + $0x78] sm:$0xff] %vm224_vm0, %v1002_v15  ;;  %v1003_v29 = vadd.f32 %v796_v19, %v305_v11  ;;  %v1035_v30 = vadd.f32 %v924_v20, %v337_v12 }
  0xff   : > { %1488 = vst.msk [vmem:[%s1927_s30 + $0x150] sm:$0xff] %vm224_vm0, %v1424_v24  ;;  %1099 = vst.msk [vmem:[%s1927_s30 + $0x178] sm:$0xff] %vm224_vm0, %v1034_v16  ;;  %v1198_v33 = vadd.f32 %v2217_v62, %v1127_v27  ;;  %v1230_v34 = vadd.f32 %v2217_v62, %v1159_v28  ;;  %v1006_v35 = vadd.f32 %v1733_v31, %v308_v21  ;;  %v799_v41 = vpop.f32.mrf.mxu0  ;;  %v2404_v42 = vpop.f32.mrf.mxu1 }
 0x100   : > { %1065 = vst.msk [vmem:[%s1927_s30 + $0x68] sm:$0xff] %vm224_vm0, %v1000_v17  ;;  %1097 = vst.msk [vmem:[%s1927_s30 + $0x168] sm:$0xff] %vm224_vm0, %v1032_v18  ;;  %v1038_v36 = vadd.f32 %v1765_v32, %v340_v22  ;;  %v1130_v38 = vld [vmem:[%s1927_s30 + $0x58] sm:$0xff]  ;;  %v1004_v50 = vadd.f32 %v799_v41, %v306_v37 }
 0x101   : > { %1070 = vst.msk [vmem:[%s1927_s30 + $0x90] sm:$0xff] %vm224_vm0, %v1005_v25  ;;  %1102 = vst.msk [vmem:[%s1927_s30 + $0x190] sm:$0xff] %vm224_vm0, %v1037_v26  ;;  %v1162_v39 = vld [vmem:[%s1927_s30 + $0x158] sm:$0xff]  ;;  %v1128_v40 = vld [vmem:[%s1927_s30 + $0x48] sm:$0xff]  ;;  %vm1262_vm5 = vcmp.ge.f32.partialorder %v1198_v33, 0.0  ;;  %vm1294_vm6 = vcmp.ge.f32.partialorder %v1230_v34, 0.0  ;;  %v1201_v45 = vadd.f32 %v2217_v62, %v1130_v38  ;;  %v2415_v51 = vpop.f32.mrf.mxu0  ;;  %v2417_v52 = vpop.f32.mrf.mxu1 }
 0x102   : > { %1068 = vst.msk [vmem:[%s1927_s30 + $0x80] sm:$0xff] %vm224_vm0, %v1003_v29  ;;  %1100 = vst.msk [vmem:[%s1927_s30 + $0x180] sm:$0xff] %vm224_vm0, %v1035_v30  ;;  %v1326_v43 = vmul.f32 0.2, %v1198_v33  ;;  %v1358_v44 = vmul.f32 0.2, %v1230_v34  ;;  %v1233_v46 = vadd.f32 %v2217_v62, %v1162_v39  ;;  %v1199_v47 = vadd.f32 %v2217_v62, %v1128_v40 }
 0x103   : > { %1071 = vst.msk [vmem:[%s1927_s30 + $0x98] sm:$0xff] %vm224_vm0, %v1006_v35  ;;  %1103 = vst.msk [vmem:[%s1927_s30 + $0x198] sm:$0xff] %vm224_vm0, %v1038_v36  ;;  %v1160_v48 = vld [vmem:[%s1927_s30 + $0x148] sm:$0xff]  ;;  %v1133_v49 = vld [vmem:[%s1927_s30 + $0x70] sm:$0xff]  ;;  %vm1265_vm7 = vcmp.ge.f32.partialorder %v1201_v45, 0.0  ;;  %v2430_v63 = vpop.f32.mrf.mxu0  ;;  %v2432_v0 = vpop.f32.mrf.mxu1 }
 0x104   : > { %v1390_v53 = vsel %vm1262_vm5, %v1198_v33, %v1326_v43  ;;  %v1422_v54 = vsel %vm1294_vm6, %v1230_v34, %v1358_v44  ;;  %v1231_v55 = vadd.f32 %v2217_v62, %v1160_v48  ;;  %v1204_v56 = vadd.f32 %v2217_v62, %v1133_v49  ;;  %v1165_v57 = vld [vmem:[%s1927_s30 + $0x170] sm:$0xff]  ;;  %v1131_v58 = vld [vmem:[%s1927_s30 + $0x60] sm:$0xff]  ;;  %1069 = vst.msk [vmem:[%s1927_s30 + $0x88] sm:$0xff] %vm224_vm0, %v1004_v50  ;;  %v338_v49 = vld [vmem:[%s1927_s30 + $0x188] sm:$0xff] }
 0x105   : > { %v1163_v59 = vld [vmem:[%s1927_s30 + $0x160] sm:$0xff]  ;;  %1454 = vst.msk [vmem:[%s1927_s30 + $0x40] sm:$0xff] %vm224_vm0, %v1390_v53  ;;  %1486 = vst.msk [vmem:[%s1927_s30 + $0x140] sm:$0xff] %vm224_vm0, %v1422_v54  ;;  %v1329_v60 = vmul.f32 0.2, %v1201_v45  ;;  %vm1297_vm8 = vcmp.ge.f32.partialorder %v1233_v46, 0.0  ;;  %v2436_v8 = vpop.f32.mrf.mxu0  ;;  %v2438_v9 = vpop.f32.mrf.mxu1  ;;  %v1236_v12 = vadd.f32 %v2217_v62, %v1165_v57  ;;  %v1202_v13 = vadd.f32 %v2217_v62, %v1131_v58 }
 0x106   : > { %v1361_v61 = vmul.f32 0.2, %v1233_v46  ;;  %vm1263_vm9 = vcmp.ge.f32.partialorder %v1199_v47, 0.0  ;;  %v1327_v1 = vmul.f32 0.2, %v1199_v47  ;;  %vm1295_vm10 = vcmp.ge.f32.partialorder %v1231_v55, 0.0 }
 0x107   : > { %v1359_v2 = vmul.f32 0.2, %v1231_v55  ;;  %v1393_v3 = vsel %vm1265_vm7, %v1201_v45, %v1329_v60  ;;  %vm1268_vm11 = vcmp.ge.f32.partialorder %v1204_v56, 0.0  ;;  %v1332_v5 = vmul.f32 0.2, %v1204_v56  ;;  %v1134_v6 = vld [vmem:[%s1927_s30 + $0x78] sm:$0xff]  ;;  %v2459_v23 = vpop.f32.mrf.mxu0  ;;  %v2461_v24 = vpop.f32.mrf.mxu1 }
 0x108   : > { %v1425_v4 = vsel %vm1297_vm8, %v1233_v46, %v1361_v61  ;;  %v1166_v7 = vld [vmem:[%s1927_s30 + $0x178] sm:$0xff]  ;;  %1457 = vst.msk [vmem:[%s1927_s30 + $0x58] sm:$0xff] %vm224_vm0, %v1393_v3  ;;  %v1391_v10 = vsel %vm1263_vm9, %v1199_v47, %v1327_v1  ;;  %v1132_v14 = vld [vmem:[%s1927_s30 + $0x68] sm:$0xff]  ;;  %v1234_v17 = vadd.f32 %v2217_v62, %v1163_v59  ;;  %v1205_v18 = vadd.f32 %v2217_v62, %v1134_v6  ;;  %v1137_v20 = vld [vmem:[%s1927_s30 + $0x90] sm:$0xff] }
 0x109   : > { %1489 = vst.msk [vmem:[%s1927_s30 + $0x158] sm:$0xff] %vm224_vm0, %v1425_v4  ;;  %v1423_v11 = vsel %vm1295_vm10, %v1231_v55, %v1359_v2  ;;  %v1164_v15 = vld [vmem:[%s1927_s30 + $0x168] sm:$0xff]  ;;  %1455 = vst.msk [vmem:[%s1927_s30 + $0x48] sm:$0xff] %vm224_vm0, %v1391_v10  ;;  %v1396_v16 = vsel %vm1268_vm11, %v1204_v56, %v1332_v5  ;;  %v1237_v19 = vadd.f32 %v2217_v62, %v1166_v7  ;;  %v1169_v21 = vld [vmem:[%s1927_s30 + $0x190] sm:$0xff]  ;;  %vm1300_vm12 = vcmp.ge.f32.partialorder %v1236_v12, 0.0  ;;  %v2465_v29 = vpop.f32.mrf.mxu0  ;;  %v2467_v30 = vpop.f32.mrf.mxu1 }
 0x10a   : > { %1487 = vst.msk [vmem:[%s1927_s30 + $0x148] sm:$0xff] %vm224_vm0, %v1423_v11  ;;  %v1135_v22 = vld [vmem:[%s1927_s30 + $0x80] sm:$0xff]  ;;  %1460 = vst.msk [vmem:[%s1927_s30 + $0x70] sm:$0xff] %vm224_vm0, %v1396_v16  ;;  %v1364_v25 = vmul.f32 0.2, %v1236_v12  ;;  %vm1266_vm13 = vcmp.ge.f32.partialorder %v1202_v13, 0.0  ;;  %v1203_v36 = vadd.f32 %v2217_v62, %v1132_v14  ;;  %v1235_v37 = vadd.f32 %v2217_v62, %v1164_v15 }
 0x10b   : > { %v1330_v26 = vmul.f32 0.2, %v1202_v13  ;;  %vm1298_vm14 = vcmp.ge.f32.partialorder %v1234_v17, 0.0  ;;  %v1362_v27 = vmul.f32 0.2, %v1234_v17  ;;  %vm1269_vm15 = vcmp.ge.f32.partialorder %v1205_v18, 0.0  ;;  %v2476_v39 = vpop.f32.mrf.mxu0  ;;  %v2478_v40 = vpop.f32.mrf.mxu1 }
 0x10c   : > { %v1333_v28 = vmul.f32 0.2, %v1205_v18  ;;  %v1428_v31 = vsel %vm1300_vm12, %v1236_v12, %v1364_v25  ;;  %vm1301_vm1 = vcmp.ge.f32.partialorder %v1237_v19, 0.0  ;;  %v1365_v33 = vmul.f32 0.2, %v1237_v19  ;;  %v1167_v38 = vld [vmem:[%s1927_s30 + $0x180] sm:$0xff] }
 0x10d   : > { %v1394_v32 = vsel %vm1266_vm13, %v1202_v13, %v1330_v26  ;;  %1492 = vst.msk [vmem:[%s1927_s30 + $0x170] sm:$0xff] %vm224_vm0, %v1428_v31  ;;  %v1426_v34 = vsel %vm1298_vm14, %v1234_v17, %v1362_v27  ;;  %v1208_v43 = vadd.f32 %v2217_v62, %v1137_v20  ;;  %v1240_v44 = vadd.f32 %v2217_v62, %v1169_v21  ;;  %v1138_v46 = vld [vmem:[%s1927_s30 + $0x98] sm:$0xff]  ;;  %v1136_v48 = vld [vmem:[%s1927_s30 + $0x88] sm:$0xff]  ;;  %v2493_v54 = vpop.f32.mrf.mxu0  ;;  %v2495_v55 = vpop.f32.mrf.mxu1  ;;  %v311_v61 = vld [vmem:[%s1927_s30 + $0xb0] sm:$0xff] }
 0x10e   : > { %1458 = vst.msk [vmem:[%s1927_s30 + $0x60] sm:$0xff] %vm224_vm0, %v1394_v32  ;;  %v1397_v35 = vsel %vm1269_vm15, %v1205_v18, %v1333_v28  ;;  %1490 = vst.msk [vmem:[%s1927_s30 + $0x160] sm:$0xff] %vm224_vm0, %v1426_v34  ;;  %v1429_v41 = vsel %vm1301_vm1, %v1237_v19, %v1365_v33  ;;  %v1206_v45 = vadd.f32 %v2217_v62, %v1135_v22  ;;  %v1170_v47 = vld [vmem:[%s1927_s30 + $0x198] sm:$0xff]  ;;  %vm1267_vm2 = vcmp.ge.f32.partialorder %v1203_v36, 0.0  ;;  %v343_v7 = vld [vmem:[%s1927_s30 + $0x1b0] sm:$0xff] }
 0x10f   : > { %1461 = vst.msk [vmem:[%s1927_s30 + $0x78] sm:$0xff] %vm224_vm0, %v1397_v35  ;;  %1493 = vst.msk [vmem:[%s1927_s30 + $0x178] sm:$0xff] %vm224_vm0, %v1429_v41  ;;  %v1331_v50 = vmul.f32 0.2, %v1203_v36  ;;  %vm1299_vm3 = vcmp.ge.f32.partialorder %v1235_v37, 0.0  ;;  %vm1272_vm4 = vcmp.ge.f32.partialorder %v1208_v43, 0.0  ;;  %v2498_v1 = vpop.f32.mrf.mxu0  ;;  %v2500_v2 = vpop.f32.mrf.mxu1  ;;  %v1238_v5 = vadd.f32 %v2217_v62, %v1167_v38 }
 0x110   : > { %v1363_v53 = vmul.f32 0.2, %v1235_v37  ;;  %v1336_v56 = vmul.f32 0.2, %v1208_v43  ;;  %vm1304_vm5 = vcmp.ge.f32.partialorder %v1240_v44, 0.0  ;;  %vm1270_vm6 = vcmp.ge.f32.partialorder %v1206_v45, 0.0 }
 0x111   : > { %v1368_v57 = vmul.f32 0.2, %v1240_v44  ;;  %v1395_v58 = vsel %vm1267_vm2, %v1203_v36, %v1331_v50  ;;  %v1334_v60 = vmul.f32 0.2, %v1206_v45  ;;  %v1209_v6 = vadd.f32 %v2217_v62, %v1138_v46  ;;  %v309_v10 = vld [vmem:[%s1927_s30 + $0xa0] sm:$0xff]  ;;  %v312_v16 = vld [vmem:[%s1927_s30 + $0xb8] sm:$0xff]  ;;  %v2523_v20 = vpop.f32.mrf.mxu0  ;;  %v2525_v21 = vpop.f32.mrf.mxu1 }
 0x112   : > { %v1427_v59 = vsel %vm1299_vm3, %v1235_v37, %v1363_v53  ;;  %1459 = vst.msk [vmem:[%s1927_s30 + $0x68] sm:$0xff] %vm224_vm0, %v1395_v58  ;;  %v1400_v3 = vsel %vm1272_vm4, %v1208_v43, %v1336_v56  ;;  %v341_v11 = vld [vmem:[%s1927_s30 + $0x1a0] sm:$0xff]  ;;  %v1241_v13 = vadd.f32 %v2217_v62, %v1170_v47  ;;  %v1207_v14 = vadd.f32 %v2217_v62, %v1136_v48  ;;  %v344_v17 = vld [vmem:[%s1927_s30 + $0x1b8] sm:$0xff]  ;;  %v310_v18 = vld [vmem:[%s1927_s30 + $0xa8] sm:$0xff] }
 0x113   : > { %1491 = vst.msk [vmem:[%s1927_s30 + $0x168] sm:$0xff] %vm224_vm0, %v1427_v59  ;;  %v1432_v4 = vsel %vm1304_vm5, %v1240_v44, %v1368_v57  ;;  %1464 = vst.msk [vmem:[%s1927_s30 + $0x90] sm:$0xff] %vm224_vm0, %v1400_v3  ;;  %v1398_v12 = vsel %vm1270_vm6, %v1206_v45, %v1334_v60  ;;  %v1036_v15 = vadd.f32 %v2404_v42, %v338_v49  ;;  %v342_v19 = vld [vmem:[%s1927_s30 + $0x1a8] sm:$0xff]  ;;  %vm1302_vm7 = vcmp.ge.f32.partialorder %v1238_v5, 0.0  ;;  %v315_v26 = vld [vmem:[%s1927_s30 + $0xd0] sm:$0xff]  ;;  %v844_v33 = vpop.f32.mrf.mxu0  ;;  %v972_v34 = vpop.f32.mrf.mxu1 }
 0x114   : > { %1496 = vst.msk [vmem:[%s1927_s30 + $0x190] sm:$0xff] %vm224_vm0, %v1432_v4  ;;  %1462 = vst.msk [vmem:[%s1927_s30 + $0x80] sm:$0xff] %vm224_vm0, %v1398_v12  ;;  %v1366_v22 = vmul.f32 0.2, %v1238_v5  ;;  %vm1273_vm8 = vcmp.ge.f32.partialorder %v1209_v6, 0.0  ;;  %v347_v27 = vld [vmem:[%s1927_s30 + $0x1d0] sm:$0xff]  ;;  %v1009_v37 = vadd.f32 %v2415_v51, %v311_v61  ;;  %v1041_v38 = vadd.f32 %v2417_v52, %v343_v7 }
 0x115   : > { %v1337_v25 = vmul.f32 0.2, %v1209_v6  ;;  %v313_v42 = vld [vmem:[%s1927_s30 + $0xc0] sm:$0xff]  ;;  %vm1305_vm9 = vcmp.ge.f32.partialorder %v1241_v13, 0.0  ;;  %v1369_v31 = vmul.f32 0.2, %v1241_v13  ;;  %v1007_v47 = vadd.f32 %v2430_v63, %v309_v10  ;;  %v1745_v50 = vpop.f32.mrf.mxu0  ;;  %v1777_v53 = vpop.f32.mrf.mxu1 }
 0x116   : > { %v345_v28 = vld [vmem:[%s1927_s30 + $0x1c0] sm:$0xff]  ;;  %vm1271_vm10 = vcmp.ge.f32.partialorder %v1207_v14, 0.0  ;;  %v1335_v32 = vmul.f32 0.2, %v1207_v14  ;;  %1101 = vst.msk [vmem:[%s1927_s30 + $0x188] sm:$0xff] %vm224_vm0, %v1036_v15  ;;  %v1430_v35 = vsel %vm1302_vm7, %v1238_v5, %v1366_v22  ;;  %v316_v41 = vld [vmem:[%s1927_s30 + $0xd8] sm:$0xff]  ;;  %v1039_v51 = vadd.f32 %v2432_v0, %v341_v11 }
 0x117   : > { %v1401_v36 = vsel %vm1273_vm8, %v1209_v6, %v1337_v25  ;;  %v348_v43 = vld [vmem:[%s1927_s30 + $0x1d8] sm:$0xff]  ;;  %v314_v44 = vld [vmem:[%s1927_s30 + $0xc8] sm:$0xff]  ;;  %1494 = vst.msk [vmem:[%s1927_s30 + $0x180] sm:$0xff] %vm224_vm0, %v1430_v35  ;;  %v1433_v45 = vsel %vm1305_vm9, %v1241_v13, %v1369_v31  ;;  %v319_v48 = vld [vmem:[%s1927_s30 + $0xf0] sm:$0xff]  ;;  %v1010_v63 = vadd.f32 %v2436_v8, %v312_v16  ;;  %v1042_v0 = vadd.f32 %v2438_v9, %v344_v17  ;;  %v847_v4 = vpop.f32.mrf.mxu0  ;;  %v975_v6 = vpop.f32.mrf.mxu1 }
 0x118   : > { %1465 = vst.msk [vmem:[%s1927_s30 + $0x98] sm:$0xff] %vm224_vm0, %v1401_v36  ;;  %v1399_v46 = vsel %vm1271_vm10, %v1207_v14, %v1335_v32  ;;  %v346_v52 = vld [vmem:[%s1927_s30 + $0x1c8] sm:$0xff]  ;;  %v351_v49 = vld [vmem:[%s1927_s30 + $0x1f0] sm:$0xff]  ;;  %1497 = vst.msk [vmem:[%s1927_s30 + $0x198] sm:$0xff] %vm224_vm0, %v1433_v45  ;;  %v1008_v56 = vadd.f32 %v2459_v23, %v310_v18  ;;  %v1040_v57 = vadd.f32 %v2461_v24, %v342_v19 }
 0x119   : > { %1463 = vst.msk [vmem:[%s1927_s30 + $0x88] sm:$0xff] %vm224_vm0, %v1399_v46  ;;  %1074 = vst.msk [vmem:[%s1927_s30 + $0xb0] sm:$0xff] %vm224_vm0, %v1009_v37  ;;  %v317_v58 = vld [vmem:[%s1927_s30 + $0xe0] sm:$0xff]  ;;  %v320_v60 = vld [vmem:[%s1927_s30 + $0xf8] sm:$0xff]  ;;  %v1013_v8 = vadd.f32 %v2465_v29, %v315_v26  ;;  %v1045_v61 = vadd.f32 %v2467_v30, %v347_v27  ;;  %v1011_v9 = vadd.f32 %v2476_v39, %v313_v42 }
 0x11a   : > { %1106 = vst.msk [vmem:[%s1927_s30 + $0x1b0] sm:$0xff] %vm224_vm0, %v1041_v38  ;;  %v349_v59 = vld [vmem:[%s1927_s30 + $0x1e0] sm:$0xff]  ;;  %1072 = vst.msk [vmem:[%s1927_s30 + $0xa0] sm:$0xff] %vm224_vm0, %v1007_v47  ;;  %v1043_v23 = vadd.f32 %v2478_v40, %v345_v28  ;;  %v352_v24 = vld [vmem:[%s1927_s30 + $0x1f8] sm:$0xff]  ;;  %v1014_v29 = vadd.f32 %v2493_v54, %v316_v41  ;;  %v1046_v30 = vadd.f32 %v2495_v55, %v348_v43 }
 0x11b   : > { %1104 = vst.msk [vmem:[%s1927_s30 + $0x1a0] sm:$0xff] %vm224_vm0, %v1039_v51  ;;  %v318_v3 = vld [vmem:[%s1927_s30 + $0xe8] sm:$0xff]  ;;  %1075 = vst.msk [vmem:[%s1927_s30 + $0xb8] sm:$0xff] %vm224_vm0, %v1010_v63  ;;  %v1012_v39 = vadd.f32 %v2498_v1, %v314_v44  ;;  %v1044_v40 = vadd.f32 %v2500_v2, %v346_v52  ;;  %v1017_v7 = vadd.f32 %v2523_v20, %v319_v48 }
 0x11c   : > { %v350_v5 = vld [vmem:[%s1927_s30 + $0x1e8] sm:$0xff]  ;;  %1107 = vst.msk [vmem:[%s1927_s30 + $0x1b8] sm:$0xff] %vm224_vm0, %v1042_v0  ;;  %1073 = vst.msk [vmem:[%s1927_s30 + $0xa8] sm:$0xff] %vm224_vm0, %v1008_v56  ;;  %v1049_v54 = vadd.f32 %v2525_v21, %v351_v49  ;;  %v1015_v55 = vadd.f32 %v844_v33, %v317_v58  ;;  %v1047_v1 = vadd.f32 %v972_v34, %v349_v59  ;;  %v2658_v58 = vld [vmem:[%s2738_s2] ss:$0 sm:$0xff] }
 0x11d   : > { %1105 = vst.msk [vmem:[%s1927_s30 + $0x1a8] sm:$0xff] %vm224_vm0, %v1040_v57  ;;  %1078 = vst.msk [vmem:[%s1927_s30 + $0xd0] sm:$0xff] %vm224_vm0, %v1013_v8  ;;  %v1168_v2 = vld [vmem:[%s1927_s30 + $0x188] sm:$0xff]  ;;  %v1018_v10 = vadd.f32 %v1745_v50, %v320_v60  ;;  %v1050_v11 = vadd.f32 %v1777_v53, %v352_v24  ;;  %v1016_v12 = vadd.f32 %v847_v4, %v318_v3 }
 0x11e   : > { %1110 = vst.msk [vmem:[%s1927_s30 + $0x1d0] sm:$0xff] %vm224_vm0, %v1045_v61  ;;  %1076 = vst.msk [vmem:[%s1927_s30 + $0xc0] sm:$0xff] %vm224_vm0, %v1011_v9  ;;  %v1048_v13 = vadd.f32 %v975_v6, %v350_v5  ;;  %v1239_v14 = vadd.f32 %v2217_v62, %v1168_v2 }
 0x11f   : > { %1108 = vst.msk [vmem:[%s1927_s30 + $0x1c0] sm:$0xff] %vm224_vm0, %v1043_v23  ;;  %1079 = vst.msk [vmem:[%s1927_s30 + $0xd8] sm:$0xff] %vm224_vm0, %v1014_v29 }
 0x120   : > { %1111 = vst.msk [vmem:[%s1927_s30 + $0x1d8] sm:$0xff] %vm224_vm0, %v1046_v30  ;;  %1077 = vst.msk [vmem:[%s1927_s30 + $0xc8] sm:$0xff] %vm224_vm0, %v1012_v39  ;;  %vm1303_vm11 = vcmp.ge.f32.partialorder %v1239_v14, 0.0  ;;  %v1367_v15 = vmul.f32 0.2, %v1239_v14  ;;  %v1141_v16 = vld [vmem:[%s1927_s30 + $0xb0] sm:$0xff] }
 0x121   : > { %1109 = vst.msk [vmem:[%s1927_s30 + $0x1c8] sm:$0xff] %vm224_vm0, %v1044_v40  ;;  %1082 = vst.msk [vmem:[%s1927_s30 + $0xf0] sm:$0xff] %vm224_vm0, %v1017_v7  ;;  %v1173_v17 = vld [vmem:[%s1927_s30 + $0x1b0] sm:$0xff]  ;;  %v1212_v18 = vadd.f32 %v2217_v62, %v1141_v16  ;;  %v1139_v20 = vld [vmem:[%s1927_s30 + $0xa0] sm:$0xff] }
 0x122   : > { %1114 = vst.msk [vmem:[%s1927_s30 + $0x1f0] sm:$0xff] %vm224_vm0, %v1049_v54  ;;  %1080 = vst.msk [vmem:[%s1927_s30 + $0xe0] sm:$0xff] %vm224_vm0, %v1015_v55  ;;  %v1244_v19 = vadd.f32 %v2217_v62, %v1173_v17  ;;  %v1171_v21 = vld [vmem:[%s1927_s30 + $0x1a0] sm:$0xff]  ;;  %v1431_v22 = vsel %vm1303_vm11, %v1239_v14, %v1367_v15  ;;  %v1210_v25 = vadd.f32 %v2217_v62, %v1139_v20  ;;  %v1142_v27 = vld [vmem:[%s1927_s30 + $0xb8] sm:$0xff] }
 0x123   : > { %1112 = vst.msk [vmem:[%s1927_s30 + $0x1e0] sm:$0xff] %vm224_vm0, %v1047_v1  ;;  %1083 = vst.msk [vmem:[%s1927_s30 + $0xf8] sm:$0xff] %vm224_vm0, %v1018_v10  ;;  %v1242_v26 = vadd.f32 %v2217_v62, %v1171_v21  ;;  %v1174_v42 = vld [vmem:[%s1927_s30 + $0x1b8] sm:$0xff]  ;;  %v1140_v28 = vld [vmem:[%s1927_s30 + $0xa8] sm:$0xff]  ;;  %vm1276_vm12 = vcmp.ge.f32.partialorder %v1212_v18, 0.0  ;;  %v1213_v37 = vadd.f32 %v2217_v62, %v1142_v27 }
 0x124   : > { %1115 = vst.msk [vmem:[%s1927_s30 + $0x1f8] sm:$0xff] %vm224_vm0, %v1050_v11  ;;  %1081 = vst.msk [vmem:[%s1927_s30 + $0xe8] sm:$0xff] %vm224_vm0, %v1016_v12  ;;  %v1340_v31 = vmul.f32 0.2, %v1212_v18  ;;  %vm1308_vm13 = vcmp.ge.f32.partialorder %v1244_v19, 0.0  ;;  %vm1274_vm14 = vcmp.ge.f32.partialorder %v1210_v25, 0.0  ;;  %v1245_v38 = vadd.f32 %v2217_v62, %v1174_v42 }
 0x125   : > { %1113 = vst.msk [vmem:[%s1927_s30 + $0x1e8] sm:$0xff] %vm224_vm0, %v1048_v13  ;;  %1495 = vst.msk [vmem:[%s1927_s30 + $0x188] sm:$0xff] %vm224_vm0, %v1431_v22  ;;  %v1372_v32 = vmul.f32 0.2, %v1244_v19  ;;  %v1338_v33 = vmul.f32 0.2, %v1210_v25  ;;  %v1211_v46 = vadd.f32 %v2217_v62, %v1140_v28 }
 0x126   : > { %vm1306_vm15 = vcmp.ge.f32.partialorder %v1242_v26, 0.0  ;;  %v1370_v34 = vmul.f32 0.2, %v1242_v26  ;;  %v1404_v35 = vsel %vm1276_vm12, %v1212_v18, %v1340_v31  ;;  %v1172_v41 = vld [vmem:[%s1927_s30 + $0x1a8] sm:$0xff]  ;;  %v1145_v43 = vld [vmem:[%s1927_s30 + $0xd0] sm:$0xff]  ;;  %v1143_v52 = vld [vmem:[%s1927_s30 + $0xc0] sm:$0xff] }
 0x127   : > { %v1436_v36 = vsel %vm1308_vm13, %v1244_v19, %v1372_v32  ;;  %1468 = vst.msk [vmem:[%s1927_s30 + $0xb0] sm:$0xff] %vm224_vm0, %v1404_v35  ;;  %v1402_v44 = vsel %vm1274_vm14, %v1210_v25, %v1338_v33  ;;  %v1243_v47 = vadd.f32 %v2217_v62, %v1172_v41  ;;  %v1177_v51 = vld [vmem:[%s1927_s30 + $0x1d0] sm:$0xff]  ;;  %v1175_v48 = vld [vmem:[%s1927_s30 + $0x1c0] sm:$0xff]  ;;  %vm1277_vm1 = vcmp.ge.f32.partialorder %v1213_v37, 0.0  ;;  %v1146_v60 = vld [vmem:[%s1927_s30 + $0xd8] sm:$0xff] }
 0x128   : > { %1500 = vst.msk [vmem:[%s1927_s30 + $0x1b0] sm:$0xff] %vm224_vm0, %v1436_v36  ;;  %v1434_v45 = vsel %vm1306_vm15, %v1242_v26, %v1370_v34  ;;  %1466 = vst.msk [vmem:[%s1927_s30 + $0xa0] sm:$0xff] %vm224_vm0, %v1402_v44  ;;  %v1341_v49 = vmul.f32 0.2, %v1213_v37  ;;  %vm1309_vm2 = vcmp.ge.f32.partialorder %v1245_v38, 0.0  ;;  %vm1275_vm3 = vcmp.ge.f32.partialorder %v1211_v46, 0.0 }
 0x129   : > { %1498 = vst.msk [vmem:[%s1927_s30 + $0x1a0] sm:$0xff] %vm224_vm0, %v1434_v45  ;;  %v1373_v50 = vmul.f32 0.2, %v1245_v38  ;;  %v1339_v53 = vmul.f32 0.2, %v1211_v46  ;;  %vm1307_vm4 = vcmp.ge.f32.partialorder %v1243_v47, 0.0  ;;  %v1216_v57 = vadd.f32 %v2217_v62, %v1145_v43 }
 0x12a   : > { %v1371_v63 = vmul.f32 0.2, %v1243_v47  ;;  %v1405_v0 = vsel %vm1277_vm1, %v1213_v37, %v1341_v49  ;;  %v1248_v59 = vadd.f32 %v2658_v58, %v1177_v51  ;;  %v1214_v9 = vadd.f32 %v2658_v58, %v1143_v52  ;;  %v1178_v24 = vld [vmem:[%s1927_s30 + $0x1d8] sm:$0xff]  ;;  %v1144_v62 = vld [vmem:[%s1927_s30 + $0xc8] sm:$0xff]  ;;  %v1149_v54 = vld [vmem:[%s1927_s30 + $0xf0] sm:$0xff] }
 0x12b   : > { %v1437_v56 = vsel %vm1309_vm2, %v1245_v38, %v1373_v50  ;;  %1469 = vst.msk [vmem:[%s1927_s30 + $0xb8] sm:$0xff] %vm224_vm0, %v1405_v0  ;;  %v1403_v8 = vsel %vm1275_vm3, %v1211_v46, %v1339_v53  ;;  %v1246_v23 = vadd.f32 %v2658_v58, %v1175_v48  ;;  %v1176_v3 = vld [vmem:[%s1927_s30 + $0x1c8] sm:$0xff]  ;;  %vm1280_vm5 = vcmp.ge.f32.partialorder %v1216_v57, 0.0  ;;  %v1181_v11 = vld [vmem:[%s1927_s30 + $0x1f0] sm:$0xff]  ;;  %v1147_v12 = vld [vmem:[%s1927_s30 + $0xe0] sm:$0xff] }
 0x12c   : > { %1501 = vst.msk [vmem:[%s1927_s30 + $0x1b8] sm:$0xff] %vm224_vm0, %v1437_v56  ;;  %v1435_v61 = vsel %vm1307_vm4, %v1243_v47, %v1371_v63  ;;  %1467 = vst.msk [vmem:[%s1927_s30 + $0xa8] sm:$0xff] %vm224_vm0, %v1403_v8  ;;  %v1344_v4 = vmul.f32 0.2, %v1216_v57  ;;  %vm1312_vm6 = vcmp.ge.f32.partialorder %v1248_v59, 0.0  ;;  %vm1278_vm7 = vcmp.ge.f32.partialorder %v1214_v9, 0.0 }
 0x12d   : > { %1499 = vst.msk [vmem:[%s1927_s30 + $0x1a8] sm:$0xff] %vm224_vm0, %v1435_v61  ;;  %v1376_v5 = vmul.f32 0.2, %v1248_v59  ;;  %v1342_v6 = vmul.f32 0.2, %v1214_v9  ;;  %vm1310_vm8 = vcmp.ge.f32.partialorder %v1246_v23, 0.0  ;;  %v1217_v40 = vadd.f32 %v2658_v58, %v1146_v60 }
 0x12e   : > { %v1374_v29 = vmul.f32 0.2, %v1246_v23  ;;  %v1408_v30 = vsel %vm1280_vm5, %v1216_v57, %v1344_v4  ;;  %v1249_v7 = vadd.f32 %v2658_v58, %v1178_v24  ;;  %v1215_v2 = vadd.f32 %v2658_v58, %v1144_v62  ;;  %v1179_v13 = vld [vmem:[%s1927_s30 + $0x1e0] sm:$0xff]  ;;  %v1150_v22 = vld [vmem:[%s1927_s30 + $0xf8] sm:$0xff]  ;;  %v1148_v31 = vld [vmem:[%s1927_s30 + $0xe8] sm:$0xff] }
 0x12f   : > { %v1440_v39 = vsel %vm1312_vm6, %v1248_v59, %v1376_v5  ;;  %1472 = vst.msk [vmem:[%s1927_s30 + $0xd0] sm:$0xff] %vm224_vm0, %v1408_v30  ;;  %v1406_v55 = vsel %vm1278_vm7, %v1214_v9, %v1342_v6  ;;  %v1247_v10 = vadd.f32 %v2658_v58, %v1176_v3  ;;  %vm1281_vm9 = vcmp.ge.f32.partialorder %v1217_v40, 0.0  ;;  %v1182_v28 = vld [vmem:[%s1927_s30 + $0x1f8] sm:$0xff]  ;;  %v1180_v32 = vld [vmem:[%s1927_s30 + $0x1e8] sm:$0xff] }
 0x130   : > { %1504 = vst.msk [vmem:[%s1927_s30 + $0x1d0] sm:$0xff] %vm224_vm0, %v1440_v39  ;;  %v1438_v1 = vsel %vm1310_vm8, %v1246_v23, %v1374_v29  ;;  %1470 = vst.msk [vmem:[%s1927_s30 + $0xc0] sm:$0xff] %vm224_vm0, %v1406_v55  ;;  %v1345_v14 = vmul.f32 0.2, %v1217_v40  ;;  %vm1313_vm10 = vcmp.ge.f32.partialorder %v1249_v7, 0.0  ;;  %vm1279_vm11 = vcmp.ge.f32.partialorder %v1215_v2, 0.0 }
 0x131   : > { %1502 = vst.msk [vmem:[%s1927_s30 + $0x1c0] sm:$0xff] %vm224_vm0, %v1438_v1  ;;  %v1377_v15 = vmul.f32 0.2, %v1249_v7  ;;  %v1343_v16 = vmul.f32 0.2, %v1215_v2  ;;  %vm1311_vm12 = vcmp.ge.f32.partialorder %v1247_v10, 0.0  ;;  %v1220_v20 = vadd.f32 %v2658_v58, %v1149_v54 }
 0x132   : > { %v1375_v17 = vmul.f32 0.2, %v1247_v10  ;;  %v1409_v18 = vsel %vm1281_vm9, %v1217_v40, %v1345_v14  ;;  %v1252_v21 = vadd.f32 %v2658_v58, %v1181_v11  ;;  %v1218_v27 = vadd.f32 %v2658_v58, %v1147_v12 }
 0x133   : > { %v1441_v19 = vsel %vm1313_vm10, %v1249_v7, %v1377_v15  ;;  %1473 = vst.msk [vmem:[%s1927_s30 + $0xd8] sm:$0xff] %vm224_vm0, %v1409_v18  ;;  %v1407_v25 = vsel %vm1279_vm11, %v1215_v2, %v1343_v16  ;;  %v1250_v42 = vadd.f32 %v2658_v58, %v1179_v13  ;;  %vm1284_vm13 = vcmp.ge.f32.partialorder %v1220_v20, 0.0 }
 0x134   : > { %1505 = vst.msk [vmem:[%s1927_s30 + $0x1d8] sm:$0xff] %vm224_vm0, %v1441_v19  ;;  %v1439_v26 = vsel %vm1311_vm12, %v1247_v10, %v1375_v17  ;;  %1471 = vst.msk [vmem:[%s1927_s30 + $0xc8] sm:$0xff] %vm224_vm0, %v1407_v25  ;;  %v1348_v33 = vmul.f32 0.2, %v1220_v20  ;;  %vm1316_vm14 = vcmp.ge.f32.partialorder %v1252_v21, 0.0  ;;  %vm1282_vm15 = vcmp.ge.f32.partialorder %v1218_v27, 0.0 }
 0x135   : > { %1503 = vst.msk [vmem:[%s1927_s30 + $0x1c8] sm:$0xff] %vm224_vm0, %v1439_v26  ;;  %v1380_v34 = vmul.f32 0.2, %v1252_v21  ;;  %v1346_v35 = vmul.f32 0.2, %v1218_v27  ;;  %vm1314_vm1 = vcmp.ge.f32.partialorder %v1250_v42, 0.0  ;;  %v1221_v41 = vadd.f32 %v2658_v58, %v1150_v22 }
 0x136   : > { %v1378_v36 = vmul.f32 0.2, %v1250_v42  ;;  %v1412_v37 = vsel %vm1284_vm13, %v1220_v20, %v1348_v33  ;;  %v1253_v43 = vadd.f32 %v2658_v58, %v1182_v28  ;;  %v1219_v46 = vadd.f32 %v2658_v58, %v1148_v31 }
 0x137   : > { %v1444_v38 = vsel %vm1316_vm14, %v1252_v21, %v1380_v34  ;;  %1476 = vst.msk [vmem:[%s1927_s30 + $0xf0] sm:$0xff] %vm224_vm0, %v1412_v37  ;;  %v1410_v44 = vsel %vm1282_vm15, %v1218_v27, %v1346_v35  ;;  %v1251_v47 = vadd.f32 %v2658_v58, %v1180_v32  ;;  %vm1285_vm2 = vcmp.ge.f32.partialorder %v1221_v41, 0.0 }
 0x138   : > { %1508 = vst.msk [vmem:[%s1927_s30 + $0x1f0] sm:$0xff] %vm224_vm0, %v1444_v38  ;;  %v1442_v45 = vsel %vm1314_vm1, %v1250_v42, %v1378_v36  ;;  %1474 = vst.msk [vmem:[%s1927_s30 + $0xe0] sm:$0xff] %vm224_vm0, %v1410_v44  ;;  %v1349_v51 = vmul.f32 0.2, %v1221_v41  ;;  %vm1317_vm3 = vcmp.ge.f32.partialorder %v1253_v43, 0.0  ;;  %vm1283_vm4 = vcmp.ge.f32.partialorder %v1219_v46, 0.0 }
 0x139   : > { %1506 = vst.msk [vmem:[%s1927_s30 + $0x1e0] sm:$0xff] %vm224_vm0, %v1442_v45  ;;  %v1381_v52 = vmul.f32 0.2, %v1253_v43  ;;  %v1347_v48 = vmul.f32 0.2, %v1219_v46  ;;  %vm1315_vm5 = vcmp.ge.f32.partialorder %v1251_v47, 0.0 }
 0x13a   : > { %v1379_v49 = vmul.f32 0.2, %v1251_v47  ;;  %v1413_v50 = vsel %vm1285_vm2, %v1221_v41, %v1349_v51 }
 0x13b   : > { %v1445_v53 = vsel %vm1317_vm3, %v1253_v43, %v1381_v52  ;;  %1477 = vst.msk [vmem:[%s1927_s30 + $0xf8] sm:$0xff] %vm224_vm0, %v1413_v50  ;;  %v1411_v63 = vsel %vm1283_vm4, %v1219_v46, %v1347_v48 }
 0x13c   : > { %1509 = vst.msk [vmem:[%s1927_s30 + $0x1f8] sm:$0xff] %vm224_vm0, %v1445_v53  ;;  %v1443_v0 = vsel %vm1315_vm5, %v1251_v47, %v1379_v49  ;;  %1475 = vst.msk [vmem:[%s1927_s30 + $0xe8] sm:$0xff] %vm224_vm0, %v1411_v63 }
 0x13d   : > { %1507 = vst.msk [vmem:[%s1927_s30 + $0x1e8] sm:$0xff] %vm224_vm0, %v1443_v0 }
 0x13e PF: > { %s13_s14 = sadd.s32 1, %s1867_s14   ;;  %s2740_s12 = smov %s1863_s13 }
 0x13f   : > { %p10_p5 = scmp.ge.s32.totalorder %s13_s14, 6   ;;  %s2741_s13 = smov %s2743_s15 }
 0x141   :  { %12 = sbr.rel (!%p10_p5) target bundleno = 2 (0x2), region = 73 }

// kernel: _lambda_.12
= control target key start
LH: loop header
LB: loop body
LE: loop exit
PB: predicated region body
PF: predicated region fallthrough
CT: control target
= control target key end

     0   :  { %s1699_s12 = smov 0   ;;  %s1701_s13 = smov 0   ;;  %s2632_s0 = inlined_call_operand.vmem [shape: bf16[512,256], index: 0, kind: input, shape index: {}]   ;;  %s2633_s1 = inlined_call_operand.vmem [shape: bf16[256,32], index: 1, kind: input, shape index: {}]   ;;  %s2634_s2 = inlined_call_operand.vmem [shape: f32[1,32], index: 2, kind: input, shape index: {}]   ;;  %s2635_s3 = inlined_call_operand.vmem [shape: f32[512,32], index: 3, kind: output, shape index: {}]  }
   0x1   :  { %s1703_s14 = smov 0  }
   0x2 LB: > { %s25_s15 = sadd.s32 1, %s1672_s13  ;;  %p1377_p0 = scmp.ge.s32.totalorder %s1676_s14, 1  ;;  %s1676_s14 = sphi %s1703_s14, %s13_s14   ;;  %s1672_s13 = sphi %s1701_s13, %s2652_s13   ;;  %s1668_s12 = sphi %s1699_s12, %s2651_s12  }
   0x3   : > { %p27_p1 = scmp.ge.s32.totalorder %s25_s15, 2  ;;  %p169_p2 = scmp.lt.s32.totalorder %s1676_s14, 3 }
   0x5   : > { %s2654_s15 = smov (%p27_p1, %s25_s15), 0  ;;  %p170_p3 = pnand %p1377_p0, %p169_p2 }
   0x6   : > { %s1378_s18 = sshll.u32 (!%p170_p3), %s1668_s12, 5 }
   0x7   : > { %173 = sbr.rel (%p170_p3) target bundleno = 423 (0x1a7), region = 32  ;;  %p205_p4 = scmp.lt.s32.totalorder (!%p170_p3), %s1378_s18, 63 }
   0xc   : > { %v1588_v0 = vld [vmem:[%s2633_s1 + $0x78] sm:$0xff]   ;;  %v1590_v2 = vld [vmem:[%s2633_s1 + $0x70] sm:$0xff]   ;;  %v1592_v4 = vld [vmem:[%s2633_s1 + $0x68] sm:$0xff]   ;;  %s2656_s18 = smov (!%p205_p4, %s1378_s18), 63  ;;  %vm232_vm0 = vcmask 261120   ;;  %v1678_v48 = vmov 0.0  }
   0xd   : > { %v1589_v1 = vld [vmem:[%s2633_s1 + $0x38] sm:$0xff]   ;;  %1435 = vmatprep.subr.bf16.mxu0 %v1588_v0  ;;  %1547 = vmatprep.subr.bf16.mxu1 %v1588_v0  ;;  %v1591_v3 = vld [vmem:[%s2633_s1 + $0x30] sm:$0xff]   ;;  %v1593_v5 = vld [vmem:[%s2633_s1 + $0x28] sm:$0xff]   ;;  %s1434_s6 = sshll.u32 %s2656_s18, 3 }
   0xe   : > { %1436 = vmatpush3.bf16.msra.mxu0 %v1589_v1  ;;  %1555 = vmatpush3.bf16.msra.mxu1 %v1589_v1  ;;  %v1594_v6 = vld [vmem:[%s2633_s1 + $0x60] sm:$0xff]   ;;  %v1596_v8 = vld [vmem:[%s2633_s1 + $0x58] sm:$0xff]   ;;  %s1752_s11 = scalar_lea.vmem %s2632_s0, %s1434_s6  ;;  %v1598_v10 = vld [vmem:[%s2633_s1 + $0x50] sm:$0xff]   ;;  %s1812_s5 = scalar_lea.vmem %s2635_s3, %s1434_s6 }
   0xf   : > { %1437 = vmatprep.subr.bf16.mxu0 %v1590_v2  ;;  %1548 = vmatprep.subr.bf16.mxu1 %v1590_v2  ;;  %v1595_v7 = vld [vmem:[%s2633_s1 + $0x20] sm:$0xff]   ;;  %v1597_v9 = vld [vmem:[%s2633_s1 + $0x18] sm:$0xff]   ;;  %v1599_v12 = vld [vmem:[%s2633_s1 + $0x10] sm:$0xff]   ;;  %233 = vst.msk [vmem:[%s1812_s5] sm:$0xff] %vm232_vm0, %v1678_v48 }
  0x10   : > { %v1606_v11 = vld [vmem:[%s1752_s11 + $0x4] ss:$8 sps:$4 sm:$0xff]   ;;  %v1604_v18 = vld [vmem:[%s1752_s11] ss:$8 sps:$4 sm:$0xff]   ;;  %v1607_v19 = vld [vmem:[%s1752_s11 + $0x14] ss:$8 sps:$4 sm:$0xff]  }
  0x11   : > { %649 = vmatprep.mubr.bf16.mxu0 %v1606_v11  ;;  %v1600_v13 = vld [vmem:[%s2633_s1 + $0x48] sm:$0xff]   ;;  %v1602_v16 = vld [vmem:[%s2633_s1 + $0x40] sm:$0xff]   ;;  %v1622_v21 = vld [vmem:[%s1752_s11 + $0x94] ss:$8 sps:$4 sm:$0xff]   ;;  %234 = vst.msk [vmem:[%s1812_s5 + $0x8] sm:$0xff] %vm232_vm0, %v1678_v48 }
  0x12   : > { %1438 = vmatpush3.bf16.msra.mxu0 %v1591_v3  ;;  %1556 = vmatpush3.bf16.msra.mxu1 %v1591_v3  ;;  %v1618_v14 = vld [vmem:[%s1752_s11 + $0x84] ss:$8 sps:$4 sm:$0xff]   ;;  %v1616_v20 = vld [vmem:[%s1752_s11 + $0x80] ss:$8 sps:$4 sm:$0xff]   ;;  %v1609_v22 = vld [vmem:[%s1752_s11 + $0x10] ss:$8 sps:$4 sm:$0xff]  }
  0x13   : > { %1439 = vmatprep.subr.bf16.mxu0 %v1592_v4  ;;  %1549 = vmatprep.subr.bf16.mxu1 %v1592_v4  ;;  %v1601_v15 = vld [vmem:[%s2633_s1 + $0x8] sm:$0xff]   ;;  %v1603_v17 = vld [vmem:[%s2633_s1] sm:$0xff]   ;;  %v1624_v24 = vld [vmem:[%s1752_s11 + $0x90] ss:$8 sps:$4 sm:$0xff]   ;;  %235 = vst.msk [vmem:[%s1812_s5 + $0x10] sm:$0xff] %vm232_vm0, %v1678_v48 }
  0x14   : > { %713 = vmatprep.mubr.bf16.mxu1 %v1618_v14  ;;  %v1610_v23 = vld [vmem:[%s1752_s11 + $0x24] ss:$8 sps:$4 sm:$0xff]   ;;  %v1612_v26 = vld [vmem:[%s1752_s11 + $0x20] ss:$8 sps:$4 sm:$0xff]   ;;  %v1613_v27 = vld [vmem:[%s1752_s11 + $0x34] ss:$8 sps:$4 sm:$0xff]  }
  0x15   : > { %v1628_v25 = vld [vmem:[%s1752_s11 + $0xa4] ss:$8 sps:$4 sm:$0xff]   ;;  %v1630_v28 = vld [vmem:[%s1752_s11 + $0xa0] ss:$8 sps:$4 sm:$0xff]   ;;  %v1634_v29 = vld [vmem:[%s1752_s11 + $0xb4] ss:$8 sps:$4 sm:$0xff]  }
  0x16   : > { %1440 = vmatpush3.bf16.msra.mxu0 %v1593_v5  ;;  %1557 = vmatpush3.bf16.msra.mxu1 %v1593_v5  ;;  %v1615_v30 = vld [vmem:[%s1752_s11 + $0x30] ss:$8 sps:$4 sm:$0xff]   ;;  %v1619_v31 = vld [vmem:[%s1752_s11 + $0x44] ss:$8 sps:$4 sm:$0xff]   ;;  %v1621_v34 = vld [vmem:[%s1752_s11 + $0x40] ss:$8 sps:$4 sm:$0xff]  }
  0x17   : > { %1441 = vmatprep.subr.bf16.mxu0 %v1594_v6  ;;  %1550 = vmatprep.subr.bf16.mxu1 %v1594_v6  ;;  %v1636_v32 = vld [vmem:[%s1752_s11 + $0xb0] ss:$8 sps:$4 sm:$0xff]   ;;  %v1640_v33 = vld [vmem:[%s1752_s11 + $0xc4] ss:$8 sps:$4 sm:$0xff]   ;;  %v1625_v35 = vld [vmem:[%s1752_s11 + $0x54] ss:$8 sps:$4 sm:$0xff]  }
  0x18   : > { %v1642_v36 = vld [vmem:[%s1752_s11 + $0xc0] ss:$8 sps:$4 sm:$0xff]   ;;  %v1643_v37 = vld [vmem:[%s1752_s11 + $0xd4] ss:$8 sps:$4 sm:$0xff]   ;;  %v1627_v38 = vld [vmem:[%s1752_s11 + $0x50] ss:$8 sps:$4 sm:$0xff]  }
  0x19   : > { %v1631_v39 = vld [vmem:[%s1752_s11 + $0x64] ss:$8 sps:$4 sm:$0xff]   ;;  %v1645_v40 = vld [vmem:[%s1752_s11 + $0xd0] ss:$8 sps:$4 sm:$0xff]   ;;  %v1633_v42 = vld [vmem:[%s1752_s11 + $0x60] ss:$8 sps:$4 sm:$0xff]  }
  0x1a   : > { %1442 = vmatpush3.bf16.msra.mxu0 %v1595_v7  ;;  %1558 = vmatpush3.bf16.msra.mxu1 %v1595_v7  ;;  %v1646_v41 = vld [vmem:[%s1752_s11 + $0xe4] ss:$8 sps:$4 sm:$0xff]   ;;  %v1637_v43 = vld [vmem:[%s1752_s11 + $0x74] ss:$8 sps:$4 sm:$0xff]   ;;  %v1648_v44 = vld [vmem:[%s1752_s11 + $0xe0] ss:$8 sps:$4 sm:$0xff]  }
  0x1b   : > { %1443 = vmatprep.subr.bf16.mxu0 %v1596_v8  ;;  %1551 = vmatprep.subr.bf16.mxu1 %v1596_v8  ;;  %v1649_v45 = vld [vmem:[%s1752_s11 + $0xf4] ss:$8 sps:$4 sm:$0xff]   ;;  %v1639_v46 = vld [vmem:[%s1752_s11 + $0x70] ss:$8 sps:$4 sm:$0xff]   ;;  %236 = vst.msk [vmem:[%s1812_s5 + $0x18] sm:$0xff] %vm232_vm0, %v1678_v48  ;;  %237 = vst.msk [vmem:[%s1812_s5 + $0x20] sm:$0xff] %vm232_vm0, %v1678_v48 }
  0x1c   : > { %v1651_v47 = vld [vmem:[%s1752_s11 + $0xf0] ss:$8 sps:$4 sm:$0xff]   ;;  %238 = vst.msk [vmem:[%s1812_s5 + $0x28] sm:$0xff] %vm232_vm0, %v1678_v48  ;;  %239 = vst.msk [vmem:[%s1812_s5 + $0x30] sm:$0xff] %vm232_vm0, %v1678_v48  ;;  %v265_v51 = vld [vmem:[%s1812_s5] sm:$0xff] }
  0x1d   : > { %240 = vst.msk [vmem:[%s1812_s5 + $0x38] sm:$0xff] %vm232_vm0, %v1678_v48  ;;  %241 = vst.msk [vmem:[%s1812_s5 + $0x40] sm:$0xff] %vm232_vm0, %v1678_v48  ;;  %v266_v60 = vld [vmem:[%s1812_s5 + $0x8] sm:$0xff]  ;;  %v267_v6 = vld [vmem:[%s1812_s5 + $0x10] sm:$0xff] }
  0x1e   : > { %1444 = vmatpush3.bf16.msra.mxu0 %v1597_v9  ;;  %1559 = vmatpush3.bf16.msra.mxu1 %v1597_v9  ;;  %242 = vst.msk [vmem:[%s1812_s5 + $0x48] sm:$0xff] %vm232_vm0, %v1678_v48  ;;  %243 = vst.msk [vmem:[%s1812_s5 + $0x50] sm:$0xff] %vm232_vm0, %v1678_v48 }
  0x1f   : > { %1445 = vmatprep.subr.bf16.mxu0 %v1598_v10  ;;  %1552 = vmatprep.subr.bf16.mxu1 %v1598_v10  ;;  %244 = vst.msk [vmem:[%s1812_s5 + $0x58] sm:$0xff] %vm232_vm0, %v1678_v48  ;;  %245 = vst.msk [vmem:[%s1812_s5 + $0x60] sm:$0xff] %vm232_vm0, %v1678_v48 }
  0x20   : > { %246 = vst.msk [vmem:[%s1812_s5 + $0x68] sm:$0xff] %vm232_vm0, %v1678_v48  ;;  %247 = vst.msk [vmem:[%s1812_s5 + $0x70] sm:$0xff] %vm232_vm0, %v1678_v48 }
  0x21   : > { %248 = vst.msk [vmem:[%s1812_s5 + $0x78] sm:$0xff] %vm232_vm0, %v1678_v48  ;;  %249 = vst.msk [vmem:[%s1812_s5 + $0x80] sm:$0xff] %vm232_vm0, %v1678_v48 }
  0x22   : > { %1446 = vmatpush3.bf16.msra.mxu0 %v1599_v12  ;;  %1560 = vmatpush3.bf16.msra.mxu1 %v1599_v12  ;;  %250 = vst.msk [vmem:[%s1812_s5 + $0x88] sm:$0xff] %vm232_vm0, %v1678_v48  ;;  %251 = vst.msk [vmem:[%s1812_s5 + $0x90] sm:$0xff] %vm232_vm0, %v1678_v48 }
  0x23   : > { %1447 = vmatprep.subr.bf16.mxu0 %v1600_v13  ;;  %1553 = vmatprep.subr.bf16.mxu1 %v1600_v13  ;;  %252 = vst.msk [vmem:[%s1812_s5 + $0x98] sm:$0xff] %vm232_vm0, %v1678_v48  ;;  %253 = vst.msk [vmem:[%s1812_s5 + $0xa0] sm:$0xff] %vm232_vm0, %v1678_v48 }
  0x24   : > { %254 = vst.msk [vmem:[%s1812_s5 + $0xa8] sm:$0xff] %vm232_vm0, %v1678_v48  ;;  %255 = vst.msk [vmem:[%s1812_s5 + $0xb0] sm:$0xff] %vm232_vm0, %v1678_v48 }
  0x25   : > { %256 = vst.msk [vmem:[%s1812_s5 + $0xb8] sm:$0xff] %vm232_vm0, %v1678_v48  ;;  %257 = vst.msk [vmem:[%s1812_s5 + $0xc0] sm:$0xff] %vm232_vm0, %v1678_v48 }
  0x26   : > { %1448 = vmatpush3.bf16.msra.mxu0 %v1601_v15  ;;  %1561 = vmatpush3.bf16.msra.mxu1 %v1601_v15  ;;  %258 = vst.msk [vmem:[%s1812_s5 + $0xc8] sm:$0xff] %vm232_vm0, %v1678_v48  ;;  %259 = vst.msk [vmem:[%s1812_s5 + $0xd0] sm:$0xff] %vm232_vm0, %v1678_v48 }
  0x27   : > { %1449 = vmatprep.subr.bf16.mxu0 %v1602_v16  ;;  %1554 = vmatprep.subr.bf16.mxu1 %v1602_v16  ;;  %260 = vst.msk [vmem:[%s1812_s5 + $0xd8] sm:$0xff] %vm232_vm0, %v1678_v48  ;;  %261 = vst.msk [vmem:[%s1812_s5 + $0xe0] sm:$0xff] %vm232_vm0, %v1678_v48  ;;  %v268_v16 = vld [vmem:[%s1812_s5 + $0x18] sm:$0xff] }
  0x28   : > { %262 = vst.msk [vmem:[%s1812_s5 + $0xe8] sm:$0xff] %vm232_vm0, %v1678_v48  ;;  %263 = vst.msk [vmem:[%s1812_s5 + $0xf0] sm:$0xff] %vm232_vm0, %v1678_v48  ;;  %v281_v54 = vld [vmem:[%s1812_s5 + $0x80] sm:$0xff] }
  0x29   : > { %264 = vst.msk [vmem:[%s1812_s5 + $0xf8] sm:$0xff] %vm232_vm0, %v1678_v48  ;;  %v282_v0 = vld [vmem:[%s1812_s5 + $0x88] sm:$0xff]  ;;  %v283_v10 = vld [vmem:[%s1812_s5 + $0x90] sm:$0xff] }
  0x2a   : > { %1450 = vmatpush3.bf16.msra.mxu0 %v1603_v17  ;;  %1562 = vmatpush3.bf16.msra.mxu1 %v1603_v17 }
  0x2d   : > { %650 = vmatmul.mubr.bf16.vlgmr.msra.gmra.mxu0 %v1604_v18  ;;  %714 = vmatmul.mubr.bf16.vlgmr.msra.gmra.mxu1 %v1616_v20  ;;  %v284_v20 = vld [vmem:[%s1812_s5 + $0x98] sm:$0xff] }
  0x2e   : > { %657 = vmatprep.mubr.bf16.mxu0 %v1607_v19  ;;  %721 = vmatprep.mubr.bf16.mxu1 %v1622_v21 }
  0x35   : > { %658 = vmatmul.mubr.bf16.gmra.mxu0 %v1609_v22  ;;  %722 = vmatmul.mubr.bf16.gmra.mxu1 %v1624_v24 }
  0x36   : > { %665 = vmatprep.mubr.bf16.mxu0 %v1610_v23  ;;  %729 = vmatprep.mubr.bf16.mxu1 %v1628_v25 }
  0x3d   : > { %666 = vmatmul.mubr.bf16.gmra.mxu0 %v1612_v26  ;;  %730 = vmatmul.mubr.bf16.gmra.mxu1 %v1630_v28  ;;  %v269_v26 = vld [vmem:[%s1812_s5 + $0x20] sm:$0xff] }
  0x3e   : > { %673 = vmatprep.mubr.bf16.mxu0 %v1613_v27  ;;  %737 = vmatprep.mubr.bf16.mxu1 %v1634_v29 }
  0x45   : > { %674 = vmatmul.mubr.bf16.gmra.mxu0 %v1615_v30  ;;  %738 = vmatmul.mubr.bf16.gmra.mxu1 %v1636_v32  ;;  %v285_v30 = vld [vmem:[%s1812_s5 + $0xa0] sm:$0xff] }
  0x46   : > { %681 = vmatprep.mubr.bf16.mxu0 %v1619_v31  ;;  %745 = vmatprep.mubr.bf16.mxu1 %v1640_v33 }
  0x4d   : > { %682 = vmatmul.mubr.bf16.gmra.mxu0 %v1621_v34  ;;  %746 = vmatmul.mubr.bf16.gmra.mxu1 %v1642_v36  ;;  %v270_v36 = vld [vmem:[%s1812_s5 + $0x28] sm:$0xff] }
  0x4e   : > { %689 = vmatprep.mubr.bf16.mxu0 %v1625_v35  ;;  %753 = vmatprep.mubr.bf16.mxu1 %v1643_v37 }
  0x55   : > { %690 = vmatmul.mubr.bf16.gmra.mxu0 %v1627_v38  ;;  %754 = vmatmul.mubr.bf16.gmra.mxu1 %v1645_v40  ;;  %v286_v40 = vld [vmem:[%s1812_s5 + $0xa8] sm:$0xff] }
  0x56   : > { %697 = vmatprep.mubr.bf16.mxu0 %v1631_v39  ;;  %761 = vmatprep.mubr.bf16.mxu1 %v1646_v41 }
  0x5d   : > { %698 = vmatmul.mubr.bf16.gmra.mxu0 %v1633_v42  ;;  %762 = vmatmul.mubr.bf16.gmra.mxu1 %v1648_v44 }
  0x5e   : > { %705 = vmatprep.mubr.bf16.mxu0 %v1637_v43  ;;  %769 = vmatprep.mubr.bf16.mxu1 %v1649_v45 }
  0x65   : > { %706 = vmatmul.mubr.bf16.gmra.mxu0 %v1639_v46  ;;  %770 = vmatmul.mubr.bf16.gmra.mxu1 %v1651_v47  ;;  %v271_v46 = vld [vmem:[%s1812_s5 + $0x30] sm:$0xff] }
  0xed   : > { %v1451_v49 = vpop.f32.mrf.mxu0  ;;  %v1499_v50 = vpop.f32.mrf.mxu1 }
  0xef   : > { %v1452_v52 = vpop.f32.mrf.mxu0  ;;  %v1500_v55 = vpop.f32.mrf.mxu1 }
  0xf0   : > { %v1453_v53 = vadd.f32 %v1452_v52, %v1451_v49  ;;  %v1501_v57 = vadd.f32 %v1500_v55, %v1499_v50  ;;  %v287_v50 = vld [vmem:[%s1812_s5 + $0xb0] sm:$0xff] }
  0xf1   : > { %v1454_v56 = vpop.f32.mrf.mxu0  ;;  %v1502_v59 = vpop.f32.mrf.mxu1 }
  0xf2   : > { %v778_v58 = vadd.f32 %v1453_v53, %v265_v51  ;;  %v794_v62 = vadd.f32 %v1501_v57, %v281_v54 }
  0xf3   : > { %v1455_v61 = vpop.f32.mrf.mxu0  ;;  %v1503_v1 = vpop.f32.mrf.mxu1 }
  0xf4   : > { %811 = vst.msk [vmem:[%s1812_s5] sm:$0xff] %vm232_vm0, %v778_v58  ;;  %v1456_v63 = vadd.f32 %v1455_v61, %v1454_v56  ;;  %827 = vst.msk [vmem:[%s1812_s5 + $0x80] sm:$0xff] %vm232_vm0, %v794_v62  ;;  %v1504_v3 = vadd.f32 %v1503_v1, %v1502_v59  ;;  %v272_v56 = vld [vmem:[%s1812_s5 + $0x38] sm:$0xff] }
  0xf5   : > { %v1457_v2 = vpop.f32.mrf.mxu0  ;;  %v1505_v5 = vpop.f32.mrf.mxu1 }
  0xf6   : > { %v779_v4 = vadd.f32 %v1456_v63, %v266_v60  ;;  %v795_v8 = vadd.f32 %v1504_v3, %v282_v0  ;;  %v288_v60 = vld [vmem:[%s1812_s5 + $0xb8] sm:$0xff] }
  0xf7   : > { %v1458_v7 = vpop.f32.mrf.mxu0  ;;  %v1506_v11 = vpop.f32.mrf.mxu1 }
  0xf8   : > { %812 = vst.msk [vmem:[%s1812_s5 + $0x8] sm:$0xff] %vm232_vm0, %v779_v4  ;;  %v1459_v9 = vadd.f32 %v1458_v7, %v1457_v2  ;;  %828 = vst.msk [vmem:[%s1812_s5 + $0x88] sm:$0xff] %vm232_vm0, %v795_v8  ;;  %v1507_v13 = vadd.f32 %v1506_v11, %v1505_v5  ;;  %v273_v2 = vld [vmem:[%s1812_s5 + $0x40] sm:$0xff] }
  0xf9   : > { %v1460_v12 = vpop.f32.mrf.mxu0  ;;  %v1508_v15 = vpop.f32.mrf.mxu1 }
  0xfa   : > { %v780_v14 = vadd.f32 %v1459_v9, %v267_v6  ;;  %v796_v18 = vadd.f32 %v1507_v13, %v283_v10  ;;  %v289_v6 = vld [vmem:[%s1812_s5 + $0xc0] sm:$0xff] }
  0xfb   : > { %v1461_v17 = vpop.f32.mrf.mxu0  ;;  %v1509_v21 = vpop.f32.mrf.mxu1  ;;  %v1932_v13 = vld [vmem:[%s2634_s2] ss:$0 sm:$0xff] }
  0xfc   : > { %813 = vst.msk [vmem:[%s1812_s5 + $0x10] sm:$0xff] %vm232_vm0, %v780_v14  ;;  %v1462_v19 = vadd.f32 %v1461_v17, %v1460_v12  ;;  %829 = vst.msk [vmem:[%s1812_s5 + $0x90] sm:$0xff] %vm232_vm0, %v796_v18  ;;  %v1510_v23 = vadd.f32 %v1509_v21, %v1508_v15  ;;  %v274_v14 = vld [vmem:[%s1812_s5 + $0x48] sm:$0xff]  ;;  %v846_v17 = vld [vmem:[%s1812_s5] sm:$0xff] }
  0xfd   : > { %v1463_v22 = vpop.f32.mrf.mxu0  ;;  %v1511_v25 = vpop.f32.mrf.mxu1 }
  0xfe   : > { %v781_v24 = vadd.f32 %v1462_v19, %v268_v16  ;;  %v797_v28 = vadd.f32 %v1510_v23, %v284_v20  ;;  %v290_v20 = vld [vmem:[%s1812_s5 + $0xc8] sm:$0xff] }
  0xff   : > { %v1464_v27 = vpop.f32.mrf.mxu0  ;;  %v1512_v31 = vpop.f32.mrf.mxu1  ;;  %v847_v10 = vld [vmem:[%s1812_s5 + $0x8] sm:$0xff] }
 0x100   : > { %814 = vst.msk [vmem:[%s1812_s5 + $0x18] sm:$0xff] %vm232_vm0, %v781_v24  ;;  %v1465_v29 = vadd.f32 %v1464_v27, %v1463_v22  ;;  %830 = vst.msk [vmem:[%s1812_s5 + $0x98] sm:$0xff] %vm232_vm0, %v797_v28  ;;  %v1513_v33 = vadd.f32 %v1512_v31, %v1511_v25  ;;  %v1941_v22 = vadd.f32 %v1932_v13, %v847_v10 }
 0x101   : > { %v1466_v32 = vpop.f32.mrf.mxu0  ;;  %v1514_v35 = vpop.f32.mrf.mxu1  ;;  %v1946_v27 = vadd.f32 %v1932_v13, %v846_v17 }
 0x102   : > { %v782_v34 = vadd.f32 %v1465_v29, %v269_v26  ;;  %v798_v38 = vadd.f32 %v1513_v33, %v285_v30  ;;  %v275_v30 = vld [vmem:[%s1812_s5 + $0x50] sm:$0xff] }
 0x103   : > { %v1467_v37 = vpop.f32.mrf.mxu0  ;;  %v1515_v41 = vpop.f32.mrf.mxu1  ;;  %v848_v18 = vld [vmem:[%s1812_s5 + $0x10] sm:$0xff] }
 0x104   : > { %815 = vst.msk [vmem:[%s1812_s5 + $0x20] sm:$0xff] %vm232_vm0, %v782_v34  ;;  %v1468_v39 = vadd.f32 %v1467_v37, %v1466_v32  ;;  %831 = vst.msk [vmem:[%s1812_s5 + $0xa0] sm:$0xff] %vm232_vm0, %v798_v38  ;;  %v1516_v43 = vadd.f32 %v1515_v41, %v1514_v35  ;;  %v1949_v28 = vadd.f32 %v1932_v13, %v848_v18  ;;  %v291_v34 = vld [vmem:[%s1812_s5 + $0xd0] sm:$0xff] }
 0x105   : > { %v1469_v42 = vpop.f32.mrf.mxu0  ;;  %v1517_v45 = vpop.f32.mrf.mxu1 }
 0x106   : > { %v783_v44 = vadd.f32 %v1468_v39, %v270_v36  ;;  %v799_v48 = vadd.f32 %v1516_v43, %v286_v40  ;;  %v988_v36 = vmul.f32 %v1941_v22, %v1941_v22  ;;  %v987_v43 = vmul.f32 %v1946_v27, %v1946_v27 }
 0x107   : > { %v1470_v47 = vpop.f32.mrf.mxu0  ;;  %v1518_v51 = vpop.f32.mrf.mxu1  ;;  %v849_v29 = vld [vmem:[%s1812_s5 + $0x18] sm:$0xff] }
 0x108   : > { %816 = vst.msk [vmem:[%s1812_s5 + $0x28] sm:$0xff] %vm232_vm0, %v783_v44  ;;  %v1471_v49 = vadd.f32 %v1470_v47, %v1469_v42  ;;  %832 = vst.msk [vmem:[%s1812_s5 + $0xa8] sm:$0xff] %vm232_vm0, %v799_v48  ;;  %v1519_v53 = vadd.f32 %v1518_v51, %v1517_v45  ;;  %v1962_v40 = vadd.f32 %v1932_v13, %v849_v29 }
 0x109   : > { %v1472_v52 = vpop.f32.mrf.mxu0  ;;  %v1520_v55 = vpop.f32.mrf.mxu1  ;;  %v989_v44 = vmul.f32 %v1949_v28, %v1949_v28 }
 0x10a   : > { %v784_v54 = vadd.f32 %v1471_v49, %v271_v46  ;;  %v800_v58 = vadd.f32 %v1519_v53, %v287_v50  ;;  %v276_v46 = vld [vmem:[%s1812_s5 + $0x58] sm:$0xff]  ;;  %v918_v49 = vsel %vm232_vm0, %v1941_v22, 0.0 }
 0x10b   : > { %v1473_v57 = vpop.f32.mrf.mxu0  ;;  %v1521_v61 = vpop.f32.mrf.mxu1  ;;  %v850_v37 = vld [vmem:[%s1812_s5 + $0x20] sm:$0xff] }
 0x10c   : > { %817 = vst.msk [vmem:[%s1812_s5 + $0x30] sm:$0xff] %vm232_vm0, %v784_v54  ;;  %v1474_v59 = vadd.f32 %v1473_v57, %v1472_v52  ;;  %833 = vst.msk [vmem:[%s1812_s5 + $0xb0] sm:$0xff] %vm232_vm0, %v800_v58  ;;  %v1522_v63 = vadd.f32 %v1521_v61, %v1520_v55  ;;  %v1973_v50 = vadd.f32 %v1932_v13, %v850_v37  ;;  %v292_v52 = vld [vmem:[%s1812_s5 + $0xd8] sm:$0xff]  ;;  %v917_v54 = vsel %vm232_vm0, %v1946_v27, 0.0 }
 0x10d   : > { %v1475_v62 = vpop.f32.mrf.mxu0  ;;  %v1523_v1 = vpop.f32.mrf.mxu1  ;;  %v1020_v55 = vsel %vm232_vm0, %v988_v36, 0.0 }
 0x10e   : > { %v785_v0 = vadd.f32 %v1474_v59, %v272_v56  ;;  %v801_v4 = vadd.f32 %v1522_v63, %v288_v60  ;;  %v920_v59 = vsel %vm232_vm0, %v1949_v28, 0.0  ;;  %v990_v60 = vmul.f32 %v1962_v40, %v1962_v40 }
 0x10f   : > { %v1476_v3 = vpop.f32.mrf.mxu0  ;;  %v1524_v7 = vpop.f32.mrf.mxu1  ;;  %v851_v45 = vld [vmem:[%s1812_s5 + $0x28] sm:$0xff] }
 0x110   : > { %818 = vst.msk [vmem:[%s1812_s5 + $0x38] sm:$0xff] %vm232_vm0, %v785_v0  ;;  %v1477_v5 = vadd.f32 %v1476_v3, %v1475_v62  ;;  %834 = vst.msk [vmem:[%s1812_s5 + $0xb8] sm:$0xff] %vm232_vm0, %v801_v4  ;;  %v1525_v9 = vadd.f32 %v1524_v7, %v1523_v1  ;;  %v1989_v61 = vadd.f32 %v1932_v13, %v851_v45  ;;  %v1019_v1 = vsel %vm232_vm0, %v987_v43, 0.0  ;;  %v277_v4 = vld [vmem:[%s1812_s5 + $0x60] sm:$0xff] }
 0x111   : > { %v1478_v8 = vpop.f32.mrf.mxu0  ;;  %v1526_v12 = vpop.f32.mrf.mxu1  ;;  %v1022_v3 = vsel %vm232_vm0, %v989_v44, 0.0  ;;  %v922_v7 = vsel %vm232_vm0, %v1962_v40, 0.0 }
 0x112   : > { %v786_v11 = vadd.f32 %v1477_v5, %v273_v2  ;;  %v802_v16 = vadd.f32 %v1525_v9, %v289_v6  ;;  %v919_v2 = vadd.f32 %v918_v49, %v917_v54  ;;  %v926_v36 = vsel %vm232_vm0, %v1989_v61, 0.0 }
 0x113   : > { %v1479_v15 = vpop.f32.mrf.mxu0  ;;  %v1527_v21 = vpop.f32.mrf.mxu1  ;;  %v852_v56 = vld [vmem:[%s1812_s5 + $0x30] sm:$0xff] }
 0x114   : > { %819 = vst.msk [vmem:[%s1812_s5 + $0x40] sm:$0xff] %vm232_vm0, %v786_v11  ;;  %v1480_v19 = vadd.f32 %v1479_v15, %v1478_v8  ;;  %835 = vst.msk [vmem:[%s1812_s5 + $0xc0] sm:$0xff] %vm232_vm0, %v802_v16  ;;  %v1528_v24 = vadd.f32 %v1527_v21, %v1526_v12  ;;  %v991_v8 = vmul.f32 %v1973_v50, %v1973_v50  ;;  %v293_v12 = vld [vmem:[%s1812_s5 + $0xe0] sm:$0xff]  ;;  %v924_v21 = vsel %vm232_vm0, %v1973_v50, 0.0 }
 0x115   : > { %v1481_v23 = vpop.f32.mrf.mxu0  ;;  %v1529_v26 = vpop.f32.mrf.mxu1  ;;  %v2000_v9 = vadd.f32 %v1932_v13, %v852_v56  ;;  %v1021_v15 = vadd.f32 %v1020_v55, %v1019_v1  ;;  %v921_v16 = vadd.f32 %v920_v59, %v919_v2  ;;  %v295_v2 = vld [vmem:[%s1812_s5 + $0xf0] sm:$0xff] }
 0x116   : > { %v787_v25 = vadd.f32 %v1480_v19, %v274_v14  ;;  %v803_v32 = vadd.f32 %v1528_v24, %v290_v20  ;;  %v1024_v20 = vsel %vm232_vm0, %v990_v60, 0.0 }
 0x117   : > { %v1482_v31 = vpop.f32.mrf.mxu0  ;;  %v1530_v35 = vpop.f32.mrf.mxu1  ;;  %v853_v62 = vld [vmem:[%s1812_s5 + $0x38] sm:$0xff]  ;;  %v923_v29 = vadd.f32 %v922_v7, %v921_v16  ;;  %v993_v37 = vmul.f32 %v2000_v9, %v2000_v9  ;;  %v928_v49 = vsel %vm232_vm0, %v2000_v9, 0.0 }
 0x118   : > { %820 = vst.msk [vmem:[%s1812_s5 + $0x48] sm:$0xff] %vm232_vm0, %v787_v25  ;;  %v1483_v33 = vadd.f32 %v1482_v31, %v1481_v23  ;;  %836 = vst.msk [vmem:[%s1812_s5 + $0xc8] sm:$0xff] %vm232_vm0, %v803_v32  ;;  %v1531_v39 = vadd.f32 %v1530_v35, %v1529_v26  ;;  %v2007_v17 = vadd.f32 %v1932_v13, %v853_v62  ;;  %v278_v32 = vld [vmem:[%s1812_s5 + $0x68] sm:$0xff]  ;;  %v1026_v35 = vsel %vm232_vm0, %v991_v8, 0.0 }
 0x119   : > { %v1484_v38 = vpop.f32.mrf.mxu0  ;;  %v1532_v42 = vpop.f32.mrf.mxu1  ;;  %v992_v23 = vmul.f32 %v1989_v61, %v1989_v61  ;;  %v1023_v26 = vadd.f32 %v1022_v3, %v1021_v15  ;;  %v925_v43 = vadd.f32 %v924_v21, %v923_v29  ;;  %v1030_v62 = vsel %vm232_vm0, %v993_v37, 0.0  ;;  %v280_v21 = vld [vmem:[%s1812_s5 + $0x78] sm:$0xff] }
 0x11a   : > { %v788_v41 = vadd.f32 %v1483_v33, %v275_v30  ;;  %v804_v48 = vadd.f32 %v1531_v39, %v291_v34  ;;  %v294_v39 = vld [vmem:[%s1812_s5 + $0xe8] sm:$0xff]  ;;  %v994_v44 = vmul.f32 %v2007_v17, %v2007_v17 }
 0x11b   : > { %v1485_v47 = vpop.f32.mrf.mxu0  ;;  %v1533_v53 = vpop.f32.mrf.mxu1  ;;  %v854_v10 = vld [vmem:[%s1812_s5 + $0x40] sm:$0xff]  ;;  %v927_v55 = vadd.f32 %v926_v36, %v925_v43 }
 0x11c   : > { %821 = vst.msk [vmem:[%s1812_s5 + $0x50] sm:$0xff] %vm232_vm0, %v788_v41  ;;  %v1486_v51 = vadd.f32 %v1485_v47, %v1484_v38  ;;  %837 = vst.msk [vmem:[%s1812_s5 + $0xd0] sm:$0xff] %vm232_vm0, %v804_v48  ;;  %v1534_v58 = vadd.f32 %v1533_v53, %v1532_v42  ;;  %v2017_v30 = vadd.f32 %v1932_v13, %v854_v10  ;;  %v1028_v48 = vsel %vm232_vm0, %v992_v23, 0.0 }
 0x11d   : > { %v1487_v57 = vpop.f32.mrf.mxu0  ;;  %v1535_v0 = vpop.f32.mrf.mxu1  ;;  %v1025_v42 = vadd.f32 %v1024_v20, %v1023_v26 }
 0x11e   : > { %v789_v63 = vadd.f32 %v1486_v51, %v276_v46  ;;  %v805_v6 = vadd.f32 %v1534_v58, %v292_v52  ;;  %v995_v56 = vmul.f32 %v2017_v30, %v2017_v30  ;;  %v279_v58 = vld [vmem:[%s1812_s5 + $0x70] sm:$0xff]  ;;  %v932_v10 = vsel %vm232_vm0, %v2017_v30, 0.0 }
 0x11f   : > { %v1488_v5 = vpop.f32.mrf.mxu0  ;;  %v1536_v14 = vpop.f32.mrf.mxu1  ;;  %v855_v31 = vld [vmem:[%s1812_s5 + $0x48] sm:$0xff]  ;;  %v1027_v54 = vadd.f32 %v1026_v35, %v1025_v42 }
 0x120   : > { %822 = vst.msk [vmem:[%s1812_s5 + $0x58] sm:$0xff] %vm232_vm0, %v789_v63  ;;  %v1489_v11 = vadd.f32 %v1488_v5, %v1487_v57  ;;  %838 = vst.msk [vmem:[%s1812_s5 + $0xd8] sm:$0xff] %vm232_vm0, %v805_v6  ;;  %v1537_v19 = vadd.f32 %v1536_v14, %v1535_v0  ;;  %v2038_v51 = vadd.f32 %v1932_v13, %v855_v31  ;;  %v930_v63 = vsel %vm232_vm0, %v2007_v17, 0.0 }
 0x121   : > { %v1490_v18 = vpop.f32.mrf.mxu0  ;;  %v1538_v25 = vpop.f32.mrf.mxu1  ;;  %v929_v5 = vadd.f32 %v928_v49, %v927_v55  ;;  %v1032_v6 = vsel %vm232_vm0, %v994_v44, 0.0 }
 0x122   : > { %v790_v24 = vadd.f32 %v1489_v11, %v277_v4  ;;  %v806_v34 = vadd.f32 %v1537_v19, %v293_v12  ;;  %v1029_v4 = vadd.f32 %v1028_v48, %v1027_v54  ;;  %v996_v11 = vmul.f32 %v2038_v51, %v2038_v51 }
 0x123   : > { %v1491_v33 = vpop.f32.mrf.mxu0  ;;  %v1539_v41 = vpop.f32.mrf.mxu1  ;;  %v856_v45 = vld [vmem:[%s1812_s5 + $0x50] sm:$0xff]  ;;  %v1034_v19 = vsel %vm232_vm0, %v995_v56, 0.0 }
 0x124   : > { %823 = vst.msk [vmem:[%s1812_s5 + $0x60] sm:$0xff] %vm232_vm0, %v790_v24  ;;  %v1492_v38 = vadd.f32 %v1491_v33, %v1490_v18  ;;  %839 = vst.msk [vmem:[%s1812_s5 + $0xe0] sm:$0xff] %vm232_vm0, %v806_v34  ;;  %v1540_v47 = vadd.f32 %v1539_v41, %v1538_v25  ;;  %v2048_v0 = vadd.f32 %v1932_v13, %v856_v45  ;;  %v934_v25 = vsel %vm232_vm0, %v2038_v51, 0.0 }
 0x125   : > { %v1493_v46 = vpop.f32.mrf.mxu0  ;;  %v1541_v53 = vpop.f32.mrf.mxu1  ;;  %v1031_v16 = vadd.f32 %v1030_v62, %v1029_v4  ;;  %v931_v18 = vadd.f32 %v930_v63, %v929_v5  ;;  %v1036_v37 = vsel %vm232_vm0, %v996_v11, 0.0 }
 0x126   : > { %v791_v52 = vadd.f32 %v1492_v38, %v278_v32  ;;  %v807_v60 = vadd.f32 %v1540_v47, %v294_v39  ;;  %v997_v26 = vmul.f32 %v2048_v0, %v2048_v0  ;;  %v296_v32 = vld [vmem:[%s1812_s5 + $0xf8] sm:$0xff]  ;;  %v936_v38 = vsel %vm232_vm0, %v2048_v0, 0.0 }
 0x127   : > { %v857_v57 = vld [vmem:[%s1812_s5 + $0x58] sm:$0xff]  ;;  %v1494_v59 = vpop.f32.mrf.mxu0  ;;  %v1542_v3 = vpop.f32.mrf.mxu1  ;;  %v1033_v34 = vadd.f32 %v1032_v6, %v1031_v16  ;;  %v933_v35 = vadd.f32 %v932_v10, %v931_v18  ;;  %v864_v10 = vld [vmem:[%s1812_s5 + $0x90] sm:$0xff] }
 0x128   : > { %824 = vst.msk [vmem:[%s1812_s5 + $0x68] sm:$0xff] %vm232_vm0, %v791_v52  ;;  %v1495_v1 = vadd.f32 %v1494_v59, %v1493_v46  ;;  %840 = vst.msk [vmem:[%s1812_s5 + $0xe8] sm:$0xff] %vm232_vm0, %v807_v60  ;;  %v1543_v8 = vadd.f32 %v1542_v3, %v1541_v53  ;;  %v2061_v12 = vadd.f32 %v1932_v13, %v857_v57  ;;  %v1038_v46 = vsel %vm232_vm0, %v997_v26, 0.0  ;;  %v862_v57 = vld [vmem:[%s1812_s5 + $0x80] sm:$0xff] }
 0x129   : > { %v1496_v7 = vpop.f32.mrf.mxu0  ;;  %v1544_v15 = vpop.f32.mrf.mxu1  ;;  %v1035_v42 = vadd.f32 %v1034_v19, %v1033_v34  ;;  %v935_v43 = vadd.f32 %v934_v25, %v933_v35  ;;  %v2111_v5 = vadd.f32 %v1932_v13, %v862_v57  ;;  %v2131_v25 = vadd.f32 %v1932_v13, %v864_v10  ;;  %v869_v57 = vld [vmem:[%s1812_s5 + $0xb8] sm:$0xff] }
 0x12a   : > { %v792_v14 = vadd.f32 %v1495_v1, %v279_v58  ;;  %v808_v24 = vadd.f32 %v1543_v8, %v295_v2  ;;  %v998_v39 = vmul.f32 %v2061_v12, %v2061_v12  ;;  %v938_v47 = vsel %vm232_vm0, %v2061_v12, 0.0  ;;  %v863_v2 = vld [vmem:[%s1812_s5 + $0x88] sm:$0xff] }
 0x12b   : > { %v858_v20 = vld [vmem:[%s1812_s5 + $0x60] sm:$0xff]  ;;  %v1497_v23 = vpop.f32.mrf.mxu0  ;;  %v1545_v33 = vpop.f32.mrf.mxu1  ;;  %v1037_v52 = vadd.f32 %v1036_v37, %v1035_v42  ;;  %v937_v53 = vadd.f32 %v936_v38, %v935_v43  ;;  %v2121_v16 = vadd.f32 %v1932_v13, %v863_v2  ;;  %v948_v35 = vsel %vm232_vm0, %v2111_v5, 0.0 }
 0x12c   : > { %v2071_v29 = vadd.f32 %v1932_v13, %v858_v20  ;;  %825 = vst.msk [vmem:[%s1812_s5 + $0x70] sm:$0xff] %vm232_vm0, %v792_v14  ;;  %v1498_v31 = vadd.f32 %v1497_v23, %v1496_v7  ;;  %841 = vst.msk [vmem:[%s1812_s5 + $0xf0] sm:$0xff] %vm232_vm0, %v808_v24  ;;  %v1546_v36 = vadd.f32 %v1545_v33, %v1544_v15  ;;  %v1040_v54 = vsel %vm232_vm0, %v998_v39, 0.0  ;;  %v865_v20 = vld [vmem:[%s1812_s5 + $0x98] sm:$0xff]  ;;  %v867_v39 = vld [vmem:[%s1812_s5 + $0xa8] sm:$0xff] }
 0x12d   : > { %v1039_v58 = vadd.f32 %v1038_v46, %v1037_v52  ;;  %v939_v59 = vadd.f32 %v938_v47, %v937_v53  ;;  %v1003_v24 = vmul.f32 %v2111_v5, %v2111_v5  ;;  %v2143_v37 = vadd.f32 %v1932_v13, %v865_v20  ;;  %v868_v47 = vld [vmem:[%s1812_s5 + $0xb0] sm:$0xff] }
 0x12e   : > { %v793_v41 = vadd.f32 %v1498_v31, %v280_v21  ;;  %v809_v45 = vadd.f32 %v1546_v36, %v296_v32  ;;  %v999_v48 = vmul.f32 %v2071_v29, %v2071_v29  ;;  %v940_v55 = vsel %vm232_vm0, %v2071_v29, 0.0  ;;  %v866_v32 = vld [vmem:[%s1812_s5 + $0xa0] sm:$0xff] }
 0x12f   : > { %v859_v44 = vld [vmem:[%s1812_s5 + $0x68] sm:$0xff]  ;;  %v1041_v3 = vadd.f32 %v1040_v54, %v1039_v58  ;;  %v941_v4 = vadd.f32 %v940_v55, %v939_v59  ;;  %v1004_v36 = vmul.f32 %v2121_v16, %v2121_v16  ;;  %v1050_v43 = vsel %vm232_vm0, %v1003_v24, 0.0 }
 0x130   : > { %v2090_v49 = vadd.f32 %v1932_v13, %v859_v44  ;;  %826 = vst.msk [vmem:[%s1812_s5 + $0x78] sm:$0xff] %vm232_vm0, %v793_v41  ;;  %842 = vst.msk [vmem:[%s1812_s5 + $0xf8] sm:$0xff] %vm232_vm0, %v809_v45  ;;  %v1042_v62 = vsel %vm232_vm0, %v999_v48, 0.0  ;;  %v950_v44 = vsel %vm232_vm0, %v2121_v16, 0.0  ;;  %v1005_v45 = vmul.f32 %v2131_v25, %v2131_v25 }
 0x131   : > { %v1043_v11 = vadd.f32 %v1042_v62, %v1041_v3  ;;  %v2153_v46 = vadd.f32 %v1932_v13, %v866_v32  ;;  %v1052_v53 = vsel %vm232_vm0, %v1004_v36, 0.0  ;;  %v952_v54 = vsel %vm232_vm0, %v2131_v25, 0.0  ;;  %v870_v3 = vld [vmem:[%s1812_s5 + $0xc0] sm:$0xff] }
 0x132   : > { %v1000_v56 = vmul.f32 %v2090_v49, %v2090_v49  ;;  %v942_v63 = vsel %vm232_vm0, %v2090_v49, 0.0  ;;  %v1006_v55 = vmul.f32 %v2143_v37, %v2143_v37  ;;  %v954_v62 = vsel %vm232_vm0, %v2143_v37, 0.0 }
 0x133   : > { %v860_v60 = vld [vmem:[%s1812_s5 + $0x70] sm:$0xff]  ;;  %v943_v14 = vadd.f32 %v942_v63, %v941_v4  ;;  %v1007_v63 = vmul.f32 %v2153_v46, %v2153_v46  ;;  %v2171_v2 = vadd.f32 %v1932_v13, %v868_v47  ;;  %v2189_v24 = vadd.f32 %v1932_v13, %v870_v3  ;;  %v874_v47 = vld [vmem:[%s1812_s5 + $0xe0] sm:$0xff] }
 0x134   : > { %v2107_v1 = vadd.f32 %v1932_v13, %v860_v60  ;;  %v1044_v6 = vsel %vm232_vm0, %v1000_v56, 0.0  ;;  %v2162_v56 = vadd.f32 %v1932_v13, %v867_v39  ;;  %v1054_v60 = vsel %vm232_vm0, %v1005_v45, 0.0 }
 0x135   : > { %v1045_v21 = vadd.f32 %v1044_v6, %v1043_v11  ;;  %v2180_v11 = vadd.f32 %v1932_v13, %v869_v57  ;;  %v1058_v20 = vsel %vm232_vm0, %v1007_v63, 0.0 }
 0x136   : > { %v944_v7 = vsel %vm232_vm0, %v2107_v1, 0.0  ;;  %v1001_v8 = vmul.f32 %v2107_v1, %v2107_v1  ;;  %v1008_v10 = vmul.f32 %v2162_v56, %v2162_v56 }
 0x137   : > { %v861_v15 = vld [vmem:[%s1812_s5 + $0x78] sm:$0xff]  ;;  %v945_v23 = vadd.f32 %v944_v7, %v943_v14  ;;  %v1056_v7 = vsel %vm232_vm0, %v1006_v55, 0.0  ;;  %v871_v14 = vld [vmem:[%s1812_s5 + $0xc8] sm:$0xff]  ;;  %v962_v45 = vsel %vm232_vm0, %v2180_v11, 0.0 }
 0x138   : > { %v1046_v18 = vsel %vm232_vm0, %v1001_v8, 0.0  ;;  %v2125_v19 = vadd.f32 %v1932_v13, %v861_v15  ;;  %v956_v8 = vsel %vm232_vm0, %v2153_v46, 0.0  ;;  %v2198_v36 = vadd.f32 %v1932_v13, %v871_v14 }
 0x139   : > { %v1047_v33 = vadd.f32 %v1046_v18, %v1045_v21  ;;  %v958_v21 = vsel %vm232_vm0, %v2162_v56, 0.0 }
 0x13a   : > { %v946_v26 = vsel %vm232_vm0, %v2125_v19, 0.0  ;;  %v1002_v31 = vmul.f32 %v2125_v19, %v2125_v19  ;;  %v1012_v55 = vmul.f32 %v2198_v36, %v2198_v36  ;;  %v966_v63 = vsel %vm232_vm0, %v2198_v36, 0.0 }
 0x13b   : > { %v947_v34 = vadd.f32 %v946_v26, %v945_v23  ;;  %v1009_v23 = vmul.f32 %v2171_v2, %v2171_v2  ;;  %v872_v26 = vld [vmem:[%s1812_s5 + $0xd0] sm:$0xff] }
 0x13c   : > { %v1048_v38 = vsel %vm232_vm0, %v1002_v31, 0.0 }
 0x13d   : > { %v949_v41 = vadd.f32 %v948_v35, %v947_v34  ;;  %v1049_v42 = vadd.f32 %v1048_v38, %v1047_v33  ;;  %v1060_v33 = vsel %vm232_vm0, %v1008_v10, 0.0  ;;  %v960_v34 = vsel %vm232_vm0, %v2171_v2, 0.0  ;;  %v873_v38 = vld [vmem:[%s1812_s5 + $0xd8] sm:$0xff] }
 0x13e   : > { %v1010_v35 = vmul.f32 %v2180_v11, %v2180_v11 }
 0x13f   : > { %v951_v48 = vadd.f32 %v950_v44, %v949_v41  ;;  %v1051_v52 = vadd.f32 %v1050_v43, %v1049_v42  ;;  %v1062_v42 = vsel %vm232_vm0, %v1009_v23, 0.0  ;;  %v1011_v43 = vmul.f32 %v2189_v24, %v2189_v24 }
 0x140   : > { %v2205_v44 = vadd.f32 %v1932_v13, %v872_v26  ;;  %v1064_v57 = vsel %vm232_vm0, %v1010_v35, 0.0 }
 0x141   : > { %v953_v58 = vadd.f32 %v952_v54, %v951_v48  ;;  %v1053_v59 = vadd.f32 %v1052_v53, %v1051_v52  ;;  %v2211_v53 = vadd.f32 %v1932_v13, %v873_v38  ;;  %v964_v54 = vsel %vm232_vm0, %v2189_v24, 0.0 }
 0x142   : > { %v1013_v3 = vmul.f32 %v2205_v44, %v2205_v44  ;;  %v968_v14 = vsel %vm232_vm0, %v2205_v44, 0.0 }
 0x143   : > { %v1055_v4 = vadd.f32 %v1054_v60, %v1053_v59  ;;  %v955_v6 = vadd.f32 %v954_v62, %v953_v58  ;;  %v875_v58 = vld [vmem:[%s1812_s5 + $0xe8] sm:$0xff]  ;;  %v2220_v62 = vadd.f32 %v1932_v13, %v874_v47 }
 0x144   : > { %v2229_v10 = vadd.f32 %v1932_v13, %v875_v58 }
 0x145   : > { %v957_v15 = vadd.f32 %v956_v8, %v955_v6  ;;  %v1057_v18 = vadd.f32 %v1056_v7, %v1055_v4  ;;  %v1066_v4 = vsel %vm232_vm0, %v1011_v43, 0.0  ;;  %v876_v6 = vld [vmem:[%s1812_s5 + $0xf0] sm:$0xff] }
 0x146   : > { %v2238_v26 = vadd.f32 %v1932_v13, %v876_v6  ;;  %v974_v47 = vsel %vm232_vm0, %v2229_v10, 0.0 }
 0x147   : > { %v959_v31 = vadd.f32 %v958_v21, %v957_v15  ;;  %v1059_v32 = vadd.f32 %v1058_v20, %v1057_v18  ;;  %v1014_v15 = vmul.f32 %v2211_v53, %v2211_v53  ;;  %v1068_v18 = vsel %vm232_vm0, %v1012_v55, 0.0  ;;  %v877_v20 = vld [vmem:[%s1812_s5 + $0xf8] sm:$0xff] }
 0x148   : > { %v2246_v38 = vadd.f32 %v1932_v13, %v877_v20  ;;  %v976_v55 = vsel %vm232_vm0, %v2238_v26, 0.0 }
 0x149   : > { %v961_v39 = vadd.f32 %v960_v34, %v959_v31  ;;  %v1061_v41 = vadd.f32 %v1060_v33, %v1059_v32  ;;  %v970_v31 = vsel %vm232_vm0, %v2211_v53, 0.0  ;;  %v1015_v32 = vmul.f32 %v2220_v62, %v2220_v62 }
 0x14a   : > { %v1070_v33 = vsel %vm232_vm0, %v1013_v3, 0.0 }
 0x14b   : > { %v963_v48 = vadd.f32 %v962_v45, %v961_v39  ;;  %v1063_v52 = vadd.f32 %v1062_v42, %v1061_v41  ;;  %v972_v39 = vsel %vm232_vm0, %v2220_v62, 0.0  ;;  %v1016_v41 = vmul.f32 %v2229_v10, %v2229_v10 }
 0x14c   : > { %v1072_v42 = vsel %vm232_vm0, %v1014_v15, 0.0 }
 0x14d   : > { %v965_v59 = vadd.f32 %v964_v54, %v963_v48  ;;  %v1065_v60 = vadd.f32 %v1064_v57, %v1063_v52  ;;  %v1017_v48 = vmul.f32 %v2238_v26, %v2238_v26  ;;  %v1074_v52 = vsel %vm232_vm0, %v1015_v32, 0.0 }
 0x14e   : > { %v1018_v57 = vmul.f32 %v2246_v38, %v2246_v38  ;;  %v1076_v58 = vsel %vm232_vm0, %v1016_v41, 0.0 }
 0x14f   : > { %v967_v7 = vadd.f32 %v966_v63, %v965_v59  ;;  %v1067_v8 = vadd.f32 %v1066_v4, %v1065_v60  ;;  %v978_v63 = vsel %vm232_vm0, %v2246_v38, 0.0  ;;  %v1078_v3 = vsel %vm232_vm0, %v1017_v48, 0.0 }
 0x151   : > { %v969_v21 = vadd.f32 %v968_v14, %v967_v7  ;;  %v1069_v23 = vadd.f32 %v1068_v18, %v1067_v8  ;;  %v1080_v7 = vsel %vm232_vm0, %v1018_v57, 0.0 }
 0x153   : > { %v971_v34 = vadd.f32 %v970_v31, %v969_v21  ;;  %v1071_v35 = vadd.f32 %v1070_v33, %v1069_v23 }
 0x155   : > { %v973_v43 = vadd.f32 %v972_v39, %v971_v34  ;;  %v1073_v45 = vadd.f32 %v1072_v42, %v1071_v35 }
 0x157   : > { %v975_v13 = vadd.f32 %v974_v47, %v973_v43  ;;  %v1075_v54 = vadd.f32 %v1074_v52, %v1073_v45 }
 0x159   : > { %v977_v59 = vadd.f32 %v976_v55, %v975_v13  ;;  %v1077_v60 = vadd.f32 %v1076_v58, %v1075_v54 }
 0x15b   : > { %v979_v4 = vadd.f32 %v978_v63, %v977_v59  ;;  %v1079_v6 = vadd.f32 %v1078_v3, %v1077_v60 }
 0x15d   : > { %v980_v8 = vrot.slane %v979_v4, 4  ;;  %v1081_v14 = vadd.f32 %v1080_v7, %v1079_v6 }
 0x15f   : > { %v981_v15 = vadd.f32 %v980_v8, %v979_v4  ;;  %v1082_v18 = vrot.slane %v1081_v14, 4 }
 0x161   : > { %v982_v20 = vrot.slane %v981_v15, 2  ;;  %v1083_v21 = vadd.f32 %v1082_v18, %v1081_v14 }
 0x163   : > { %v983_v23 = vadd.f32 %v982_v20, %v981_v15  ;;  %v1084_v31 = vrot.slane %v1083_v21, 2 }
 0x165   : > { %v984_v32 = vrot.slane %v983_v23, 1  ;;  %v1085_v33 = vadd.f32 %v1084_v31, %v1083_v21 }
 0x167   : > { %v985_v34 = vadd.f32 %v984_v32, %v983_v23  ;;  %v1086_v35 = vrot.slane %v1085_v33, 1 }
 0x169   : > { %v2267_v39 = vmul.f32 0.00390625, %v985_v34  ;;  %v1087_v41 = vadd.f32 %v1086_v35, %v1085_v33 }
 0x16b   : > { %v1088_v42 = vmul.f32 0.00390625, %v1087_v41  ;;  %v1089_v43 = vmul.f32 %v2267_v39, %v2267_v39  ;;  %v1092_v52 = vsub.f32 %v1946_v27, %v2267_v39  ;;  %v1093_v13 = vsub.f32 %v1941_v22, %v2267_v39 }
 0x16c   : > { %v1094_v54 = vsub.f32 %v1949_v28, %v2267_v39  ;;  %v1095_v55 = vsub.f32 %v1962_v40, %v2267_v39  ;;  %v1096_v57 = vsub.f32 %v1973_v50, %v2267_v39  ;;  %v1097_v58 = vsub.f32 %v1989_v61, %v2267_v39 }
 0x16d   : > { %v1090_v45 = vsub.f32 %v1088_v42, %v1089_v43  ;;  %v1098_v59 = vsub.f32 %v2000_v9, %v2267_v39  ;;  %v1099_v27 = vsub.f32 %v2007_v17, %v2267_v39  ;;  %v1100_v22 = vsub.f32 %v2017_v30, %v2267_v39 }
 0x16e   : > { %v1101_v28 = vsub.f32 %v2038_v51, %v2267_v39  ;;  %v1102_v40 = vsub.f32 %v2048_v0, %v2267_v39  ;;  %v1103_v50 = vsub.f32 %v2061_v12, %v2267_v39  ;;  %v1104_v61 = vsub.f32 %v2071_v29, %v2267_v39 }
 0x16f   : > { %v1091_v47 = vmax.f32 %v1090_v45, 0.0  ;;  %v1105_v9 = vsub.f32 %v2090_v49, %v2267_v39  ;;  %v1106_v17 = vsub.f32 %v2107_v1, %v2267_v39  ;;  %v1107_v30 = vsub.f32 %v2125_v19, %v2267_v39 }
 0x170   : > { %v1108_v51 = vsub.f32 %v2111_v5, %v2267_v39  ;;  %v1109_v0 = vsub.f32 %v2121_v16, %v2267_v39  ;;  %v1110_v12 = vsub.f32 %v2131_v25, %v2267_v39  ;;  %v1111_v29 = vsub.f32 %v2143_v37, %v2267_v39 }
 0x171   : > { %v1124_v48 = vadd.f32 1e-05, %v1091_v47  ;;  %v1112_v49 = vsub.f32 %v2153_v46, %v2267_v39  ;;  %v1113_v1 = vsub.f32 %v2162_v56, %v2267_v39  ;;  %v1114_v19 = vsub.f32 %v2171_v2, %v2267_v39 }
 0x172   : > { %v1115_v5 = vsub.f32 %v2180_v11, %v2267_v39  ;;  %v1116_v16 = vsub.f32 %v2189_v24, %v2267_v39  ;;  %v1117_v25 = vsub.f32 %v2198_v36, %v2267_v39  ;;  %v1118_v37 = vsub.f32 %v2205_v44, %v2267_v39 }
 0x173   : > { %1652 = vrsqrt.f32 %v1124_v48  ;;  %v1119_v46 = vsub.f32 %v2211_v53, %v2267_v39  ;;  %v1120_v56 = vsub.f32 %v2220_v62, %v2267_v39  ;;  %v1121_v2 = vsub.f32 %v2229_v10, %v2267_v39 }
 0x174   : > { %v1122_v11 = vsub.f32 %v2238_v26, %v2267_v39  ;;  %v1123_v24 = vsub.f32 %v2246_v38, %v2267_v39 }
 0x180   : > { %v1653_v60 = vpop.eup %1652 }
 0x181   : > { %v2335_v63 = vmul.f32 %v1653_v60, %v1092_v52  ;;  %v2337_v36 = vmul.f32 %v1653_v60, %v1093_v13  ;;  %v2339_v44 = vmul.f32 %v1653_v60, %v1094_v54  ;;  %v2341_v3 = vmul.f32 %v1653_v60, %v1095_v55 }
 0x182   : > { %v2343_v53 = vmul.f32 %v1653_v60, %v1096_v57  ;;  %v2345_v62 = vmul.f32 %v1653_v60, %v1097_v58  ;;  %v2347_v4 = vmul.f32 %v1653_v60, %v1098_v59  ;;  %v2349_v10 = vmul.f32 %v1653_v60, %v1099_v27 }
 0x183   : > { %v2351_v26 = vmul.f32 %v1653_v60, %v1100_v22  ;;  %v2353_v6 = vmul.f32 %v1653_v60, %v1101_v28  ;;  %v2355_v38 = vmul.f32 %v1653_v60, %v1102_v40  ;;  %v2357_v7 = vmul.f32 %v1653_v60, %v1103_v50 }
 0x184   : > { %v2359_v8 = vmul.f32 %v1653_v60, %v1104_v61  ;;  %v2361_v14 = vmul.f32 %v1653_v60, %v1105_v9  ;;  %v2363_v15 = vmul.f32 %v1653_v60, %v1106_v17  ;;  %v2365_v18 = vmul.f32 %v1653_v60, %v1107_v30 }
 0x185   : > { %v2367_v20 = vmul.f32 %v1653_v60, %v1108_v51  ;;  %v2369_v21 = vmul.f32 %v1653_v60, %v1109_v0  ;;  %v2371_v23 = vmul.f32 %v1653_v60, %v1110_v12  ;;  %v2373_v31 = vmul.f32 %v1653_v60, %v1111_v29 }
 0x186   : > { %v2375_v32 = vmul.f32 %v1653_v60, %v1112_v49  ;;  %v2377_v33 = vmul.f32 %v1653_v60, %v1113_v1  ;;  %v2379_v34 = vmul.f32 %v1653_v60, %v1114_v19  ;;  %v2381_v35 = vmul.f32 %v1653_v60, %v1115_v5 }
 0x187   : > { %v2383_v39 = vmul.f32 %v1653_v60, %v1116_v16  ;;  %v2385_v41 = vmul.f32 %v1653_v60, %v1117_v25  ;;  %v2387_v42 = vmul.f32 %v1653_v60, %v1118_v37  ;;  %v2389_v43 = vmul.f32 %v1653_v60, %v1119_v46 }
 0x188   : > { %v2391_v45 = vmul.f32 %v1653_v60, %v1120_v56  ;;  %v2393_v47 = vmul.f32 %v1653_v60, %v1121_v2  ;;  %vm1158_vm1 = vcmp.ge.f32.partialorder %v2335_v63, 0.0  ;;  %vm1159_vm2 = vcmp.ge.f32.partialorder %v2337_v36, 0.0 }
 0x189   : > { %vm1160_vm3 = vcmp.ge.f32.partialorder %v2339_v44, 0.0  ;;  %vm1161_vm4 = vcmp.ge.f32.partialorder %v2341_v3, 0.0  ;;  %vm1162_vm5 = vcmp.ge.f32.partialorder %v2343_v53, 0.0  ;;  %vm1163_vm6 = vcmp.ge.f32.partialorder %v2345_v62, 0.0 }
 0x18a   : > { %vm1164_vm7 = vcmp.ge.f32.partialorder %v2347_v4, 0.0  ;;  %vm1165_vm8 = vcmp.ge.f32.partialorder %v2349_v10, 0.0  ;;  %v2405_v48 = vmul.f32 %v1653_v60, %v1122_v11  ;;  %v1190_v52 = vmul.f32 0.2, %v2335_v63 }
 0x18b   : > { %v1191_v13 = vmul.f32 0.2, %v2337_v36  ;;  %v1192_v54 = vmul.f32 0.2, %v2339_v44  ;;  %v2414_v55 = vmul.f32 %v1653_v60, %v1123_v24  ;;  %vm1173_vm10 = vcmp.ge.f32.partialorder %v2365_v18, 0.0 }
 0x18c   : > { %vm1174_vm11 = vcmp.ge.f32.partialorder %v2367_v20, 0.0  ;;  %v1193_v57 = vmul.f32 0.2, %v2341_v3  ;;  %v1194_v58 = vmul.f32 0.2, %v2343_v53  ;;  %vm1179_vm15 = vcmp.ge.f32.partialorder %v2377_v33, 0.0 }
 0x18d   : > { %v1195_v59 = vmul.f32 0.2, %v2345_v62  ;;  %v1196_v27 = vmul.f32 0.2, %v2347_v4  ;;  %v1197_v22 = vmul.f32 0.2, %v2349_v10  ;;  %v1222_v40 = vsel %vm1158_vm1, %v2335_v63, %v1190_v52 }
 0x18e   : > { %v1198_v28 = vmul.f32 0.2, %v2351_v26  ;;  %vm1180_vm12 = vcmp.ge.f32.partialorder %v2379_v34, 0.0  ;;  %v1199_v50 = vmul.f32 0.2, %v2353_v6  ;;  %v1223_v17 = vsel %vm1159_vm2, %v2337_v36, %v1191_v13  ;;  %1254 = vst.msk [vmem:[%s1812_s5] sm:$0xff] %vm232_vm0, %v1222_v40 }
 0x18f   : > { %v1200_v61 = vmul.f32 0.2, %v2355_v38  ;;  %v1201_v9 = vmul.f32 0.2, %v2357_v7  ;;  %vm1184_vm1 = vcmp.ge.f32.partialorder %v2387_v42, 0.0  ;;  %vm1185_vm14 = vcmp.ge.f32.partialorder %v2389_v43, 0.0 }
 0x190   : > { %vm1187_vm9 = vcmp.ge.f32.partialorder %v2393_v47, 0.0  ;;  %v1202_v30 = vmul.f32 0.2, %v2359_v8  ;;  %v1203_v51 = vmul.f32 0.2, %v2361_v14  ;;  %v1224_v12 = vsel %vm1160_vm3, %v2339_v44, %v1192_v54  ;;  %1255 = vst.msk [vmem:[%s1812_s5 + $0x8] sm:$0xff] %vm232_vm0, %v1223_v17 }
 0x191   : > { %v1204_v0 = vmul.f32 0.2, %v2363_v15  ;;  %vm1188_vm2 = vcmp.ge.f32.partialorder %v2405_v48, 0.0  ;;  %vm1189_vm13 = vcmp.ge.f32.partialorder %v2414_v55, 0.0  ;;  %v1205_v29 = vmul.f32 0.2, %v2365_v18 }
 0x192   : > { %v1206_v60 = vmul.f32 0.2, %v2367_v20  ;;  %v1207_v49 = vmul.f32 0.2, %v2369_v21  ;;  %v1225_v1 = vsel %vm1161_vm4, %v2341_v3, %v1193_v57  ;;  %1256 = vst.msk [vmem:[%s1812_s5 + $0x10] sm:$0xff] %vm232_vm0, %v1224_v12  ;;  %v1226_v25 = vsel %vm1162_vm5, %v2343_v53, %v1194_v58 }
 0x193   : > { %v1208_v19 = vmul.f32 0.2, %v2371_v23  ;;  %v1209_v5 = vmul.f32 0.2, %v2373_v31  ;;  %v1210_v16 = vmul.f32 0.2, %v2375_v32  ;;  %v1227_v2 = vsel %vm1163_vm6, %v2345_v62, %v1195_v59 }
 0x194   : > { %1257 = vst.msk [vmem:[%s1812_s5 + $0x18] sm:$0xff] %vm232_vm0, %v1225_v1  ;;  %v1211_v37 = vmul.f32 0.2, %v2377_v33  ;;  %v1212_v46 = vmul.f32 0.2, %v2379_v34  ;;  %1258 = vst.msk [vmem:[%s1812_s5 + $0x20] sm:$0xff] %vm232_vm0, %v1226_v25  ;;  %v1228_v36 = vsel %vm1164_vm7, %v2347_v4, %v1196_v27  ;;  %v1229_v62 = vsel %vm1165_vm8, %v2349_v10, %v1197_v22 }
 0x195   : > { %v1213_v56 = vmul.f32 0.2, %v2381_v35  ;;  %v1214_v11 = vmul.f32 0.2, %v2383_v39  ;;  %v1215_v24 = vmul.f32 0.2, %v2385_v41 }
 0x196   : > { %v1216_v63 = vmul.f32 0.2, %v2387_v42  ;;  %1259 = vst.msk [vmem:[%s1812_s5 + $0x28] sm:$0xff] %vm232_vm0, %v1227_v2  ;;  %v1217_v44 = vmul.f32 0.2, %v2389_v43  ;;  %1260 = vst.msk [vmem:[%s1812_s5 + $0x30] sm:$0xff] %vm232_vm0, %v1228_v36 }
 0x197   : > { %v1218_v3 = vmul.f32 0.2, %v2391_v45  ;;  %v1219_v53 = vmul.f32 0.2, %v2393_v47  ;;  %v1220_v52 = vmul.f32 0.2, %v2405_v48 }
 0x198   : > { %v1221_v4 = vmul.f32 0.2, %v2414_v55  ;;  %vm2636_vm3 = vcmp.ge.f32.partialorder %v2351_v26, 0.0  ;;  %vm2637_vm4 = vcmp.ge.f32.partialorder %v2353_v6, 0.0  ;;  %1261 = vst.msk [vmem:[%s1812_s5 + $0x38] sm:$0xff] %vm232_vm0, %v1229_v62  ;;  %vm2638_vm5 = vcmp.ge.f32.partialorder %v2355_v38, 0.0 }
 0x199   : > { %v1230_v13 = vsel %vm2636_vm3, %v2351_v26, %v1198_v28  ;;  %v1231_v54 = vsel %vm2637_vm4, %v2353_v6, %v1199_v50  ;;  %v1232_v10 = vsel %vm2638_vm5, %v2355_v38, %v1200_v61  ;;  %vm2639_vm6 = vcmp.ge.f32.partialorder %v2357_v7, 0.0 }
 0x19a   : > { %v1233_v57 = vsel %vm2639_vm6, %v2357_v7, %v1201_v9  ;;  %vm2640_vm7 = vcmp.ge.f32.partialorder %v2359_v8, 0.0  ;;  %vm2641_vm8 = vcmp.ge.f32.partialorder %v2361_v14, 0.0  ;;  %1262 = vst.msk [vmem:[%s1812_s5 + $0x40] sm:$0xff] %vm232_vm0, %v1230_v13  ;;  %1263 = vst.msk [vmem:[%s1812_s5 + $0x48] sm:$0xff] %vm232_vm0, %v1231_v54  ;;  %vm2642_vm3 = vcmp.ge.f32.partialorder %v2363_v15, 0.0 }
 0x19b   : > { %v1234_v58 = vsel %vm2640_vm7, %v2359_v8, %v1202_v30  ;;  %v1235_v26 = vsel %vm2641_vm8, %v2361_v14, %v1203_v51  ;;  %v1236_v6 = vsel %vm2642_vm3, %v2363_v15, %v1204_v0  ;;  %v1237_v38 = vsel %vm1173_vm10, %v2365_v18, %v1205_v29  ;;  %1264 = vst.msk [vmem:[%s1812_s5 + $0x50] sm:$0xff] %vm232_vm0, %v1232_v10 }
 0x19c   : > { %v1238_v7 = vsel %vm1174_vm11, %v2367_v20, %v1206_v60  ;;  %vm2643_vm4 = vcmp.ge.f32.partialorder %v2369_v21, 0.0  ;;  %1265 = vst.msk [vmem:[%s1812_s5 + $0x58] sm:$0xff] %vm232_vm0, %v1233_v57  ;;  %1266 = vst.msk [vmem:[%s1812_s5 + $0x60] sm:$0xff] %vm232_vm0, %v1234_v58  ;;  %vm2644_vm10 = vcmp.ge.f32.partialorder %v2371_v23, 0.0  ;;  %vm2645_vm11 = vcmp.ge.f32.partialorder %v2373_v31, 0.0 }
 0x19d   : > { %v1239_v8 = vsel %vm2643_vm4, %v2369_v21, %v1207_v49  ;;  %1267 = vst.msk [vmem:[%s1812_s5 + $0x68] sm:$0xff] %vm232_vm0, %v1235_v26  ;;  %v1240_v14 = vsel %vm2644_vm10, %v2371_v23, %v1208_v19  ;;  %v1241_v15 = vsel %vm2645_vm11, %v2373_v31, %v1209_v5  ;;  %vm2646_vm5 = vcmp.ge.f32.partialorder %v2375_v32, 0.0  ;;  %1268 = vst.msk [vmem:[%s1812_s5 + $0x70] sm:$0xff] %vm232_vm0, %v1236_v6 }
 0x19e   : > { %v1242_v18 = vsel %vm2646_vm5, %v2375_v32, %v1210_v16  ;;  %v1243_v20 = vsel %vm1179_vm15, %v2377_v33, %v1211_v37  ;;  %1269 = vst.msk [vmem:[%s1812_s5 + $0x78] sm:$0xff] %vm232_vm0, %v1237_v38  ;;  %1270 = vst.msk [vmem:[%s1812_s5 + $0x80] sm:$0xff] %vm232_vm0, %v1238_v7  ;;  %v1244_v21 = vsel %vm1180_vm12, %v2379_v34, %v1212_v46  ;;  %vm2647_vm6 = vcmp.ge.f32.partialorder %v2381_v35, 0.0 }
 0x19f   : > { %1271 = vst.msk [vmem:[%s1812_s5 + $0x88] sm:$0xff] %vm232_vm0, %v1239_v8  ;;  %v1245_v23 = vsel %vm2647_vm6, %v2381_v35, %v1213_v56  ;;  %vm2648_vm15 = vcmp.ge.f32.partialorder %v2383_v39, 0.0  ;;  %vm2649_vm7 = vcmp.ge.f32.partialorder %v2385_v41, 0.0  ;;  %1272 = vst.msk [vmem:[%s1812_s5 + $0x90] sm:$0xff] %vm232_vm0, %v1240_v14  ;;  %v1248_v33 = vsel %vm1184_vm1, %v2387_v42, %v1216_v63 }
 0x1a0   : > { %v1246_v31 = vsel %vm2648_vm15, %v2383_v39, %v1214_v11  ;;  %v1247_v32 = vsel %vm2649_vm7, %v2385_v41, %v1215_v24  ;;  %1273 = vst.msk [vmem:[%s1812_s5 + $0x98] sm:$0xff] %vm232_vm0, %v1241_v15  ;;  %1274 = vst.msk [vmem:[%s1812_s5 + $0xa0] sm:$0xff] %vm232_vm0, %v1242_v18  ;;  %v1249_v34 = vsel %vm1185_vm14, %v2389_v43, %v1217_v44  ;;  %vm2650_vm12 = vcmp.ge.f32.partialorder %v2391_v45, 0.0 }
 0x1a1   : > { %1275 = vst.msk [vmem:[%s1812_s5 + $0xa8] sm:$0xff] %vm232_vm0, %v1243_v20  ;;  %v1250_v35 = vsel %vm2650_vm12, %v2391_v45, %v1218_v3  ;;  %v1251_v39 = vsel %vm1187_vm9, %v2393_v47, %v1219_v53  ;;  %1276 = vst.msk [vmem:[%s1812_s5 + $0xb0] sm:$0xff] %vm232_vm0, %v1244_v21  ;;  %v1252_v41 = vsel %vm1188_vm2, %v2405_v48, %v1220_v52 }
 0x1a2   : > { %1277 = vst.msk [vmem:[%s1812_s5 + $0xb8] sm:$0xff] %vm232_vm0, %v1245_v23  ;;  %1278 = vst.msk [vmem:[%s1812_s5 + $0xc0] sm:$0xff] %vm232_vm0, %v1246_v31  ;;  %v1253_v42 = vsel %vm1189_vm13, %v2414_v55, %v1221_v4 }
 0x1a3   : > { %1279 = vst.msk [vmem:[%s1812_s5 + $0xc8] sm:$0xff] %vm232_vm0, %v1247_v32  ;;  %1280 = vst.msk [vmem:[%s1812_s5 + $0xd0] sm:$0xff] %vm232_vm0, %v1248_v33 }
 0x1a4   : > { %1281 = vst.msk [vmem:[%s1812_s5 + $0xd8] sm:$0xff] %vm232_vm0, %v1249_v34  ;;  %1282 = vst.msk [vmem:[%s1812_s5 + $0xe0] sm:$0xff] %vm232_vm0, %v1250_v35 }
 0x1a5   : > { %1283 = vst.msk [vmem:[%s1812_s5 + $0xe8] sm:$0xff] %vm232_vm0, %v1251_v39  ;;  %1284 = vst.msk [vmem:[%s1812_s5 + $0xf0] sm:$0xff] %vm232_vm0, %v1252_v41 }
 0x1a6   : > { %1285 = vst.msk [vmem:[%s1812_s5 + $0xf8] sm:$0xff] %vm232_vm0, %v1253_v42 }
 0x1a7 PF: > { %s13_s14 = sadd.s32 1, %s1676_s14   ;;  %s2651_s12 = smov %s1672_s13 }
 0x1a8   : > { %p10_p5 = scmp.ge.s32.totalorder %s13_s14, 4   ;;  %s2652_s13 = smov %s2654_s15 }
 0x1aa   :  { %12 = sbr.rel (!%p10_p5) target bundleno = 2 (0x2), region = 73 }

// kernel: _lambda_.13
= control target key start
LH: loop header
LB: loop body
LE: loop exit
PB: predicated region body
PF: predicated region fallthrough
CT: control target
= control target key end

     0   :  { %s1236_s12 = smov 0   ;;  %s1238_s13 = smov 0   ;;  %s1519_s0 = inlined_call_operand.vmem [shape: bf16[128,512], index: 0, kind: input, shape index: {}]   ;;  %s1520_s1 = inlined_call_operand.vmem [shape: bf16[512,64], index: 1, kind: input, shape index: {}]   ;;  %s1521_s2 = inlined_call_operand.vmem [shape: f32[1,64], index: 2, kind: input, shape index: {}]   ;;  %s1522_s3 = inlined_call_operand.vmem [shape: f32[128,64], index: 3, kind: output, shape index: {}]  }
   0x1   :  { %s1240_s14 = smov 0  }
   0x2 LB: > { %s25_s15 = sadd.s32 1, %s1209_s13  ;;  %p970_p0 = scmp.ge.s32.totalorder %s1213_s14, 1  ;;  %s1213_s14 = sphi %s1240_s14, %s13_s14   ;;  %s1209_s13 = sphi %s1238_s13, %s1524_s13   ;;  %s1205_s12 = sphi %s1236_s12, %s1523_s12  }
   0x3   : > { %p27_p1 = scmp.ge.s32.totalorder %s25_s15, 2  ;;  %p169_p2 = scmp.lt.s32.totalorder %s1213_s14, 3 }
   0x5   : > { %s1526_s15 = smov (%p27_p1, %s25_s15), 0  ;;  %p170_p3 = pnand %p970_p0, %p169_p2 }
   0x6   : > { %s971_s25 = sshll.u32 (!%p170_p3), %s1205_s12, 3 }
   0x7   : > { %173 = sbr.rel (%p170_p3) target bundleno = 337 (0x151), region = 32  ;;  %p205_p4 = scmp.lt.s32.totalorder (!%p170_p3), %s971_s25, 15 }
   0xc   : > { %v1133_v0 = vld [vmem:[%s1520_s1 + $0x78] sm:$0xff]   ;;  %v1137_v4 = vld [vmem:[%s1520_s1 + $0x70] sm:$0xff]   ;;  %v1141_v8 = vld [vmem:[%s1520_s1 + $0x68] sm:$0xff]   ;;  %s1528_s25 = smov (!%p205_p4, %s971_s25), 15  ;;  %vm232_vm0 = vcmask 523264   ;;  %v1215_v48 = vmov 0.0  }
   0xd   : > { %v1134_v1 = vld [vmem:[%s1520_s1 + $0xf8] sm:$0xff]   ;;  %1028 = vmatprep.subr.bf16.mxu0 %v1133_v0  ;;  %v1138_v5 = vld [vmem:[%s1520_s1 + $0xf0] sm:$0xff]   ;;  %v1142_v9 = vld [vmem:[%s1520_s1 + $0xe8] sm:$0xff]   ;;  %s1027_s24 = sshll.u32 %s1528_s25, 4  ;;  %s975_s11 = sshll.u32 %s1528_s25, 3 }
   0xe   : > { %v1135_v2 = vld [vmem:[%s1520_s1 + $0x38] sm:$0xff]   ;;  %1068 = vmatprep.subr.bf16.mxu1 %v1134_v1  ;;  %v1139_v6 = vld [vmem:[%s1520_s1 + $0x30] sm:$0xff]   ;;  %v1143_v10 = vld [vmem:[%s1520_s1 + $0x28] sm:$0xff]   ;;  %s1353_s12 = scalar_lea.vmem %s1519_s0, %s1027_s24  ;;  %s1381_s18 = scalar_lea.vmem %s1522_s3, %s975_s11 }
   0xf   : > { %v1136_v3 = vld [vmem:[%s1520_s1 + $0xb8] sm:$0xff]   ;;  %1029 = vmatpush3.bf16.msra.mxu0 %v1135_v2  ;;  %v1140_v7 = vld [vmem:[%s1520_s1 + $0xb0] sm:$0xff]   ;;  %v1144_v11 = vld [vmem:[%s1520_s1 + $0xa8] sm:$0xff]   ;;  %233 = vst.msk [vmem:[%s1381_s18] sm:$0xff] %vm232_vm0, %v1215_v48 }
  0x10   : > { %1069 = vmatpush3.bf16.msra.mxu1 %v1136_v3  ;;  %1030 = vmatprep.subr.bf16.mxu0 %v1137_v4  ;;  %v1145_v12 = vld [vmem:[%s1520_s1 + $0x60] sm:$0xff]   ;;  %v1149_v16 = vld [vmem:[%s1520_s1 + $0x58] sm:$0xff]   ;;  %v1153_v20 = vld [vmem:[%s1520_s1 + $0x50] sm:$0xff]   ;;  %234 = vst.msk [vmem:[%s1381_s18 + $0x8] sm:$0xff] %vm232_vm0, %v1215_v48 }
  0x11   : > { %1070 = vmatprep.subr.bf16.mxu1 %v1138_v5  ;;  %v1146_v13 = vld [vmem:[%s1520_s1 + $0xe0] sm:$0xff]   ;;  %v1150_v17 = vld [vmem:[%s1520_s1 + $0xd8] sm:$0xff]   ;;  %v1154_v21 = vld [vmem:[%s1520_s1 + $0xd0] sm:$0xff]   ;;  %235 = vst.msk [vmem:[%s1381_s18 + $0x10] sm:$0xff] %vm232_vm0, %v1215_v48 }
  0x12   : > { %v1147_v14 = vld [vmem:[%s1520_s1 + $0x20] sm:$0xff]   ;;  %v1151_v18 = vld [vmem:[%s1520_s1 + $0x18] sm:$0xff]   ;;  %v1155_v22 = vld [vmem:[%s1520_s1 + $0x10] sm:$0xff]   ;;  %236 = vst.msk [vmem:[%s1381_s18 + $0x18] sm:$0xff] %vm232_vm0, %v1215_v48 }
  0x13   : > { %1031 = vmatpush3.bf16.msra.mxu0 %v1139_v6  ;;  %v1148_v15 = vld [vmem:[%s1520_s1 + $0xa0] sm:$0xff]   ;;  %v1152_v19 = vld [vmem:[%s1520_s1 + $0x98] sm:$0xff]   ;;  %v1156_v23 = vld [vmem:[%s1520_s1 + $0x90] sm:$0xff]   ;;  %237 = vst.msk [vmem:[%s1381_s18 + $0x20] sm:$0xff] %vm232_vm0, %v1215_v48 }
  0x14   : > { %1071 = vmatpush3.bf16.msra.mxu1 %v1140_v7  ;;  %1032 = vmatprep.subr.bf16.mxu0 %v1141_v8  ;;  %v1157_v24 = vld [vmem:[%s1520_s1 + $0x48] sm:$0xff]   ;;  %v1161_v28 = vld [vmem:[%s1520_s1 + $0x40] sm:$0xff]   ;;  %238 = vst.msk [vmem:[%s1381_s18 + $0x28] sm:$0xff] %vm232_vm0, %v1215_v48  ;;  %239 = vst.msk [vmem:[%s1381_s18 + $0x30] sm:$0xff] %vm232_vm0, %v1215_v48 }
  0x15   : > { %1072 = vmatprep.subr.bf16.mxu1 %v1142_v9  ;;  %v1158_v25 = vld [vmem:[%s1520_s1 + $0xc8] sm:$0xff]   ;;  %v1162_v29 = vld [vmem:[%s1520_s1 + $0xc0] sm:$0xff]   ;;  %240 = vst.msk [vmem:[%s1381_s18 + $0x38] sm:$0xff] %vm232_vm0, %v1215_v48 }
  0x16   : > { %v1159_v26 = vld [vmem:[%s1520_s1 + $0x8] sm:$0xff]   ;;  %v1163_v30 = vld [vmem:[%s1520_s1] sm:$0xff]  }
  0x17   : > { %1033 = vmatpush3.bf16.msra.mxu0 %v1143_v10  ;;  %v1160_v27 = vld [vmem:[%s1520_s1 + $0x88] sm:$0xff]   ;;  %v1164_v31 = vld [vmem:[%s1520_s1 + $0x80] sm:$0xff]  }
  0x18   : > { %1073 = vmatpush3.bf16.msra.mxu1 %v1144_v11  ;;  %1034 = vmatprep.subr.bf16.mxu0 %v1145_v12  ;;  %v1165_v32 = vld [vmem:[%s1353_s12] ss:$16 sps:$4 sm:$0xff]   ;;  %v1167_v33 = vld [vmem:[%s1353_s12 + $0x4] ss:$16 sps:$4 sm:$0xff]   ;;  %v1168_v34 = vld [vmem:[%s1353_s12 + $0x8] ss:$16 sps:$4 sm:$0xff]  }
  0x19   : > { %1074 = vmatprep.subr.bf16.mxu1 %v1146_v13  ;;  %v1170_v35 = vld [vmem:[%s1353_s12 + $0xc] ss:$16 sps:$4 sm:$0xff]   ;;  %633 = vmatprep.mubr.bf16.mxu0 %v1167_v33  ;;  %v1171_v36 = vld [vmem:[%s1353_s12 + $0x24] ss:$16 sps:$4 sm:$0xff]   ;;  %v1175_v38 = vld [vmem:[%s1353_s12 + $0x20] ss:$16 sps:$4 sm:$0xff]  }
  0x1a   : > { %698 = vmatprep.mubr.bf16.mxu1 %v1170_v35  ;;  %v1173_v37 = vld [vmem:[%s1353_s12 + $0x2c] ss:$16 sps:$4 sm:$0xff]   ;;  %v1176_v39 = vld [vmem:[%s1353_s12 + $0x28] ss:$16 sps:$4 sm:$0xff]   ;;  %v1177_v40 = vld [vmem:[%s1353_s12 + $0x44] ss:$16 sps:$4 sm:$0xff]  }
  0x1b   : > { %1035 = vmatpush3.bf16.msra.mxu0 %v1147_v14  ;;  %v1179_v41 = vld [vmem:[%s1353_s12 + $0x4c] ss:$16 sps:$4 sm:$0xff]   ;;  %v1181_v42 = vld [vmem:[%s1353_s12 + $0x40] ss:$16 sps:$4 sm:$0xff]   ;;  %v1182_v43 = vld [vmem:[%s1353_s12 + $0x48] ss:$16 sps:$4 sm:$0xff]  }
  0x1c   : > { %1075 = vmatpush3.bf16.msra.mxu1 %v1148_v15  ;;  %1036 = vmatprep.subr.bf16.mxu0 %v1149_v16  ;;  %v1183_v44 = vld [vmem:[%s1353_s12 + $0x64] ss:$16 sps:$4 sm:$0xff]   ;;  %v1185_v45 = vld [vmem:[%s1353_s12 + $0x6c] ss:$16 sps:$4 sm:$0xff]   ;;  %v1187_v46 = vld [vmem:[%s1353_s12 + $0x60] ss:$16 sps:$4 sm:$0xff]  }
  0x1d   : > { %1076 = vmatprep.subr.bf16.mxu1 %v1150_v17  ;;  %v1188_v47 = vld [vmem:[%s1353_s12 + $0x68] ss:$16 sps:$4 sm:$0xff]   ;;  %v241_v56 = vld [vmem:[%s1381_s18] sm:$0xff]  ;;  %v243_v10 = vld [vmem:[%s1381_s18 + $0x10] sm:$0xff] }
  0x1e   : > { %v242_v1 = vld [vmem:[%s1381_s18 + $0x8] sm:$0xff] }
  0x1f   : > { %1037 = vmatpush3.bf16.msra.mxu0 %v1151_v18 }
  0x20   : > { %1077 = vmatpush3.bf16.msra.mxu1 %v1152_v19  ;;  %1038 = vmatprep.subr.bf16.mxu0 %v1153_v20  ;;  %v244_v19 = vld [vmem:[%s1381_s18 + $0x18] sm:$0xff] }
  0x21   : > { %1078 = vmatprep.subr.bf16.mxu1 %v1154_v21 }
  0x23   : > { %1039 = vmatpush3.bf16.msra.mxu0 %v1155_v22 }
  0x24   : > { %1079 = vmatpush3.bf16.msra.mxu1 %v1156_v23  ;;  %1040 = vmatprep.subr.bf16.mxu0 %v1157_v24 }
  0x25   : > { %1080 = vmatprep.subr.bf16.mxu1 %v1158_v25 }
  0x27   : > { %1041 = vmatpush3.bf16.msra.mxu0 %v1159_v26 }
  0x28   : > { %1081 = vmatpush3.bf16.msra.mxu1 %v1160_v27  ;;  %1042 = vmatprep.subr.bf16.mxu0 %v1161_v28  ;;  %v245_v28 = vld [vmem:[%s1381_s18 + $0x20] sm:$0xff] }
  0x29   : > { %1082 = vmatprep.subr.bf16.mxu1 %v1162_v29 }
  0x2b   : > { %1043 = vmatpush3.bf16.msra.mxu0 %v1163_v30 }
  0x2c   : > { %1083 = vmatpush3.bf16.msra.mxu1 %v1164_v31 }
  0x2e   : > { %634 = vmatmul.mubr.bf16.vlgmr.msra.gmra.mxu0 %v1165_v32 }
  0x2f   : > { %699 = vmatmul.mubr.bf16.vlgmr.msra.gmra.mxu1 %v1168_v34  ;;  %641 = vmatprep.mubr.bf16.mxu0 %v1171_v36 }
  0x30   : > { %706 = vmatprep.mubr.bf16.mxu1 %v1173_v37 }
  0x36   : > { %642 = vmatmul.mubr.bf16.gmra.mxu0 %v1175_v38  ;;  %v246_v38 = vld [vmem:[%s1381_s18 + $0x28] sm:$0xff] }
  0x37   : > { %707 = vmatmul.mubr.bf16.gmra.mxu1 %v1176_v39  ;;  %649 = vmatprep.mubr.bf16.mxu0 %v1177_v40 }
  0x38   : > { %714 = vmatprep.mubr.bf16.mxu1 %v1179_v41 }
  0x3e   : > { %650 = vmatmul.mubr.bf16.gmra.mxu0 %v1181_v42 }
  0x3f   : > { %715 = vmatmul.mubr.bf16.gmra.mxu1 %v1182_v43  ;;  %657 = vmatprep.mubr.bf16.mxu0 %v1183_v44  ;;  %v1024_v43 = vld [vmem:[%s1521_s2] ss:$0 sm:$0xff] }
  0x40   : > { %722 = vmatprep.mubr.bf16.mxu1 %v1185_v45 }
  0x46   : > { %658 = vmatmul.mubr.bf16.gmra.mxu0 %v1187_v46 }
  0x47   : > { %723 = vmatmul.mubr.bf16.gmra.mxu1 %v1188_v47 }
  0xee   : > { %v1044_v49 = vpop.f32.mrf.mxu0 }
  0xef   : > { %v1084_v50 = vpop.f32.mrf.mxu1 }
  0xf0   : > { %v1045_v51 = vpop.f32.mrf.mxu0 }
  0xf1   : > { %v1046_v52 = vadd.f32 %v1045_v51, %v1044_v49  ;;  %v1085_v53 = vpop.f32.mrf.mxu1 }
  0xf2   : > { %v1086_v54 = vadd.f32 %v1085_v53, %v1084_v50  ;;  %v1047_v55 = vpop.f32.mrf.mxu0 }
  0xf3   : > { %v1087_v57 = vpop.f32.mrf.mxu1 }
  0xf4   : > { %v701_v58 = vadd.f32 %v1086_v54, %v1046_v52  ;;  %v1048_v59 = vpop.f32.mrf.mxu0  ;;  %v247_v52 = vld [vmem:[%s1381_s18 + $0x30] sm:$0xff] }
  0xf5   : > { %v1049_v60 = vadd.f32 %v1048_v59, %v1047_v55  ;;  %v1088_v61 = vpop.f32.mrf.mxu1 }
  0xf6   : > { %v731_v62 = vadd.f32 %v701_v58, %v241_v56  ;;  %v1089_v63 = vadd.f32 %v1088_v61, %v1087_v57  ;;  %v1050_v0 = vpop.f32.mrf.mxu0 }
  0xf7   : > { %v1090_v2 = vpop.f32.mrf.mxu1 }
  0xf8   : > { %740 = vst.msk [vmem:[%s1381_s18] sm:$0xff] %vm232_vm0, %v731_v62  ;;  %v704_v3 = vadd.f32 %v1089_v63, %v1049_v60  ;;  %v1051_v4 = vpop.f32.mrf.mxu0 }
  0xf9   : > { %v1052_v5 = vadd.f32 %v1051_v4, %v1050_v0  ;;  %v1091_v6 = vpop.f32.mrf.mxu1  ;;  %v248_v0 = vld [vmem:[%s1381_s18 + $0x38] sm:$0xff] }
  0xfa   : > { %v732_v7 = vadd.f32 %v704_v3, %v242_v1  ;;  %v1092_v8 = vadd.f32 %v1091_v6, %v1090_v2  ;;  %v1053_v9 = vpop.f32.mrf.mxu0 }
  0xfb   : > { %v1093_v11 = vpop.f32.mrf.mxu1 }
  0xfc   : > { %741 = vst.msk [vmem:[%s1381_s18 + $0x8] sm:$0xff] %vm232_vm0, %v732_v7  ;;  %v709_v12 = vadd.f32 %v1092_v8, %v1052_v5  ;;  %v1054_v13 = vpop.f32.mrf.mxu0 }
  0xfd   : > { %v1055_v14 = vadd.f32 %v1054_v13, %v1053_v9  ;;  %v1094_v15 = vpop.f32.mrf.mxu1 }
  0xfe   : > { %v733_v16 = vadd.f32 %v709_v12, %v243_v10  ;;  %v1095_v17 = vadd.f32 %v1094_v15, %v1093_v11  ;;  %v1056_v18 = vpop.f32.mrf.mxu0 }
  0xff   : > { %v1096_v20 = vpop.f32.mrf.mxu1  ;;  %v751_v40 = vld [vmem:[%s1381_s18] sm:$0xff] }
 0x100   : > { %742 = vst.msk [vmem:[%s1381_s18 + $0x10] sm:$0xff] %vm232_vm0, %v733_v16  ;;  %v712_v21 = vadd.f32 %v1095_v17, %v1055_v14  ;;  %v1057_v22 = vpop.f32.mrf.mxu0  ;;  %v1425_v54 = vadd.f32 %v1024_v43, %v751_v40 }
 0x101   : > { %v1058_v23 = vadd.f32 %v1057_v22, %v1056_v18  ;;  %v1097_v24 = vpop.f32.mrf.mxu1 }
 0x102   : > { %v734_v25 = vadd.f32 %v712_v21, %v244_v19  ;;  %v1098_v26 = vadd.f32 %v1097_v24, %v1096_v20  ;;  %v1059_v27 = vpop.f32.mrf.mxu0  ;;  %v796_v2 = vmul.f32 %v1425_v54, %v1425_v54  ;;  %v774_v7 = vsel %vm232_vm0, %v1425_v54, 0.0 }
 0x103   : > { %v1099_v29 = vpop.f32.mrf.mxu1  ;;  %v752_v37 = vld [vmem:[%s1381_s18 + $0x8] sm:$0xff] }
 0x104   : > { %743 = vst.msk [vmem:[%s1381_s18 + $0x18] sm:$0xff] %vm232_vm0, %v734_v25  ;;  %v717_v30 = vadd.f32 %v1098_v26, %v1058_v23  ;;  %v1060_v31 = vpop.f32.mrf.mxu0  ;;  %v1421_v50 = vadd.f32 %v1024_v43, %v752_v37  ;;  %v804_v14 = vsel %vm232_vm0, %v796_v2, 0.0 }
 0x105   : > { %v1061_v32 = vadd.f32 %v1060_v31, %v1059_v27  ;;  %v1100_v33 = vpop.f32.mrf.mxu1 }
 0x106   : > { %v735_v34 = vadd.f32 %v717_v30, %v245_v28  ;;  %v1101_v35 = vadd.f32 %v1100_v33, %v1099_v29  ;;  %v1062_v36 = vpop.f32.mrf.mxu0  ;;  %v797_v63 = vmul.f32 %v1421_v50, %v1421_v50  ;;  %v775_v5 = vsel %vm232_vm0, %v1421_v50, 0.0 }
 0x107   : > { %v1102_v39 = vpop.f32.mrf.mxu1  ;;  %v753_v44 = vld [vmem:[%s1381_s18 + $0x10] sm:$0xff]  ;;  %v776_v13 = vadd.f32 %v775_v5, %v774_v7 }
 0x108   : > { %744 = vst.msk [vmem:[%s1381_s18 + $0x20] sm:$0xff] %vm232_vm0, %v735_v34  ;;  %v720_v41 = vadd.f32 %v1101_v35, %v1061_v32  ;;  %v1063_v42 = vpop.f32.mrf.mxu0  ;;  %v1429_v57 = vadd.f32 %v1024_v43, %v753_v44  ;;  %v805_v11 = vsel %vm232_vm0, %v797_v63, 0.0 }
 0x109   : > { %v1064_v45 = vadd.f32 %v1063_v42, %v1062_v36  ;;  %v1103_v46 = vpop.f32.mrf.mxu1  ;;  %v806_v20 = vadd.f32 %v805_v11, %v804_v14 }
 0x10a   : > { %v736_v47 = vadd.f32 %v720_v41, %v246_v38  ;;  %v1104_v48 = vadd.f32 %v1103_v46, %v1102_v39  ;;  %v1065_v49 = vpop.f32.mrf.mxu0  ;;  %v798_v6 = vmul.f32 %v1429_v57, %v1429_v57  ;;  %v777_v9 = vsel %vm232_vm0, %v1429_v57, 0.0 }
 0x10b   : > { %v754_v51 = vld [vmem:[%s1381_s18 + $0x18] sm:$0xff]  ;;  %v1105_v53 = vpop.f32.mrf.mxu1  ;;  %v778_v19 = vadd.f32 %v777_v9, %v776_v13 }
 0x10c   : > { %745 = vst.msk [vmem:[%s1381_s18 + $0x28] sm:$0xff] %vm232_vm0, %v736_v47  ;;  %v725_v55 = vadd.f32 %v1104_v48, %v1064_v45  ;;  %v1066_v56 = vpop.f32.mrf.mxu0  ;;  %v1431_v62 = vadd.f32 %v1024_v43, %v754_v51  ;;  %v807_v18 = vsel %vm232_vm0, %v798_v6, 0.0 }
 0x10d   : > { %v1067_v58 = vadd.f32 %v1066_v56, %v1065_v49  ;;  %v1106_v59 = vpop.f32.mrf.mxu1  ;;  %v808_v26 = vadd.f32 %v807_v18, %v806_v20 }
 0x10e   : > { %v737_v60 = vadd.f32 %v725_v55, %v247_v52  ;;  %v1107_v61 = vadd.f32 %v1106_v59, %v1105_v53  ;;  %v799_v10 = vmul.f32 %v1431_v62, %v1431_v62  ;;  %v779_v16 = vsel %vm232_vm0, %v1431_v62, 0.0 }
 0x10f   : > { %v755_v1 = vld [vmem:[%s1381_s18 + $0x20] sm:$0xff]  ;;  %v780_v25 = vadd.f32 %v779_v16, %v778_v19 }
 0x110   : > { %746 = vst.msk [vmem:[%s1381_s18 + $0x30] sm:$0xff] %vm232_vm0, %v737_v60  ;;  %v728_v3 = vadd.f32 %v1107_v61, %v1067_v58  ;;  %v1441_v4 = vadd.f32 %v1024_v43, %v755_v1  ;;  %v809_v23 = vsel %vm232_vm0, %v799_v10, 0.0 }
 0x111   : > { %v810_v31 = vadd.f32 %v809_v23, %v808_v26 }
 0x112   : > { %v738_v8 = vadd.f32 %v728_v3, %v248_v0  ;;  %v800_v17 = vmul.f32 %v1441_v4, %v1441_v4  ;;  %v781_v21 = vsel %vm232_vm0, %v1441_v4, 0.0 }
 0x113   : > { %v756_v12 = vld [vmem:[%s1381_s18 + $0x28] sm:$0xff]  ;;  %v782_v30 = vadd.f32 %v781_v21, %v780_v25 }
 0x114   : > { %747 = vst.msk [vmem:[%s1381_s18 + $0x38] sm:$0xff] %vm232_vm0, %v738_v8  ;;  %v1458_v15 = vadd.f32 %v1024_v43, %v756_v12  ;;  %v811_v29 = vsel %vm232_vm0, %v800_v17, 0.0 }
 0x115   : > { %v812_v37 = vadd.f32 %v811_v29, %v810_v31 }
 0x116   : > { %v801_v22 = vmul.f32 %v1458_v15, %v1458_v15  ;;  %v783_v28 = vsel %vm232_vm0, %v1458_v15, 0.0 }
 0x117   : > { %v757_v24 = vld [vmem:[%s1381_s18 + $0x30] sm:$0xff]  ;;  %v784_v36 = vadd.f32 %v783_v28, %v782_v30 }
 0x118   : > { %v772_v27 = vadd.f32 %v1024_v43, %v757_v24  ;;  %v813_v34 = vsel %vm232_vm0, %v801_v22, 0.0 }
 0x119   : > { %v814_v41 = vadd.f32 %v813_v34, %v812_v37 }
 0x11a   : > { %v785_v32 = vsel %vm232_vm0, %v772_v27, 0.0  ;;  %v802_v33 = vmul.f32 %v772_v27, %v772_v27 }
 0x11b   : > { %v758_v35 = vld [vmem:[%s1381_s18 + $0x38] sm:$0xff]  ;;  %v786_v40 = vadd.f32 %v785_v32, %v784_v36 }
 0x11c   : > { %v773_v38 = vadd.f32 %v1024_v43, %v758_v35  ;;  %v815_v39 = vsel %vm232_vm0, %v802_v33, 0.0 }
 0x11d   : > { %v816_v46 = vadd.f32 %v815_v39, %v814_v41 }
 0x11e   : > { %v787_v42 = vsel %vm232_vm0, %v773_v38, 0.0  ;;  %v803_v44 = vmul.f32 %v773_v38, %v773_v38 }
 0x11f   : > { %v788_v45 = vadd.f32 %v787_v42, %v786_v40 }
 0x120   : > { %v817_v47 = vsel %vm232_vm0, %v803_v44, 0.0 }
 0x121   : > { %v789_v48 = vrot.slane %v788_v45, 4  ;;  %v818_v49 = vadd.f32 %v817_v47, %v816_v46 }
 0x123   : > { %v790_v51 = vadd.f32 %v789_v48, %v788_v45  ;;  %v819_v52 = vrot.slane %v818_v49, 4 }
 0x125   : > { %v791_v53 = vrot.slane %v790_v51, 2  ;;  %v820_v55 = vadd.f32 %v819_v52, %v818_v49 }
 0x127   : > { %v792_v56 = vadd.f32 %v791_v53, %v790_v51  ;;  %v821_v58 = vrot.slane %v820_v55, 2 }
 0x129   : > { %v793_v43 = vrot.slane %v792_v56, 1  ;;  %v822_v59 = vadd.f32 %v821_v58, %v820_v55 }
 0x12b   : > { %v794_v60 = vadd.f32 %v793_v43, %v792_v56  ;;  %v823_v61 = vrot.slane %v822_v59, 1 }
 0x12d   : > { %v795_v63 = vmul.f32 0.015625, %v794_v60  ;;  %v824_v0 = vadd.f32 %v823_v61, %v822_v59 }
 0x12f   : > { %v825_v1 = vmul.f32 0.015625, %v824_v0  ;;  %v826_v2 = vmul.f32 %v795_v63, %v795_v63  ;;  %v829_v7 = vsub.f32 %v1425_v54, %v795_v63  ;;  %v830_v8 = vsub.f32 %v1421_v50, %v795_v63 }
 0x130   : > { %v831_v9 = vsub.f32 %v1429_v57, %v795_v63  ;;  %v832_v10 = vsub.f32 %v1431_v62, %v795_v63  ;;  %v833_v12 = vsub.f32 %v1441_v4, %v795_v63  ;;  %v834_v13 = vsub.f32 %v1458_v15, %v795_v63 }
 0x131   : > { %v827_v3 = vsub.f32 %v825_v1, %v826_v2  ;;  %v835_v14 = vsub.f32 %v772_v27, %v795_v63  ;;  %v836_v16 = vsub.f32 %v773_v38, %v795_v63 }
 0x133   : > { %v828_v5 = vmax.f32 %v827_v3, 0.0 }
 0x135   : > { %v837_v6 = vadd.f32 1e-05, %v828_v5 }
 0x137   : > { %1189 = vrsqrt.f32 %v837_v6 }
 0x144   : > { %v1190_v11 = vpop.eup %1189 }
 0x145   : > { %v839_v17 = vmul.f32 %v1190_v11, %v829_v7  ;;  %v840_v18 = vmul.f32 %v1190_v11, %v830_v8  ;;  %v841_v19 = vmul.f32 %v1190_v11, %v831_v9  ;;  %v842_v20 = vmul.f32 %v1190_v11, %v832_v10 }
 0x146   : > { %v843_v21 = vmul.f32 %v1190_v11, %v833_v12  ;;  %v844_v22 = vmul.f32 %v1190_v11, %v834_v13  ;;  %v845_v54 = vmul.f32 %v1190_v11, %v835_v14  ;;  %v846_v23 = vmul.f32 %v1190_v11, %v836_v16 }
 0x147   : > { %vm847_vm1 = vcmp.ge.f32.partialorder %v839_v17, 0.0  ;;  %vm848_vm2 = vcmp.ge.f32.partialorder %v840_v18, 0.0  ;;  %vm849_vm3 = vcmp.ge.f32.partialorder %v841_v19, 0.0  ;;  %vm850_vm4 = vcmp.ge.f32.partialorder %v842_v20, 0.0 }
 0x148   : > { %vm851_vm5 = vcmp.ge.f32.partialorder %v843_v21, 0.0  ;;  %vm852_vm6 = vcmp.ge.f32.partialorder %v844_v22, 0.0  ;;  %vm853_vm7 = vcmp.ge.f32.partialorder %v845_v54, 0.0  ;;  %vm854_vm8 = vcmp.ge.f32.partialorder %v846_v23, 0.0 }
 0x149   : > { %v855_v50 = vmul.f32 0.2, %v839_v17  ;;  %v856_v57 = vmul.f32 0.2, %v840_v18  ;;  %v857_v62 = vmul.f32 0.2, %v841_v19 }
 0x14a   : > { %v858_v4 = vmul.f32 0.2, %v842_v20  ;;  %v859_v15 = vmul.f32 0.2, %v843_v21  ;;  %v860_v24 = vmul.f32 0.2, %v844_v22 }
 0x14b   : > { %v861_v25 = vmul.f32 0.2, %v845_v54  ;;  %v862_v26 = vmul.f32 0.2, %v846_v23  ;;  %v863_v27 = vsel %vm847_vm1, %v839_v17, %v855_v50  ;;  %v864_v28 = vsel %vm848_vm2, %v840_v18, %v856_v57 }
 0x14c   : > { %v865_v29 = vsel %vm849_vm3, %v841_v19, %v857_v62  ;;  %v866_v30 = vsel %vm850_vm4, %v842_v20, %v858_v4  ;;  %v867_v31 = vsel %vm851_vm5, %v843_v21, %v859_v15  ;;  %v868_v32 = vsel %vm852_vm6, %v844_v22, %v860_v24  ;;  %871 = vst.msk [vmem:[%s1381_s18] sm:$0xff] %vm232_vm0, %v863_v27 }
 0x14d   : > { %872 = vst.msk [vmem:[%s1381_s18 + $0x8] sm:$0xff] %vm232_vm0, %v864_v28  ;;  %v869_v33 = vsel %vm853_vm7, %v845_v54, %v861_v25  ;;  %v870_v34 = vsel %vm854_vm8, %v846_v23, %v862_v26  ;;  %873 = vst.msk [vmem:[%s1381_s18 + $0x10] sm:$0xff] %vm232_vm0, %v865_v29 }
 0x14e   : > { %874 = vst.msk [vmem:[%s1381_s18 + $0x18] sm:$0xff] %vm232_vm0, %v866_v30  ;;  %875 = vst.msk [vmem:[%s1381_s18 + $0x20] sm:$0xff] %vm232_vm0, %v867_v31 }
 0x14f   : > { %876 = vst.msk [vmem:[%s1381_s18 + $0x28] sm:$0xff] %vm232_vm0, %v868_v32  ;;  %877 = vst.msk [vmem:[%s1381_s18 + $0x30] sm:$0xff] %vm232_vm0, %v869_v33 }
 0x150   : > { %878 = vst.msk [vmem:[%s1381_s18 + $0x38] sm:$0xff] %vm232_vm0, %v870_v34 }
 0x151 PF: > { %s13_s14 = sadd.s32 1, %s1213_s14   ;;  %s1523_s12 = smov %s1209_s13 }
 0x152   : > { %p10_p5 = scmp.ge.s32.totalorder %s13_s14, 4   ;;  %s1524_s13 = smov %s1526_s15 }
 0x154   :  { %12 = sbr.rel (!%p10_p5) target bundleno = 2 (0x2), region = 73 }

// kernel: _lambda_.14
= control target key start
LH: loop header
LB: loop body
LE: loop exit
PB: predicated region body
PF: predicated region fallthrough
CT: control target
= control target key end

     0   :  { %s2412_s12 = smov 0   ;;  %s2838_s0 = inlined_call_operand.vmem [shape: bf16[2,10,10,64], index: 0, kind: input, shape index: {}]   ;;  %s2839_s1 = inlined_call_operand.vmem [shape: bf16[16,64,128], index: 1, kind: input, shape index: {}]   ;;  %s2840_s2 = inlined_call_operand.vmem [shape: f32[1,128], index: 2, kind: input, shape index: {}]   ;;  %s2841_s3 = inlined_call_operand.vmem [shape: f32[2,7,7,128], index: 3, kind: output, shape index: {}]  }
   0x1 LB: > { %s1777_s13 = sadd.s32 4294967295, %s2384_s12   ;;  %p1781_p0 = scmp.ge.s32.totalorder %s2384_s12, 1  ;;  %s2384_s12 = sphi %s2412_s12, %s13_s12  }
   0x2   : > { %p137_p1 = scmp.lt.s32.totalorder %s2384_s12, 3 }
   0x4   : > { %p138_p2 = pnand %p1781_p0, %p137_p1 }
   0x5   : > { %p161_p3 = scmp.lt.s32.totalorder (!%p138_p2), %s1777_s13, 1  ;;  %s2435_s24 = smov (!%p138_p2), 0  }
   0x6   : > { %141 = sbr.rel (%p138_p2) target bundleno = 424 (0x1a8), region = 32 }
   0xb   : > { %v2423_v0 = vld [vmem:[%s2840_s2] ss:$0 sm:$0xff]  ;;  %s2843_s13 = smov (!%p161_p3, %s1777_s13), 1 }
   0xc   : > { %s2280_s16 = smul.u32 80, %s2843_s13 }
   0xd   : > { %s2281_s17 = smul.u32 56, %s2843_s13 }
   0xe   : > { %s2428_s20 = scalar_lea.vmem %s2838_s0, %s2280_s16 }
   0xf   : > { %s2433_s23 = scalar_lea.vmem %s2841_s3, %s2281_s17 }
  0x10 LB: >> { %v2300_v1 = vld [vmem:[%s2839_s1 + $0x38] sm:$0xff]   ;;  %v2390_v2 = vmov 0.0   ;;  %v2302_v4 = vld [vmem:[%s2839_s1 + $0x30] sm:$0xff]   ;;  %vm2391_vm0 = vmmov 0   ;;  %s2007_s4 = sshll.u32 %s2388_s24, 3  ;;  %v2304_v6 = vld [vmem:[%s2839_s1 + $0x28] sm:$0xff]   ;;  %s2388_s24 = sphi %s2435_s24, %s178_s24  }
  0x11   : >> { %2088 = vmatprep.subr.bf16.mxu0 %v2390_v2  ;;  %2100 = vmatprep.subr.bf16.mxu1 %v2390_v2  ;;  %v2301_v3 = vld [vmem:[%s2839_s1 + $0x18] sm:$0xff]   ;;  %v2303_v5 = vld [vmem:[%s2839_s1 + $0x10] sm:$0xff]   ;;  %s2464_s7 = scalar_lea.vmem %s2428_s20, %s2007_s4  ;;  %v2305_v7 = vld [vmem:[%s2839_s1 + $0x8] sm:$0xff]   ;;  %vm235_vm1 = vcmask 523264   ;;  %s1528_s26 = scalar_lea.vmem %s2433_s23, %s2007_s4 }
  0x12   : >> { %2089 = vmatpush3.bf16.msra.mxu0 %v2300_v1  ;;  %2096 = vmatprep.mubr.msk.bf16.mxu0 %vm2391_vm0, %v2390_v2  ;;  %v182_v8 = vld [vmem:[%s2464_s7] sm:$0xf]  ;;  %v183_v14 = vld [vmem:[%s2464_s7 + $0x4] sm:$0x1]  ;;  %v2310_v16 = vld [vmem:[%s2839_s1 + $0x58] sm:$0xff]   ;;  %s178_s24 = sadd.s32 1, %s2388_s24  }
  0x13   : >> { %2101 = vmatpush3.bf16.msra.mxu1 %v2301_v3  ;;  %2090 = vmatprep.subr.bf16.mxu0 %v2390_v2  ;;  %v1794_v9 = vcombine.low %v182_v8, %v182_v8  ;;  %v2306_v10 = vld [vmem:[%s2839_s1 + $0x20] sm:$0xff]   ;;  %v2311_v18 = vld [vmem:[%s2839_s1 + $0x78] sm:$0xff]   ;;  %v1813_v19 = vcombine.low %v182_v8, %v183_v14  ;;  %v2312_v20 = vld [vmem:[%s2839_s1 + $0x50] sm:$0xff]   ;;  %p175_p4 = scmp.ge.s32.totalorder %s178_s24, 7  }
  0x14   : >> { %2102 = vmatprep.subr.bf16.mxu1 %v2390_v2  ;;  %2108 = vmatprep.mubr.msk.bf16.mxu1 %vm2391_vm0, %v2390_v2  ;;  %v2307_v11 = vld [vmem:[%s2839_s1] sm:$0xff]   ;;  %v2313_v21 = vld [vmem:[%s2839_s1 + $0x70] sm:$0xff]   ;;  %v2314_v22 = vld [vmem:[%s2839_s1 + $0x48] sm:$0xff]   ;;  %vm1537_vm2 = vcmask (%p175_p4), 1046528  }
  0x15   : >> { %v205_v12 = vshrl.u32 %v1794_v9, 16  ;;  %v207_v13 = vshll.u32 %v1794_v9, 16  ;;  %v437_v23 = vshrl.u32 %v1813_v19, 16  ;;  %v440_v24 = vshll.u32 %v1813_v19, 16  ;;  %v2315_v25 = vld [vmem:[%s2839_s1 + $0x68] sm:$0xff]   ;;  %v2316_v26 = vld [vmem:[%s2839_s1 + $0x40] sm:$0xff]  }
  0x16   : >> { %2091 = vmatpush3.bf16.msra.mxu0 %v2302_v4  ;;  %v2317_v29 = vld [vmem:[%s2839_s1 + $0x60] sm:$0xff]   ;;  %v358_v30 = vrot.slane %v1813_v19, 1  ;;  %v2318_v31 = vld [vmem:[%s2839_s1 + $0x98] sm:$0xff]   ;;  %v1833_v34 = vld [vmem:[%s2464_s7 + $0x8] sm:$0xf] }
  0x17   : >> { %2103 = vmatpush3.bf16.msra.mxu1 %v2303_v5  ;;  %2092 = vmatprep.subr.bf16.mxu0 %v2390_v2  ;;  %v209_v15 = vrot.slane %v207_v13, 1  ;;  %v439_v27 = vrot.slane %v437_v23, 1  ;;  %v442_v28 = vrot.slane %v440_v24, 2  ;;  %v2319_v33 = vld [vmem:[%s2839_s1 + $0xb8] sm:$0xff]   ;;  %v2320_v35 = vld [vmem:[%s2839_s1 + $0x90] sm:$0xff]   ;;  %v1856_v36 = vcombine.low %v1833_v34, %v1833_v34  ;;  %v2322_v38 = vld [vmem:[%s2839_s1 + $0x88] sm:$0xff]  }
  0x18   : >> { %2104 = vmatprep.subr.bf16.mxu1 %v2390_v2  ;;  %v2321_v37 = vld [vmem:[%s2839_s1 + $0xb0] sm:$0xff]   ;;  %v2323_v40 = vld [vmem:[%s2839_s1 + $0xa8] sm:$0xff]   ;;  %v2324_v41 = vld [vmem:[%s2839_s1 + $0x80] sm:$0xff]  }
  0x19   : >> { %v210_v17 = vor.u32 %v209_v15, %v205_v12  ;;  %v443_v32 = vor.u32 %v442_v28, %v439_v27  ;;  %v610_v39 = vshll.u32 %v1856_v36, 16  ;;  %v608_v42 = vshrl.u32 %v1856_v36, 16  ;;  %v2325_v44 = vld [vmem:[%s2839_s1 + $0xa0] sm:$0xff]   ;;  %v1834_v45 = vld [vmem:[%s2464_s7 + $0xc] sm:$0x1]  ;;  %v2328_v47 = vld [vmem:[%s2839_s1 + $0xd8] sm:$0xff]  }
  0x1a   : >> { %2093 = vmatpush3.bf16.msra.mxu0 %v2304_v6  ;;  %v2329_v48 = vld [vmem:[%s2839_s1 + $0xf8] sm:$0xff]   ;;  %v1870_v49 = vcombine.low %v1833_v34, %v1834_v45  ;;  %v2330_v50 = vld [vmem:[%s2839_s1 + $0xd0] sm:$0xff]   ;;  %v2332_v54 = vld [vmem:[%s2839_s1 + $0xc8] sm:$0xff]  }
  0x1b   : >> { %2105 = vmatpush3.bf16.msra.mxu1 %v2305_v7  ;;  %2094 = vmatprep.subr.bf16.mxu0 %v2390_v2  ;;  %v612_v43 = vrot.slane %v610_v39, 1  ;;  %v2331_v51 = vld [vmem:[%s2839_s1 + $0xf0] sm:$0xff]   ;;  %v2333_v55 = vld [vmem:[%s2839_s1 + $0xe8] sm:$0xff]   ;;  %v2334_v58 = vld [vmem:[%s2839_s1 + $0xc0] sm:$0xff]  }
  0x1c   : >> { %2106 = vmatprep.subr.bf16.mxu1 %v2390_v2  ;;  %v773_v52 = vshrl.u32 %v1870_v49, 16  ;;  %v776_v53 = vshll.u32 %v1870_v49, 16  ;;  %v2335_v59 = vld [vmem:[%s2839_s1 + $0xe0] sm:$0xff]   ;;  %v694_v60 = vrot.slane %v1870_v49, 1  ;;  %v2336_v61 = vld [vmem:[%s2839_s1 + $0x118] sm:$0xff]   ;;  %v2338_v3 = vld [vmem:[%s2839_s1 + $0x110] sm:$0xff]  }
  0x1d   : >> { %v613_v46 = vor.u32 %v612_v43, %v608_v42  ;;  %v2337_v63 = vld [vmem:[%s2839_s1 + $0x138] sm:$0xff]   ;;  %v1890_v1 = vld [vmem:[%s2464_s7 + $0x10] sm:$0xf]  ;;  %v2340_v6 = vld [vmem:[%s2839_s1 + $0x108] sm:$0xff]  }
  0x1e   : >> { %2095 = vmatpush3.bf16.msra.mxu0 %v2306_v10  ;;  %v775_v56 = vrot.slane %v773_v52, 1  ;;  %v778_v57 = vrot.slane %v776_v53, 2  ;;  %v1913_v4 = vcombine.low %v1890_v1, %v1890_v1  ;;  %v2339_v5 = vld [vmem:[%s2839_s1 + $0x130] sm:$0xff]   ;;  %v2342_v9 = vld [vmem:[%s2839_s1 + $0x100] sm:$0xff]   ;;  %v2346_v14 = vld [vmem:[%s2839_s1 + $0x158] sm:$0xff]  }
  0x1f   : >> { %2107 = vmatpush3.bf16.msra.mxu1 %v2307_v11  ;;  %2112 = vmatprep.subr.bf16.mxu0 %v2390_v2  ;;  %v2343_v12 = vld [vmem:[%s2839_s1 + $0x120] sm:$0xff]   ;;  %v1891_v15 = vld [vmem:[%s2464_s7 + $0x14] sm:$0x1]  ;;  %v2351_v23 = vld [vmem:[%s2839_s1 + $0x168] sm:$0xff]  }
  0x20   : >> { %2124 = vmatprep.subr.bf16.mxu1 %v2390_v2  ;;  %v779_v62 = vor.u32 %v778_v57, %v775_v56  ;;  %v946_v7 = vshll.u32 %v1913_v4, 16  ;;  %v944_v10 = vshrl.u32 %v1913_v4, 16  ;;  %v2349_v19 = vld [vmem:[%s2839_s1 + $0x170] sm:$0xff]   ;;  %v2353_v27 = vld [vmem:[%s2839_s1 + $0x160] sm:$0xff]   ;;  %v2358_v36 = vld [vmem:[%s2839_s1 + $0x188] sm:$0xff]  }
  0x21   : >> { %2097 = vmatmul.mubr.msk.bf16.vlgmr.msra.gmra.mxu0 %vm235_vm1, %v210_v17  ;;  %v1927_v17 = vcombine.low %v1890_v1, %v1891_v15  ;;  %v2360_v39 = vld [vmem:[%s2839_s1 + $0x180] sm:$0xff]   ;;  %v1948_v45 = vld [vmem:[%s2464_s7 + $0x1c] sm:$0x1]  ;;  %v2367_v49 = vld [vmem:[%s2839_s1 + $0x1f0] sm:$0xff]  }
  0x22   : >> { %2109 = vmatmul.mubr.msk.bf16.vlgmr.msra.gmra.mxu1 %vm235_vm1, %v182_v8  ;;  %2113 = vmatpush3.bf16.msra.mxu0 %v2310_v16  ;;  %v2341_v8 = vld [vmem:[%s2839_s1 + $0x128] sm:$0xff]   ;;  %v948_v11 = vrot.slane %v946_v7, 1  ;;  %v2347_v16 = vld [vmem:[%s2839_s1 + $0x178] sm:$0xff]   ;;  %v2361_v42 = vld [vmem:[%s2839_s1 + $0x1a0] sm:$0xff]  }
  0x23   : >> { %2125 = vmatpush3.bf16.msra.mxu1 %v2311_v18  ;;  %2114 = vmatprep.subr.bf16.mxu0 %v2390_v2  ;;  %v2348_v18 = vld [vmem:[%s2839_s1 + $0x150] sm:$0xff]   ;;  %v1030_v28 = vrot.slane %v1927_v17, 1  ;;  %v2368_v52 = vld [vmem:[%s2839_s1 + $0x1c8] sm:$0xff]   ;;  %v2370_v56 = vld [vmem:[%s2839_s1 + $0x1c0] sm:$0xff]  }
  0x24   : >> { %2126 = vmatprep.subr.bf16.mxu1 %v2390_v2  ;;  %2120 = vmatprep.mubr.msk.bf16.mxu0 %vm2391_vm0, %v2390_v2  ;;  %v949_v13 = vor.u32 %v948_v11, %v944_v10  ;;  %v2369_v53 = vld [vmem:[%s2839_s1 + $0x1e8] sm:$0xff]   ;;  %v2371_v57 = vld [vmem:[%s2839_s1 + $0x1e0] sm:$0xff]  }
  0x25   : >> { %2132 = vmatprep.mubr.msk.bf16.mxu1 %vm2391_vm0, %v2390_v2 }
  0x26   : >> { %2115 = vmatpush3.bf16.msra.mxu0 %v2312_v20  ;;  %v1109_v20 = vshrl.u32 %v1927_v17, 16 }
  0x27   : >> { %2127 = vmatpush3.bf16.msra.mxu1 %v2313_v21  ;;  %2116 = vmatprep.subr.bf16.mxu0 %v2390_v2  ;;  %v1112_v21 = vshll.u32 %v1927_v17, 16 }
  0x28   : >> { %2128 = vmatprep.subr.bf16.mxu1 %v2390_v2  ;;  %v1111_v24 = vrot.slane %v1109_v20, 1 }
  0x2a   : >> { %2117 = vmatpush3.bf16.msra.mxu0 %v2314_v22  ;;  %v2350_v22 = vld [vmem:[%s2839_s1 + $0x148] sm:$0xff]  }
  0x2b   : >> { %2129 = vmatpush3.bf16.msra.mxu1 %v2315_v25  ;;  %2118 = vmatprep.subr.bf16.mxu0 %v2390_v2  ;;  %v1114_v25 = vrot.slane %v1112_v21, 2 }
  0x2c   : >> { %2130 = vmatprep.subr.bf16.mxu1 %v2390_v2 }
  0x2e   : >> { %2119 = vmatpush3.bf16.msra.mxu0 %v2316_v26  ;;  %v2352_v26 = vld [vmem:[%s2839_s1 + $0x140] sm:$0xff]  }
  0x2f   : >> { %2131 = vmatpush3.bf16.msra.mxu1 %v2317_v29  ;;  %2136 = vmatprep.subr.bf16.mxu0 %v2390_v2  ;;  %v1115_v29 = vor.u32 %v1114_v25, %v1111_v24 }
  0x30   : >> { %2148 = vmatprep.subr.bf16.mxu1 %v2390_v2 }
  0x31   : >> { %2121 = vmatmul.mubr.msk.bf16.vlgmr.msra.gmra.mxu0 %vm235_vm1, %v358_v30  ;;  %v2354_v30 = vld [vmem:[%s2839_s1 + $0x198] sm:$0xff]  }
  0x32   : >> { %2133 = vmatmul.mubr.msk.bf16.vlgmr.msra.gmra.mxu1 %vm235_vm1, %v443_v32  ;;  %2137 = vmatpush3.bf16.msra.mxu0 %v2318_v31  ;;  %v2355_v31 = vld [vmem:[%s2839_s1 + $0x1b8] sm:$0xff]  }
  0x33   : >> { %2149 = vmatpush3.bf16.msra.mxu1 %v2319_v33  ;;  %2138 = vmatprep.subr.bf16.mxu0 %v2390_v2  ;;  %v1947_v32 = vld [vmem:[%s2464_s7 + $0x18] sm:$0xf]  ;;  %v2356_v33 = vld [vmem:[%s2839_s1 + $0x190] sm:$0xff]  }
  0x34   : >> { %2150 = vmatprep.subr.bf16.mxu1 %v2390_v2  ;;  %2144 = vmatprep.mubr.msk.bf16.mxu0 %vm2391_vm0, %v2390_v2 }
  0x35   : >> { %2156 = vmatprep.mubr.msk.bf16.mxu1 %vm2391_vm0, %v2390_v2 }
  0x36   : >> { %2139 = vmatpush3.bf16.msra.mxu0 %v2320_v35  ;;  %v2357_v35 = vld [vmem:[%s2839_s1 + $0x1b0] sm:$0xff]  }
  0x37   : >> { %2151 = vmatpush3.bf16.msra.mxu1 %v2321_v37  ;;  %2140 = vmatprep.subr.bf16.mxu0 %v2390_v2 }
  0x38   : >> { %2152 = vmatprep.subr.bf16.mxu1 %v2390_v2 }
  0x3a   : >> { %2141 = vmatpush3.bf16.msra.mxu0 %v2322_v38  ;;  %v2359_v38 = vld [vmem:[%s2839_s1 + $0x1a8] sm:$0xff]  }
  0x3b   : >> { %2153 = vmatpush3.bf16.msra.mxu1 %v2323_v40  ;;  %2142 = vmatprep.subr.bf16.mxu0 %v2390_v2 }
  0x3c   : >> { %2154 = vmatprep.subr.bf16.mxu1 %v2390_v2 }
  0x3e   : >> { %2143 = vmatpush3.bf16.msra.mxu0 %v2324_v41 }
  0x3f   : >> { %2155 = vmatpush3.bf16.msra.mxu1 %v2325_v44  ;;  %2160 = vmatprep.subr.bf16.mxu0 %v2390_v2  ;;  %v2364_v44 = vld [vmem:[%s2839_s1 + $0x1d8] sm:$0xff]  }
  0x40   : >> { %2172 = vmatprep.subr.bf16.mxu1 %v2390_v2 }
  0x41   : >> { %2145 = vmatmul.mubr.msk.bf16.vlgmr.msra.gmra.mxu0 %vm235_vm1, %v1833_v34  ;;  %v1970_v34 = vcombine.low %v1947_v32, %v1947_v32 }
  0x42   : >> { %2157 = vmatmul.mubr.msk.bf16.vlgmr.msra.gmra.mxu1 %vm235_vm1, %v613_v46  ;;  %2161 = vmatpush3.bf16.msra.mxu0 %v2328_v47  ;;  %v2365_v46 = vld [vmem:[%s2839_s1 + $0x1f8] sm:$0xff]   ;;  %v1984_v47 = vcombine.low %v1947_v32, %v1948_v45 }
  0x43   : >> { %2173 = vmatpush3.bf16.msra.mxu1 %v2329_v48  ;;  %2162 = vmatprep.subr.bf16.mxu0 %v2390_v2  ;;  %v1282_v37 = vshll.u32 %v1970_v34, 16  ;;  %v1280_v40 = vshrl.u32 %v1970_v34, 16  ;;  %v2366_v48 = vld [vmem:[%s2839_s1 + $0x1d0] sm:$0xff]  }
  0x44   : >> { %2174 = vmatprep.subr.bf16.mxu1 %v2390_v2  ;;  %2168 = vmatprep.mubr.msk.bf16.mxu0 %vm2391_vm0, %v2390_v2 }
  0x45   : >> { %2180 = vmatprep.mubr.msk.bf16.mxu1 %vm2391_vm0, %v2390_v2  ;;  %v1284_v41 = vrot.slane %v1282_v37, 1 }
  0x46   : >> { %2163 = vmatpush3.bf16.msra.mxu0 %v2330_v50  ;;  %v1445_v50 = vshrl.u32 %v1984_v47, 16 }
  0x47   : >> { %2175 = vmatpush3.bf16.msra.mxu1 %v2331_v51  ;;  %2164 = vmatprep.subr.bf16.mxu0 %v2390_v2  ;;  %v1285_v43 = vor.u32 %v1284_v41, %v1280_v40  ;;  %v1448_v51 = vshll.u32 %v1984_v47, 16 }
  0x48   : >> { %2176 = vmatprep.subr.bf16.mxu1 %v2390_v2 }
  0x4a   : >> { %2165 = vmatpush3.bf16.msra.mxu0 %v2332_v54  ;;  %v1447_v54 = vrot.slane %v1445_v50, 1 }
  0x4b   : >> { %2177 = vmatpush3.bf16.msra.mxu1 %v2333_v55  ;;  %2166 = vmatprep.subr.bf16.mxu0 %v2390_v2  ;;  %v1450_v55 = vrot.slane %v1448_v51, 2 }
  0x4c   : >> { %2178 = vmatprep.subr.bf16.mxu1 %v2390_v2 }
  0x4e   : >> { %2167 = vmatpush3.bf16.msra.mxu0 %v2334_v58  ;;  %v1366_v58 = vrot.slane %v1984_v47, 1 }
  0x4f   : >> { %2179 = vmatpush3.bf16.msra.mxu1 %v2335_v59  ;;  %2184 = vmatprep.subr.bf16.mxu0 %v2390_v2  ;;  %v1451_v59 = vor.u32 %v1450_v55, %v1447_v54 }
  0x50   : >> { %2196 = vmatprep.subr.bf16.mxu1 %v2390_v2 }
  0x51   : >> { %2169 = vmatmul.mubr.msk.bf16.vlgmr.msra.gmra.mxu0 %vm235_vm1, %v694_v60 }
  0x52   : >> { %2181 = vmatmul.mubr.msk.bf16.vlgmr.msra.gmra.mxu1 %vm235_vm1, %v779_v62  ;;  %2185 = vmatpush3.bf16.msra.mxu0 %v2336_v61 }
  0x53   : >> { %2197 = vmatpush3.bf16.msra.mxu1 %v2337_v63  ;;  %2186 = vmatprep.subr.bf16.mxu0 %v2390_v2 }
  0x54   : >> { %2198 = vmatprep.subr.bf16.mxu1 %v2390_v2  ;;  %2192 = vmatprep.mubr.msk.bf16.mxu0 %vm2391_vm0, %v2390_v2 }
  0x55   : >> { %2204 = vmatprep.mubr.msk.bf16.mxu1 %vm2391_vm0, %v2390_v2 }
  0x56   : >> { %2187 = vmatpush3.bf16.msra.mxu0 %v2338_v3 }
  0x57   : >> { %2199 = vmatpush3.bf16.msra.mxu1 %v2339_v5  ;;  %2188 = vmatprep.subr.bf16.mxu0 %v2390_v2 }
  0x58   : >> { %2200 = vmatprep.subr.bf16.mxu1 %v2390_v2 }
  0x5a   : >> { %2189 = vmatpush3.bf16.msra.mxu0 %v2340_v6 }
  0x5b   : >> { %2201 = vmatpush3.bf16.msra.mxu1 %v2341_v8  ;;  %2190 = vmatprep.subr.bf16.mxu0 %v2390_v2 }
  0x5c   : >> { %2202 = vmatprep.subr.bf16.mxu1 %v2390_v2 }
  0x5e   : >> { %2191 = vmatpush3.bf16.msra.mxu0 %v2342_v9 }
  0x5f   : >> { %2203 = vmatpush3.bf16.msra.mxu1 %v2343_v12  ;;  %2208 = vmatprep.subr.bf16.mxu0 %v2390_v2 }
  0x60   : >> { %2220 = vmatprep.subr.bf16.mxu1 %v2390_v2 }
  0x61   : >> { %2193 = vmatmul.mubr.msk.bf16.vlgmr.msra.gmra.mxu0 %vm235_vm1, %v1890_v1 }
  0x62   : >> { %2205 = vmatmul.mubr.msk.bf16.vlgmr.msra.gmra.mxu1 %vm235_vm1, %v949_v13  ;;  %2209 = vmatpush3.bf16.msra.mxu0 %v2346_v14 }
  0x63   : >> { %2221 = vmatpush3.bf16.msra.mxu1 %v2347_v16  ;;  %2210 = vmatprep.subr.bf16.mxu0 %v2390_v2 }
  0x64   : >> { %2222 = vmatprep.subr.bf16.mxu1 %v2390_v2  ;;  %2216 = vmatprep.mubr.msk.bf16.mxu0 %vm2391_vm0, %v2390_v2 }
  0x65   : >> { %2228 = vmatprep.mubr.msk.bf16.mxu1 %vm2391_vm0, %v2390_v2 }
  0x66   : >> { %2211 = vmatpush3.bf16.msra.mxu0 %v2348_v18 }
  0x67   : >> { %2223 = vmatpush3.bf16.msra.mxu1 %v2349_v19  ;;  %2212 = vmatprep.subr.bf16.mxu0 %v2390_v2 }
  0x68   : >> { %2224 = vmatprep.subr.bf16.mxu1 %v2390_v2 }
  0x6a   : >> { %2213 = vmatpush3.bf16.msra.mxu0 %v2350_v22 }
  0x6b   : >> { %2225 = vmatpush3.bf16.msra.mxu1 %v2351_v23  ;;  %2214 = vmatprep.subr.bf16.mxu0 %v2390_v2 }
  0x6c   : >> { %2226 = vmatprep.subr.bf16.mxu1 %v2390_v2 }
  0x6e   : >> { %2215 = vmatpush3.bf16.msra.mxu0 %v2352_v26 }
  0x6f   : >> { %2227 = vmatpush3.bf16.msra.mxu1 %v2353_v27  ;;  %2232 = vmatprep.subr.bf16.mxu0 %v2390_v2 }
  0x70   : >> { %2244 = vmatprep.subr.bf16.mxu1 %v2390_v2 }
  0x71   : >> { %2217 = vmatmul.mubr.msk.bf16.vlgmr.msra.gmra.mxu0 %vm235_vm1, %v1030_v28 }
  0x72   : >> { %2229 = vmatmul.mubr.msk.bf16.vlgmr.msra.gmra.mxu1 %vm235_vm1, %v1115_v29  ;;  %2233 = vmatpush3.bf16.msra.mxu0 %v2354_v30 }
  0x73   : >> { %2245 = vmatpush3.bf16.msra.mxu1 %v2355_v31  ;;  %2234 = vmatprep.subr.bf16.mxu0 %v2390_v2 }
  0x74   : >> { %2246 = vmatprep.subr.bf16.mxu1 %v2390_v2  ;;  %2240 = vmatprep.mubr.msk.bf16.mxu0 %vm2391_vm0, %v2390_v2 }
  0x75   : >> { %2252 = vmatprep.mubr.msk.bf16.mxu1 %vm2391_vm0, %v2390_v2 }
  0x76   : >> { %2235 = vmatpush3.bf16.msra.mxu0 %v2356_v33 }
  0x77   : >> { %2247 = vmatpush3.bf16.msra.mxu1 %v2357_v35  ;;  %2236 = vmatprep.subr.bf16.mxu0 %v2390_v2 }
  0x78   : >> { %2248 = vmatprep.subr.bf16.mxu1 %v2390_v2 }
  0x7a   : >> { %2237 = vmatpush3.bf16.msra.mxu0 %v2358_v36 }
  0x7b   : >> { %2249 = vmatpush3.bf16.msra.mxu1 %v2359_v38  ;;  %2238 = vmatprep.subr.bf16.mxu0 %v2390_v2 }
  0x7c   : >> { %2250 = vmatprep.subr.bf16.mxu1 %v2390_v2 }
  0x7e   : >> { %2239 = vmatpush3.bf16.msra.mxu0 %v2360_v39 }
  0x7f   : >> { %2251 = vmatpush3.bf16.msra.mxu1 %v2361_v42  ;;  %2256 = vmatprep.subr.bf16.mxu0 %v2390_v2 }
  0x80   : >> { %2268 = vmatprep.subr.bf16.mxu1 %v2390_v2 }
  0x81   : >> { %2241 = vmatmul.mubr.msk.bf16.vlgmr.msra.gmra.mxu0 %vm235_vm1, %v1947_v32 }
  0x82   : >> { %2253 = vmatmul.mubr.msk.bf16.vlgmr.msra.gmra.mxu1 %vm235_vm1, %v1285_v43  ;;  %2257 = vmatpush3.bf16.msra.mxu0 %v2364_v44 }
  0x83   : >> { %2269 = vmatpush3.bf16.msra.mxu1 %v2365_v46  ;;  %2258 = vmatprep.subr.bf16.mxu0 %v2390_v2 }
  0x84   : >> { %2270 = vmatprep.subr.bf16.mxu1 %v2390_v2  ;;  %2264 = vmatprep.mubr.msk.bf16.mxu0 %vm2391_vm0, %v2390_v2 }
  0x85   : >> { %2276 = vmatprep.mubr.msk.bf16.mxu1 %vm2391_vm0, %v2390_v2 }
  0x86   : >> { %2259 = vmatpush3.bf16.msra.mxu0 %v2366_v48 }
  0x87   : >> { %2271 = vmatpush3.bf16.msra.mxu1 %v2367_v49  ;;  %2260 = vmatprep.subr.bf16.mxu0 %v2390_v2 }
  0x88   : >> { %2272 = vmatprep.subr.bf16.mxu1 %v2390_v2 }
  0x8a   : >> { %2261 = vmatpush3.bf16.msra.mxu0 %v2368_v52 }
  0x8b   : >> { %2273 = vmatpush3.bf16.msra.mxu1 %v2369_v53  ;;  %2262 = vmatprep.subr.bf16.mxu0 %v2390_v2 }
  0x8c   : >> { %2274 = vmatprep.subr.bf16.mxu1 %v2390_v2 }
  0x8e   : >> { %2263 = vmatpush3.bf16.msra.mxu0 %v2370_v56 }
  0x8f   : >> { %2275 = vmatpush3.bf16.msra.mxu1 %v2371_v57 }
  0x91   : >> { %2265 = vmatmul.mubr.msk.bf16.vlgmr.msra.gmra.mxu0 %vm235_vm1, %v1366_v58 }
  0x92   : >> { %2277 = vmatmul.mubr.msk.bf16.vlgmr.msra.gmra.mxu1 %vm235_vm1, %v1451_v59 }
  0xe1   : >> { %v273_v60 = vpop.f32.mrf.mxu0 }
  0xe2   : >> { %v340_v61 = vpop.f32.mrf.mxu1 }
  0xe3   : >> { %v341_v62 = vadd.f32 %v340_v61, %v273_v60  ;;  %v2098_v63 = vpop.f32.mrf.mxu0 }
  0xe4   : >> { %v2110_v1 = vpop.f32.mrf.mxu1 }
  0xe5   : >> { %v276_v3 = vpop.f32.mrf.mxu0 }
  0xe6   : >> { %v343_v4 = vpop.f32.mrf.mxu1 }
  0xe7   : >> { %v2099_v5 = vpop.f32.mrf.mxu0 }
  0xe8   : >> { %v2111_v6 = vpop.f32.mrf.mxu1 }
  0xf1   : >> { %v420_v7 = vpop.f32.mrf.mxu0 }
  0xf2   : >> { %v426_v8 = vadd.f32 %v420_v7, %v341_v62  ;;  %v505_v2 = vpop.f32.mrf.mxu1 }
  0xf3   : >> { %v2122_v9 = vpop.f32.mrf.mxu0 }
  0xf4   : >> { %v511_v10 = vadd.f32 %v505_v2, %v426_v8  ;;  %v2134_v11 = vpop.f32.mrf.mxu1 }
  0xf5   : >> { %v423_v12 = vpop.f32.mrf.mxu0 }
  0xf6   : >> { %v508_v13 = vpop.f32.mrf.mxu1 }
  0xf7   : >> { %v2123_v14 = vpop.f32.mrf.mxu0 }
  0xf8   : >> { %v2135_v15 = vpop.f32.mrf.mxu1 }
 0x101   : >> { %v588_v16 = vpop.f32.mrf.mxu0 }
 0x102   : >> { %v675_v17 = vpop.f32.mrf.mxu1  ;;  %v594_v43 = vadd.f32 %v588_v16, %v511_v10 }
 0x103   : >> { %v2146_v18 = vpop.f32.mrf.mxu0 }
 0x104   : >> { %v2158_v19 = vpop.f32.mrf.mxu1  ;;  %v681_v48 = vadd.f32 %v675_v17, %v594_v43 }
 0x105   : >> { %v591_v20 = vpop.f32.mrf.mxu0 }
 0x106   : >> { %v678_v21 = vpop.f32.mrf.mxu1 }
 0x107   : >> { %v2147_v22 = vpop.f32.mrf.mxu0 }
 0x108   : >> { %v2159_v23 = vpop.f32.mrf.mxu1 }
 0x111   : >> { %v756_v24 = vpop.f32.mrf.mxu0 }
 0x112   : >> { %v841_v25 = vpop.f32.mrf.mxu1  ;;  %v762_v50 = vadd.f32 %v756_v24, %v681_v48 }
 0x113   : >> { %v2170_v26 = vpop.f32.mrf.mxu0 }
 0x114   : >> { %v2182_v27 = vpop.f32.mrf.mxu1  ;;  %v847_v51 = vadd.f32 %v841_v25, %v762_v50 }
 0x115   : >> { %v759_v28 = vpop.f32.mrf.mxu0 }
 0x116   : >> { %v844_v29 = vpop.f32.mrf.mxu1 }
 0x117   : >> { %v2171_v30 = vpop.f32.mrf.mxu0 }
 0x118   : >> { %v2183_v31 = vpop.f32.mrf.mxu1 }
 0x121   : >> { %v924_v32 = vpop.f32.mrf.mxu0 }
 0x122   : >> { %v1011_v33 = vpop.f32.mrf.mxu1  ;;  %v930_v52 = vadd.f32 %v924_v32, %v847_v51 }
 0x123   : >> { %v2194_v34 = vpop.f32.mrf.mxu0 }
 0x124   : >> { %v2206_v35 = vpop.f32.mrf.mxu1  ;;  %v1017_v56 = vadd.f32 %v1011_v33, %v930_v52 }
 0x125   : >> { %v927_v36 = vpop.f32.mrf.mxu0 }
 0x126   : >> { %v1014_v37 = vpop.f32.mrf.mxu1 }
 0x127   : >> { %v2195_v38 = vpop.f32.mrf.mxu0 }
 0x128   : >> { %v2207_v39 = vpop.f32.mrf.mxu1 }
 0x131   : >> { %v1092_v40 = vpop.f32.mrf.mxu0 }
 0x132   : >> { %v1177_v41 = vpop.f32.mrf.mxu1  ;;  %v1098_v59 = vadd.f32 %v1092_v40, %v1017_v56 }
 0x133   : >> { %v2218_v42 = vpop.f32.mrf.mxu0 }
 0x134   : >> { %v2230_v44 = vpop.f32.mrf.mxu1  ;;  %v1183_v63 = vadd.f32 %v1177_v41, %v1098_v59 }
 0x135   : >> { %v1095_v45 = vpop.f32.mrf.mxu0 }
 0x136   : >> { %v1180_v46 = vpop.f32.mrf.mxu1 }
 0x137   : >> { %v2219_v47 = vpop.f32.mrf.mxu0 }
 0x138   : >> { %v2231_v49 = vpop.f32.mrf.mxu1 }
 0x141   : >> { %v1260_v53 = vpop.f32.mrf.mxu0 }
 0x142   : >> { %v1347_v54 = vpop.f32.mrf.mxu1  ;;  %v1266_v1 = vadd.f32 %v1260_v53, %v1183_v63 }
 0x143   : >> { %v2242_v55 = vpop.f32.mrf.mxu0 }
 0x144   : >> { %v2254_v57 = vpop.f32.mrf.mxu1  ;;  %v1353_v3 = vadd.f32 %v1347_v54, %v1266_v1 }
 0x145   : >> { %v1263_v58 = vpop.f32.mrf.mxu0 }
 0x146   : >> { %v1350_v60 = vpop.f32.mrf.mxu1 }
 0x147   : >> { %v2243_v61 = vpop.f32.mrf.mxu0 }
 0x148   : >> { %v2255_v62 = vpop.f32.mrf.mxu1 }
 0x151   : >> { %v1428_v4 = vpop.f32.mrf.mxu0 }
 0x152   : >> { %v1434_v5 = vadd.f32 %v1428_v4, %v1353_v3  ;;  %v1513_v6 = vpop.f32.mrf.mxu1 }
 0x153   : >> { %v2266_v7 = vpop.f32.mrf.mxu0 }
 0x154   : >> { %v1519_v8 = vadd.f32 %v1513_v6, %v1434_v5  ;;  %v2278_v2 = vpop.f32.mrf.mxu1  ;;  %177 = sbr.rel (!%p175_p4) target bundleno = 16 (0x10), region = 89 }
 0x155   : >> { %v1431_v9 = vpop.f32.mrf.mxu0 }
 0x156   : >> { %v1526_v10 = vadd.f32 %v2423_v0, %v1519_v8  ;;  %v1516_v11 = vpop.f32.mrf.mxu1 }
 0x157   : >> { %v2267_v12 = vpop.f32.mrf.mxu0 }
 0x158   : >> { %1529 = vst [vmem:[%s1528_s26] sm:$0x7f] %v1526_v10  ;;  %v2279_v13 = vpop.f32.mrf.mxu1 }
 0x15f   : > { %v2766_v14 = vld [vmem:[%s2433_s23] sm:$0x7f]  ;;  %v2769_v15 = vld [vmem:[%s2433_s23 + $0x8] sm:$0x7f]  ;;  %v2772_v16 = vld [vmem:[%s2433_s23 + $0x10] sm:$0x7f] }
 0x160   : > { %v2775_v17 = vld [vmem:[%s2433_s23 + $0x18] sm:$0x7f]  ;;  %v2778_v18 = vld [vmem:[%s2433_s23 + $0x20] sm:$0x7f]  ;;  %v2781_v19 = vld [vmem:[%s2433_s23 + $0x28] sm:$0x7f]  ;;  %v1594_v0 = vmul.f32 %v2766_v14, %v2766_v14  ;;  %v1595_v21 = vmul.f32 %v2769_v15, %v2769_v15  ;;  %v1596_v33 = vmul.f32 %v2772_v16, %v2772_v16 }
 0x161   : > { %v2784_v20 = vld [vmem:[%s2433_s23 + $0x30] sm:$0x7f]  ;;  %v1538_v22 = vsel %vm1537_vm2, %v2766_v14, 0.0  ;;  %v1545_v23 = vsel %vm1537_vm2, %v2769_v15, 0.0  ;;  %v1552_v24 = vsel %vm1537_vm2, %v2772_v16, 0.0  ;;  %v1559_v25 = vsel %vm1537_vm2, %v2775_v17, 0.0 }
 0x162   : > { %v1539_v26 = vrot.slane %v1538_v22, 4  ;;  %v1546_v27 = vrot.slane %v1545_v23, 4  ;;  %v1553_v28 = vrot.slane %v1552_v24, 4  ;;  %v1560_v29 = vrot.slane %v1559_v25, 4 }
 0x163   : > { %v1566_v30 = vsel %vm1537_vm2, %v2778_v18, 0.0  ;;  %v1573_v31 = vsel %vm1537_vm2, %v2781_v19, 0.0  ;;  %v1580_v32 = vsel %vm1537_vm2, %v2784_v20, 0.0  ;;  %v1601_v41 = vsel %vm1537_vm2, %v1594_v0, 0.0 }
 0x164   : > { %v1540_v34 = vadd.f32 %v1539_v26, %v1538_v22  ;;  %v1547_v35 = vadd.f32 %v1546_v27, %v1545_v23  ;;  %v1554_v36 = vadd.f32 %v1553_v28, %v1552_v24  ;;  %v1561_v37 = vadd.f32 %v1560_v29, %v1559_v25 }
 0x165   : > { %v1567_v38 = vrot.slane %v1566_v30, 4  ;;  %v1574_v39 = vrot.slane %v1573_v31, 4  ;;  %v1581_v40 = vrot.slane %v1580_v32, 4  ;;  %v1602_v49 = vrot.slane %v1601_v41, 4 }
 0x166   : > { %v1541_v42 = vrot.slane %v1540_v34, 2  ;;  %v1548_v43 = vrot.slane %v1547_v35, 2  ;;  %v1555_v44 = vrot.slane %v1554_v36, 2  ;;  %v1562_v45 = vrot.slane %v1561_v37, 2 }
 0x167   : > { %v1568_v46 = vadd.f32 %v1567_v38, %v1566_v30  ;;  %v1575_v47 = vadd.f32 %v1574_v39, %v1573_v31  ;;  %v1582_v48 = vadd.f32 %v1581_v40, %v1580_v32  ;;  %v1597_v56 = vmul.f32 %v2775_v17, %v2775_v17 }
 0x168   : > { %v1542_v50 = vadd.f32 %v1541_v42, %v1540_v34  ;;  %v1549_v51 = vadd.f32 %v1548_v43, %v1547_v35  ;;  %v1556_v52 = vadd.f32 %v1555_v44, %v1554_v36  ;;  %v1563_v53 = vadd.f32 %v1562_v45, %v1561_v37 }
 0x169   : > { %v1569_v54 = vrot.slane %v1568_v46, 2  ;;  %v1576_v55 = vrot.slane %v1575_v47, 2  ;;  %v1603_v57 = vadd.f32 %v1602_v49, %v1601_v41  ;;  %v1583_v1 = vrot.slane %v1582_v48, 2 }
 0x16a   : > { %v1543_v58 = vrot.slane %v1542_v50, 1  ;;  %v1550_v59 = vrot.slane %v1549_v51, 1  ;;  %v1557_v60 = vrot.slane %v1556_v52, 1  ;;  %v1564_v61 = vrot.slane %v1563_v53, 1 }
 0x16b   : > { %v1570_v62 = vadd.f32 %v1569_v54, %v1568_v46  ;;  %v1577_v63 = vadd.f32 %v1576_v55, %v1575_v47  ;;  %v1604_v3 = vrot.slane %v1603_v57, 2  ;;  %v1598_v7 = vmul.f32 %v2778_v18, %v2778_v18 }
 0x16c   : > { %v1544_v4 = vadd.f32 %v1543_v58, %v1542_v50  ;;  %v1551_v5 = vadd.f32 %v1550_v59, %v1549_v51  ;;  %v1558_v6 = vadd.f32 %v1557_v60, %v1556_v52  ;;  %v1565_v8 = vadd.f32 %v1564_v61, %v1563_v53 }
 0x16d   : > { %v1571_v2 = vrot.slane %v1570_v62, 1  ;;  %v1599_v9 = vmul.f32 %v2781_v19, %v2781_v19  ;;  %v1600_v10 = vmul.f32 %v2784_v20, %v2784_v20  ;;  %v1608_v12 = vsel %vm1537_vm2, %v1595_v21, 0.0 }
 0x16e   : > { %v1587_v11 = vadd.f32 %v1551_v5, %v1544_v4  ;;  %v1615_v13 = vsel %vm1537_vm2, %v1596_v33, 0.0  ;;  %v1622_v0 = vsel %vm1537_vm2, %v1597_v56, 0.0  ;;  %v1578_v22 = vrot.slane %v1577_v63, 1 }
 0x16f   : > { %v1584_v23 = vadd.f32 %v1583_v1, %v1582_v48  ;;  %v1605_v24 = vadd.f32 %v1604_v3, %v1603_v57  ;;  %v1609_v26 = vrot.slane %v1608_v12, 4  ;;  %v1616_v27 = vrot.slane %v1615_v13, 4 }
 0x170   : > { %v1588_v25 = vadd.f32 %v1587_v11, %v1558_v6  ;;  %v1623_v28 = vrot.slane %v1622_v0, 4  ;;  %v1572_v29 = vadd.f32 %v1571_v2, %v1570_v62  ;;  %v1629_v30 = vsel %vm1537_vm2, %v1598_v7, 0.0 }
 0x171   : > { %v1636_v31 = vsel %vm1537_vm2, %v1599_v9, 0.0  ;;  %v1643_v32 = vsel %vm1537_vm2, %v1600_v10, 0.0  ;;  %v1610_v21 = vadd.f32 %v1609_v26, %v1608_v12  ;;  %v1617_v35 = vadd.f32 %v1616_v27, %v1615_v13 }
 0x172   : > { %v1589_v34 = vadd.f32 %v1588_v25, %v1565_v8  ;;  %v1624_v33 = vadd.f32 %v1623_v28, %v1622_v0  ;;  %v1585_v36 = vrot.slane %v1584_v23, 1  ;;  %v1630_v37 = vrot.slane %v1629_v30, 4 }
 0x173   : > { %v1637_v38 = vrot.slane %v1636_v31, 4  ;;  %v1644_v39 = vrot.slane %v1643_v32, 4  ;;  %v1606_v40 = vrot.slane %v1605_v24, 1  ;;  %v1611_v41 = vrot.slane %v1610_v21, 2 }
 0x174   : > { %v1618_v42 = vrot.slane %v1617_v35, 2  ;;  %v1625_v43 = vrot.slane %v1624_v33, 2  ;;  %v1579_v44 = vadd.f32 %v1578_v22, %v1577_v63  ;;  %v1631_v45 = vadd.f32 %v1630_v37, %v1629_v30 }
 0x175   : > { %v1638_v46 = vadd.f32 %v1637_v38, %v1636_v31  ;;  %v1645_v47 = vadd.f32 %v1644_v39, %v1643_v32  ;;  %v1590_v48 = vadd.f32 %v1589_v34, %v1572_v29  ;;  %v1612_v49 = vadd.f32 %v1611_v41, %v1610_v21 }
 0x176   : > { %v1619_v50 = vadd.f32 %v1618_v42, %v1617_v35  ;;  %v1626_v51 = vadd.f32 %v1625_v43, %v1624_v33  ;;  %v1632_v52 = vrot.slane %v1631_v45, 2  ;;  %v1607_v55 = vadd.f32 %v1606_v40, %v1605_v24 }
 0x177   : > { %v1639_v53 = vrot.slane %v1638_v46, 2  ;;  %v1646_v54 = vrot.slane %v1645_v47, 2  ;;  %v1613_v56 = vrot.slane %v1612_v49, 1  ;;  %v1586_v59 = vadd.f32 %v1585_v36, %v1584_v23 }
 0x178   : > { %v1620_v57 = vrot.slane %v1619_v50, 1  ;;  %v1627_v58 = vrot.slane %v1626_v51, 1  ;;  %v1633_v60 = vadd.f32 %v1632_v52, %v1631_v45  ;;  %v1591_v62 = vadd.f32 %v1590_v48, %v1579_v44 }
 0x179   : > { %v1640_v61 = vadd.f32 %v1639_v53, %v1638_v46  ;;  %v1614_v1 = vadd.f32 %v1613_v56, %v1612_v49  ;;  %v1647_v3 = vadd.f32 %v1646_v54, %v1645_v47 }
 0x17a   : > { %v1621_v63 = vadd.f32 %v1620_v57, %v1619_v50  ;;  %v1634_v4 = vrot.slane %v1633_v60, 1  ;;  %v1628_v5 = vadd.f32 %v1627_v58, %v1626_v51  ;;  %v1592_v8 = vadd.f32 %v1591_v62, %v1586_v59 }
 0x17b   : > { %v1641_v6 = vrot.slane %v1640_v61, 1  ;;  %v1650_v7 = vadd.f32 %v1614_v1, %v1607_v55  ;;  %v1648_v9 = vrot.slane %v1647_v3, 1 }
 0x17c   : > { %v1635_v2 = vadd.f32 %v1634_v4, %v1633_v60  ;;  %v1593_v13 = vmul.f32 0.020408163, %v1592_v8 }
 0x17d   : > { %v1651_v10 = vadd.f32 %v1650_v7, %v1621_v63  ;;  %v1642_v11 = vadd.f32 %v1641_v6, %v1640_v61  ;;  %v1649_v0 = vadd.f32 %v1648_v9, %v1647_v3 }
 0x17e   : > { %v1657_v25 = vmul.f32 %v1593_v13, %v1593_v13  ;;  %v1660_v30 = vsub.f32 %v2766_v14, %v1593_v13  ;;  %v1661_v31 = vsub.f32 %v2769_v15, %v1593_v13  ;;  %v1662_v32 = vsub.f32 %v2772_v16, %v1593_v13 }
 0x17f   : > { %v1652_v12 = vadd.f32 %v1651_v10, %v1628_v5  ;;  %v1663_v34 = vsub.f32 %v2775_v17, %v1593_v13  ;;  %v1664_v21 = vsub.f32 %v2778_v18, %v1593_v13  ;;  %v1665_v35 = vsub.f32 %v2781_v19, %v1593_v13 }
 0x180   : > { %v1666_v33 = vsub.f32 %v2784_v20, %v1593_v13 }
 0x181   : > { %v1653_v22 = vadd.f32 %v1652_v12, %v1635_v2 }
 0x183   : > { %v1654_v23 = vadd.f32 %v1653_v22, %v1642_v11 }
 0x185   : > { %v1655_v24 = vadd.f32 %v1654_v23, %v1649_v0 }
 0x187   : > { %v1656_v26 = vmul.f32 0.020408163, %v1655_v24 }
 0x189   : > { %v1658_v27 = vsub.f32 %v1656_v26, %v1657_v25 }
 0x18b   : > { %v1659_v28 = vmax.f32 %v1658_v27, 0.0 }
 0x18d   : > { %v1667_v29 = vadd.f32 1e-05, %v1659_v28 }
 0x18f   : > { %2372 = vrsqrt.f32 %v1667_v29 }
 0x19c   : > { %v2373_v36 = vpop.eup %2372 }
 0x19d   : > { %v1669_v37 = vmul.f32 %v2373_v36, %v1660_v30  ;;  %v1670_v38 = vmul.f32 %v2373_v36, %v1661_v31  ;;  %v1671_v39 = vmul.f32 %v2373_v36, %v1662_v32  ;;  %v1672_v40 = vmul.f32 %v2373_v36, %v1663_v34 }
 0x19e   : > { %v1673_v41 = vmul.f32 %v2373_v36, %v1664_v21  ;;  %v1674_v14 = vmul.f32 %v2373_v36, %v1665_v35  ;;  %v1675_v15 = vmul.f32 %v2373_v36, %v1666_v33 }
 0x19f   : > { %vm1676_vm3 = vcmp.ge.f32.partialorder %v1669_v37, 0.0  ;;  %v1683_v16 = vmul.f32 0.2, %v1669_v37  ;;  %vm1677_vm4 = vcmp.ge.f32.partialorder %v1670_v38, 0.0  ;;  %v1684_v17 = vmul.f32 0.2, %v1670_v38 }
 0x1a0   : > { %vm1678_vm5 = vcmp.ge.f32.partialorder %v1671_v39, 0.0  ;;  %v1685_v18 = vmul.f32 0.2, %v1671_v39  ;;  %vm1679_vm6 = vcmp.ge.f32.partialorder %v1672_v40, 0.0  ;;  %v1686_v19 = vmul.f32 0.2, %v1672_v40 }
 0x1a1   : > { %v1690_v20 = vsel %vm1676_vm3, %v1669_v37, %v1683_v16  ;;  %v1691_v42 = vsel %vm1677_vm4, %v1670_v38, %v1684_v17  ;;  %vm1680_vm7 = vcmp.ge.f32.partialorder %v1673_v41, 0.0  ;;  %v1687_v43 = vmul.f32 0.2, %v1673_v41 }
 0x1a2   : > { %1697 = vst [vmem:[%s2433_s23] sm:$0x7f] %v1690_v20  ;;  %1698 = vst [vmem:[%s2433_s23 + $0x8] sm:$0x7f] %v1691_v42  ;;  %v1692_v44 = vsel %vm1678_vm5, %v1671_v39, %v1685_v18  ;;  %v1693_v45 = vsel %vm1679_vm6, %v1672_v40, %v1686_v19  ;;  %vm1681_vm8 = vcmp.ge.f32.partialorder %v1674_v14, 0.0  ;;  %v1688_v46 = vmul.f32 0.2, %v1674_v14 }
 0x1a3   : > { %1699 = vst [vmem:[%s2433_s23 + $0x10] sm:$0x7f] %v1692_v44  ;;  %1700 = vst [vmem:[%s2433_s23 + $0x18] sm:$0x7f] %v1693_v45  ;;  %v1694_v47 = vsel %vm1680_vm7, %v1673_v41, %v1687_v43  ;;  %vm1682_vm9 = vcmp.ge.f32.partialorder %v1675_v15, 0.0 }
 0x1a4   : > { %v1689_v48 = vmul.f32 0.2, %v1675_v15  ;;  %1701 = vst [vmem:[%s2433_s23 + $0x20] sm:$0x7f] %v1694_v47  ;;  %v1695_v49 = vsel %vm1681_vm8, %v1674_v14, %v1688_v46 }
 0x1a5   : > { %1702 = vst [vmem:[%s2433_s23 + $0x28] sm:$0x7f] %v1695_v49 }
 0x1a6   : > { %v1696_v50 = vsel %vm1682_vm9, %v1675_v15, %v1689_v48 }
 0x1a7   : > { %1703 = vst [vmem:[%s2433_s23 + $0x30] sm:$0x7f] %v1696_v50 }
 0x1a8 PF: > { %s13_s12 = sadd.s32 1, %s2384_s12  }
 0x1a9   : > { %p10_p5 = scmp.ge.s32.totalorder %s13_s12, 4  }
 0x1ab   :  { %12 = sbr.rel (!%p10_p5) target bundleno = 1 (0x1), region = 100 }

// kernel: _lambda_.15
= control target key start
LH: loop header
LB: loop body
LE: loop exit
PB: predicated region body
PF: predicated region fallthrough
CT: control target
= control target key end

     0   :  { %s3141_s14 = smov 0   ;;  %s3760_s0 = inlined_call_operand.vmem [shape: bf16[2,9,9,128], index: 0, kind: input, shape index: {}]   ;;  %s3761_s1 = inlined_call_operand.vmem [shape: bf16[16,128,1], index: 1, kind: input, shape index: {}]   ;;  %s3762_s2 = inlined_call_operand.<no memory space> [shape: f32[1,1], index: 2, kind: input, shape index: {}]   ;;  %s3763_s3 = inlined_call_operand.vmem [shape: f32[2,6,6,1], index: 3, kind: output, shape index: {}]  }
   0x1   :  { %v8_v0 = vstv %s3762_s2 }
   0x2   :  { %9 = vst [vmem:[#allocation2] sm:$0x1] %v8_v0 }
   0x3 LB: > { %s2081_s15 = sadd.s32 4294967295, %s3110_s14   ;;  %p2085_p0 = scmp.ge.s32.totalorder %s3110_s14, 1  ;;  %s3110_s14 = sphi %s3141_s14, %s15_s14  }
   0x4   : > { %p139_p1 = scmp.lt.s32.totalorder %s3110_s14, 3 }
   0x6   : > { %p140_p2 = pnand %p2085_p0, %p139_p1 }
   0x7   : > { %p163_p3 = scmp.lt.s32.totalorder (!%p140_p2), %s2081_s15, 1  ;;  %s3161_s23 = smov (!%p140_p2), 0  }
   0x8   : > { %143 = sbr.rel (%p140_p2) target bundleno = 475 (0x1db), region = 32 }
   0xd   : > { %v3149_v1 = vld [vmem:[#allocation2] ss:$0 sm:$0xff]  ;;  %s3765_s15 = smov (!%p163_p3, %s2081_s15), 1 }
   0xe   : > { %s2944_s2 = smul.u32 72, %s3765_s15 }
   0xf   : > { %s2945_s16 = smul.u32 48, %s3765_s15 }
  0x10   : > { %s3154_s19 = scalar_lea.vmem %s3760_s0, %s2944_s2 }
  0x11   : > { %s3159_s22 = scalar_lea.vmem %s3763_s3, %s2945_s16 }
  0x12 LB: >> { %v2964_v2 = vld [vmem:[%s3761_s1 + $0x78] sm:$0xff]   ;;  %v3116_v3 = vmov 0.0   ;;  %v2966_v5 = vld [vmem:[%s3761_s1 + $0x70] sm:$0xff]   ;;  %vm3117_vm0 = vmmov 0   ;;  %v2968_v7 = vld [vmem:[%s3761_s1 + $0x68] sm:$0xff]   ;;  %s2479_s11 = sshll.u32 %s3114_s23, 3  ;;  %s3114_s23 = sphi %s3161_s23, %s180_s23  }
  0x13   : >> { %2624 = vmatprep.subr.bf16.mxu0 %v3116_v3  ;;  %2644 = vmatprep.subr.bf16.mxu1 %v3116_v3  ;;  %v2965_v4 = vld [vmem:[%s3761_s1 + $0x38] sm:$0xff]   ;;  %v2967_v6 = vld [vmem:[%s3761_s1 + $0x30] sm:$0xff]   ;;  %v2969_v8 = vld [vmem:[%s3761_s1 + $0x28] sm:$0xff]   ;;  %s3206_s15 = scalar_lea.vmem %s3154_s19, %s2479_s11  ;;  %s2005_s10 = scalar_lea.vmem %s3159_s22, %s2479_s11  ;;  %vm2006_vm1 = vcmask 5120  }
  0x14   : >> { %2625 = vmatpush3.bf16.msra.mxu0 %v2964_v2  ;;  %2640 = vmatprep.mubr.msk.bf16.mxu0 %vm3117_vm0, %v3116_v3  ;;  %v2970_v9 = vld [vmem:[%s3761_s1 + $0x60] sm:$0xff]   ;;  %v2972_v11 = vld [vmem:[%s3761_s1 + $0x58] sm:$0xff]   ;;  %v2974_v15 = vld [vmem:[%s3761_s1 + $0x50] sm:$0xff]   ;;  %s180_s23 = sadd.s32 1, %s3114_s23  }
  0x15   : >> { %2645 = vmatpush3.bf16.msra.mxu1 %v2965_v4  ;;  %2626 = vmatprep.subr.bf16.mxu0 %v3116_v3  ;;  %v2971_v10 = vld [vmem:[%s3761_s1 + $0x20] sm:$0xff]   ;;  %v2973_v12 = vld [vmem:[%s3761_s1 + $0x18] sm:$0xff]   ;;  %v2975_v16 = vld [vmem:[%s3761_s1 + $0x10] sm:$0xff]   ;;  %p177_p4 = scmp.ge.s32.totalorder %s180_s23, 6  }
  0x16   : >> { %2646 = vmatprep.subr.bf16.mxu1 %v3116_v3  ;;  %2660 = vmatprep.mubr.msk.bf16.mxu1 %vm3117_vm0, %v3116_v3  ;;  %v184_v13 = vld [vmem:[%s3206_s15] sm:$0xf]  ;;  %v2976_v18 = vld [vmem:[%s3761_s1 + $0x48] sm:$0xff]   ;;  %v2981_v25 = vld [vmem:[%s3761_s1 + $0xb8] sm:$0xff]  }
  0x17   : >> { %v3217_v14 = vcombine.low %v184_v13, %v184_v13  ;;  %v2977_v19 = vld [vmem:[%s3761_s1 + $0x8] sm:$0xff]   ;;  %v2978_v22 = vld [vmem:[%s3761_s1 + $0x40] sm:$0xff]   ;;  %v2982_v26 = vld [vmem:[%s3761_s1 + $0xf8] sm:$0xff]  }
  0x18   : >> { %2627 = vmatpush3.bf16.msra.mxu0 %v2966_v5  ;;  %v2979_v23 = vld [vmem:[%s3761_s1] sm:$0xff]   ;;  %v2983_v27 = vld [vmem:[%s3761_s1 + $0xb0] sm:$0xff]   ;;  %v2985_v29 = vld [vmem:[%s3761_s1 + $0xa8] sm:$0xff]  }
  0x19   : >> { %2647 = vmatpush3.bf16.msra.mxu1 %v2967_v6  ;;  %2628 = vmatprep.subr.bf16.mxu0 %v3116_v3  ;;  %v225_v17 = vshll.u32 %v3217_v14, 16  ;;  %v223_v20 = vshrl.u32 %v3217_v14, 16  ;;  %v2984_v28 = vld [vmem:[%s3761_s1 + $0xf0] sm:$0xff]   ;;  %v2986_v30 = vld [vmem:[%s3761_s1 + $0xe8] sm:$0xff]   ;;  %v2987_v31 = vld [vmem:[%s3761_s1 + $0xa0] sm:$0xff]   ;;  %v423_v47 = vrot.slane %v3217_v14, 1 }
  0x1a   : >> { %2648 = vmatprep.subr.bf16.mxu1 %v3116_v3  ;;  %v2988_v32 = vld [vmem:[%s3761_s1 + $0xe0] sm:$0xff]   ;;  %v2989_v33 = vld [vmem:[%s3761_s1 + $0x98] sm:$0xff]   ;;  %v2991_v36 = vld [vmem:[%s3761_s1 + $0x90] sm:$0xff]  }
  0x1b   : >> { %v227_v21 = vrot.slane %v225_v17, 1  ;;  %v2990_v34 = vld [vmem:[%s3761_s1 + $0xd8] sm:$0xff]   ;;  %v185_v35 = vld [vmem:[%s3206_s15 + $0x4] sm:$0x1]  ;;  %v2992_v38 = vld [vmem:[%s3761_s1 + $0xd0] sm:$0xff]  }
  0x1c   : >> { %2629 = vmatpush3.bf16.msra.mxu0 %v2968_v7  ;;  %v2163_v37 = vcombine.low %v184_v13, %v185_v35  ;;  %v2993_v39 = vld [vmem:[%s3761_s1 + $0x88] sm:$0xff]   ;;  %v2995_v43 = vld [vmem:[%s3761_s1 + $0x80] sm:$0xff]   ;;  %v2998_v49 = vld [vmem:[%s3761_s1 + $0x138] sm:$0xff]  }
  0x1d   : >> { %2649 = vmatpush3.bf16.msra.mxu1 %v2969_v8  ;;  %2630 = vmatprep.subr.bf16.mxu0 %v3116_v3  ;;  %v228_v24 = vor.u32 %v227_v21, %v223_v20  ;;  %v2994_v40 = vld [vmem:[%s3761_s1 + $0xc8] sm:$0xff]   ;;  %v2996_v46 = vld [vmem:[%s3761_s1 + $0xc0] sm:$0xff]   ;;  %v2999_v50 = vld [vmem:[%s3761_s1 + $0x178] sm:$0xff]  }
  0x1e   : >> { %2650 = vmatprep.subr.bf16.mxu1 %v3116_v3  ;;  %v535_v41 = vshrl.u32 %v2163_v37, 16  ;;  %v538_v42 = vshll.u32 %v2163_v37, 16  ;;  %v3000_v51 = vld [vmem:[%s3761_s1 + $0x130] sm:$0xff]   ;;  %v3002_v53 = vld [vmem:[%s3761_s1 + $0x128] sm:$0xff]   ;;  %v3004_v55 = vld [vmem:[%s3761_s1 + $0x120] sm:$0xff]  }
  0x1f   : >> { %v3001_v52 = vld [vmem:[%s3761_s1 + $0x170] sm:$0xff]   ;;  %v3003_v54 = vld [vmem:[%s3761_s1 + $0x168] sm:$0xff]   ;;  %v3005_v56 = vld [vmem:[%s3761_s1 + $0x160] sm:$0xff]  }
  0x20   : >> { %2631 = vmatpush3.bf16.msra.mxu0 %v2970_v9  ;;  %v537_v44 = vrot.slane %v535_v41, 1  ;;  %v540_v45 = vrot.slane %v538_v42, 2  ;;  %v3006_v57 = vld [vmem:[%s3761_s1 + $0x118] sm:$0xff]   ;;  %v2173_v59 = vld [vmem:[%s3206_s15 + $0x8] sm:$0xf]  ;;  %v3008_v60 = vld [vmem:[%s3761_s1 + $0x110] sm:$0xff]  }
  0x21   : >> { %2651 = vmatpush3.bf16.msra.mxu1 %v2971_v10  ;;  %2632 = vmatprep.subr.bf16.mxu0 %v3116_v3  ;;  %v3007_v58 = vld [vmem:[%s3761_s1 + $0x158] sm:$0xff]   ;;  %v3363_v61 = vcombine.low %v2173_v59, %v2173_v59  ;;  %v3009_v62 = vld [vmem:[%s3761_s1 + $0x150] sm:$0xff]   ;;  %v3010_v63 = vld [vmem:[%s3761_s1 + $0x108] sm:$0xff]  }
  0x22   : >> { %2652 = vmatprep.subr.bf16.mxu1 %v3116_v3  ;;  %v541_v48 = vor.u32 %v540_v45, %v537_v44  ;;  %v3011_v2 = vld [vmem:[%s3761_s1 + $0x148] sm:$0xff]   ;;  %v3012_v4 = vld [vmem:[%s3761_s1 + $0x100] sm:$0xff]   ;;  %v3016_v9 = vld [vmem:[%s3761_s1 + $0x1b8] sm:$0xff]  }
  0x23   : >> { %v767_v0 = vshll.u32 %v3363_v61, 16  ;;  %v765_v5 = vshrl.u32 %v3363_v61, 16  ;;  %v3013_v7 = vld [vmem:[%s3761_s1 + $0x140] sm:$0xff]   ;;  %v3017_v10 = vld [vmem:[%s3761_s1 + $0x1f8] sm:$0xff]   ;;  %v3021_v14 = vld [vmem:[%s3761_s1 + $0x1e8] sm:$0xff]  }
  0x24   : >> { %2633 = vmatpush3.bf16.msra.mxu0 %v2972_v11  ;;  %v3018_v11 = vld [vmem:[%s3761_s1 + $0x1b0] sm:$0xff]   ;;  %v2174_v17 = vld [vmem:[%s3206_s15 + $0xc] sm:$0x1]  ;;  %v3040_v41 = vld [vmem:[%s3761_s1 + $0x218] sm:$0xff]  }
  0x25   : >> { %2653 = vmatpush3.bf16.msra.mxu1 %v2973_v12  ;;  %2634 = vmatprep.subr.bf16.mxu0 %v3116_v3  ;;  %v769_v6 = vrot.slane %v767_v0, 1  ;;  %v3019_v12 = vld [vmem:[%s3761_s1 + $0x1f0] sm:$0xff]   ;;  %v2264_v20 = vcombine.low %v2173_v59, %v2174_v17  ;;  %v3036_v37 = vld [vmem:[%s3761_s1 + $0x228] sm:$0xff]   ;;  %v3041_v42 = vld [vmem:[%s3761_s1 + $0x258] sm:$0xff]  }
  0x26   : >> { %2654 = vmatprep.subr.bf16.mxu1 %v3116_v3  ;;  %v3026_v21 = vld [vmem:[%s3761_s1 + $0x190] sm:$0xff]   ;;  %v3066_v17 = vld [vmem:[%s3761_s1 + $0x338] sm:$0xff]  }
  0x27   : >> { %v770_v8 = vor.u32 %v769_v6, %v765_v5  ;;  %v3034_v35 = vld [vmem:[%s3761_s1 + $0x230] sm:$0xff]  }
  0x28   : >> { %2635 = vmatpush3.bf16.msra.mxu0 %v2974_v15  ;;  %v3022_v15 = vld [vmem:[%s3761_s1 + $0x1a0] sm:$0xff]   ;;  %v3042_v44 = vld [vmem:[%s3761_s1 + $0x210] sm:$0xff]  }
  0x29   : >> { %2655 = vmatpush3.bf16.msra.mxu1 %v2975_v16  ;;  %2636 = vmatprep.subr.bf16.mxu0 %v3116_v3  ;;  %v3023_v16 = vld [vmem:[%s3761_s1 + $0x1e0] sm:$0xff]   ;;  %v2275_v0 = vld [vmem:[%s3206_s15 + $0x14] sm:$0x1] }
  0x2a   : >> { %2656 = vmatprep.subr.bf16.mxu1 %v3116_v3  ;;  %v3060_v5 = vld [vmem:[%s3761_s1 + $0x290] sm:$0xff]  }
  0x2b   : >> { %v3061_v6 = vld [vmem:[%s3761_s1 + $0x2d0] sm:$0xff]  }
  0x2c   : >> { %2637 = vmatpush3.bf16.msra.mxu0 %v2976_v18  ;;  %v3024_v18 = vld [vmem:[%s3761_s1 + $0x198] sm:$0xff]  }
  0x2d   : >> { %2657 = vmatpush3.bf16.msra.mxu1 %v2977_v19  ;;  %2638 = vmatprep.subr.bf16.mxu0 %v3116_v3  ;;  %v3025_v19 = vld [vmem:[%s3761_s1 + $0x1d8] sm:$0xff]  }
  0x2e   : >> { %2658 = vmatprep.subr.bf16.mxu1 %v3116_v3 }
  0x30   : >> { %2639 = vmatpush3.bf16.msra.mxu0 %v2978_v22  ;;  %v3027_v22 = vld [vmem:[%s3761_s1 + $0x1d0] sm:$0xff]  }
  0x31   : >> { %2659 = vmatpush3.bf16.msra.mxu1 %v2979_v23  ;;  %2664 = vmatprep.subr.bf16.mxu0 %v3116_v3  ;;  %v990_v23 = vshrl.u32 %v2264_v20, 16 }
  0x32   : >> { %2684 = vmatprep.subr.bf16.mxu1 %v3116_v3 }
  0x33   : >> { %2641 = vmatmul.mubr.bf16.vlgmr.msra.gmra.mxu0 %v228_v24  ;;  %v993_v24 = vshll.u32 %v2264_v20, 16  ;;  %v3069_v20 = vld [vmem:[%s3761_s1 + $0x370] sm:$0xff]  }
  0x34   : >> { %2661 = vmatmul.mubr.bf16.vlgmr.msra.gmra.mxu1 %v184_v13  ;;  %2665 = vmatpush3.bf16.msra.mxu0 %v2981_v25  ;;  %v3020_v13 = vld [vmem:[%s3761_s1 + $0x1a8] sm:$0xff]  }
  0x35   : >> { %2685 = vmatpush3.bf16.msra.mxu1 %v2982_v26  ;;  %2666 = vmatprep.subr.bf16.mxu0 %v3116_v3  ;;  %v3028_v25 = vld [vmem:[%s3761_s1 + $0x188] sm:$0xff]  }
  0x36   : >> { %2686 = vmatprep.subr.bf16.mxu1 %v3116_v3  ;;  %2680 = vmatprep.mubr.msk.bf16.mxu0 %vm3117_vm0, %v3116_v3  ;;  %v3029_v26 = vld [vmem:[%s3761_s1 + $0x1c8] sm:$0xff]  }
  0x37   : >> { %2700 = vmatprep.mubr.msk.bf16.mxu1 %vm3117_vm0, %v3116_v3 }
  0x38   : >> { %2667 = vmatpush3.bf16.msra.mxu0 %v2983_v27  ;;  %v992_v27 = vrot.slane %v990_v23, 1  ;;  %v3072_v23 = vld [vmem:[%s3761_s1 + $0x320] sm:$0xff]  }
  0x39   : >> { %2687 = vmatpush3.bf16.msra.mxu1 %v2984_v28  ;;  %2668 = vmatprep.subr.bf16.mxu0 %v3116_v3  ;;  %v995_v28 = vrot.slane %v993_v24, 2  ;;  %v3073_v24 = vld [vmem:[%s3761_s1 + $0x360] sm:$0xff]  }
  0x3a   : >> { %2688 = vmatprep.subr.bf16.mxu1 %v3116_v3 }
  0x3c   : >> { %2669 = vmatpush3.bf16.msra.mxu0 %v2985_v29  ;;  %v3030_v29 = vld [vmem:[%s3761_s1 + $0x180] sm:$0xff]  }
  0x3d   : >> { %2689 = vmatpush3.bf16.msra.mxu1 %v2986_v30  ;;  %2670 = vmatprep.subr.bf16.mxu0 %v3116_v3  ;;  %v3031_v30 = vld [vmem:[%s3761_s1 + $0x1c0] sm:$0xff]  }
  0x3e   : >> { %2690 = vmatprep.subr.bf16.mxu1 %v3116_v3 }
  0x40   : >> { %2671 = vmatpush3.bf16.msra.mxu0 %v2987_v31  ;;  %v878_v31 = vrot.slane %v3363_v61, 1  ;;  %v3056_v61 = vld [vmem:[%s3761_s1 + $0x2a0] sm:$0xff]  }
  0x41   : >> { %2691 = vmatpush3.bf16.msra.mxu1 %v2988_v32  ;;  %2672 = vmatprep.subr.bf16.mxu0 %v3116_v3  ;;  %v996_v32 = vor.u32 %v995_v28, %v992_v27  ;;  %v3645_v27 = vld [vmem:[%s3206_s15 + $0x18] sm:$0xf]  ;;  %v3076_v28 = vld [vmem:[%s3761_s1 + $0x310] sm:$0xff]  }
  0x42   : >> { %2692 = vmatprep.subr.bf16.mxu1 %v3116_v3 }
  0x44   : >> { %2673 = vmatpush3.bf16.msra.mxu0 %v2989_v33  ;;  %v3032_v33 = vld [vmem:[%s3761_s1 + $0x238] sm:$0xff]  }
  0x45   : >> { %2693 = vmatpush3.bf16.msra.mxu1 %v2990_v34  ;;  %2674 = vmatprep.subr.bf16.mxu0 %v3116_v3  ;;  %v3033_v34 = vld [vmem:[%s3761_s1 + $0x278] sm:$0xff]  }
  0x46   : >> { %2694 = vmatprep.subr.bf16.mxu1 %v3116_v3 }
  0x48   : >> { %2675 = vmatpush3.bf16.msra.mxu0 %v2991_v36  ;;  %v3035_v36 = vld [vmem:[%s3761_s1 + $0x270] sm:$0xff]  }
  0x49   : >> { %2695 = vmatpush3.bf16.msra.mxu1 %v2992_v38  ;;  %2676 = vmatprep.subr.bf16.mxu0 %v3116_v3  ;;  %v3037_v38 = vld [vmem:[%s3761_s1 + $0x268] sm:$0xff]  }
  0x4a   : >> { %2696 = vmatprep.subr.bf16.mxu1 %v3116_v3 }
  0x4c   : >> { %2677 = vmatpush3.bf16.msra.mxu0 %v2993_v39  ;;  %v3038_v39 = vld [vmem:[%s3761_s1 + $0x220] sm:$0xff]  }
  0x4d   : >> { %2697 = vmatpush3.bf16.msra.mxu1 %v2994_v40  ;;  %2678 = vmatprep.subr.bf16.mxu0 %v3116_v3  ;;  %v3039_v40 = vld [vmem:[%s3761_s1 + $0x260] sm:$0xff]  }
  0x4e   : >> { %2698 = vmatprep.subr.bf16.mxu1 %v3116_v3 }
  0x50   : >> { %2679 = vmatpush3.bf16.msra.mxu0 %v2995_v43  ;;  %v2274_v43 = vld [vmem:[%s3206_s15 + $0x10] sm:$0xf] }
  0x51   : >> { %2699 = vmatpush3.bf16.msra.mxu1 %v2996_v46  ;;  %2704 = vmatprep.subr.bf16.mxu0 %v3116_v3  ;;  %v3506_v45 = vcombine.low %v2274_v43, %v2274_v43  ;;  %v3043_v46 = vld [vmem:[%s3761_s1 + $0x250] sm:$0xff]  }
  0x52   : >> { %2724 = vmatprep.subr.bf16.mxu1 %v3116_v3 }
  0x53   : >> { %2681 = vmatmul.mubr.bf16.vlgmr.msra.gmra.mxu0 %v423_v47  ;;  %v3044_v47 = vld [vmem:[%s3761_s1 + $0x208] sm:$0xff]  }
  0x54   : >> { %2701 = vmatmul.mubr.bf16.vlgmr.msra.gmra.mxu1 %v541_v48  ;;  %2705 = vmatpush3.bf16.msra.mxu0 %v2998_v49  ;;  %v1222_v48 = vshll.u32 %v3506_v45, 16  ;;  %v3045_v49 = vld [vmem:[%s3761_s1 + $0x248] sm:$0xff]  }
  0x55   : >> { %2725 = vmatpush3.bf16.msra.mxu1 %v2999_v50  ;;  %2706 = vmatprep.subr.bf16.mxu0 %v3116_v3  ;;  %v3046_v50 = vld [vmem:[%s3761_s1 + $0x200] sm:$0xff]  }
  0x56   : >> { %2726 = vmatprep.subr.bf16.mxu1 %v3116_v3  ;;  %2720 = vmatprep.mubr.msk.bf16.mxu0 %vm3117_vm0, %v3116_v3 }
  0x57   : >> { %2740 = vmatprep.mubr.msk.bf16.mxu1 %vm3117_vm0, %v3116_v3 }
  0x58   : >> { %2707 = vmatpush3.bf16.msra.mxu0 %v3000_v51  ;;  %v1220_v51 = vshrl.u32 %v3506_v45, 16 }
  0x59   : >> { %2727 = vmatpush3.bf16.msra.mxu1 %v3001_v52  ;;  %2708 = vmatprep.subr.bf16.mxu0 %v3116_v3  ;;  %v1224_v52 = vrot.slane %v1222_v48, 1 }
  0x5a   : >> { %2728 = vmatprep.subr.bf16.mxu1 %v3116_v3 }
  0x5c   : >> { %2709 = vmatpush3.bf16.msra.mxu0 %v3002_v53  ;;  %v3047_v53 = vld [vmem:[%s3761_s1 + $0x240] sm:$0xff]  }
  0x5d   : >> { %2729 = vmatpush3.bf16.msra.mxu1 %v3003_v54  ;;  %2710 = vmatprep.subr.bf16.mxu0 %v3116_v3  ;;  %v1225_v54 = vor.u32 %v1224_v52, %v1220_v51  ;;  %v3089_v52 = vld [vmem:[%s3761_s1 + $0x3e8] sm:$0xff]  }
  0x5e   : >> { %2730 = vmatprep.subr.bf16.mxu1 %v3116_v3 }
  0x60   : >> { %2711 = vmatpush3.bf16.msra.mxu0 %v3004_v55  ;;  %v3050_v55 = vld [vmem:[%s3761_s1 + $0x2b8] sm:$0xff]  }
  0x61   : >> { %2731 = vmatpush3.bf16.msra.mxu1 %v3005_v56  ;;  %2712 = vmatprep.subr.bf16.mxu0 %v3116_v3  ;;  %v3051_v56 = vld [vmem:[%s3761_s1 + $0x2f8] sm:$0xff]  }
  0x62   : >> { %2732 = vmatprep.subr.bf16.mxu1 %v3116_v3 }
  0x64   : >> { %2713 = vmatpush3.bf16.msra.mxu0 %v3006_v57  ;;  %v3052_v57 = vld [vmem:[%s3761_s1 + $0x2b0] sm:$0xff]  }
  0x65   : >> { %2733 = vmatpush3.bf16.msra.mxu1 %v3007_v58  ;;  %2714 = vmatprep.subr.bf16.mxu0 %v3116_v3  ;;  %v3053_v58 = vld [vmem:[%s3761_s1 + $0x2f0] sm:$0xff]  }
  0x66   : >> { %2734 = vmatprep.subr.bf16.mxu1 %v3116_v3 }
  0x68   : >> { %2715 = vmatpush3.bf16.msra.mxu0 %v3008_v60  ;;  %v3055_v60 = vld [vmem:[%s3761_s1 + $0x2e8] sm:$0xff]  }
  0x69   : >> { %2735 = vmatpush3.bf16.msra.mxu1 %v3009_v62  ;;  %2716 = vmatprep.subr.bf16.mxu0 %v3116_v3  ;;  %v3057_v62 = vld [vmem:[%s3761_s1 + $0x2e0] sm:$0xff]  }
  0x6a   : >> { %2736 = vmatprep.subr.bf16.mxu1 %v3116_v3 }
  0x6c   : >> { %2717 = vmatpush3.bf16.msra.mxu0 %v3010_v63  ;;  %v3058_v63 = vld [vmem:[%s3761_s1 + $0x298] sm:$0xff]  }
  0x6d   : >> { %2737 = vmatpush3.bf16.msra.mxu1 %v3011_v2  ;;  %2718 = vmatprep.subr.bf16.mxu0 %v3116_v3  ;;  %v3059_v2 = vld [vmem:[%s3761_s1 + $0x2d8] sm:$0xff]  }
  0x6e   : >> { %2738 = vmatprep.subr.bf16.mxu1 %v3116_v3 }
  0x70   : >> { %2719 = vmatpush3.bf16.msra.mxu0 %v3012_v4  ;;  %v2365_v4 = vcombine.low %v2274_v43, %v2275_v0  ;;  %v3096_v0 = vld [vmem:[%s3761_s1 + $0x388] sm:$0xff]  }
  0x71   : >> { %2739 = vmatpush3.bf16.msra.mxu1 %v3013_v7  ;;  %2744 = vmatprep.subr.bf16.mxu0 %v3116_v3 }
  0x72   : >> { %2764 = vmatprep.subr.bf16.mxu1 %v3116_v3  ;;  %v1445_v7 = vshrl.u32 %v2365_v4, 16 }
  0x73   : >> { %2721 = vmatmul.mubr.bf16.vlgmr.msra.gmra.mxu0 %v2173_v59  ;;  %v3054_v59 = vld [vmem:[%s3761_s1 + $0x2a8] sm:$0xff]  }
  0x74   : >> { %2741 = vmatmul.mubr.bf16.vlgmr.msra.gmra.mxu1 %v770_v8  ;;  %2745 = vmatpush3.bf16.msra.mxu0 %v3016_v9  ;;  %v1448_v8 = vshll.u32 %v2365_v4, 16  ;;  %v3062_v9 = vld [vmem:[%s3761_s1 + $0x288] sm:$0xff]  }
  0x75   : >> { %2765 = vmatpush3.bf16.msra.mxu1 %v3017_v10  ;;  %2746 = vmatprep.subr.bf16.mxu0 %v3116_v3  ;;  %v3063_v10 = vld [vmem:[%s3761_s1 + $0x2c8] sm:$0xff]  }
  0x76   : >> { %2766 = vmatprep.subr.bf16.mxu1 %v3116_v3  ;;  %2760 = vmatprep.mubr.msk.bf16.mxu0 %vm3117_vm0, %v3116_v3 }
  0x77   : >> { %2780 = vmatprep.mubr.msk.bf16.mxu1 %vm3117_vm0, %v3116_v3 }
  0x78   : >> { %2747 = vmatpush3.bf16.msra.mxu0 %v3018_v11  ;;  %v1447_v11 = vrot.slane %v1445_v7, 1  ;;  %v3099_v7 = vld [vmem:[%s3761_s1 + $0x3c0] sm:$0xff]  }
  0x79   : >> { %2767 = vmatpush3.bf16.msra.mxu1 %v3019_v12  ;;  %2748 = vmatprep.subr.bf16.mxu0 %v3116_v3  ;;  %v1450_v12 = vrot.slane %v1448_v8, 2 }
  0x7a   : >> { %2768 = vmatprep.subr.bf16.mxu1 %v3116_v3 }
  0x7c   : >> { %2749 = vmatpush3.bf16.msra.mxu0 %v3020_v13  ;;  %v3064_v13 = vld [vmem:[%s3761_s1 + $0x280] sm:$0xff]  }
  0x7d   : >> { %2769 = vmatpush3.bf16.msra.mxu1 %v3021_v14  ;;  %2750 = vmatprep.subr.bf16.mxu0 %v3116_v3  ;;  %v3065_v14 = vld [vmem:[%s3761_s1 + $0x2c0] sm:$0xff]  }
  0x7e   : >> { %2770 = vmatprep.subr.bf16.mxu1 %v3116_v3 }
  0x80   : >> { %2751 = vmatpush3.bf16.msra.mxu0 %v3022_v15  ;;  %v1333_v15 = vrot.slane %v3506_v45, 1 }
  0x81   : >> { %2771 = vmatpush3.bf16.msra.mxu1 %v3023_v16  ;;  %2752 = vmatprep.subr.bf16.mxu0 %v3116_v3  ;;  %v1451_v16 = vor.u32 %v1450_v12, %v1447_v11 }
  0x82   : >> { %2772 = vmatprep.subr.bf16.mxu1 %v3116_v3 }
  0x84   : >> { %2753 = vmatpush3.bf16.msra.mxu0 %v3024_v18  ;;  %v3067_v18 = vld [vmem:[%s3761_s1 + $0x378] sm:$0xff]  }
  0x85   : >> { %2773 = vmatpush3.bf16.msra.mxu1 %v3025_v19  ;;  %2754 = vmatprep.subr.bf16.mxu0 %v3116_v3  ;;  %v3068_v19 = vld [vmem:[%s3761_s1 + $0x330] sm:$0xff]  }
  0x86   : >> { %2774 = vmatprep.subr.bf16.mxu1 %v3116_v3 }
  0x88   : >> { %2755 = vmatpush3.bf16.msra.mxu0 %v3026_v21  ;;  %v3070_v21 = vld [vmem:[%s3761_s1 + $0x328] sm:$0xff]  }
  0x89   : >> { %2775 = vmatpush3.bf16.msra.mxu1 %v3027_v22  ;;  %2756 = vmatprep.subr.bf16.mxu0 %v3116_v3  ;;  %v3071_v22 = vld [vmem:[%s3761_s1 + $0x368] sm:$0xff]  }
  0x8a   : >> { %2776 = vmatprep.subr.bf16.mxu1 %v3116_v3 }
  0x8c   : >> { %2757 = vmatpush3.bf16.msra.mxu0 %v3028_v25  ;;  %v3074_v25 = vld [vmem:[%s3761_s1 + $0x318] sm:$0xff]  }
  0x8d   : >> { %2777 = vmatpush3.bf16.msra.mxu1 %v3029_v26  ;;  %2758 = vmatprep.subr.bf16.mxu0 %v3116_v3  ;;  %v3075_v26 = vld [vmem:[%s3761_s1 + $0x358] sm:$0xff]  }
  0x8e   : >> { %2778 = vmatprep.subr.bf16.mxu1 %v3116_v3 }
  0x90   : >> { %2759 = vmatpush3.bf16.msra.mxu0 %v3030_v29  ;;  %v3653_v29 = vcombine.low %v3645_v27, %v3645_v27 }
  0x91   : >> { %2779 = vmatpush3.bf16.msra.mxu1 %v3031_v30  ;;  %2784 = vmatprep.subr.bf16.mxu0 %v3116_v3  ;;  %v3077_v30 = vld [vmem:[%s3761_s1 + $0x350] sm:$0xff]  }
  0x92   : >> { %2804 = vmatprep.subr.bf16.mxu1 %v3116_v3  ;;  %v1788_v8 = vrot.slane %v3653_v29, 1 }
  0x93   : >> { %2761 = vmatmul.mubr.bf16.vlgmr.msra.gmra.mxu0 %v878_v31  ;;  %v3078_v31 = vld [vmem:[%s3761_s1 + $0x308] sm:$0xff]  }
  0x94   : >> { %2781 = vmatmul.mubr.bf16.vlgmr.msra.gmra.mxu1 %v996_v32  ;;  %2785 = vmatpush3.bf16.msra.mxu0 %v3032_v33  ;;  %v1677_v32 = vshll.u32 %v3653_v29, 16  ;;  %v3079_v33 = vld [vmem:[%s3761_s1 + $0x348] sm:$0xff]  }
  0x95   : >> { %2805 = vmatpush3.bf16.msra.mxu1 %v3033_v34  ;;  %2786 = vmatprep.subr.bf16.mxu0 %v3116_v3  ;;  %v3080_v34 = vld [vmem:[%s3761_s1 + $0x300] sm:$0xff]  }
  0x96   : >> { %2806 = vmatprep.subr.bf16.mxu1 %v3116_v3  ;;  %2800 = vmatprep.mubr.msk.bf16.mxu0 %vm3117_vm0, %v3116_v3 }
  0x97   : >> { %2820 = vmatprep.mubr.msk.bf16.mxu1 %vm3117_vm0, %v3116_v3 }
  0x98   : >> { %2787 = vmatpush3.bf16.msra.mxu0 %v3034_v35  ;;  %v1675_v35 = vshrl.u32 %v3653_v29, 16 }
  0x99   : >> { %2807 = vmatpush3.bf16.msra.mxu1 %v3035_v36  ;;  %2788 = vmatprep.subr.bf16.mxu0 %v3116_v3  ;;  %v1679_v36 = vrot.slane %v1677_v32, 1 }
  0x9a   : >> { %2808 = vmatprep.subr.bf16.mxu1 %v3116_v3 }
  0x9c   : >> { %2789 = vmatpush3.bf16.msra.mxu0 %v3036_v37  ;;  %v3081_v37 = vld [vmem:[%s3761_s1 + $0x340] sm:$0xff]  }
  0x9d   : >> { %2809 = vmatpush3.bf16.msra.mxu1 %v3037_v38  ;;  %2790 = vmatprep.subr.bf16.mxu0 %v3116_v3  ;;  %v1680_v38 = vor.u32 %v1679_v36, %v1675_v35 }
  0x9e   : >> { %2810 = vmatprep.subr.bf16.mxu1 %v3116_v3 }
  0xa0   : >> { %2791 = vmatpush3.bf16.msra.mxu0 %v3038_v39  ;;  %v3084_v39 = vld [vmem:[%s3761_s1 + $0x3b8] sm:$0xff]  }
  0xa1   : >> { %2811 = vmatpush3.bf16.msra.mxu1 %v3039_v40  ;;  %2792 = vmatprep.subr.bf16.mxu0 %v3116_v3  ;;  %v3085_v40 = vld [vmem:[%s3761_s1 + $0x3f8] sm:$0xff]  }
  0xa2   : >> { %2812 = vmatprep.subr.bf16.mxu1 %v3116_v3 }
  0xa4   : >> { %2793 = vmatpush3.bf16.msra.mxu0 %v3040_v41 }
  0xa5   : >> { %2813 = vmatpush3.bf16.msra.mxu1 %v3041_v42  ;;  %2794 = vmatprep.subr.bf16.mxu0 %v3116_v3 }
  0xa6   : >> { %2814 = vmatprep.subr.bf16.mxu1 %v3116_v3 }
  0xa8   : >> { %2795 = vmatpush3.bf16.msra.mxu0 %v3042_v44 }
  0xa9   : >> { %2815 = vmatpush3.bf16.msra.mxu1 %v3043_v46  ;;  %2796 = vmatprep.subr.bf16.mxu0 %v3116_v3  ;;  %v3087_v46 = vld [vmem:[%s3761_s1 + $0x3f0] sm:$0xff]  }
  0xaa   : >> { %2816 = vmatprep.subr.bf16.mxu1 %v3116_v3 }
  0xac   : >> { %2797 = vmatpush3.bf16.msra.mxu0 %v3044_v47 }
  0xad   : >> { %2817 = vmatpush3.bf16.msra.mxu1 %v3045_v49  ;;  %2798 = vmatprep.subr.bf16.mxu0 %v3116_v3 }
  0xae   : >> { %2818 = vmatprep.subr.bf16.mxu1 %v3116_v3 }
  0xb0   : >> { %2799 = vmatpush3.bf16.msra.mxu0 %v3046_v50  ;;  %v3088_v50 = vld [vmem:[%s3761_s1 + $0x3a8] sm:$0xff]  }
  0xb1   : >> { %2819 = vmatpush3.bf16.msra.mxu1 %v3047_v53  ;;  %2824 = vmatprep.subr.bf16.mxu0 %v3116_v3 }
  0xb2   : >> { %2844 = vmatprep.subr.bf16.mxu1 %v3116_v3 }
  0xb3   : >> { %2801 = vmatmul.mubr.bf16.vlgmr.msra.gmra.mxu0 %v2274_v43  ;;  %v3086_v43 = vld [vmem:[%s3761_s1 + $0x3b0] sm:$0xff]  }
  0xb4   : >> { %2821 = vmatmul.mubr.bf16.vlgmr.msra.gmra.mxu1 %v1225_v54  ;;  %2825 = vmatpush3.bf16.msra.mxu0 %v3050_v55  ;;  %v3090_v54 = vld [vmem:[%s3761_s1 + $0x3a0] sm:$0xff]  }
  0xb5   : >> { %2845 = vmatpush3.bf16.msra.mxu1 %v3051_v56  ;;  %2826 = vmatprep.subr.bf16.mxu0 %v3116_v3  ;;  %v3091_v55 = vld [vmem:[%s3761_s1 + $0x3e0] sm:$0xff]   ;;  %v3092_v56 = vld [vmem:[%s3761_s1 + $0x398] sm:$0xff]  }
  0xb6   : >> { %2846 = vmatprep.subr.bf16.mxu1 %v3116_v3  ;;  %2840 = vmatprep.mubr.msk.bf16.mxu0 %vm3117_vm0, %v3116_v3 }
  0xb7   : >> { %2860 = vmatprep.mubr.msk.bf16.mxu1 %vm3117_vm0, %v3116_v3 }
  0xb8   : >> { %2827 = vmatpush3.bf16.msra.mxu0 %v3052_v57  ;;  %v2376_v57 = vld [vmem:[%s3206_s15 + $0x1c] sm:$0x1] }
  0xb9   : >> { %2847 = vmatpush3.bf16.msra.mxu1 %v3053_v58  ;;  %2828 = vmatprep.subr.bf16.mxu0 %v3116_v3  ;;  %v3093_v58 = vld [vmem:[%s3761_s1 + $0x3d8] sm:$0xff]  }
  0xba   : >> { %2848 = vmatprep.subr.bf16.mxu1 %v3116_v3 }
  0xbc   : >> { %2829 = vmatpush3.bf16.msra.mxu0 %v3054_v59  ;;  %v2466_v59 = vcombine.low %v3645_v27, %v2376_v57 }
  0xbd   : >> { %2849 = vmatpush3.bf16.msra.mxu1 %v3055_v60  ;;  %2830 = vmatprep.subr.bf16.mxu0 %v3116_v3  ;;  %v3094_v60 = vld [vmem:[%s3761_s1 + $0x390] sm:$0xff]  }
  0xbe   : >> { %2850 = vmatprep.subr.bf16.mxu1 %v3116_v3 }
  0xc0   : >> { %2831 = vmatpush3.bf16.msra.mxu0 %v3056_v61  ;;  %v3095_v61 = vld [vmem:[%s3761_s1 + $0x3d0] sm:$0xff]  }
  0xc1   : >> { %2851 = vmatpush3.bf16.msra.mxu1 %v3057_v62  ;;  %2832 = vmatprep.subr.bf16.mxu0 %v3116_v3  ;;  %v1900_v62 = vshrl.u32 %v2466_v59, 16 }
  0xc2   : >> { %2852 = vmatprep.subr.bf16.mxu1 %v3116_v3 }
  0xc3   : >> { %v1902_v4 = vrot.slane %v1900_v62, 1 }
  0xc4   : >> { %2833 = vmatpush3.bf16.msra.mxu0 %v3058_v63  ;;  %v1903_v63 = vshll.u32 %v2466_v59, 16 }
  0xc5   : >> { %2853 = vmatpush3.bf16.msra.mxu1 %v3059_v2  ;;  %2834 = vmatprep.subr.bf16.mxu0 %v3116_v3  ;;  %v3097_v2 = vld [vmem:[%s3761_s1 + $0x3c8] sm:$0xff]  }
  0xc6   : >> { %2854 = vmatprep.subr.bf16.mxu1 %v3116_v3 }
  0xc8   : >> { %2835 = vmatpush3.bf16.msra.mxu0 %v3060_v5  ;;  %v1905_v5 = vrot.slane %v1903_v63, 2 }
  0xc9   : >> { %2855 = vmatpush3.bf16.msra.mxu1 %v3061_v6  ;;  %2836 = vmatprep.subr.bf16.mxu0 %v3116_v3  ;;  %v3098_v6 = vld [vmem:[%s3761_s1 + $0x380] sm:$0xff]  }
  0xca   : >> { %2856 = vmatprep.subr.bf16.mxu1 %v3116_v3 }
  0xcc   : >> { %2837 = vmatpush3.bf16.msra.mxu0 %v3062_v9  ;;  %v1906_v9 = vor.u32 %v1905_v5, %v1902_v4 }
  0xcd   : >> { %2857 = vmatpush3.bf16.msra.mxu1 %v3063_v10  ;;  %2838 = vmatprep.subr.bf16.mxu0 %v3116_v3 }
  0xce   : >> { %2858 = vmatprep.subr.bf16.mxu1 %v3116_v3 }
  0xd0   : >> { %2839 = vmatpush3.bf16.msra.mxu0 %v3064_v13 }
  0xd1   : >> { %2859 = vmatpush3.bf16.msra.mxu1 %v3065_v14  ;;  %2864 = vmatprep.subr.bf16.mxu0 %v3116_v3 }
  0xd2   : >> { %2884 = vmatprep.subr.bf16.mxu1 %v3116_v3 }
  0xd3   : >> { %2841 = vmatmul.mubr.bf16.vlgmr.msra.gmra.mxu0 %v1333_v15 }
  0xd4   : >> { %2861 = vmatmul.mubr.bf16.vlgmr.msra.gmra.mxu1 %v1451_v16  ;;  %2865 = vmatpush3.bf16.msra.mxu0 %v3066_v17 }
  0xd5   : >> { %2885 = vmatpush3.bf16.msra.mxu1 %v3067_v18  ;;  %2866 = vmatprep.subr.bf16.mxu0 %v3116_v3 }
  0xd6   : >> { %2886 = vmatprep.subr.bf16.mxu1 %v3116_v3  ;;  %2880 = vmatprep.mubr.msk.bf16.mxu0 %vm3117_vm0, %v3116_v3 }
  0xd7   : >> { %2900 = vmatprep.mubr.msk.bf16.mxu1 %vm3117_vm0, %v3116_v3 }
  0xd8   : >> { %2867 = vmatpush3.bf16.msra.mxu0 %v3068_v19 }
  0xd9   : >> { %2887 = vmatpush3.bf16.msra.mxu1 %v3069_v20  ;;  %2868 = vmatprep.subr.bf16.mxu0 %v3116_v3 }
  0xda   : >> { %2888 = vmatprep.subr.bf16.mxu1 %v3116_v3 }
  0xdc   : >> { %2869 = vmatpush3.bf16.msra.mxu0 %v3070_v21 }
  0xdd   : >> { %2889 = vmatpush3.bf16.msra.mxu1 %v3071_v22  ;;  %2870 = vmatprep.subr.bf16.mxu0 %v3116_v3 }
  0xde   : >> { %2890 = vmatprep.subr.bf16.mxu1 %v3116_v3 }
  0xe0   : >> { %2871 = vmatpush3.bf16.msra.mxu0 %v3072_v23 }
  0xe1   : >> { %2891 = vmatpush3.bf16.msra.mxu1 %v3073_v24  ;;  %2872 = vmatprep.subr.bf16.mxu0 %v3116_v3 }
  0xe2   : >> { %2892 = vmatprep.subr.bf16.mxu1 %v3116_v3 }
  0xe4   : >> { %2873 = vmatpush3.bf16.msra.mxu0 %v3074_v25 }
  0xe5   : >> { %2893 = vmatpush3.bf16.msra.mxu1 %v3075_v26  ;;  %2874 = vmatprep.subr.bf16.mxu0 %v3116_v3 }
  0xe6   : >> { %2894 = vmatprep.subr.bf16.mxu1 %v3116_v3 }
  0xe8   : >> { %2875 = vmatpush3.bf16.msra.mxu0 %v3076_v28 }
  0xe9   : >> { %2895 = vmatpush3.bf16.msra.mxu1 %v3077_v30  ;;  %2876 = vmatprep.subr.bf16.mxu0 %v3116_v3 }
  0xea   : >> { %2896 = vmatprep.subr.bf16.mxu1 %v3116_v3 }
  0xec   : >> { %2877 = vmatpush3.bf16.msra.mxu0 %v3078_v31 }
  0xed   : >> { %2897 = vmatpush3.bf16.msra.mxu1 %v3079_v33  ;;  %2878 = vmatprep.subr.bf16.mxu0 %v3116_v3 }
  0xee   : >> { %2898 = vmatprep.subr.bf16.mxu1 %v3116_v3 }
  0xf0   : >> { %2879 = vmatpush3.bf16.msra.mxu0 %v3080_v34 }
  0xf1   : >> { %2899 = vmatpush3.bf16.msra.mxu1 %v3081_v37  ;;  %2904 = vmatprep.subr.bf16.mxu0 %v3116_v3 }
  0xf2   : >> { %2924 = vmatprep.subr.bf16.mxu1 %v3116_v3 }
  0xf3   : >> { %v312_v41 = vpop.f32.mrf.mxu0  ;;  %2881 = vmatmul.mubr.bf16.vlgmr.msra.gmra.mxu0 %v3645_v27 }
  0xf4   : >> { %v400_v42 = vpop.f32.mrf.mxu1  ;;  %2901 = vmatmul.mubr.bf16.vlgmr.msra.gmra.mxu1 %v1680_v38  ;;  %2905 = vmatpush3.bf16.msra.mxu0 %v3084_v39 }
  0xf5   : >> { %v401_v44 = vadd.f32 %v400_v42, %v312_v41  ;;  %2925 = vmatpush3.bf16.msra.mxu1 %v3085_v40  ;;  %v2642_v45 = vpop.f32.mrf.mxu0  ;;  %2906 = vmatprep.subr.bf16.mxu0 %v3116_v3 }
  0xf6   : >> { %v2662_v47 = vpop.f32.mrf.mxu1  ;;  %2926 = vmatprep.subr.bf16.mxu1 %v3116_v3  ;;  %2920 = vmatprep.mubr.msk.bf16.mxu0 %vm3117_vm0, %v3116_v3 }
  0xf7   : >> { %v315_v48 = vpop.f32.mrf.mxu0  ;;  %2940 = vmatprep.mubr.msk.bf16.mxu1 %vm3117_vm0, %v3116_v3 }
  0xf8   : >> { %v403_v49 = vpop.f32.mrf.mxu1  ;;  %2907 = vmatpush3.bf16.msra.mxu0 %v3086_v43 }
  0xf9   : >> { %2927 = vmatpush3.bf16.msra.mxu1 %v3087_v46  ;;  %v2643_v51 = vpop.f32.mrf.mxu0  ;;  %2908 = vmatprep.subr.bf16.mxu0 %v3116_v3 }
  0xfa   : >> { %v2663_v53 = vpop.f32.mrf.mxu1  ;;  %2928 = vmatprep.subr.bf16.mxu1 %v3116_v3 }
  0xfc   : >> { %2909 = vmatpush3.bf16.msra.mxu0 %v3088_v50 }
  0xfd   : >> { %2929 = vmatpush3.bf16.msra.mxu1 %v3089_v52  ;;  %2910 = vmatprep.subr.bf16.mxu0 %v3116_v3 }
  0xfe   : >> { %2930 = vmatprep.subr.bf16.mxu1 %v3116_v3 }
 0x100   : >> { %2911 = vmatpush3.bf16.msra.mxu0 %v3090_v54 }
 0x101   : >> { %2931 = vmatpush3.bf16.msra.mxu1 %v3091_v55  ;;  %2912 = vmatprep.subr.bf16.mxu0 %v3116_v3 }
 0x102   : >> { %2932 = vmatprep.subr.bf16.mxu1 %v3116_v3 }
 0x104   : >> { %2913 = vmatpush3.bf16.msra.mxu0 %v3092_v56 }
 0x105   : >> { %2933 = vmatpush3.bf16.msra.mxu1 %v3093_v58  ;;  %2914 = vmatprep.subr.bf16.mxu0 %v3116_v3 }
 0x106   : >> { %2934 = vmatprep.subr.bf16.mxu1 %v3116_v3 }
 0x108   : >> { %2915 = vmatpush3.bf16.msra.mxu0 %v3094_v60 }
 0x109   : >> { %2935 = vmatpush3.bf16.msra.mxu1 %v3095_v61  ;;  %2916 = vmatprep.subr.bf16.mxu0 %v3116_v3 }
 0x10a   : >> { %2936 = vmatprep.subr.bf16.mxu1 %v3116_v3 }
 0x10c   : >> { %2917 = vmatpush3.bf16.msra.mxu0 %v3096_v0 }
 0x10d   : >> { %2937 = vmatpush3.bf16.msra.mxu1 %v3097_v2  ;;  %2918 = vmatprep.subr.bf16.mxu0 %v3116_v3 }
 0x10e   : >> { %2938 = vmatprep.subr.bf16.mxu1 %v3116_v3 }
 0x110   : >> { %2919 = vmatpush3.bf16.msra.mxu0 %v3098_v6 }
 0x111   : >> { %2939 = vmatpush3.bf16.msra.mxu1 %v3099_v7 }
 0x113   : >> { %v507_v10 = vpop.f32.mrf.mxu0  ;;  %2921 = vmatmul.mubr.bf16.vlgmr.msra.gmra.mxu0 %v1788_v8 }
 0x114   : >> { %v513_v11 = vadd.f32 %v507_v10, %v401_v44  ;;  %v625_v12 = vpop.f32.mrf.mxu1  ;;  %2941 = vmatmul.mubr.bf16.vlgmr.msra.gmra.mxu1 %v1906_v9 }
 0x115   : >> { %v2682_v13 = vpop.f32.mrf.mxu0 }
 0x116   : >> { %v631_v14 = vadd.f32 %v625_v12, %v513_v11  ;;  %v2702_v15 = vpop.f32.mrf.mxu1 }
 0x117   : >> { %v510_v16 = vpop.f32.mrf.mxu0 }
 0x118   : >> { %v628_v17 = vpop.f32.mrf.mxu1 }
 0x119   : >> { %v2683_v18 = vpop.f32.mrf.mxu0 }
 0x11a   : >> { %v2703_v19 = vpop.f32.mrf.mxu1 }
 0x133   : >> { %v737_v20 = vpop.f32.mrf.mxu0 }
 0x134   : >> { %v743_v21 = vadd.f32 %v737_v20, %v631_v14  ;;  %v854_v3 = vpop.f32.mrf.mxu1 }
 0x135   : >> { %v2722_v22 = vpop.f32.mrf.mxu0 }
 0x136   : >> { %v860_v23 = vadd.f32 %v854_v3, %v743_v21  ;;  %v2742_v24 = vpop.f32.mrf.mxu1 }
 0x137   : >> { %v740_v25 = vpop.f32.mrf.mxu0 }
 0x138   : >> { %v857_v26 = vpop.f32.mrf.mxu1 }
 0x139   : >> { %v2723_v27 = vpop.f32.mrf.mxu0 }
 0x13a   : >> { %v2743_v28 = vpop.f32.mrf.mxu1 }
 0x153   : >> { %v962_v29 = vpop.f32.mrf.mxu0 }
 0x154   : >> { %v968_v30 = vadd.f32 %v962_v29, %v860_v23  ;;  %v1080_v31 = vpop.f32.mrf.mxu1 }
 0x155   : >> { %v2762_v32 = vpop.f32.mrf.mxu0 }
 0x156   : >> { %v1086_v33 = vadd.f32 %v1080_v31, %v968_v30  ;;  %v2782_v34 = vpop.f32.mrf.mxu1 }
 0x157   : >> { %v965_v35 = vpop.f32.mrf.mxu0 }
 0x158   : >> { %v1083_v36 = vpop.f32.mrf.mxu1 }
 0x159   : >> { %v2763_v37 = vpop.f32.mrf.mxu0 }
 0x15a   : >> { %v2783_v38 = vpop.f32.mrf.mxu1 }
 0x173   : >> { %v1192_v39 = vpop.f32.mrf.mxu0 }
 0x174   : >> { %v1198_v40 = vadd.f32 %v1192_v39, %v1086_v33  ;;  %v1309_v41 = vpop.f32.mrf.mxu1 }
 0x175   : >> { %v2802_v42 = vpop.f32.mrf.mxu0 }
 0x176   : >> { %v1315_v43 = vadd.f32 %v1309_v41, %v1198_v40  ;;  %v2822_v44 = vpop.f32.mrf.mxu1 }
 0x177   : >> { %v1195_v45 = vpop.f32.mrf.mxu0 }
 0x178   : >> { %v1312_v46 = vpop.f32.mrf.mxu1 }
 0x179   : >> { %v2803_v47 = vpop.f32.mrf.mxu0 }
 0x17a   : >> { %v2823_v48 = vpop.f32.mrf.mxu1 }
 0x193   : >> { %v1417_v49 = vpop.f32.mrf.mxu0 }
 0x194   : >> { %v1535_v50 = vpop.f32.mrf.mxu1  ;;  %v1423_v2 = vadd.f32 %v1417_v49, %v1315_v43 }
 0x195   : >> { %v2842_v51 = vpop.f32.mrf.mxu0 }
 0x196   : >> { %v2862_v52 = vpop.f32.mrf.mxu1  ;;  %v1541_v4 = vadd.f32 %v1535_v50, %v1423_v2 }
 0x197   : >> { %v1420_v53 = vpop.f32.mrf.mxu0 }
 0x198   : >> { %v1538_v54 = vpop.f32.mrf.mxu1 }
 0x199   : >> { %v2843_v55 = vpop.f32.mrf.mxu0 }
 0x19a   : >> { %v2863_v56 = vpop.f32.mrf.mxu1 }
 0x1b3   : >> { %v1647_v57 = vpop.f32.mrf.mxu0 }
 0x1b4   : >> { %v1764_v58 = vpop.f32.mrf.mxu1  ;;  %v1653_v5 = vadd.f32 %v1647_v57, %v1541_v4 }
 0x1b5   : >> { %v2882_v59 = vpop.f32.mrf.mxu0 }
 0x1b6   : >> { %v2902_v60 = vpop.f32.mrf.mxu1  ;;  %v1770_v6 = vadd.f32 %v1764_v58, %v1653_v5 }
 0x1b7   : >> { %v1650_v61 = vpop.f32.mrf.mxu0 }
 0x1b8   : >> { %v1767_v62 = vpop.f32.mrf.mxu1 }
 0x1b9   : >> { %v2883_v63 = vpop.f32.mrf.mxu0 }
 0x1ba   : >> { %v2903_v0 = vpop.f32.mrf.mxu1 }
 0x1d3   : >> { %v1872_v7 = vpop.f32.mrf.mxu0 }
 0x1d4   : >> { %v1878_v8 = vadd.f32 %v1872_v7, %v1770_v6  ;;  %v1990_v9 = vpop.f32.mrf.mxu1 }
 0x1d5   : >> { %v2922_v10 = vpop.f32.mrf.mxu0 }
 0x1d6   : >> { %v1996_v11 = vadd.f32 %v1990_v9, %v1878_v8  ;;  %v2942_v12 = vpop.f32.mrf.mxu1  ;;  %179 = sbr.rel (!%p177_p4) target bundleno = 18 (0x12), region = 89 }
 0x1d7   : >> { %v1875_v13 = vpop.f32.mrf.mxu0 }
 0x1d8   : >> { %v2003_v14 = vadd.f32 %v3149_v1, %v1996_v11  ;;  %v1993_v15 = vpop.f32.mrf.mxu1 }
 0x1d9   : >> { %v2923_v16 = vpop.f32.mrf.mxu0 }
 0x1da   : >> { %2007 = vst.msk [vmem:[%s2005_s10] sm:$0x3f] %vm2006_vm1, %v2003_v14  ;;  %v2943_v17 = vpop.f32.mrf.mxu1 }
 0x1db PF: > { %s15_s14 = sadd.s32 1, %s3110_s14  }
 0x1dc   : > { %p12_p5 = scmp.ge.s32.totalorder %s15_s14, 4  }
 0x1de   :  { %14 = sbr.rel (!%p12_p5) target bundleno = 3 (0x3), region = 100 }

// kernel: _lambda_.16
= control target key start
LH: loop header
LB: loop body
LE: loop exit
PB: predicated region body
PF: predicated region fallthrough
CT: control target
= control target key end

     0   :  { %s662_s12 = smov 0   ;;  %s758_s0 = inlined_call_operand.vmem [shape: f32[32,66], index: 0, kind: input, shape index: {}]   ;;  %s759_s1 = inlined_call_operand.vmem [shape: f32[6,66,66], index: 1, kind: input, shape index: {}]   ;;  %s760_s2 = inlined_call_operand.vmem [shape: f32[66,32], index: 2, kind: input, shape index: {}]   ;;  %s761_s3 = inlined_call_operand.vmem [shape: f32[6,32,32], index: 3, kind: output, shape index: {}]  }
   0x1 LB: > { %s495_s13 = sadd.s32 4294967295, %s638_s12   ;;  %p499_p0 = scmp.ge.s32.totalorder %s638_s12, 1  ;;  %s638_s12 = sphi %s662_s12, %s13_s12  }
   0x2   : > { %p137_p1 = scmp.lt.s32.totalorder %s638_s12, 7 }
   0x4   : > { %p138_p2 = pnand %p499_p0, %p137_p1 }
   0x5   : > { %p161_p3 = scmp.lt.s32.totalorder (!%p138_p2), %s495_s13, 5 }
   0x6   : > { %141 = sbr.rel (%p138_p2) target bundleno = 473 (0x1d9), region = 32 }
   0xb   : > { %v188_v0 = vld [vmem:[%s760_s2 + $0x40] sm:$0x3]  ;;  %vm217_vm0 = vcmask 1041408   ;;  %v640_v1 = vmov 0.0   ;;  %v187_v2 = vld [vmem:[%s760_s2 + $0x38] sm:$0xff]  ;;  %vm641_vm1 = vmmov 0  }
   0xc   : > { %552 = vmatprep.subr.mxu0 %v640_v1  ;;  %570 = vmatprep.mubr.msk.f32.mxu0 %vm641_vm1, %v640_v1  ;;  %v186_v3 = vld [vmem:[%s760_s2 + $0x30] sm:$0xff]  ;;  %v185_v4 = vld [vmem:[%s760_s2 + $0x28] sm:$0xff]  ;;  %s763_s13 = smov (!%p161_p3, %s495_s13), 5  ;;  %v184_v5 = vld [vmem:[%s760_s2 + $0x20] sm:$0xff]  ;;  %vm189_vm2 = vcmask 539648   ;;  %vm435_vm3 = vcmask 261120  }
   0xd   : > { %553 = vmatpush3.msk.msra.mxu0 %vm217_vm0, %v188_v0  ;;  %v183_v6 = vld [vmem:[%s760_s2 + $0x18] sm:$0xff]  ;;  %s621_s26 = smul.u32 72, %s763_s13  ;;  %v182_v7 = vld [vmem:[%s760_s2 + $0x10] sm:$0xff]  ;;  %v181_v8 = vld [vmem:[%s760_s2 + $0x8] sm:$0xff]  ;;  %s520_s19 = sshll.u32 %s763_s13, 5 }
   0xe   : > { %554 = vmatprep.subr.mxu0 %v640_v1  ;;  %v180_v9 = vld [vmem:[%s760_s2] sm:$0xff]  ;;  %v332_v38 = vld [vmem:[%s758_s0 + $0x8] sm:$0xff]  ;;  %v333_v39 = vld [vmem:[%s758_s0 + $0x10] sm:$0xff]  ;;  %s170_s22 = scalar_lea.vmem %s761_s3, %s520_s19 }
   0xf   : > { %555 = vmatpush3.msra.mxu0 %v187_v2  ;;  %s702_s6 = scalar_lea.vmem %s759_s1, %s621_s26  ;;  %v331_v19 = vld [vmem:[%s758_s0] sm:$0xff]  ;;  %v334_v40 = vld [vmem:[%s758_s0 + $0x18] sm:$0xff] }
  0x10   : > { %556 = vmatprep.subr.mxu0 %v640_v1  ;;  %v171_v10 = vld [vmem:[%s702_s6] sm:$0xff]  ;;  %v172_v11 = vld [vmem:[%s702_s6 + $0x8] sm:$0xff]  ;;  %v173_v12 = vld [vmem:[%s702_s6 + $0x10] sm:$0xff]  ;;  %615 = vmatprep.mubr.msk.f32.mxu1 %vm189_vm2, %v331_v19 }
  0x11   : > { %557 = vmatpush3.msra.mxu0 %v186_v3  ;;  %v174_v13 = vld [vmem:[%s702_s6 + $0x18] sm:$0xff]  ;;  %v175_v14 = vld [vmem:[%s702_s6 + $0x20] sm:$0xff]  ;;  %v176_v15 = vld [vmem:[%s702_s6 + $0x28] sm:$0xff] }
  0x12   : > { %558 = vmatprep.subr.mxu0 %v640_v1  ;;  %v177_v16 = vld [vmem:[%s702_s6 + $0x30] sm:$0xff]  ;;  %v178_v17 = vld [vmem:[%s702_s6 + $0x38] sm:$0xff]  ;;  %v179_v18 = vld [vmem:[%s702_s6 + $0x40] sm:$0x3] }
  0x13   : > { %559 = vmatpush3.msra.mxu0 %v185_v4 }
  0x14   : > { %560 = vmatprep.subr.mxu0 %v640_v1 }
  0x15   : > { %561 = vmatpush3.msra.mxu0 %v184_v5 }
  0x16   : > { %562 = vmatprep.subr.mxu0 %v640_v1 }
  0x17   : > { %563 = vmatpush3.msra.mxu0 %v183_v6 }
  0x18   : > { %564 = vmatprep.subr.mxu0 %v640_v1 }
  0x19   : > { %565 = vmatpush3.msra.mxu0 %v182_v7 }
  0x1a   : > { %566 = vmatprep.subr.mxu0 %v640_v1 }
  0x1b   : > { %567 = vmatpush3.msra.mxu0 %v181_v8 }
  0x1c   : > { %568 = vmatprep.subr.mxu0 %v640_v1 }
  0x1d   : > { %569 = vmatpush3.msra.mxu0 %v180_v9 }
  0x1e   : > { %571 = vmatmul.mubr.msk.f32.vlgmr.msra.gmra.mxu0 %vm189_vm2, %v171_v10 }
  0x1f   : > { %573 = vmatprep.mubr.msk.f32.mxu0 %vm641_vm1, %v640_v1 }
  0x22   : > { %574 = vmatmul.mubr.msk.f32.gmra.mxu0 %vm189_vm2, %v172_v11 }
  0x23   : > { %576 = vmatprep.mubr.msk.f32.mxu0 %vm641_vm1, %v640_v1 }
  0x26   : > { %577 = vmatmul.mubr.msk.f32.gmra.mxu0 %vm189_vm2, %v173_v12 }
  0x27   : > { %579 = vmatprep.mubr.msk.f32.mxu0 %vm641_vm1, %v640_v1 }
  0x2a   : > { %580 = vmatmul.mubr.msk.f32.gmra.mxu0 %vm189_vm2, %v174_v13 }
  0x2b   : > { %582 = vmatprep.mubr.msk.f32.mxu0 %vm641_vm1, %v640_v1 }
  0x2e   : > { %583 = vmatmul.mubr.msk.f32.gmra.mxu0 %vm189_vm2, %v175_v14 }
  0x2f   : > { %585 = vmatprep.mubr.msk.f32.mxu0 %vm641_vm1, %v640_v1 }
  0x32   : > { %586 = vmatmul.mubr.msk.f32.gmra.mxu0 %vm189_vm2, %v176_v15 }
  0x33   : > { %588 = vmatprep.mubr.msk.f32.mxu0 %vm641_vm1, %v640_v1 }
  0x36   : > { %589 = vmatmul.mubr.msk.f32.gmra.mxu0 %vm189_vm2, %v177_v16 }
  0x37   : > { %591 = vmatprep.mubr.msk.f32.mxu0 %vm641_vm1, %v640_v1 }
  0x3a   : > { %592 = vmatmul.mubr.msk.f32.gmra.mxu0 %vm189_vm2, %v178_v17 }
  0x3b   : > { %594 = vmatprep.mubr.msk.f32.mxu0 %vm641_vm1, %v640_v1 }
  0x3e   : > { %595 = vmatmul.mubr.msk.f32.gmra.mxu0 %vm189_vm2, %v179_v18 }
  0xde   : > { %v287_v20 = vpop.f32.mrf.mxu0 }
  0xe0   : > { %v572_v21 = vpop.f32.mrf.mxu0 }
  0xe2   : > { %v292_v22 = vpop.f32.mrf.mxu0 }
  0xe4   : > { %v575_v23 = vpop.f32.mrf.mxu0 }
  0xe6   : > { %v297_v24 = vpop.f32.mrf.mxu0 }
  0xe8   : > { %v578_v25 = vpop.f32.mrf.mxu0 }
  0xea   : > { %v302_v26 = vpop.f32.mrf.mxu0 }
  0xec   : > { %v581_v27 = vpop.f32.mrf.mxu0 }
  0xee   : > { %v307_v28 = vpop.f32.mrf.mxu0 }
  0xf0   : > { %v584_v29 = vpop.f32.mrf.mxu0 }
  0xf2   : > { %v312_v30 = vpop.f32.mrf.mxu0 }
  0xf4   : > { %v587_v31 = vpop.f32.mrf.mxu0 }
  0xf6   : > { %v317_v32 = vpop.f32.mrf.mxu0 }
  0xf8   : > { %v590_v33 = vpop.f32.mrf.mxu0 }
  0xfa   : > { %v322_v34 = vpop.f32.mrf.mxu0 }
  0xfc   : > { %v593_v35 = vpop.f32.mrf.mxu0 }
  0xfe   : > { %v327_v36 = vpop.f32.mrf.mxu0 }
  0xff   : > { %597 = vmatprep.subr.msk.mxu1 %vm217_vm0, %v327_v36 }
 0x100   : > { %v596_v37 = vpop.f32.mrf.mxu0  ;;  %598 = vmatpush3.msk.msra.mxu1 %vm217_vm0, %v327_v36 }
 0x101   : > { %599 = vmatprep.subr.mxu1 %v322_v34 }
 0x102   : > { %600 = vmatpush3.msra.mxu1 %v322_v34 }
 0x103   : > { %601 = vmatprep.subr.mxu1 %v317_v32 }
 0x104   : > { %602 = vmatpush3.msra.mxu1 %v317_v32 }
 0x105   : > { %603 = vmatprep.subr.mxu1 %v312_v30 }
 0x106   : > { %604 = vmatpush3.msra.mxu1 %v312_v30 }
 0x107   : > { %605 = vmatprep.subr.mxu1 %v307_v28 }
 0x108   : > { %606 = vmatpush3.msra.mxu1 %v307_v28 }
 0x109   : > { %607 = vmatprep.subr.mxu1 %v302_v26 }
 0x10a   : > { %608 = vmatpush3.msra.mxu1 %v302_v26 }
 0x10b   : > { %609 = vmatprep.subr.mxu1 %v297_v24 }
 0x10c   : > { %610 = vmatpush3.msra.mxu1 %v297_v24 }
 0x10d   : > { %611 = vmatprep.subr.mxu1 %v292_v22 }
 0x10e   : > { %612 = vmatpush3.msra.mxu1 %v292_v22 }
 0x10f   : > { %613 = vmatprep.subr.mxu1 %v287_v20 }
 0x110   : > { %614 = vmatpush3.msra.mxu1 %v287_v20 }
 0x111   : > { %616 = vmatmul.mubr.msk.f32.vlgmr.msra.gmra.mxu1 %vm189_vm2, %v332_v38 }
 0x112   : > { %618 = vmatprep.mubr.msk.f32.mxu1 %vm189_vm2, %v333_v39 }
 0x115   : > { %619 = vmatmul.mubr.msk.f32.gmra.mxu1 %vm189_vm2, %v334_v40 }
 0x1d1   : > { %v617_v41 = vpop.f32.mrf.mxu1 }
 0x1d2   : > { %437 = vst.msk [vmem:[%s170_s22 + $0x8] sm:$0xff] %vm435_vm3, %v617_v41 }
 0x1d3   : > { %v416_v42 = vpop.f32.mrf.mxu1 }
 0x1d4   : > { %436 = vst.msk [vmem:[%s170_s22] sm:$0xff] %vm435_vm3, %v416_v42 }
 0x1d5   : > { %v620_v43 = vpop.f32.mrf.mxu1 }
 0x1d6   : > { %439 = vst.msk [vmem:[%s170_s22 + $0x18] sm:$0xff] %vm435_vm3, %v620_v43 }
 0x1d7   : > { %v426_v44 = vpop.f32.mrf.mxu1 }
 0x1d8   : > { %438 = vst.msk [vmem:[%s170_s22 + $0x10] sm:$0xff] %vm435_vm3, %v426_v44 }
 0x1d9 PF: > { %s13_s12 = sadd.s32 1, %s638_s12  }
 0x1da   : > { %p10_p4 = scmp.ge.s32.totalorder %s13_s12, 8  }
 0x1dc   :  { %12 = sbr.rel (!%p10_p4) target bundleno = 1 (0x1), region = 62 }

// kernel: _lambda_.17
= control target key start
LH: loop header
LB: loop body
LE: loop exit
PB: predicated region body
PF: predicated region fallthrough
CT: control target
= control target key end

     0   :  { %vm19_vm0 = vcmask 130048   ;;  %v1525_v1 = vmov 0.0   ;;  %vm396_vm1 = vcmask 392192   ;;  %s3056_s1 = inlined_call_operand.vmem [shape: bf16[48,16], index: 1, kind: input, shape index: {}]   ;;  %s3057_s3 = inlined_call_operand.vmem [shape: f32[512,16], index: 3, kind: output, shape index: {}]   ;;  %s3058_s0 = inlined_call_operand.vmem [shape: bf16[512,48], index: 0, kind: input, shape index: {}]   ;;  %s3059_s2 = inlined_call_operand.vmem [shape: f32[1,16], index: 2, kind: input, shape index: {}]  }
   0x1   :  { %v1549_v0 = vld [vmem:[%s3056_s1 + $0x10] sm:$0xff]   ;;  %22 = vst.msk [vmem:[%s3057_s3 + $0x10] sm:$0xff] %vm19_vm0, %v1525_v1  ;;  %20 = vst.msk [vmem:[%s3057_s3] sm:$0xff] %vm19_vm0, %v1525_v1  ;;  %v1490_v2 = vld [vmem:[%s3056_s1 + $0x8] sm:$0xff]  }
   0x2   :  { %21 = vst.msk [vmem:[%s3057_s3 + $0x8] sm:$0xff] %vm19_vm0, %v1525_v1  ;;  %23 = vst.msk [vmem:[%s3057_s3 + $0x18] sm:$0xff] %vm19_vm0, %v1525_v1  ;;  %1412 = vmatprep.subr.bf16.mxu0 %v1549_v0  ;;  %1482 = vmatprep.subr.bf16.mxu1 %v1549_v0  ;;  %v1491_v3 = vld [vmem:[%s3056_s1] sm:$0xff]   ;;  %v1494_v6 = vld [vmem:[%s3058_s0 + $0x8] sm:$0xff]  }
   0x3   :  { %24 = vst.msk [vmem:[%s3057_s3 + $0x20] sm:$0xff] %vm19_vm0, %v1525_v1  ;;  %25 = vst.msk [vmem:[%s3057_s3 + $0x28] sm:$0xff] %vm19_vm0, %v1525_v1  ;;  %1413 = vmatpush3.bf16.msra.mxu0 %v1549_v0  ;;  %1485 = vmatpush3.bf16.msra.mxu1 %v1549_v0  ;;  %v1492_v4 = vld [vmem:[%s3058_s0] sm:$0xff]   ;;  %v1495_v7 = vld [vmem:[%s3058_s0 + $0x88] sm:$0xff]  }
   0x4   :  { %26 = vst.msk [vmem:[%s3057_s3 + $0x30] sm:$0xff] %vm19_vm0, %v1525_v1  ;;  %27 = vst.msk [vmem:[%s3057_s3 + $0x38] sm:$0xff] %vm19_vm0, %v1525_v1  ;;  %1414 = vmatprep.subr.bf16.mxu0 %v1490_v2  ;;  %1483 = vmatprep.subr.bf16.mxu1 %v1490_v2  ;;  %v1493_v5 = vld [vmem:[%s3058_s0 + $0x80] sm:$0xff]   ;;  %v1496_v8 = vld [vmem:[%s3058_s0 + $0x10] sm:$0xff]  }
   0x5   :  { %28 = vst.msk [vmem:[%s3057_s3 + $0x40] sm:$0xff] %vm19_vm0, %v1525_v1  ;;  %29 = vst.msk [vmem:[%s3057_s3 + $0x48] sm:$0xff] %vm19_vm0, %v1525_v1  ;;  %1418 = vmatprep.mubr.msk.bf16.mxu0 %vm396_vm1, %v1492_v4  ;;  %1450 = vmatprep.mubr.msk.bf16.mxu1 %vm396_vm1, %v1493_v5  ;;  %v1497_v9 = vld [vmem:[%s3058_s0 + $0x90] sm:$0xff]   ;;  %v1498_v10 = vld [vmem:[%s3058_s0 + $0x18] sm:$0xff]  }
   0x6   :  { %30 = vst.msk [vmem:[%s3057_s3 + $0x50] sm:$0xff] %vm19_vm0, %v1525_v1  ;;  %31 = vst.msk [vmem:[%s3057_s3 + $0x58] sm:$0xff] %vm19_vm0, %v1525_v1  ;;  %v1499_v11 = vld [vmem:[%s3058_s0 + $0x98] sm:$0xff]   ;;  %v1500_v12 = vld [vmem:[%s3058_s0 + $0x20] sm:$0xff]  }
   0x7   :  { %32 = vst.msk [vmem:[%s3057_s3 + $0x60] sm:$0xff] %vm19_vm0, %v1525_v1  ;;  %33 = vst.msk [vmem:[%s3057_s3 + $0x68] sm:$0xff] %vm19_vm0, %v1525_v1  ;;  %1415 = vmatpush3.bf16.msra.mxu0 %v1490_v2  ;;  %1486 = vmatpush3.bf16.msra.mxu1 %v1490_v2  ;;  %v1501_v13 = vld [vmem:[%s3058_s0 + $0xa0] sm:$0xff]   ;;  %v1502_v14 = vld [vmem:[%s3058_s0 + $0x28] sm:$0xff]  }
   0x8   :  { %34 = vst.msk [vmem:[%s3057_s3 + $0x70] sm:$0xff] %vm19_vm0, %v1525_v1  ;;  %35 = vst.msk [vmem:[%s3057_s3 + $0x78] sm:$0xff] %vm19_vm0, %v1525_v1  ;;  %1416 = vmatprep.subr.bf16.mxu0 %v1491_v3  ;;  %1484 = vmatprep.subr.bf16.mxu1 %v1491_v3  ;;  %v1503_v15 = vld [vmem:[%s3058_s0 + $0xa8] sm:$0xff]   ;;  %v1504_v16 = vld [vmem:[%s3058_s0 + $0x30] sm:$0xff]  }
   0x9   :  { %36 = vst.msk [vmem:[%s3057_s3 + $0x80] sm:$0xff] %vm19_vm0, %v1525_v1  ;;  %37 = vst.msk [vmem:[%s3057_s3 + $0x88] sm:$0xff] %vm19_vm0, %v1525_v1  ;;  %v1505_v17 = vld [vmem:[%s3058_s0 + $0xb0] sm:$0xff]   ;;  %v1506_v18 = vld [vmem:[%s3058_s0 + $0x38] sm:$0xff]  }
   0xa   :  { %38 = vst.msk [vmem:[%s3057_s3 + $0x90] sm:$0xff] %vm19_vm0, %v1525_v1  ;;  %39 = vst.msk [vmem:[%s3057_s3 + $0x98] sm:$0xff] %vm19_vm0, %v1525_v1  ;;  %v1507_v19 = vld [vmem:[%s3058_s0 + $0xb8] sm:$0xff]   ;;  %v1508_v20 = vld [vmem:[%s3058_s0 + $0x40] sm:$0xff]  }
   0xb   :  { %40 = vst.msk [vmem:[%s3057_s3 + $0xa0] sm:$0xff] %vm19_vm0, %v1525_v1  ;;  %41 = vst.msk [vmem:[%s3057_s3 + $0xa8] sm:$0xff] %vm19_vm0, %v1525_v1  ;;  %1417 = vmatpush3.bf16.msra.mxu0 %v1491_v3  ;;  %1487 = vmatpush3.bf16.msra.mxu1 %v1491_v3  ;;  %v1509_v21 = vld [vmem:[%s3058_s0 + $0xc0] sm:$0xff]   ;;  %v1510_v22 = vld [vmem:[%s3058_s0 + $0x48] sm:$0xff]  }
   0xc   :  { %42 = vst.msk [vmem:[%s3057_s3 + $0xb0] sm:$0xff] %vm19_vm0, %v1525_v1  ;;  %43 = vst.msk [vmem:[%s3057_s3 + $0xb8] sm:$0xff] %vm19_vm0, %v1525_v1  ;;  %v1511_v23 = vld [vmem:[%s3058_s0 + $0xc8] sm:$0xff]   ;;  %v1512_v24 = vld [vmem:[%s3058_s0 + $0x50] sm:$0xff]  }
   0xd   :  { %44 = vst.msk [vmem:[%s3057_s3 + $0xc0] sm:$0xff] %vm19_vm0, %v1525_v1  ;;  %45 = vst.msk [vmem:[%s3057_s3 + $0xc8] sm:$0xff] %vm19_vm0, %v1525_v1  ;;  %v1513_v25 = vld [vmem:[%s3058_s0 + $0xd0] sm:$0xff]   ;;  %v1514_v26 = vld [vmem:[%s3058_s0 + $0x58] sm:$0xff]  }
   0xe   :  { %46 = vst.msk [vmem:[%s3057_s3 + $0xd0] sm:$0xff] %vm19_vm0, %v1525_v1  ;;  %47 = vst.msk [vmem:[%s3057_s3 + $0xd8] sm:$0xff] %vm19_vm0, %v1525_v1  ;;  %1419 = vmatmul.mubr.msk.bf16.vlgmr.msra.gmra.mxu0 %vm396_vm1, %v1494_v6  ;;  %1451 = vmatmul.mubr.msk.bf16.vlgmr.msra.gmra.mxu1 %vm396_vm1, %v1495_v7  ;;  %v1515_v27 = vld [vmem:[%s3058_s0 + $0xd8] sm:$0xff]   ;;  %v1516_v28 = vld [vmem:[%s3058_s0 + $0x60] sm:$0xff]  }
   0xf   :  { %48 = vst.msk [vmem:[%s3057_s3 + $0xe0] sm:$0xff] %vm19_vm0, %v1525_v1  ;;  %49 = vst.msk [vmem:[%s3057_s3 + $0xe8] sm:$0xff] %vm19_vm0, %v1525_v1  ;;  %1422 = vmatprep.mubr.msk.bf16.mxu0 %vm396_vm1, %v1496_v8  ;;  %1454 = vmatprep.mubr.msk.bf16.mxu1 %vm396_vm1, %v1497_v9  ;;  %v1517_v29 = vld [vmem:[%s3058_s0 + $0xe0] sm:$0xff]   ;;  %v1518_v30 = vld [vmem:[%s3058_s0 + $0x68] sm:$0xff]  }
  0x10   :  { %50 = vst.msk [vmem:[%s3057_s3 + $0xf0] sm:$0xff] %vm19_vm0, %v1525_v1  ;;  %51 = vst.msk [vmem:[%s3057_s3 + $0xf8] sm:$0xff] %vm19_vm0, %v1525_v1  ;;  %v1519_v31 = vld [vmem:[%s3058_s0 + $0xe8] sm:$0xff]   ;;  %v1520_v32 = vld [vmem:[%s3058_s0 + $0x70] sm:$0xff]  }
  0x11   :  { %52 = vst.msk [vmem:[%s3057_s3 + $0x100] sm:$0xff] %vm19_vm0, %v1525_v1  ;;  %53 = vst.msk [vmem:[%s3057_s3 + $0x108] sm:$0xff] %vm19_vm0, %v1525_v1  ;;  %v1521_v33 = vld [vmem:[%s3058_s0 + $0xf0] sm:$0xff]   ;;  %v1522_v34 = vld [vmem:[%s3058_s0 + $0x78] sm:$0xff]  }
  0x12   :  { %54 = vst.msk [vmem:[%s3057_s3 + $0x110] sm:$0xff] %vm19_vm0, %v1525_v1  ;;  %55 = vst.msk [vmem:[%s3057_s3 + $0x118] sm:$0xff] %vm19_vm0, %v1525_v1  ;;  %v1523_v35 = vld [vmem:[%s3058_s0 + $0xf8] sm:$0xff]   ;;  %v86_v36 = vld [vmem:[%s3057_s3 + $0x10] sm:$0xff] }
  0x13   :  { %56 = vst.msk [vmem:[%s3057_s3 + $0x120] sm:$0xff] %vm19_vm0, %v1525_v1  ;;  %57 = vst.msk [vmem:[%s3057_s3 + $0x128] sm:$0xff] %vm19_vm0, %v1525_v1  ;;  %v84_v40 = vld [vmem:[%s3057_s3] sm:$0xff]  ;;  %v87_v46 = vld [vmem:[%s3057_s3 + $0x18] sm:$0xff] }
  0x14   :  { %58 = vst.msk [vmem:[%s3057_s3 + $0x130] sm:$0xff] %vm19_vm0, %v1525_v1  ;;  %59 = vst.msk [vmem:[%s3057_s3 + $0x138] sm:$0xff] %vm19_vm0, %v1525_v1  ;;  %v85_v52 = vld [vmem:[%s3057_s3 + $0x8] sm:$0xff]  ;;  %v90_v58 = vld [vmem:[%s3057_s3 + $0x30] sm:$0xff] }
  0x15   :  { %60 = vst.msk [vmem:[%s3057_s3 + $0x140] sm:$0xff] %vm19_vm0, %v1525_v1  ;;  %61 = vst.msk [vmem:[%s3057_s3 + $0x148] sm:$0xff] %vm19_vm0, %v1525_v1  ;;  %v2066_v62 = vld [vmem:[%s3059_s2] ss:$0 sm:$0xff] }
  0x16   :  { %62 = vst.msk [vmem:[%s3057_s3 + $0x150] sm:$0xff] %vm19_vm0, %v1525_v1  ;;  %63 = vst.msk [vmem:[%s3057_s3 + $0x158] sm:$0xff] %vm19_vm0, %v1525_v1  ;;  %1423 = vmatmul.mubr.msk.bf16.gmra.mxu0 %vm396_vm1, %v1498_v10  ;;  %1455 = vmatmul.mubr.msk.bf16.gmra.mxu1 %vm396_vm1, %v1499_v11 }
  0x17   :  { %64 = vst.msk [vmem:[%s3057_s3 + $0x160] sm:$0xff] %vm19_vm0, %v1525_v1  ;;  %65 = vst.msk [vmem:[%s3057_s3 + $0x168] sm:$0xff] %vm19_vm0, %v1525_v1  ;;  %1426 = vmatprep.mubr.msk.bf16.mxu0 %vm396_vm1, %v1500_v12  ;;  %1458 = vmatprep.mubr.msk.bf16.mxu1 %vm396_vm1, %v1501_v13  ;;  %v91_v13 = vld [vmem:[%s3057_s3 + $0x38] sm:$0xff] }
  0x18   :  { %66 = vst.msk [vmem:[%s3057_s3 + $0x170] sm:$0xff] %vm19_vm0, %v1525_v1  ;;  %67 = vst.msk [vmem:[%s3057_s3 + $0x178] sm:$0xff] %vm19_vm0, %v1525_v1  ;;  %v116_v41 = vld [vmem:[%s3057_s3 + $0x100] sm:$0xff]  ;;  %v117_v53 = vld [vmem:[%s3057_s3 + $0x108] sm:$0xff] }
  0x19   :  { %68 = vst.msk [vmem:[%s3057_s3 + $0x180] sm:$0xff] %vm19_vm0, %v1525_v1  ;;  %69 = vst.msk [vmem:[%s3057_s3 + $0x188] sm:$0xff] %vm19_vm0, %v1525_v1  ;;  %v118_v37 = vld [vmem:[%s3057_s3 + $0x110] sm:$0xff]  ;;  %v119_v47 = vld [vmem:[%s3057_s3 + $0x118] sm:$0xff] }
  0x1a   :  { %70 = vst.msk [vmem:[%s3057_s3 + $0x190] sm:$0xff] %vm19_vm0, %v1525_v1  ;;  %71 = vst.msk [vmem:[%s3057_s3 + $0x198] sm:$0xff] %vm19_vm0, %v1525_v1  ;;  %v120_v2 = vld [vmem:[%s3057_s3 + $0x120] sm:$0xff] }
  0x1b   :  { %72 = vst.msk [vmem:[%s3057_s3 + $0x1a0] sm:$0xff] %vm19_vm0, %v1525_v1  ;;  %73 = vst.msk [vmem:[%s3057_s3 + $0x1a8] sm:$0xff] %vm19_vm0, %v1525_v1  ;;  %v122_v59 = vld [vmem:[%s3057_s3 + $0x130] sm:$0xff] }
  0x1c   :  { %74 = vst.msk [vmem:[%s3057_s3 + $0x1b0] sm:$0xff] %vm19_vm0, %v1525_v1  ;;  %75 = vst.msk [vmem:[%s3057_s3 + $0x1b8] sm:$0xff] %vm19_vm0, %v1525_v1 }
  0x1d   :  { %76 = vst.msk [vmem:[%s3057_s3 + $0x1c0] sm:$0xff] %vm19_vm0, %v1525_v1  ;;  %77 = vst.msk [vmem:[%s3057_s3 + $0x1c8] sm:$0xff] %vm19_vm0, %v1525_v1 }
  0x1e   :  { %78 = vst.msk [vmem:[%s3057_s3 + $0x1d0] sm:$0xff] %vm19_vm0, %v1525_v1  ;;  %79 = vst.msk [vmem:[%s3057_s3 + $0x1d8] sm:$0xff] %vm19_vm0, %v1525_v1  ;;  %1427 = vmatmul.mubr.msk.bf16.gmra.mxu0 %vm396_vm1, %v1502_v14  ;;  %1459 = vmatmul.mubr.msk.bf16.gmra.mxu1 %vm396_vm1, %v1503_v15  ;;  %v123_v14 = vld [vmem:[%s3057_s3 + $0x138] sm:$0xff] }
  0x1f   :  { %80 = vst.msk [vmem:[%s3057_s3 + $0x1e0] sm:$0xff] %vm19_vm0, %v1525_v1  ;;  %81 = vst.msk [vmem:[%s3057_s3 + $0x1e8] sm:$0xff] %vm19_vm0, %v1525_v1  ;;  %1430 = vmatprep.mubr.msk.bf16.mxu0 %vm396_vm1, %v1504_v16  ;;  %1462 = vmatprep.mubr.msk.bf16.mxu1 %vm396_vm1, %v1505_v17 }
  0x20   :  { %82 = vst.msk [vmem:[%s3057_s3 + $0x1f0] sm:$0xff] %vm19_vm0, %v1525_v1  ;;  %83 = vst.msk [vmem:[%s3057_s3 + $0x1f8] sm:$0xff] %vm19_vm0, %v1525_v1  ;;  %v88_v1 = vld [vmem:[%s3057_s3 + $0x20] sm:$0xff] }
  0x26   :  { %1431 = vmatmul.mubr.msk.bf16.gmra.mxu0 %vm396_vm1, %v1506_v18  ;;  %1463 = vmatmul.mubr.msk.bf16.gmra.mxu1 %vm396_vm1, %v1507_v19 }
  0x27   :  { %1434 = vmatprep.mubr.msk.bf16.mxu0 %vm396_vm1, %v1508_v20  ;;  %1466 = vmatprep.mubr.msk.bf16.mxu1 %vm396_vm1, %v1509_v21 }
  0x2e   :  { %1435 = vmatmul.mubr.msk.bf16.gmra.mxu0 %vm396_vm1, %v1510_v22  ;;  %1467 = vmatmul.mubr.msk.bf16.gmra.mxu1 %vm396_vm1, %v1511_v23 }
  0x2f   :  { %1438 = vmatprep.mubr.msk.bf16.mxu0 %vm396_vm1, %v1512_v24  ;;  %1470 = vmatprep.mubr.msk.bf16.mxu1 %vm396_vm1, %v1513_v25 }
  0x36   :  { %1439 = vmatmul.mubr.msk.bf16.gmra.mxu0 %vm396_vm1, %v1514_v26  ;;  %1471 = vmatmul.mubr.msk.bf16.gmra.mxu1 %vm396_vm1, %v1515_v27  ;;  %v89_v27 = vld [vmem:[%s3057_s3 + $0x28] sm:$0xff] }
  0x37   :  { %1442 = vmatprep.mubr.msk.bf16.mxu0 %vm396_vm1, %v1516_v28  ;;  %1474 = vmatprep.mubr.msk.bf16.mxu1 %vm396_vm1, %v1517_v29 }
  0x3e   :  { %1443 = vmatmul.mubr.msk.bf16.gmra.mxu0 %vm396_vm1, %v1518_v30  ;;  %1475 = vmatmul.mubr.msk.bf16.gmra.mxu1 %vm396_vm1, %v1519_v31 }
  0x3f   :  { %1446 = vmatprep.mubr.msk.bf16.mxu0 %vm396_vm1, %v1520_v32  ;;  %1478 = vmatprep.mubr.msk.bf16.mxu1 %vm396_vm1, %v1521_v33 }
  0x46   :  { %1447 = vmatmul.mubr.msk.bf16.gmra.mxu0 %vm396_vm1, %v1522_v34  ;;  %1479 = vmatmul.mubr.msk.bf16.gmra.mxu1 %vm396_vm1, %v1523_v35  ;;  %v121_v34 = vld [vmem:[%s3057_s3 + $0x128] sm:$0xff]  ;;  %v94_v35 = vld [vmem:[%s3057_s3 + $0x50] sm:$0xff] }
  0xce   :  { %v1420_v38 = vpop.f32.mrf.mxu0  ;;  %v1452_v39 = vpop.f32.mrf.mxu1 }
  0xcf   :  { %v784_v42 = vadd.f32 %v1420_v38, %v86_v36  ;;  %v816_v43 = vadd.f32 %v1452_v39, %v118_v37  ;;  %v126_v36 = vld [vmem:[%s3057_s3 + $0x150] sm:$0xff] }
  0xd0   :  { %v527_v44 = vpop.f32.mrf.mxu0  ;;  %v655_v45 = vpop.f32.mrf.mxu1 }
  0xd1   :  { %849 = vst.msk [vmem:[%s3057_s3 + $0x10] sm:$0xff] %vm19_vm0, %v784_v42  ;;  %881 = vst.msk [vmem:[%s3057_s3 + $0x110] sm:$0xff] %vm19_vm0, %v816_v43  ;;  %v782_v48 = vadd.f32 %v527_v44, %v84_v40  ;;  %v814_v49 = vadd.f32 %v655_v45, %v116_v41 }
  0xd2   :  { %v1421_v50 = vpop.f32.mrf.mxu0  ;;  %v1453_v51 = vpop.f32.mrf.mxu1 }
  0xd3   :  { %847 = vst.msk [vmem:[%s3057_s3] sm:$0xff] %vm19_vm0, %v782_v48  ;;  %879 = vst.msk [vmem:[%s3057_s3 + $0x100] sm:$0xff] %vm19_vm0, %v814_v49  ;;  %v785_v54 = vadd.f32 %v1421_v50, %v87_v46  ;;  %v817_v55 = vadd.f32 %v1453_v51, %v119_v47 }
  0xd4   :  { %v530_v56 = vpop.f32.mrf.mxu0  ;;  %v658_v57 = vpop.f32.mrf.mxu1 }
  0xd5   :  { %850 = vst.msk [vmem:[%s3057_s3 + $0x18] sm:$0xff] %vm19_vm0, %v785_v54  ;;  %882 = vst.msk [vmem:[%s3057_s3 + $0x118] sm:$0xff] %vm19_vm0, %v817_v55  ;;  %v783_v60 = vadd.f32 %v530_v56, %v85_v52  ;;  %v815_v61 = vadd.f32 %v658_v57, %v117_v53 }
  0xd6   :  { %v1424_v63 = vpop.f32.mrf.mxu0  ;;  %v1456_v0 = vpop.f32.mrf.mxu1 }
  0xd7   :  { %848 = vst.msk [vmem:[%s3057_s3 + $0x8] sm:$0xff] %vm19_vm0, %v783_v60  ;;  %880 = vst.msk [vmem:[%s3057_s3 + $0x108] sm:$0xff] %vm19_vm0, %v815_v61  ;;  %v788_v3 = vadd.f32 %v1424_v63, %v90_v58  ;;  %v820_v4 = vadd.f32 %v1456_v0, %v122_v59 }
  0xd8   :  { %v916_v5 = vld [vmem:[%s3057_s3 + $0x10] sm:$0xff]  ;;  %v543_v7 = vpop.f32.mrf.mxu0  ;;  %v671_v8 = vpop.f32.mrf.mxu1 }
  0xd9   :  { %v948_v6 = vld [vmem:[%s3057_s3 + $0x110] sm:$0xff]  ;;  %v987_v9 = vadd.f32 %v2066_v62, %v916_v5  ;;  %853 = vst.msk [vmem:[%s3057_s3 + $0x30] sm:$0xff] %vm19_vm0, %v788_v3  ;;  %885 = vst.msk [vmem:[%s3057_s3 + $0x130] sm:$0xff] %vm19_vm0, %v820_v4  ;;  %v786_v11 = vadd.f32 %v543_v7, %v88_v1  ;;  %v818_v12 = vadd.f32 %v671_v8, %v120_v2 }
  0xda   :  { %v1019_v10 = vadd.f32 %v2066_v62, %v948_v6  ;;  %v914_v15 = vld [vmem:[%s3057_s3] sm:$0xff]  ;;  %v1425_v17 = vpop.f32.mrf.mxu0  ;;  %v1457_v18 = vpop.f32.mrf.mxu1 }
  0xdb   :  { %v946_v16 = vld [vmem:[%s3057_s3 + $0x100] sm:$0xff]  ;;  %vm1051_vm2 = vcmp.ge.f32.partialorder %v987_v9, 0.0  ;;  %v1115_v19 = vmul.f32 0.2, %v987_v9  ;;  %851 = vst.msk [vmem:[%s3057_s3 + $0x20] sm:$0xff] %vm19_vm0, %v786_v11  ;;  %883 = vst.msk [vmem:[%s3057_s3 + $0x120] sm:$0xff] %vm19_vm0, %v818_v12  ;;  %v985_v21 = vadd.f32 %v2066_v62, %v914_v15  ;;  %v789_v25 = vadd.f32 %v1425_v17, %v91_v13 }
  0xdc   :  { %vm1083_vm3 = vcmp.ge.f32.partialorder %v1019_v10, 0.0  ;;  %v1147_v20 = vmul.f32 0.2, %v1019_v10  ;;  %v1017_v22 = vadd.f32 %v2066_v62, %v946_v16  ;;  %v917_v23 = vld [vmem:[%s3057_s3 + $0x18] sm:$0xff]  ;;  %v821_v26 = vadd.f32 %v1457_v18, %v123_v14  ;;  %v546_v28 = vpop.f32.mrf.mxu0  ;;  %v674_v29 = vpop.f32.mrf.mxu1  ;;  %v92_v6 = vld [vmem:[%s3057_s3 + $0x40] sm:$0xff] }
  0xdd   :  { %v949_v24 = vld [vmem:[%s3057_s3 + $0x118] sm:$0xff]  ;;  %v1179_v30 = vsel %vm1051_vm2, %v987_v9, %v1115_v19  ;;  %v988_v32 = vadd.f32 %v2066_v62, %v917_v23  ;;  %vm1049_vm4 = vcmp.ge.f32.partialorder %v985_v21, 0.0  ;;  %v1113_v37 = vmul.f32 0.2, %v985_v21  ;;  %854 = vst.msk [vmem:[%s3057_s3 + $0x38] sm:$0xff] %vm19_vm0, %v789_v25  ;;  %v124_v15 = vld [vmem:[%s3057_s3 + $0x140] sm:$0xff] }
  0xde   :  { %v1211_v31 = vsel %vm1083_vm3, %v1019_v10, %v1147_v20  ;;  %v1020_v33 = vadd.f32 %v2066_v62, %v949_v24  ;;  %1243 = vst.msk [vmem:[%s3057_s3 + $0x10] sm:$0xff] %vm19_vm0, %v1179_v30  ;;  %vm1081_vm5 = vcmp.ge.f32.partialorder %v1017_v22, 0.0  ;;  %v1145_v38 = vmul.f32 0.2, %v1017_v22  ;;  %886 = vst.msk [vmem:[%s3057_s3 + $0x138] sm:$0xff] %vm19_vm0, %v821_v26  ;;  %v1428_v39 = vpop.f32.mrf.mxu0  ;;  %v1460_v40 = vpop.f32.mrf.mxu1  ;;  %v915_v45 = vld [vmem:[%s3057_s3 + $0x8] sm:$0xff] }
  0xdf   :  { %1275 = vst.msk [vmem:[%s3057_s3 + $0x110] sm:$0xff] %vm19_vm0, %v1211_v31  ;;  %vm1052_vm6 = vcmp.ge.f32.partialorder %v988_v32, 0.0  ;;  %v1116_v41 = vmul.f32 0.2, %v988_v32  ;;  %v1177_v43 = vsel %vm1049_vm4, %v985_v21, %v1113_v37  ;;  %v947_v46 = vld [vmem:[%s3057_s3 + $0x108] sm:$0xff]  ;;  %v787_v48 = vadd.f32 %v546_v28, %v89_v27  ;;  %v95_v20 = vld [vmem:[%s3057_s3 + $0x58] sm:$0xff] }
  0xe0   :  { %vm1084_vm7 = vcmp.ge.f32.partialorder %v1020_v33, 0.0  ;;  %v1148_v42 = vmul.f32 0.2, %v1020_v33  ;;  %v1209_v44 = vsel %vm1081_vm5, %v1017_v22, %v1145_v38  ;;  %v920_v47 = vld [vmem:[%s3057_s3 + $0x30] sm:$0xff]  ;;  %v819_v49 = vadd.f32 %v674_v29, %v121_v34  ;;  %v2165_v50 = vpop.f32.mrf.mxu0  ;;  %v2167_v51 = vpop.f32.mrf.mxu1  ;;  %1241 = vst.msk [vmem:[%s3057_s3] sm:$0xff] %vm19_vm0, %v1177_v43  ;;  %v127_v21 = vld [vmem:[%s3057_s3 + $0x158] sm:$0xff] }
  0xe1   :  { %1273 = vst.msk [vmem:[%s3057_s3 + $0x100] sm:$0xff] %vm19_vm0, %v1209_v44  ;;  %v1180_v52 = vsel %vm1052_vm6, %v988_v32, %v1116_v41  ;;  %v986_v54 = vadd.f32 %v2066_v62, %v915_v45  ;;  %v1018_v55 = vadd.f32 %v2066_v62, %v947_v46  ;;  %v952_v56 = vld [vmem:[%s3057_s3 + $0x130] sm:$0xff]  ;;  %v991_v57 = vadd.f32 %v2066_v62, %v920_v47  ;;  %v93_v22 = vld [vmem:[%s3057_s3 + $0x48] sm:$0xff]  ;;  %v96_v44 = vld [vmem:[%s3057_s3 + $0x60] sm:$0xff] }
  0xe2   :  { %v1212_v53 = vsel %vm1084_vm7, %v1020_v33, %v1148_v42  ;;  %1244 = vst.msk [vmem:[%s3057_s3 + $0x18] sm:$0xff] %vm19_vm0, %v1180_v52  ;;  %v1023_v58 = vadd.f32 %v2066_v62, %v952_v56  ;;  %v918_v59 = vld [vmem:[%s3057_s3 + $0x20] sm:$0xff]  ;;  %852 = vst.msk [vmem:[%s3057_s3 + $0x28] sm:$0xff] %vm19_vm0, %v787_v48  ;;  %v792_v61 = vadd.f32 %v1428_v39, %v94_v35  ;;  %v2206_v0 = vpop.f32.mrf.mxu0  ;;  %v2208_v1 = vpop.f32.mrf.mxu1  ;;  %v125_v23 = vld [vmem:[%s3057_s3 + $0x148] sm:$0xff] }
  0xe3   :  { %1276 = vst.msk [vmem:[%s3057_s3 + $0x118] sm:$0xff] %vm19_vm0, %v1212_v53  ;;  %v950_v60 = vld [vmem:[%s3057_s3 + $0x120] sm:$0xff]  ;;  %884 = vst.msk [vmem:[%s3057_s3 + $0x128] sm:$0xff] %vm19_vm0, %v819_v49  ;;  %v824_v63 = vadd.f32 %v1460_v40, %v126_v36  ;;  %vm1050_vm8 = vcmp.ge.f32.partialorder %v986_v54, 0.0  ;;  %v1114_v2 = vmul.f32 0.2, %v986_v54  ;;  %v989_v11 = vadd.f32 %v2066_v62, %v918_v59 }
  0xe4   :  { %vm1082_vm9 = vcmp.ge.f32.partialorder %v1018_v55, 0.0  ;;  %v1146_v3 = vmul.f32 0.2, %v1018_v55  ;;  %vm1055_vm10 = vcmp.ge.f32.partialorder %v991_v57, 0.0  ;;  %v1119_v4 = vmul.f32 0.2, %v991_v57  ;;  %v562_v7 = vpop.f32.mrf.mxu0  ;;  %v690_v8 = vpop.f32.mrf.mxu1 }
  0xe5   :  { %vm1087_vm11 = vcmp.ge.f32.partialorder %v1023_v58, 0.0  ;;  %v1151_v5 = vmul.f32 0.2, %v1023_v58  ;;  %857 = vst.msk [vmem:[%s3057_s3 + $0x50] sm:$0xff] %vm19_vm0, %v792_v61  ;;  %889 = vst.msk [vmem:[%s3057_s3 + $0x150] sm:$0xff] %vm19_vm0, %v824_v63  ;;  %v1178_v9 = vsel %vm1050_vm8, %v986_v54, %v1114_v2  ;;  %v1021_v12 = vadd.f32 %v2066_v62, %v950_v60  ;;  %v921_v13 = vld [vmem:[%s3057_s3 + $0x38] sm:$0xff] }
  0xe6   :  { %v1210_v10 = vsel %vm1082_vm9, %v1018_v55, %v1146_v3  ;;  %v953_v14 = vld [vmem:[%s3057_s3 + $0x138] sm:$0xff]  ;;  %1242 = vst.msk [vmem:[%s3057_s3 + $0x8] sm:$0xff] %vm19_vm0, %v1178_v9  ;;  %v1183_v16 = vsel %vm1055_vm10, %v991_v57, %v1119_v4  ;;  %v992_v18 = vadd.f32 %v2066_v62, %v921_v13  ;;  %v1432_v24 = vpop.f32.mrf.mxu0  ;;  %v1464_v25 = vpop.f32.mrf.mxu1  ;;  %vm1053_vm12 = vcmp.ge.f32.partialorder %v989_v11, 0.0  ;;  %v98_v38 = vld [vmem:[%s3057_s3 + $0x70] sm:$0xff]  ;;  %v128_v45 = vld [vmem:[%s3057_s3 + $0x160] sm:$0xff] }
  0xe7   :  { %1274 = vst.msk [vmem:[%s3057_s3 + $0x108] sm:$0xff] %vm19_vm0, %v1210_v10  ;;  %v1215_v17 = vsel %vm1087_vm11, %v1023_v58, %v1151_v5  ;;  %v1024_v19 = vadd.f32 %v2066_v62, %v953_v14  ;;  %1247 = vst.msk [vmem:[%s3057_s3 + $0x30] sm:$0xff] %vm19_vm0, %v1183_v16  ;;  %v1117_v26 = vmul.f32 0.2, %v989_v11  ;;  %vm1085_vm13 = vcmp.ge.f32.partialorder %v1021_v12, 0.0  ;;  %v130_v43 = vld [vmem:[%s3057_s3 + $0x170] sm:$0xff] }
  0xe8   :  { %1279 = vst.msk [vmem:[%s3057_s3 + $0x130] sm:$0xff] %vm19_vm0, %v1215_v17  ;;  %v1149_v27 = vmul.f32 0.2, %v1021_v12  ;;  %vm1056_vm14 = vcmp.ge.f32.partialorder %v992_v18, 0.0  ;;  %v1120_v28 = vmul.f32 0.2, %v992_v18  ;;  %v575_v30 = vpop.f32.mrf.mxu0  ;;  %v703_v31 = vpop.f32.mrf.mxu1  ;;  %v790_v36 = vadd.f32 %v2165_v50, %v92_v6 }
  0xe9   :  { %vm1088_vm15 = vcmp.ge.f32.partialorder %v1024_v19, 0.0  ;;  %v1152_v29 = vmul.f32 0.2, %v1024_v19  ;;  %v1181_v32 = vsel %vm1053_vm12, %v989_v11, %v1117_v26  ;;  %v919_v34 = vld [vmem:[%s3057_s3 + $0x28] sm:$0xff]  ;;  %v822_v37 = vadd.f32 %v2167_v51, %v124_v15  ;;  %v99_v54 = vld [vmem:[%s3057_s3 + $0x78] sm:$0xff]  ;;  %v102_v3 = vld [vmem:[%s3057_s3 + $0x90] sm:$0xff] }
  0xea   :  { %v1213_v33 = vsel %vm1085_vm13, %v1021_v12, %v1149_v27  ;;  %v951_v35 = vld [vmem:[%s3057_s3 + $0x128] sm:$0xff]  ;;  %1245 = vst.msk [vmem:[%s3057_s3 + $0x20] sm:$0xff] %vm19_vm0, %v1181_v32  ;;  %v1184_v39 = vsel %vm1056_vm14, %v992_v18, %v1120_v28  ;;  %v990_v41 = vadd.f32 %v2066_v62, %v919_v34  ;;  %v1433_v46 = vpop.f32.mrf.mxu0  ;;  %v1465_v47 = vpop.f32.mrf.mxu1  ;;  %855 = vst.msk [vmem:[%s3057_s3 + $0x40] sm:$0xff] %vm19_vm0, %v790_v36  ;;  %v131_v55 = vld [vmem:[%s3057_s3 + $0x178] sm:$0xff] }
  0xeb   :  { %1277 = vst.msk [vmem:[%s3057_s3 + $0x120] sm:$0xff] %vm19_vm0, %v1213_v33  ;;  %v1216_v40 = vsel %vm1088_vm15, %v1024_v19, %v1152_v29  ;;  %v1022_v42 = vadd.f32 %v2066_v62, %v951_v35  ;;  %1248 = vst.msk [vmem:[%s3057_s3 + $0x38] sm:$0xff] %vm19_vm0, %v1184_v39  ;;  %v793_v50 = vadd.f32 %v2206_v0, %v95_v20  ;;  %v129_v2 = vld [vmem:[%s3057_s3 + $0x168] sm:$0xff]  ;;  %v134_v9 = vld [vmem:[%s3057_s3 + $0x190] sm:$0xff] }
  0xec   :  { %1280 = vst.msk [vmem:[%s3057_s3 + $0x138] sm:$0xff] %vm19_vm0, %v1216_v40  ;;  %v924_v48 = vld [vmem:[%s3057_s3 + $0x50] sm:$0xff]  ;;  %887 = vst.msk [vmem:[%s3057_s3 + $0x140] sm:$0xff] %vm19_vm0, %v822_v37  ;;  %v825_v51 = vadd.f32 %v2208_v1, %v127_v21  ;;  %v791_v52 = vadd.f32 %v562_v7, %v93_v22  ;;  %v823_v53 = vadd.f32 %v690_v8, %v125_v23  ;;  %vm1054_vm1 = vcmp.ge.f32.partialorder %v990_v41, 0.0  ;;  %v578_v58 = vpop.f32.mrf.mxu0  ;;  %v706_v59 = vpop.f32.mrf.mxu1  ;;  %v97_v1 = vld [vmem:[%s3057_s3 + $0x68] sm:$0xff] }
  0xed   :  { %v956_v49 = vld [vmem:[%s3057_s3 + $0x150] sm:$0xff]  ;;  %v1118_v56 = vmul.f32 0.2, %v990_v41  ;;  %vm1086_vm2 = vcmp.ge.f32.partialorder %v1022_v42, 0.0  ;;  %v1150_v57 = vmul.f32 0.2, %v1022_v42  ;;  %v995_v60 = vadd.f32 %v2066_v62, %v924_v48 }
  0xee   :  { %v1027_v61 = vadd.f32 %v2066_v62, %v956_v49  ;;  %858 = vst.msk [vmem:[%s3057_s3 + $0x58] sm:$0xff] %vm19_vm0, %v793_v50  ;;  %890 = vst.msk [vmem:[%s3057_s3 + $0x158] sm:$0xff] %vm19_vm0, %v825_v51  ;;  %v796_v63 = vadd.f32 %v1432_v24, %v98_v38  ;;  %v828_v0 = vadd.f32 %v1464_v25, %v130_v43  ;;  %v1436_v8 = vpop.f32.mrf.mxu0  ;;  %v1468_v10 = vpop.f32.mrf.mxu1  ;;  %v100_v11 = vld [vmem:[%s3057_s3 + $0x80] sm:$0xff]  ;;  %v103_v21 = vld [vmem:[%s3057_s3 + $0x98] sm:$0xff] }
  0xef   :  { %856 = vst.msk [vmem:[%s3057_s3 + $0x48] sm:$0xff] %vm19_vm0, %v791_v52  ;;  %888 = vst.msk [vmem:[%s3057_s3 + $0x148] sm:$0xff] %vm19_vm0, %v823_v53  ;;  %v1182_v4 = vsel %vm1054_vm1, %v990_v41, %v1118_v56  ;;  %v1214_v5 = vsel %vm1086_vm2, %v1022_v42, %v1150_v57  ;;  %v794_v6 = vadd.f32 %v575_v30, %v96_v44  ;;  %v132_v12 = vld [vmem:[%s3057_s3 + $0x180] sm:$0xff]  ;;  %vm1059_vm3 = vcmp.ge.f32.partialorder %v995_v60, 0.0  ;;  %v135_v22 = vld [vmem:[%s3057_s3 + $0x198] sm:$0xff] }
  0xf0   :  { %v826_v7 = vadd.f32 %v703_v31, %v128_v45  ;;  %1246 = vst.msk [vmem:[%s3057_s3 + $0x28] sm:$0xff] %vm19_vm0, %v1182_v4  ;;  %1278 = vst.msk [vmem:[%s3057_s3 + $0x128] sm:$0xff] %vm19_vm0, %v1214_v5  ;;  %v1123_v13 = vmul.f32 0.2, %v995_v60  ;;  %vm1091_vm4 = vcmp.ge.f32.partialorder %v1027_v61, 0.0  ;;  %v797_v15 = vadd.f32 %v1433_v46, %v99_v54  ;;  %v591_v19 = vpop.f32.mrf.mxu0  ;;  %v719_v20 = vpop.f32.mrf.mxu1  ;;  %v101_v37 = vld [vmem:[%s3057_s3 + $0x88] sm:$0xff] }
  0xf1   :  { %v1155_v14 = vmul.f32 0.2, %v1027_v61  ;;  %861 = vst.msk [vmem:[%s3057_s3 + $0x70] sm:$0xff] %vm19_vm0, %v796_v63  ;;  %893 = vst.msk [vmem:[%s3057_s3 + $0x170] sm:$0xff] %vm19_vm0, %v828_v0  ;;  %v829_v16 = vadd.f32 %v1465_v47, %v131_v55  ;;  %v795_v17 = vadd.f32 %v578_v58, %v97_v1  ;;  %v827_v18 = vadd.f32 %v706_v59, %v129_v2  ;;  %v922_v27 = vld [vmem:[%s3057_s3 + $0x40] sm:$0xff] }
  0xf2   :  { %859 = vst.msk [vmem:[%s3057_s3 + $0x60] sm:$0xff] %vm19_vm0, %v794_v6  ;;  %891 = vst.msk [vmem:[%s3057_s3 + $0x160] sm:$0xff] %vm19_vm0, %v826_v7  ;;  %v1187_v23 = vsel %vm1059_vm3, %v995_v60, %v1123_v13  ;;  %v800_v25 = vadd.f32 %v1436_v8, %v102_v3  ;;  %v832_v26 = vadd.f32 %v1468_v10, %v134_v9  ;;  %v1437_v31 = vpop.f32.mrf.mxu0  ;;  %v1469_v32 = vpop.f32.mrf.mxu1 }
  0xf3   :  { %v1219_v24 = vsel %vm1091_vm4, %v1027_v61, %v1155_v14  ;;  %1251 = vst.msk [vmem:[%s3057_s3 + $0x50] sm:$0xff] %vm19_vm0, %v1187_v23  ;;  %v954_v28 = vld [vmem:[%s3057_s3 + $0x140] sm:$0xff]  ;;  %862 = vst.msk [vmem:[%s3057_s3 + $0x78] sm:$0xff] %vm19_vm0, %v797_v15  ;;  %v798_v29 = vadd.f32 %v591_v19, %v100_v11  ;;  %v830_v30 = vadd.f32 %v719_v20, %v132_v12 }
  0xf4   :  { %1283 = vst.msk [vmem:[%s3057_s3 + $0x150] sm:$0xff] %vm19_vm0, %v1219_v24  ;;  %894 = vst.msk [vmem:[%s3057_s3 + $0x178] sm:$0xff] %vm19_vm0, %v829_v16  ;;  %v993_v33 = vadd.f32 %v2066_v62, %v922_v27  ;;  %v1025_v34 = vadd.f32 %v2066_v62, %v954_v28  ;;  %v801_v35 = vadd.f32 %v1437_v31, %v103_v21  ;;  %v594_v41 = vpop.f32.mrf.mxu0  ;;  %v2453_v42 = vpop.f32.mrf.mxu1 }
  0xf5   :  { %860 = vst.msk [vmem:[%s3057_s3 + $0x68] sm:$0xff] %vm19_vm0, %v795_v17  ;;  %892 = vst.msk [vmem:[%s3057_s3 + $0x168] sm:$0xff] %vm19_vm0, %v827_v18  ;;  %v833_v36 = vadd.f32 %v1469_v32, %v135_v22  ;;  %v925_v38 = vld [vmem:[%s3057_s3 + $0x58] sm:$0xff]  ;;  %v799_v50 = vadd.f32 %v594_v41, %v101_v37 }
  0xf6   :  { %865 = vst.msk [vmem:[%s3057_s3 + $0x90] sm:$0xff] %vm19_vm0, %v800_v25  ;;  %897 = vst.msk [vmem:[%s3057_s3 + $0x190] sm:$0xff] %vm19_vm0, %v832_v26  ;;  %v957_v39 = vld [vmem:[%s3057_s3 + $0x158] sm:$0xff]  ;;  %v923_v40 = vld [vmem:[%s3057_s3 + $0x48] sm:$0xff]  ;;  %vm1057_vm5 = vcmp.ge.f32.partialorder %v993_v33, 0.0  ;;  %vm1089_vm6 = vcmp.ge.f32.partialorder %v1025_v34, 0.0  ;;  %v996_v45 = vadd.f32 %v2066_v62, %v925_v38  ;;  %v2472_v51 = vpop.f32.mrf.mxu0  ;;  %v2474_v52 = vpop.f32.mrf.mxu1 }
  0xf7   :  { %863 = vst.msk [vmem:[%s3057_s3 + $0x80] sm:$0xff] %vm19_vm0, %v798_v29  ;;  %895 = vst.msk [vmem:[%s3057_s3 + $0x180] sm:$0xff] %vm19_vm0, %v830_v30  ;;  %v1121_v43 = vmul.f32 0.2, %v993_v33  ;;  %v1153_v44 = vmul.f32 0.2, %v1025_v34  ;;  %v1028_v46 = vadd.f32 %v2066_v62, %v957_v39  ;;  %v994_v47 = vadd.f32 %v2066_v62, %v923_v40 }
  0xf8   :  { %866 = vst.msk [vmem:[%s3057_s3 + $0x98] sm:$0xff] %vm19_vm0, %v801_v35  ;;  %898 = vst.msk [vmem:[%s3057_s3 + $0x198] sm:$0xff] %vm19_vm0, %v833_v36  ;;  %v955_v48 = vld [vmem:[%s3057_s3 + $0x148] sm:$0xff]  ;;  %v928_v49 = vld [vmem:[%s3057_s3 + $0x70] sm:$0xff]  ;;  %vm1060_vm7 = vcmp.ge.f32.partialorder %v996_v45, 0.0  ;;  %v2499_v63 = vpop.f32.mrf.mxu0  ;;  %v2501_v0 = vpop.f32.mrf.mxu1 }
  0xf9   :  { %v1185_v53 = vsel %vm1057_vm5, %v993_v33, %v1121_v43  ;;  %v1217_v54 = vsel %vm1089_vm6, %v1025_v34, %v1153_v44  ;;  %v1026_v55 = vadd.f32 %v2066_v62, %v955_v48  ;;  %v999_v56 = vadd.f32 %v2066_v62, %v928_v49  ;;  %v960_v57 = vld [vmem:[%s3057_s3 + $0x170] sm:$0xff]  ;;  %v926_v58 = vld [vmem:[%s3057_s3 + $0x60] sm:$0xff]  ;;  %864 = vst.msk [vmem:[%s3057_s3 + $0x88] sm:$0xff] %vm19_vm0, %v799_v50  ;;  %v133_v49 = vld [vmem:[%s3057_s3 + $0x188] sm:$0xff] }
  0xfa   :  { %v958_v59 = vld [vmem:[%s3057_s3 + $0x160] sm:$0xff]  ;;  %1249 = vst.msk [vmem:[%s3057_s3 + $0x40] sm:$0xff] %vm19_vm0, %v1185_v53  ;;  %1281 = vst.msk [vmem:[%s3057_s3 + $0x140] sm:$0xff] %vm19_vm0, %v1217_v54  ;;  %v1124_v60 = vmul.f32 0.2, %v996_v45  ;;  %vm1092_vm8 = vcmp.ge.f32.partialorder %v1028_v46, 0.0  ;;  %v2509_v8 = vpop.f32.mrf.mxu0  ;;  %v2511_v9 = vpop.f32.mrf.mxu1  ;;  %v1031_v12 = vadd.f32 %v2066_v62, %v960_v57  ;;  %v997_v13 = vadd.f32 %v2066_v62, %v926_v58 }
  0xfb   :  { %v1156_v61 = vmul.f32 0.2, %v1028_v46  ;;  %vm1058_vm9 = vcmp.ge.f32.partialorder %v994_v47, 0.0  ;;  %v1122_v1 = vmul.f32 0.2, %v994_v47  ;;  %vm1090_vm10 = vcmp.ge.f32.partialorder %v1026_v55, 0.0 }
  0xfc   :  { %v1154_v2 = vmul.f32 0.2, %v1026_v55  ;;  %v1188_v3 = vsel %vm1060_vm7, %v996_v45, %v1124_v60  ;;  %vm1063_vm11 = vcmp.ge.f32.partialorder %v999_v56, 0.0  ;;  %v1127_v5 = vmul.f32 0.2, %v999_v56  ;;  %v929_v6 = vld [vmem:[%s3057_s3 + $0x78] sm:$0xff]  ;;  %v2550_v23 = vpop.f32.mrf.mxu0  ;;  %v2552_v24 = vpop.f32.mrf.mxu1 }
  0xfd   :  { %v1220_v4 = vsel %vm1092_vm8, %v1028_v46, %v1156_v61  ;;  %v961_v7 = vld [vmem:[%s3057_s3 + $0x178] sm:$0xff]  ;;  %1252 = vst.msk [vmem:[%s3057_s3 + $0x58] sm:$0xff] %vm19_vm0, %v1188_v3  ;;  %v1186_v10 = vsel %vm1058_vm9, %v994_v47, %v1122_v1  ;;  %v927_v14 = vld [vmem:[%s3057_s3 + $0x68] sm:$0xff]  ;;  %v1029_v17 = vadd.f32 %v2066_v62, %v958_v59  ;;  %v1000_v18 = vadd.f32 %v2066_v62, %v929_v6  ;;  %v932_v20 = vld [vmem:[%s3057_s3 + $0x90] sm:$0xff] }
  0xfe   :  { %1284 = vst.msk [vmem:[%s3057_s3 + $0x158] sm:$0xff] %vm19_vm0, %v1220_v4  ;;  %v1218_v11 = vsel %vm1090_vm10, %v1026_v55, %v1154_v2  ;;  %v959_v15 = vld [vmem:[%s3057_s3 + $0x168] sm:$0xff]  ;;  %1250 = vst.msk [vmem:[%s3057_s3 + $0x48] sm:$0xff] %vm19_vm0, %v1186_v10  ;;  %v1191_v16 = vsel %vm1063_vm11, %v999_v56, %v1127_v5  ;;  %v1032_v19 = vadd.f32 %v2066_v62, %v961_v7  ;;  %v964_v21 = vld [vmem:[%s3057_s3 + $0x190] sm:$0xff]  ;;  %vm1095_vm12 = vcmp.ge.f32.partialorder %v1031_v12, 0.0  ;;  %v2558_v29 = vpop.f32.mrf.mxu0  ;;  %v2560_v30 = vpop.f32.mrf.mxu1 }
  0xff   :  { %1282 = vst.msk [vmem:[%s3057_s3 + $0x148] sm:$0xff] %vm19_vm0, %v1218_v11  ;;  %v930_v22 = vld [vmem:[%s3057_s3 + $0x80] sm:$0xff]  ;;  %1255 = vst.msk [vmem:[%s3057_s3 + $0x70] sm:$0xff] %vm19_vm0, %v1191_v16  ;;  %v1159_v25 = vmul.f32 0.2, %v1031_v12  ;;  %vm1061_vm13 = vcmp.ge.f32.partialorder %v997_v13, 0.0  ;;  %v998_v36 = vadd.f32 %v2066_v62, %v927_v14  ;;  %v1030_v37 = vadd.f32 %v2066_v62, %v959_v15 }
 0x100   :  { %v1125_v26 = vmul.f32 0.2, %v997_v13  ;;  %vm1093_vm14 = vcmp.ge.f32.partialorder %v1029_v17, 0.0  ;;  %v1157_v27 = vmul.f32 0.2, %v1029_v17  ;;  %vm1064_vm15 = vcmp.ge.f32.partialorder %v1000_v18, 0.0  ;;  %v2575_v39 = vpop.f32.mrf.mxu0  ;;  %v2577_v40 = vpop.f32.mrf.mxu1 }
 0x101   :  { %v1128_v28 = vmul.f32 0.2, %v1000_v18  ;;  %v1223_v31 = vsel %vm1095_vm12, %v1031_v12, %v1159_v25  ;;  %vm1096_vm1 = vcmp.ge.f32.partialorder %v1032_v19, 0.0  ;;  %v1160_v33 = vmul.f32 0.2, %v1032_v19  ;;  %v962_v38 = vld [vmem:[%s3057_s3 + $0x180] sm:$0xff] }
 0x102   :  { %v1189_v32 = vsel %vm1061_vm13, %v997_v13, %v1125_v26  ;;  %1287 = vst.msk [vmem:[%s3057_s3 + $0x170] sm:$0xff] %vm19_vm0, %v1223_v31  ;;  %v1221_v34 = vsel %vm1093_vm14, %v1029_v17, %v1157_v27  ;;  %v1003_v43 = vadd.f32 %v2066_v62, %v932_v20  ;;  %v1035_v44 = vadd.f32 %v2066_v62, %v964_v21  ;;  %v933_v46 = vld [vmem:[%s3057_s3 + $0x98] sm:$0xff]  ;;  %v931_v48 = vld [vmem:[%s3057_s3 + $0x88] sm:$0xff]  ;;  %v2606_v54 = vpop.f32.mrf.mxu0  ;;  %v2608_v55 = vpop.f32.mrf.mxu1  ;;  %v106_v61 = vld [vmem:[%s3057_s3 + $0xb0] sm:$0xff] }
 0x103   :  { %1253 = vst.msk [vmem:[%s3057_s3 + $0x60] sm:$0xff] %vm19_vm0, %v1189_v32  ;;  %v1192_v35 = vsel %vm1064_vm15, %v1000_v18, %v1128_v28  ;;  %1285 = vst.msk [vmem:[%s3057_s3 + $0x160] sm:$0xff] %vm19_vm0, %v1221_v34  ;;  %v1224_v41 = vsel %vm1096_vm1, %v1032_v19, %v1160_v33  ;;  %v1001_v45 = vadd.f32 %v2066_v62, %v930_v22  ;;  %v965_v47 = vld [vmem:[%s3057_s3 + $0x198] sm:$0xff]  ;;  %vm1062_vm2 = vcmp.ge.f32.partialorder %v998_v36, 0.0  ;;  %v138_v7 = vld [vmem:[%s3057_s3 + $0x1b0] sm:$0xff] }
 0x104   :  { %1256 = vst.msk [vmem:[%s3057_s3 + $0x78] sm:$0xff] %vm19_vm0, %v1192_v35  ;;  %1288 = vst.msk [vmem:[%s3057_s3 + $0x178] sm:$0xff] %vm19_vm0, %v1224_v41  ;;  %v1126_v50 = vmul.f32 0.2, %v998_v36  ;;  %vm1094_vm3 = vcmp.ge.f32.partialorder %v1030_v37, 0.0  ;;  %vm1067_vm4 = vcmp.ge.f32.partialorder %v1003_v43, 0.0  ;;  %v2613_v1 = vpop.f32.mrf.mxu0  ;;  %v2615_v2 = vpop.f32.mrf.mxu1  ;;  %v1033_v5 = vadd.f32 %v2066_v62, %v962_v38 }
 0x105   :  { %v1158_v53 = vmul.f32 0.2, %v1030_v37  ;;  %v1131_v56 = vmul.f32 0.2, %v1003_v43  ;;  %vm1099_vm5 = vcmp.ge.f32.partialorder %v1035_v44, 0.0  ;;  %vm1065_vm6 = vcmp.ge.f32.partialorder %v1001_v45, 0.0 }
 0x106   :  { %v1163_v57 = vmul.f32 0.2, %v1035_v44  ;;  %v1190_v58 = vsel %vm1062_vm2, %v998_v36, %v1126_v50  ;;  %v1129_v60 = vmul.f32 0.2, %v1001_v45  ;;  %v1004_v6 = vadd.f32 %v2066_v62, %v933_v46  ;;  %v104_v10 = vld [vmem:[%s3057_s3 + $0xa0] sm:$0xff]  ;;  %v107_v16 = vld [vmem:[%s3057_s3 + $0xb8] sm:$0xff]  ;;  %v2660_v20 = vpop.f32.mrf.mxu0  ;;  %v2662_v21 = vpop.f32.mrf.mxu1 }
 0x107   :  { %v1222_v59 = vsel %vm1094_vm3, %v1030_v37, %v1158_v53  ;;  %1254 = vst.msk [vmem:[%s3057_s3 + $0x68] sm:$0xff] %vm19_vm0, %v1190_v58  ;;  %v1195_v3 = vsel %vm1067_vm4, %v1003_v43, %v1131_v56  ;;  %v136_v11 = vld [vmem:[%s3057_s3 + $0x1a0] sm:$0xff]  ;;  %v1036_v13 = vadd.f32 %v2066_v62, %v965_v47  ;;  %v1002_v14 = vadd.f32 %v2066_v62, %v931_v48  ;;  %v139_v17 = vld [vmem:[%s3057_s3 + $0x1b8] sm:$0xff]  ;;  %v105_v18 = vld [vmem:[%s3057_s3 + $0xa8] sm:$0xff] }
 0x108   :  { %1286 = vst.msk [vmem:[%s3057_s3 + $0x168] sm:$0xff] %vm19_vm0, %v1222_v59  ;;  %v1227_v4 = vsel %vm1099_vm5, %v1035_v44, %v1163_v57  ;;  %1259 = vst.msk [vmem:[%s3057_s3 + $0x90] sm:$0xff] %vm19_vm0, %v1195_v3  ;;  %v1193_v12 = vsel %vm1065_vm6, %v1001_v45, %v1129_v60  ;;  %v831_v15 = vadd.f32 %v2453_v42, %v133_v49  ;;  %v137_v19 = vld [vmem:[%s3057_s3 + $0x1a8] sm:$0xff]  ;;  %vm1097_vm7 = vcmp.ge.f32.partialorder %v1033_v5, 0.0  ;;  %v110_v25 = vld [vmem:[%s3057_s3 + $0xd0] sm:$0xff]  ;;  %v639_v33 = vpop.f32.mrf.mxu0  ;;  %v767_v34 = vpop.f32.mrf.mxu1 }
 0x109   :  { %1291 = vst.msk [vmem:[%s3057_s3 + $0x190] sm:$0xff] %vm19_vm0, %v1227_v4  ;;  %1257 = vst.msk [vmem:[%s3057_s3 + $0x80] sm:$0xff] %vm19_vm0, %v1193_v12  ;;  %v1161_v42 = vmul.f32 0.2, %v1033_v5  ;;  %vm1068_vm8 = vcmp.ge.f32.partialorder %v1004_v6, 0.0  ;;  %v142_v26 = vld [vmem:[%s3057_s3 + $0x1d0] sm:$0xff]  ;;  %v804_v37 = vadd.f32 %v2472_v51, %v106_v61  ;;  %v836_v38 = vadd.f32 %v2474_v52, %v138_v7 }
 0x10a   :  { %v1132_v22 = vmul.f32 0.2, %v1004_v6  ;;  %v108_v27 = vld [vmem:[%s3057_s3 + $0xc0] sm:$0xff]  ;;  %vm1100_vm9 = vcmp.ge.f32.partialorder %v1036_v13, 0.0  ;;  %v1164_v31 = vmul.f32 0.2, %v1036_v13  ;;  %v802_v45 = vadd.f32 %v2499_v63, %v104_v10  ;;  %v1449_v50 = vpop.f32.mrf.mxu0  ;;  %v1481_v53 = vpop.f32.mrf.mxu1 }
 0x10b   :  { %v140_v28 = vld [vmem:[%s3057_s3 + $0x1c0] sm:$0xff]  ;;  %vm1066_vm10 = vcmp.ge.f32.partialorder %v1002_v14, 0.0  ;;  %v1130_v32 = vmul.f32 0.2, %v1002_v14  ;;  %896 = vst.msk [vmem:[%s3057_s3 + $0x188] sm:$0xff] %vm19_vm0, %v831_v15  ;;  %v1225_v35 = vsel %vm1097_vm7, %v1033_v5, %v1161_v42  ;;  %v111_v41 = vld [vmem:[%s3057_s3 + $0xd8] sm:$0xff]  ;;  %v834_v46 = vadd.f32 %v2501_v0, %v136_v11 }
 0x10c   :  { %v1196_v36 = vsel %vm1068_vm8, %v1004_v6, %v1132_v22  ;;  %v143_v43 = vld [vmem:[%s3057_s3 + $0x1d8] sm:$0xff]  ;;  %v109_v44 = vld [vmem:[%s3057_s3 + $0xc8] sm:$0xff]  ;;  %1289 = vst.msk [vmem:[%s3057_s3 + $0x180] sm:$0xff] %vm19_vm0, %v1225_v35  ;;  %v1228_v51 = vsel %vm1100_vm9, %v1036_v13, %v1164_v31  ;;  %v114_v48 = vld [vmem:[%s3057_s3 + $0xf0] sm:$0xff]  ;;  %v805_v63 = vadd.f32 %v2509_v8, %v107_v16  ;;  %v837_v0 = vadd.f32 %v2511_v9, %v139_v17  ;;  %v642_v4 = vpop.f32.mrf.mxu0 }
 0x10d   :  { %1260 = vst.msk [vmem:[%s3057_s3 + $0x98] sm:$0xff] %vm19_vm0, %v1196_v36  ;;  %v1194_v52 = vsel %vm1066_vm10, %v1002_v14, %v1130_v32  ;;  %v141_v47 = vld [vmem:[%s3057_s3 + $0x1c8] sm:$0xff]  ;;  %v146_v49 = vld [vmem:[%s3057_s3 + $0x1f0] sm:$0xff]  ;;  %1292 = vst.msk [vmem:[%s3057_s3 + $0x198] sm:$0xff] %vm19_vm0, %v1228_v51  ;;  %v803_v56 = vadd.f32 %v2550_v23, %v105_v18  ;;  %v835_v57 = vadd.f32 %v2552_v24, %v137_v19 }
 0x10e   :  { %1258 = vst.msk [vmem:[%s3057_s3 + $0x88] sm:$0xff] %vm19_vm0, %v1194_v52  ;;  %869 = vst.msk [vmem:[%s3057_s3 + $0xb0] sm:$0xff] %vm19_vm0, %v804_v37  ;;  %v112_v58 = vld [vmem:[%s3057_s3 + $0xe0] sm:$0xff]  ;;  %v115_v60 = vld [vmem:[%s3057_s3 + $0xf8] sm:$0xff]  ;;  %v808_v8 = vadd.f32 %v2558_v29, %v110_v25  ;;  %v840_v9 = vadd.f32 %v2560_v30, %v142_v26  ;;  %v806_v23 = vadd.f32 %v2575_v39, %v108_v27  ;;  %v770_v29 = vpop.f32.mrf.mxu1 }
 0x10f   :  { %901 = vst.msk [vmem:[%s3057_s3 + $0x1b0] sm:$0xff] %vm19_vm0, %v836_v38  ;;  %v144_v59 = vld [vmem:[%s3057_s3 + $0x1e0] sm:$0xff]  ;;  %867 = vst.msk [vmem:[%s3057_s3 + $0xa0] sm:$0xff] %vm19_vm0, %v802_v45  ;;  %v838_v24 = vadd.f32 %v2577_v40, %v140_v28  ;;  %v147_v61 = vld [vmem:[%s3057_s3 + $0x1f8] sm:$0xff]  ;;  %v809_v30 = vadd.f32 %v2606_v54, %v111_v41  ;;  %v841_v39 = vadd.f32 %v2608_v55, %v143_v43 }
 0x110   :  { %899 = vst.msk [vmem:[%s3057_s3 + $0x1a0] sm:$0xff] %vm19_vm0, %v834_v46  ;;  %v113_v3 = vld [vmem:[%s3057_s3 + $0xe8] sm:$0xff]  ;;  %870 = vst.msk [vmem:[%s3057_s3 + $0xb8] sm:$0xff] %vm19_vm0, %v805_v63  ;;  %v807_v40 = vadd.f32 %v2613_v1, %v109_v44  ;;  %v839_v6 = vadd.f32 %v2615_v2, %v141_v47  ;;  %v812_v54 = vadd.f32 %v2660_v20, %v114_v48 }
 0x111   :  { %v145_v5 = vld [vmem:[%s3057_s3 + $0x1e8] sm:$0xff]  ;;  %902 = vst.msk [vmem:[%s3057_s3 + $0x1b8] sm:$0xff] %vm19_vm0, %v837_v0  ;;  %868 = vst.msk [vmem:[%s3057_s3 + $0xa8] sm:$0xff] %vm19_vm0, %v803_v56  ;;  %v844_v55 = vadd.f32 %v2662_v21, %v146_v49  ;;  %v810_v1 = vadd.f32 %v639_v33, %v112_v58  ;;  %v842_v2 = vadd.f32 %v767_v34, %v144_v59  ;;  %v2923_v58 = vld [vmem:[%s3059_s2] ss:$0 sm:$0xff] }
 0x112   :  { %900 = vst.msk [vmem:[%s3057_s3 + $0x1a8] sm:$0xff] %vm19_vm0, %v835_v57  ;;  %873 = vst.msk [vmem:[%s3057_s3 + $0xd0] sm:$0xff] %vm19_vm0, %v808_v8  ;;  %v963_v7 = vld [vmem:[%s3057_s3 + $0x188] sm:$0xff]  ;;  %v813_v10 = vadd.f32 %v1449_v50, %v115_v60  ;;  %v845_v11 = vadd.f32 %v1481_v53, %v147_v61  ;;  %v811_v12 = vadd.f32 %v642_v4, %v113_v3 }
 0x113   :  { %905 = vst.msk [vmem:[%s3057_s3 + $0x1d0] sm:$0xff] %vm19_vm0, %v840_v9  ;;  %871 = vst.msk [vmem:[%s3057_s3 + $0xc0] sm:$0xff] %vm19_vm0, %v806_v23  ;;  %v843_v13 = vadd.f32 %v770_v29, %v145_v5  ;;  %v1034_v14 = vadd.f32 %v2066_v62, %v963_v7 }
 0x114   :  { %903 = vst.msk [vmem:[%s3057_s3 + $0x1c0] sm:$0xff] %vm19_vm0, %v838_v24  ;;  %874 = vst.msk [vmem:[%s3057_s3 + $0xd8] sm:$0xff] %vm19_vm0, %v809_v30 }
 0x115   :  { %906 = vst.msk [vmem:[%s3057_s3 + $0x1d8] sm:$0xff] %vm19_vm0, %v841_v39  ;;  %872 = vst.msk [vmem:[%s3057_s3 + $0xc8] sm:$0xff] %vm19_vm0, %v807_v40  ;;  %vm1098_vm11 = vcmp.ge.f32.partialorder %v1034_v14, 0.0  ;;  %v1162_v15 = vmul.f32 0.2, %v1034_v14  ;;  %v936_v16 = vld [vmem:[%s3057_s3 + $0xb0] sm:$0xff] }
 0x116   :  { %904 = vst.msk [vmem:[%s3057_s3 + $0x1c8] sm:$0xff] %vm19_vm0, %v839_v6  ;;  %877 = vst.msk [vmem:[%s3057_s3 + $0xf0] sm:$0xff] %vm19_vm0, %v812_v54  ;;  %v968_v17 = vld [vmem:[%s3057_s3 + $0x1b0] sm:$0xff]  ;;  %v1007_v18 = vadd.f32 %v2066_v62, %v936_v16  ;;  %v934_v20 = vld [vmem:[%s3057_s3 + $0xa0] sm:$0xff] }
 0x117   :  { %909 = vst.msk [vmem:[%s3057_s3 + $0x1f0] sm:$0xff] %vm19_vm0, %v844_v55  ;;  %875 = vst.msk [vmem:[%s3057_s3 + $0xe0] sm:$0xff] %vm19_vm0, %v810_v1  ;;  %v1039_v19 = vadd.f32 %v2066_v62, %v968_v17  ;;  %v966_v21 = vld [vmem:[%s3057_s3 + $0x1a0] sm:$0xff]  ;;  %v1226_v42 = vsel %vm1098_vm11, %v1034_v14, %v1162_v15  ;;  %v1005_v22 = vadd.f32 %v2066_v62, %v934_v20  ;;  %v937_v26 = vld [vmem:[%s3057_s3 + $0xb8] sm:$0xff] }
 0x118   :  { %907 = vst.msk [vmem:[%s3057_s3 + $0x1e0] sm:$0xff] %vm19_vm0, %v842_v2  ;;  %878 = vst.msk [vmem:[%s3057_s3 + $0xf8] sm:$0xff] %vm19_vm0, %v813_v10  ;;  %v1037_v25 = vadd.f32 %v2066_v62, %v966_v21  ;;  %v969_v27 = vld [vmem:[%s3057_s3 + $0x1b8] sm:$0xff]  ;;  %v935_v28 = vld [vmem:[%s3057_s3 + $0xa8] sm:$0xff]  ;;  %vm1071_vm12 = vcmp.ge.f32.partialorder %v1007_v18, 0.0  ;;  %v1008_v37 = vadd.f32 %v2066_v62, %v937_v26 }
 0x119   :  { %910 = vst.msk [vmem:[%s3057_s3 + $0x1f8] sm:$0xff] %vm19_vm0, %v845_v11  ;;  %876 = vst.msk [vmem:[%s3057_s3 + $0xe8] sm:$0xff] %vm19_vm0, %v811_v12  ;;  %v1135_v31 = vmul.f32 0.2, %v1007_v18  ;;  %vm1103_vm13 = vcmp.ge.f32.partialorder %v1039_v19, 0.0  ;;  %vm1069_vm14 = vcmp.ge.f32.partialorder %v1005_v22, 0.0  ;;  %v1040_v38 = vadd.f32 %v2066_v62, %v969_v27 }
 0x11a   :  { %908 = vst.msk [vmem:[%s3057_s3 + $0x1e8] sm:$0xff] %vm19_vm0, %v843_v13  ;;  %1290 = vst.msk [vmem:[%s3057_s3 + $0x188] sm:$0xff] %vm19_vm0, %v1226_v42  ;;  %v1167_v32 = vmul.f32 0.2, %v1039_v19  ;;  %v1133_v33 = vmul.f32 0.2, %v1005_v22  ;;  %v1006_v52 = vadd.f32 %v2066_v62, %v935_v28 }
 0x11b   :  { %vm1101_vm15 = vcmp.ge.f32.partialorder %v1037_v25, 0.0  ;;  %v1165_v34 = vmul.f32 0.2, %v1037_v25  ;;  %v1199_v35 = vsel %vm1071_vm12, %v1007_v18, %v1135_v31  ;;  %v967_v41 = vld [vmem:[%s3057_s3 + $0x1a8] sm:$0xff]  ;;  %v940_v43 = vld [vmem:[%s3057_s3 + $0xd0] sm:$0xff]  ;;  %v938_v47 = vld [vmem:[%s3057_s3 + $0xc0] sm:$0xff] }
 0x11c   :  { %v1231_v36 = vsel %vm1103_vm13, %v1039_v19, %v1167_v32  ;;  %1263 = vst.msk [vmem:[%s3057_s3 + $0xb0] sm:$0xff] %vm19_vm0, %v1199_v35  ;;  %v1197_v44 = vsel %vm1069_vm14, %v1005_v22, %v1133_v33  ;;  %v1038_v45 = vadd.f32 %v2066_v62, %v967_v41  ;;  %v972_v46 = vld [vmem:[%s3057_s3 + $0x1d0] sm:$0xff]  ;;  %v970_v48 = vld [vmem:[%s3057_s3 + $0x1c0] sm:$0xff]  ;;  %vm1072_vm1 = vcmp.ge.f32.partialorder %v1008_v37, 0.0  ;;  %v941_v60 = vld [vmem:[%s3057_s3 + $0xd8] sm:$0xff] }
 0x11d   :  { %1295 = vst.msk [vmem:[%s3057_s3 + $0x1b0] sm:$0xff] %vm19_vm0, %v1231_v36  ;;  %v1229_v51 = vsel %vm1101_vm15, %v1037_v25, %v1165_v34  ;;  %1261 = vst.msk [vmem:[%s3057_s3 + $0xa0] sm:$0xff] %vm19_vm0, %v1197_v44  ;;  %v1136_v49 = vmul.f32 0.2, %v1008_v37  ;;  %vm1104_vm2 = vcmp.ge.f32.partialorder %v1040_v38, 0.0  ;;  %vm1070_vm3 = vcmp.ge.f32.partialorder %v1006_v52, 0.0 }
 0x11e   :  { %1293 = vst.msk [vmem:[%s3057_s3 + $0x1a0] sm:$0xff] %vm19_vm0, %v1229_v51  ;;  %v1168_v50 = vmul.f32 0.2, %v1040_v38  ;;  %v1134_v53 = vmul.f32 0.2, %v1006_v52  ;;  %vm1102_vm4 = vcmp.ge.f32.partialorder %v1038_v45, 0.0  ;;  %v1011_v57 = vadd.f32 %v2066_v62, %v940_v43 }
 0x11f   :  { %v1166_v63 = vmul.f32 0.2, %v1038_v45  ;;  %v1200_v0 = vsel %vm1072_vm1, %v1008_v37, %v1136_v49  ;;  %v1043_v59 = vadd.f32 %v2923_v58, %v972_v46  ;;  %v1009_v9 = vadd.f32 %v2923_v58, %v938_v47  ;;  %v973_v24 = vld [vmem:[%s3057_s3 + $0x1d8] sm:$0xff]  ;;  %v939_v61 = vld [vmem:[%s3057_s3 + $0xc8] sm:$0xff]  ;;  %v944_v55 = vld [vmem:[%s3057_s3 + $0xf0] sm:$0xff] }
 0x120   :  { %v1232_v56 = vsel %vm1104_vm2, %v1040_v38, %v1168_v50  ;;  %1264 = vst.msk [vmem:[%s3057_s3 + $0xb8] sm:$0xff] %vm19_vm0, %v1200_v0  ;;  %v1198_v62 = vsel %vm1070_vm3, %v1006_v52, %v1134_v53  ;;  %v1041_v23 = vadd.f32 %v2923_v58, %v970_v48  ;;  %v971_v3 = vld [vmem:[%s3057_s3 + $0x1c8] sm:$0xff]  ;;  %vm1075_vm5 = vcmp.ge.f32.partialorder %v1011_v57, 0.0  ;;  %v976_v11 = vld [vmem:[%s3057_s3 + $0x1f0] sm:$0xff]  ;;  %v942_v12 = vld [vmem:[%s3057_s3 + $0xe0] sm:$0xff] }
 0x121   :  { %1296 = vst.msk [vmem:[%s3057_s3 + $0x1b8] sm:$0xff] %vm19_vm0, %v1232_v56  ;;  %v1230_v8 = vsel %vm1102_vm4, %v1038_v45, %v1166_v63  ;;  %1262 = vst.msk [vmem:[%s3057_s3 + $0xa8] sm:$0xff] %vm19_vm0, %v1198_v62  ;;  %v1139_v4 = vmul.f32 0.2, %v1011_v57  ;;  %vm1107_vm6 = vcmp.ge.f32.partialorder %v1043_v59, 0.0  ;;  %vm1073_vm7 = vcmp.ge.f32.partialorder %v1009_v9, 0.0 }
 0x122   :  { %1294 = vst.msk [vmem:[%s3057_s3 + $0x1a8] sm:$0xff] %vm19_vm0, %v1230_v8  ;;  %v1171_v5 = vmul.f32 0.2, %v1043_v59  ;;  %v1137_v29 = vmul.f32 0.2, %v1009_v9  ;;  %vm1105_vm8 = vcmp.ge.f32.partialorder %v1041_v23, 0.0  ;;  %v1012_v6 = vadd.f32 %v2923_v58, %v941_v60 }
 0x123   :  { %v1169_v30 = vmul.f32 0.2, %v1041_v23  ;;  %v1203_v39 = vsel %vm1075_vm5, %v1011_v57, %v1139_v4  ;;  %v1044_v54 = vadd.f32 %v2923_v58, %v973_v24  ;;  %v1010_v7 = vadd.f32 %v2923_v58, %v939_v61  ;;  %v974_v13 = vld [vmem:[%s3057_s3 + $0x1e0] sm:$0xff]  ;;  %v945_v42 = vld [vmem:[%s3057_s3 + $0xf8] sm:$0xff]  ;;  %v943_v31 = vld [vmem:[%s3057_s3 + $0xe8] sm:$0xff] }
 0x124   :  { %v1235_v40 = vsel %vm1107_vm6, %v1043_v59, %v1171_v5  ;;  %1267 = vst.msk [vmem:[%s3057_s3 + $0xd0] sm:$0xff] %vm19_vm0, %v1203_v39  ;;  %v1201_v1 = vsel %vm1073_vm7, %v1009_v9, %v1137_v29  ;;  %v1042_v10 = vadd.f32 %v2923_v58, %v971_v3  ;;  %vm1076_vm9 = vcmp.ge.f32.partialorder %v1012_v6, 0.0  ;;  %v977_v28 = vld [vmem:[%s3057_s3 + $0x1f8] sm:$0xff]  ;;  %v975_v32 = vld [vmem:[%s3057_s3 + $0x1e8] sm:$0xff] }
 0x125   :  { %1299 = vst.msk [vmem:[%s3057_s3 + $0x1d0] sm:$0xff] %vm19_vm0, %v1235_v40  ;;  %v1233_v2 = vsel %vm1105_vm8, %v1041_v23, %v1169_v30  ;;  %1265 = vst.msk [vmem:[%s3057_s3 + $0xc0] sm:$0xff] %vm19_vm0, %v1201_v1  ;;  %v1140_v14 = vmul.f32 0.2, %v1012_v6  ;;  %vm1108_vm10 = vcmp.ge.f32.partialorder %v1044_v54, 0.0  ;;  %vm1074_vm11 = vcmp.ge.f32.partialorder %v1010_v7, 0.0 }
 0x126   :  { %1297 = vst.msk [vmem:[%s3057_s3 + $0x1c0] sm:$0xff] %vm19_vm0, %v1233_v2  ;;  %v1172_v15 = vmul.f32 0.2, %v1044_v54  ;;  %v1138_v16 = vmul.f32 0.2, %v1010_v7  ;;  %vm1106_vm12 = vcmp.ge.f32.partialorder %v1042_v10, 0.0  ;;  %v1015_v20 = vadd.f32 %v2923_v58, %v944_v55 }
 0x127   :  { %v1170_v17 = vmul.f32 0.2, %v1042_v10  ;;  %v1204_v18 = vsel %vm1076_vm9, %v1012_v6, %v1140_v14  ;;  %v1047_v21 = vadd.f32 %v2923_v58, %v976_v11  ;;  %v1013_v26 = vadd.f32 %v2923_v58, %v942_v12 }
 0x128   :  { %v1236_v19 = vsel %vm1108_vm10, %v1044_v54, %v1172_v15  ;;  %1268 = vst.msk [vmem:[%s3057_s3 + $0xd8] sm:$0xff] %vm19_vm0, %v1204_v18  ;;  %v1202_v22 = vsel %vm1074_vm11, %v1010_v7, %v1138_v16  ;;  %v1045_v27 = vadd.f32 %v2923_v58, %v974_v13  ;;  %vm1079_vm13 = vcmp.ge.f32.partialorder %v1015_v20, 0.0 }
 0x129   :  { %1300 = vst.msk [vmem:[%s3057_s3 + $0x1d8] sm:$0xff] %vm19_vm0, %v1236_v19  ;;  %v1234_v25 = vsel %vm1106_vm12, %v1042_v10, %v1170_v17  ;;  %1266 = vst.msk [vmem:[%s3057_s3 + $0xc8] sm:$0xff] %vm19_vm0, %v1202_v22  ;;  %v1143_v33 = vmul.f32 0.2, %v1015_v20  ;;  %vm1111_vm14 = vcmp.ge.f32.partialorder %v1047_v21, 0.0  ;;  %vm1077_vm15 = vcmp.ge.f32.partialorder %v1013_v26, 0.0 }
 0x12a   :  { %1298 = vst.msk [vmem:[%s3057_s3 + $0x1c8] sm:$0xff] %vm19_vm0, %v1234_v25  ;;  %v1175_v34 = vmul.f32 0.2, %v1047_v21  ;;  %v1141_v35 = vmul.f32 0.2, %v1013_v26  ;;  %vm1109_vm1 = vcmp.ge.f32.partialorder %v1045_v27, 0.0  ;;  %v1016_v41 = vadd.f32 %v2923_v58, %v945_v42 }
 0x12b   :  { %v1173_v36 = vmul.f32 0.2, %v1045_v27  ;;  %v1207_v37 = vsel %vm1079_vm13, %v1015_v20, %v1143_v33  ;;  %v1048_v43 = vadd.f32 %v2923_v58, %v977_v28  ;;  %v1014_v52 = vadd.f32 %v2923_v58, %v943_v31 }
 0x12c   :  { %v1239_v38 = vsel %vm1111_vm14, %v1047_v21, %v1175_v34  ;;  %1271 = vst.msk [vmem:[%s3057_s3 + $0xf0] sm:$0xff] %vm19_vm0, %v1207_v37  ;;  %v1205_v44 = vsel %vm1077_vm15, %v1013_v26, %v1141_v35  ;;  %v1046_v45 = vadd.f32 %v2923_v58, %v975_v32  ;;  %vm1080_vm2 = vcmp.ge.f32.partialorder %v1016_v41, 0.0 }
 0x12d   :  { %1303 = vst.msk [vmem:[%s3057_s3 + $0x1f0] sm:$0xff] %vm19_vm0, %v1239_v38  ;;  %v1237_v51 = vsel %vm1109_vm1, %v1045_v27, %v1173_v36  ;;  %1269 = vst.msk [vmem:[%s3057_s3 + $0xe0] sm:$0xff] %vm19_vm0, %v1205_v44  ;;  %v1144_v46 = vmul.f32 0.2, %v1016_v41  ;;  %vm1112_vm3 = vcmp.ge.f32.partialorder %v1048_v43, 0.0  ;;  %vm1078_vm4 = vcmp.ge.f32.partialorder %v1014_v52, 0.0 }
 0x12e   :  { %1301 = vst.msk [vmem:[%s3057_s3 + $0x1e0] sm:$0xff] %vm19_vm0, %v1237_v51  ;;  %v1176_v47 = vmul.f32 0.2, %v1048_v43  ;;  %v1142_v48 = vmul.f32 0.2, %v1014_v52  ;;  %vm1110_vm5 = vcmp.ge.f32.partialorder %v1046_v45, 0.0 }
 0x12f   :  { %v1174_v49 = vmul.f32 0.2, %v1046_v45  ;;  %v1208_v50 = vsel %vm1080_vm2, %v1016_v41, %v1144_v46 }
 0x130   :  { %v1240_v53 = vsel %vm1112_vm3, %v1048_v43, %v1176_v47  ;;  %1272 = vst.msk [vmem:[%s3057_s3 + $0xf8] sm:$0xff] %vm19_vm0, %v1208_v50  ;;  %v1206_v63 = vsel %vm1078_vm4, %v1014_v52, %v1142_v48 }
 0x131   :  { %1304 = vst.msk [vmem:[%s3057_s3 + $0x1f8] sm:$0xff] %vm19_vm0, %v1240_v53  ;;  %v1238_v0 = vsel %vm1110_vm5, %v1046_v45, %v1174_v49  ;;  %1270 = vst.msk [vmem:[%s3057_s3 + $0xe8] sm:$0xff] %vm19_vm0, %v1206_v63 }
 0x132   :  { %1302 = vst.msk [vmem:[%s3057_s3 + $0x1e8] sm:$0xff] %vm19_vm0, %v1238_v0 }

// kernel: _lambda_.18
= control target key start
LH: loop header
LB: loop body
LE: loop exit
PB: predicated region body
PF: predicated region fallthrough
CT: control target
= control target key end

     0   :  { %s919_s12 = smov 0   ;;  %s921_s13 = smov 0   ;;  %s1152_s0 = inlined_call_operand.vmem [shape: bf16[128,256], index: 0, kind: input, shape index: {}]   ;;  %s1153_s1 = inlined_call_operand.vmem [shape: bf16[256,32], index: 1, kind: input, shape index: {}]   ;;  %s1154_s2 = inlined_call_operand.vmem [shape: f32[1,32], index: 2, kind: input, shape index: {}]   ;;  %s1155_s3 = inlined_call_operand.vmem [shape: f32[128,32], index: 3, kind: output, shape index: {}]  }
   0x1   :  { %s923_s14 = smov 0  }
   0x2 LB: > { %s25_s15 = sadd.s32 1, %s892_s13  ;;  %p729_p0 = scmp.ge.s32.totalorder %s896_s14, 1  ;;  %s896_s14 = sphi %s923_s14, %s13_s14   ;;  %s892_s13 = sphi %s921_s13, %s1157_s13   ;;  %s888_s12 = sphi %s919_s12, %s1156_s12  }
   0x3   : > { %p27_p1 = scmp.ge.s32.totalorder %s25_s15, 2  ;;  %p169_p2 = scmp.lt.s32.totalorder %s896_s14, 3 }
   0x5   : > { %s1159_s15 = smov (%p27_p1, %s25_s15), 0  ;;  %p170_p3 = pnand %p729_p0, %p169_p2 }
   0x6   : > { %s730_s18 = sshll.u32 (!%p170_p3), %s888_s12, 3 }
   0x7   : > { %173 = sbr.rel (%p170_p3) target bundleno = 325 (0x145), region = 32  ;;  %p205_p4 = scmp.lt.s32.totalorder (!%p170_p3), %s730_s18, 15 }
   0xc   : > { %v844_v0 = vld [vmem:[%s1153_s1 + $0x78] sm:$0xff]   ;;  %v846_v2 = vld [vmem:[%s1153_s1 + $0x70] sm:$0xff]   ;;  %v848_v4 = vld [vmem:[%s1153_s1 + $0x68] sm:$0xff]   ;;  %s1161_s18 = smov (!%p205_p4, %s730_s18), 15  ;;  %vm232_vm0 = vcmask 261120   ;;  %v898_v24 = vmov 0.0  }
   0xd   : > { %v845_v1 = vld [vmem:[%s1153_s1 + $0x38] sm:$0xff]   ;;  %763 = vmatprep.subr.bf16.mxu0 %v844_v0  ;;  %803 = vmatprep.subr.bf16.mxu1 %v844_v0  ;;  %v847_v3 = vld [vmem:[%s1153_s1 + $0x30] sm:$0xff]   ;;  %v849_v5 = vld [vmem:[%s1153_s1 + $0x28] sm:$0xff]   ;;  %s762_s6 = sshll.u32 %s1161_s18, 3 }
   0xe   : > { %764 = vmatpush3.bf16.msra.mxu0 %v845_v1  ;;  %811 = vmatpush3.bf16.msra.mxu1 %v845_v1  ;;  %v850_v6 = vld [vmem:[%s1153_s1 + $0x60] sm:$0xff]   ;;  %v852_v8 = vld [vmem:[%s1153_s1 + $0x58] sm:$0xff]   ;;  %s972_s11 = scalar_lea.vmem %s1152_s0, %s762_s6  ;;  %v854_v10 = vld [vmem:[%s1153_s1 + $0x50] sm:$0xff]   ;;  %s1008_s5 = scalar_lea.vmem %s1155_s3, %s762_s6 }
   0xf   : > { %765 = vmatprep.subr.bf16.mxu0 %v846_v2  ;;  %804 = vmatprep.subr.bf16.mxu1 %v846_v2  ;;  %v851_v7 = vld [vmem:[%s1153_s1 + $0x20] sm:$0xff]   ;;  %v853_v9 = vld [vmem:[%s1153_s1 + $0x18] sm:$0xff]   ;;  %v855_v13 = vld [vmem:[%s1153_s1 + $0x10] sm:$0xff]   ;;  %233 = vst.msk [vmem:[%s1008_s5] sm:$0xff] %vm232_vm0, %v898_v24 }
  0x10   : > { %v862_v11 = vld [vmem:[%s972_s11 + $0x4] ss:$8 sps:$4 sm:$0xff]   ;;  %v860_v18 = vld [vmem:[%s972_s11] ss:$8 sps:$4 sm:$0xff]   ;;  %v866_v20 = vld [vmem:[%s972_s11 + $0x14] ss:$8 sps:$4 sm:$0xff]  }
  0x11   : > { %v865_v12 = vld [vmem:[%s972_s11 + $0x24] ss:$8 sps:$4 sm:$0xff]   ;;  %457 = vmatprep.mubr.bf16.mxu0 %v862_v11  ;;  %v863_v19 = vld [vmem:[%s972_s11 + $0x20] ss:$8 sps:$4 sm:$0xff]   ;;  %v869_v21 = vld [vmem:[%s972_s11 + $0x34] ss:$8 sps:$4 sm:$0xff]  }
  0x12   : > { %766 = vmatpush3.bf16.msra.mxu0 %v847_v3  ;;  %812 = vmatpush3.bf16.msra.mxu1 %v847_v3  ;;  %v856_v14 = vld [vmem:[%s1153_s1 + $0x48] sm:$0xff]   ;;  %v858_v16 = vld [vmem:[%s1153_s1 + $0x40] sm:$0xff]   ;;  %v868_v22 = vld [vmem:[%s972_s11 + $0x10] ss:$8 sps:$4 sm:$0xff]   ;;  %234 = vst.msk [vmem:[%s1008_s5 + $0x8] sm:$0xff] %vm232_vm0, %v898_v24 }
  0x13   : > { %767 = vmatprep.subr.bf16.mxu0 %v848_v4  ;;  %805 = vmatprep.subr.bf16.mxu1 %v848_v4  ;;  %v857_v15 = vld [vmem:[%s1153_s1 + $0x8] sm:$0xff]   ;;  %v859_v17 = vld [vmem:[%s1153_s1] sm:$0xff]   ;;  %v871_v23 = vld [vmem:[%s972_s11 + $0x30] ss:$8 sps:$4 sm:$0xff]   ;;  %235 = vst.msk [vmem:[%s1008_s5 + $0x10] sm:$0xff] %vm232_vm0, %v898_v24 }
  0x14   : > { %473 = vmatprep.mubr.bf16.mxu1 %v865_v12  ;;  %236 = vst.msk [vmem:[%s1008_s5 + $0x18] sm:$0xff] %vm232_vm0, %v898_v24  ;;  %237 = vst.msk [vmem:[%s1008_s5 + $0x20] sm:$0xff] %vm232_vm0, %v898_v24  ;;  %v759_v0 = vld [vmem:[%s1154_s2] ss:$0 sm:$0xff] }
  0x15   : > { %238 = vst.msk [vmem:[%s1008_s5 + $0x28] sm:$0xff] %vm232_vm0, %v898_v24  ;;  %239 = vst.msk [vmem:[%s1008_s5 + $0x30] sm:$0xff] %vm232_vm0, %v898_v24 }
  0x16   : > { %768 = vmatpush3.bf16.msra.mxu0 %v849_v5  ;;  %813 = vmatpush3.bf16.msra.mxu1 %v849_v5  ;;  %240 = vst.msk [vmem:[%s1008_s5 + $0x38] sm:$0xff] %vm232_vm0, %v898_v24  ;;  %v241_v27 = vld [vmem:[%s1008_s5] sm:$0xff] }
  0x17   : > { %769 = vmatprep.subr.bf16.mxu0 %v850_v6  ;;  %806 = vmatprep.subr.bf16.mxu1 %v850_v6 }
  0x19   : > { %v242_v37 = vld [vmem:[%s1008_s5 + $0x8] sm:$0xff] }
  0x1a   : > { %770 = vmatpush3.bf16.msra.mxu0 %v851_v7  ;;  %814 = vmatpush3.bf16.msra.mxu1 %v851_v7  ;;  %v243_v47 = vld [vmem:[%s1008_s5 + $0x10] sm:$0xff] }
  0x1b   : > { %771 = vmatprep.subr.bf16.mxu0 %v852_v8  ;;  %807 = vmatprep.subr.bf16.mxu1 %v852_v8  ;;  %v245_v29 = vld [vmem:[%s1008_s5 + $0x20] sm:$0xff]  ;;  %v244_v57 = vld [vmem:[%s1008_s5 + $0x18] sm:$0xff] }
  0x1c   : > { %v246_v39 = vld [vmem:[%s1008_s5 + $0x28] sm:$0xff]  ;;  %v247_v49 = vld [vmem:[%s1008_s5 + $0x30] sm:$0xff] }
  0x1d   : > { %v248_v59 = vld [vmem:[%s1008_s5 + $0x38] sm:$0xff] }
  0x1e   : > { %772 = vmatpush3.bf16.msra.mxu0 %v853_v9  ;;  %815 = vmatpush3.bf16.msra.mxu1 %v853_v9 }
  0x1f   : > { %773 = vmatprep.subr.bf16.mxu0 %v854_v10  ;;  %808 = vmatprep.subr.bf16.mxu1 %v854_v10 }
  0x22   : > { %774 = vmatpush3.bf16.msra.mxu0 %v855_v13  ;;  %816 = vmatpush3.bf16.msra.mxu1 %v855_v13 }
  0x23   : > { %775 = vmatprep.subr.bf16.mxu0 %v856_v14  ;;  %809 = vmatprep.subr.bf16.mxu1 %v856_v14 }
  0x26   : > { %776 = vmatpush3.bf16.msra.mxu0 %v857_v15  ;;  %817 = vmatpush3.bf16.msra.mxu1 %v857_v15 }
  0x27   : > { %777 = vmatprep.subr.bf16.mxu0 %v858_v16  ;;  %810 = vmatprep.subr.bf16.mxu1 %v858_v16 }
  0x2a   : > { %778 = vmatpush3.bf16.msra.mxu0 %v859_v17  ;;  %818 = vmatpush3.bf16.msra.mxu1 %v859_v17 }
  0x2d   : > { %458 = vmatmul.mubr.bf16.vlgmr.msra.gmra.mxu0 %v860_v18  ;;  %474 = vmatmul.mubr.bf16.vlgmr.msra.gmra.mxu1 %v863_v19 }
  0x2e   : > { %465 = vmatprep.mubr.bf16.mxu0 %v866_v20  ;;  %481 = vmatprep.mubr.bf16.mxu1 %v869_v21 }
  0x35   : > { %466 = vmatmul.mubr.bf16.gmra.mxu0 %v868_v22  ;;  %482 = vmatmul.mubr.bf16.gmra.mxu1 %v871_v23 }
  0xed   : > { %v779_v25 = vpop.f32.mrf.mxu0  ;;  %v791_v26 = vpop.f32.mrf.mxu1 }
  0xef   : > { %v780_v28 = vpop.f32.mrf.mxu0  ;;  %v792_v30 = vpop.f32.mrf.mxu1 }
  0xf0   : > { %v781_v31 = vadd.f32 %v780_v28, %v779_v25  ;;  %v793_v32 = vadd.f32 %v792_v30, %v791_v26 }
  0xf1   : > { %v782_v33 = vpop.f32.mrf.mxu0  ;;  %v794_v34 = vpop.f32.mrf.mxu1 }
  0xf2   : > { %v490_v35 = vadd.f32 %v781_v31, %v241_v27  ;;  %v494_v36 = vadd.f32 %v793_v32, %v245_v29 }
  0xf3   : > { %v783_v38 = vpop.f32.mrf.mxu0  ;;  %v795_v40 = vpop.f32.mrf.mxu1 }
  0xf4   : > { %499 = vst.msk [vmem:[%s1008_s5] sm:$0xff] %vm232_vm0, %v490_v35  ;;  %503 = vst.msk [vmem:[%s1008_s5 + $0x20] sm:$0xff] %vm232_vm0, %v494_v36  ;;  %v784_v41 = vadd.f32 %v783_v38, %v782_v33  ;;  %v796_v42 = vadd.f32 %v795_v40, %v794_v34 }
  0xf5   : > { %v785_v43 = vpop.f32.mrf.mxu0  ;;  %v797_v44 = vpop.f32.mrf.mxu1 }
  0xf6   : > { %v491_v45 = vadd.f32 %v784_v41, %v242_v37  ;;  %v495_v46 = vadd.f32 %v796_v42, %v246_v39 }
  0xf7   : > { %v786_v48 = vpop.f32.mrf.mxu0  ;;  %v798_v50 = vpop.f32.mrf.mxu1 }
  0xf8   : > { %500 = vst.msk [vmem:[%s1008_s5 + $0x8] sm:$0xff] %vm232_vm0, %v491_v45  ;;  %504 = vst.msk [vmem:[%s1008_s5 + $0x28] sm:$0xff] %vm232_vm0, %v495_v46  ;;  %v787_v51 = vadd.f32 %v786_v48, %v785_v43  ;;  %v799_v52 = vadd.f32 %v798_v50, %v797_v44 }
  0xf9   : > { %v788_v53 = vpop.f32.mrf.mxu0  ;;  %v800_v54 = vpop.f32.mrf.mxu1 }
  0xfa   : > { %v492_v55 = vadd.f32 %v787_v51, %v243_v47  ;;  %v496_v56 = vadd.f32 %v799_v52, %v247_v49 }
  0xfb   : > { %v789_v58 = vpop.f32.mrf.mxu0  ;;  %v801_v60 = vpop.f32.mrf.mxu1  ;;  %v510_v63 = vld [vmem:[%s1008_s5] sm:$0xff] }
  0xfc   : > { %501 = vst.msk [vmem:[%s1008_s5 + $0x10] sm:$0xff] %vm232_vm0, %v492_v55  ;;  %505 = vst.msk [vmem:[%s1008_s5 + $0x30] sm:$0xff] %vm232_vm0, %v496_v56  ;;  %v790_v61 = vadd.f32 %v789_v58, %v788_v53  ;;  %v802_v62 = vadd.f32 %v801_v60, %v800_v54  ;;  %v1055_v4 = vadd.f32 %v759_v0, %v510_v63  ;;  %v514_v6 = vld [vmem:[%s1008_s5 + $0x20] sm:$0xff] }
  0xfd   : > { %v1070_v13 = vadd.f32 %v759_v0, %v514_v6 }
  0xfe   : > { %v493_v1 = vadd.f32 %v790_v61, %v244_v57  ;;  %v497_v2 = vadd.f32 %v802_v62, %v248_v59  ;;  %v555_v11 = vmul.f32 %v1055_v4, %v1055_v4  ;;  %v533_v14 = vsel %vm232_vm0, %v1055_v4, 0.0 }
  0xff   : > { %v511_v3 = vld [vmem:[%s1008_s5 + $0x8] sm:$0xff]  ;;  %v559_v31 = vmul.f32 %v1070_v13, %v1070_v13  ;;  %v540_v35 = vsel %vm232_vm0, %v1070_v13, 0.0 }
 0x100   : > { %502 = vst.msk [vmem:[%s1008_s5 + $0x18] sm:$0xff] %vm232_vm0, %v493_v1  ;;  %506 = vst.msk [vmem:[%s1008_s5 + $0x38] sm:$0xff] %vm232_vm0, %v497_v2  ;;  %v1057_v5 = vadd.f32 %v759_v0, %v511_v3  ;;  %v515_v12 = vld [vmem:[%s1008_s5 + $0x28] sm:$0xff]  ;;  %v563_v23 = vsel %vm232_vm0, %v555_v11, 0.0 }
 0x101   : > { %v1083_v22 = vadd.f32 %v759_v0, %v515_v12  ;;  %v570_v42 = vsel %vm232_vm0, %v559_v31, 0.0 }
 0x102   : > { %v556_v7 = vmul.f32 %v1057_v5, %v1057_v5  ;;  %v534_v10 = vsel %vm232_vm0, %v1057_v5, 0.0 }
 0x103   : > { %v512_v8 = vld [vmem:[%s1008_s5 + $0x10] sm:$0xff]  ;;  %v535_v20 = vadd.f32 %v534_v10, %v533_v14  ;;  %v560_v36 = vmul.f32 %v1083_v22, %v1083_v22  ;;  %v542_v40 = vsel %vm232_vm0, %v1083_v22, 0.0 }
 0x104   : > { %v1063_v9 = vadd.f32 %v759_v0, %v512_v8  ;;  %v564_v17 = vsel %vm232_vm0, %v556_v7, 0.0  ;;  %v516_v19 = vld [vmem:[%s1008_s5 + $0x30] sm:$0xff] }
 0x105   : > { %v565_v27 = vadd.f32 %v564_v17, %v563_v23  ;;  %v1088_v28 = vadd.f32 %v759_v0, %v516_v19  ;;  %v572_v47 = vsel %vm232_vm0, %v560_v36, 0.0 }
 0x106   : > { %v536_v15 = vsel %vm232_vm0, %v1063_v9, 0.0  ;;  %v557_v16 = vmul.f32 %v1063_v9, %v1063_v9 }
 0x107   : > { %v513_v18 = vld [vmem:[%s1008_s5 + $0x18] sm:$0xff]  ;;  %v537_v26 = vadd.f32 %v536_v15, %v535_v20  ;;  %v561_v41 = vmul.f32 %v1088_v28, %v1088_v28  ;;  %v544_v45 = vsel %vm232_vm0, %v1088_v28, 0.0 }
 0x108   : > { %v1081_v21 = vadd.f32 %v759_v0, %v513_v18  ;;  %v566_v24 = vsel %vm232_vm0, %v557_v16, 0.0  ;;  %v517_v25 = vld [vmem:[%s1008_s5 + $0x38] sm:$0xff] }
 0x109   : > { %v567_v33 = vadd.f32 %v566_v24, %v565_v27  ;;  %v532_v34 = vadd.f32 %v759_v0, %v517_v25  ;;  %v574_v51 = vsel %vm232_vm0, %v561_v41, 0.0 }
 0x10a   : > { %v538_v29 = vsel %vm232_vm0, %v1081_v21, 0.0  ;;  %v558_v30 = vmul.f32 %v1081_v21, %v1081_v21 }
 0x10b   : > { %v539_v32 = vadd.f32 %v538_v29, %v537_v26  ;;  %v562_v46 = vmul.f32 %v532_v34, %v532_v34  ;;  %v546_v50 = vsel %vm232_vm0, %v532_v34, 0.0 }
 0x10c   : > { %v568_v37 = vsel %vm232_vm0, %v558_v30, 0.0 }
 0x10d   : > { %v541_v38 = vadd.f32 %v540_v35, %v539_v32  ;;  %v569_v39 = vadd.f32 %v568_v37, %v567_v33  ;;  %v576_v54 = vsel %vm232_vm0, %v562_v46, 0.0 }
 0x10f   : > { %v543_v43 = vadd.f32 %v542_v40, %v541_v38  ;;  %v571_v44 = vadd.f32 %v570_v42, %v569_v39 }
 0x111   : > { %v545_v48 = vadd.f32 %v544_v45, %v543_v43  ;;  %v573_v49 = vadd.f32 %v572_v47, %v571_v44 }
 0x113   : > { %v547_v52 = vadd.f32 %v546_v50, %v545_v48  ;;  %v575_v53 = vadd.f32 %v574_v51, %v573_v49 }
 0x115   : > { %v548_v55 = vrot.slane %v547_v52, 4  ;;  %v577_v56 = vadd.f32 %v576_v54, %v575_v53 }
 0x117   : > { %v549_v57 = vadd.f32 %v548_v55, %v547_v52  ;;  %v578_v58 = vrot.slane %v577_v56, 4 }
 0x119   : > { %v550_v59 = vrot.slane %v549_v57, 2  ;;  %v579_v60 = vadd.f32 %v578_v58, %v577_v56 }
 0x11b   : > { %v551_v61 = vadd.f32 %v550_v59, %v549_v57  ;;  %v580_v62 = vrot.slane %v579_v60, 2 }
 0x11d   : > { %v552_v63 = vrot.slane %v551_v61, 1  ;;  %v581_v0 = vadd.f32 %v580_v62, %v579_v60 }
 0x11f   : > { %v553_v1 = vadd.f32 %v552_v63, %v551_v61  ;;  %v582_v2 = vrot.slane %v581_v0, 1 }
 0x121   : > { %v554_v3 = vmul.f32 0.015625, %v553_v1  ;;  %v583_v6 = vadd.f32 %v582_v2, %v581_v0 }
 0x123   : > { %v584_v7 = vmul.f32 0.015625, %v583_v6  ;;  %v585_v8 = vmul.f32 %v554_v3, %v554_v3  ;;  %v588_v14 = vsub.f32 %v1055_v4, %v554_v3  ;;  %v589_v15 = vsub.f32 %v1057_v5, %v554_v3 }
 0x124   : > { %v590_v16 = vsub.f32 %v1063_v9, %v554_v3  ;;  %v591_v17 = vsub.f32 %v1081_v21, %v554_v3  ;;  %v592_v19 = vsub.f32 %v1070_v13, %v554_v3  ;;  %v593_v20 = vsub.f32 %v1083_v22, %v554_v3 }
 0x125   : > { %v586_v10 = vsub.f32 %v584_v7, %v585_v8  ;;  %v594_v23 = vsub.f32 %v1088_v28, %v554_v3  ;;  %v595_v24 = vsub.f32 %v532_v34, %v554_v3 }
 0x127   : > { %v587_v11 = vmax.f32 %v586_v10, 0.0 }
 0x129   : > { %v596_v12 = vadd.f32 1e-05, %v587_v11 }
 0x12b   : > { %872 = vrsqrt.f32 %v596_v12 }
 0x138   : > { %v873_v18 = vpop.eup %872 }
 0x139   : > { %v598_v25 = vmul.f32 %v873_v18, %v588_v14  ;;  %v599_v26 = vmul.f32 %v873_v18, %v589_v15  ;;  %v600_v27 = vmul.f32 %v873_v18, %v590_v16  ;;  %v601_v29 = vmul.f32 %v873_v18, %v591_v17 }
 0x13a   : > { %v602_v30 = vmul.f32 %v873_v18, %v592_v19  ;;  %v603_v4 = vmul.f32 %v873_v18, %v593_v20  ;;  %v604_v31 = vmul.f32 %v873_v18, %v594_v23  ;;  %v605_v5 = vmul.f32 %v873_v18, %v595_v24 }
 0x13b   : > { %vm606_vm1 = vcmp.ge.f32.partialorder %v598_v25, 0.0  ;;  %vm607_vm2 = vcmp.ge.f32.partialorder %v599_v26, 0.0  ;;  %vm608_vm3 = vcmp.ge.f32.partialorder %v600_v27, 0.0  ;;  %vm609_vm4 = vcmp.ge.f32.partialorder %v601_v29, 0.0 }
 0x13c   : > { %vm610_vm5 = vcmp.ge.f32.partialorder %v602_v30, 0.0  ;;  %vm611_vm6 = vcmp.ge.f32.partialorder %v603_v4, 0.0  ;;  %vm612_vm7 = vcmp.ge.f32.partialorder %v604_v31, 0.0  ;;  %vm613_vm8 = vcmp.ge.f32.partialorder %v605_v5, 0.0 }
 0x13d   : > { %v614_v9 = vmul.f32 0.2, %v598_v25  ;;  %v615_v13 = vmul.f32 0.2, %v599_v26  ;;  %v616_v21 = vmul.f32 0.2, %v600_v27 }
 0x13e   : > { %v617_v22 = vmul.f32 0.2, %v601_v29  ;;  %v618_v28 = vmul.f32 0.2, %v602_v30  ;;  %v619_v32 = vmul.f32 0.2, %v603_v4 }
 0x13f   : > { %v620_v33 = vmul.f32 0.2, %v604_v31  ;;  %v621_v34 = vmul.f32 0.2, %v605_v5  ;;  %v622_v35 = vsel %vm606_vm1, %v598_v25, %v614_v9  ;;  %v623_v36 = vsel %vm607_vm2, %v599_v26, %v615_v13 }
 0x140   : > { %v624_v37 = vsel %vm608_vm3, %v600_v27, %v616_v21  ;;  %v625_v38 = vsel %vm609_vm4, %v601_v29, %v617_v22  ;;  %v626_v39 = vsel %vm610_vm5, %v602_v30, %v618_v28  ;;  %v627_v40 = vsel %vm611_vm6, %v603_v4, %v619_v32  ;;  %630 = vst.msk [vmem:[%s1008_s5] sm:$0xff] %vm232_vm0, %v622_v35 }
 0x141   : > { %631 = vst.msk [vmem:[%s1008_s5 + $0x8] sm:$0xff] %vm232_vm0, %v623_v36  ;;  %v628_v41 = vsel %vm612_vm7, %v604_v31, %v620_v33  ;;  %v629_v42 = vsel %vm613_vm8, %v605_v5, %v621_v34  ;;  %632 = vst.msk [vmem:[%s1008_s5 + $0x10] sm:$0xff] %vm232_vm0, %v624_v37 }
 0x142   : > { %633 = vst.msk [vmem:[%s1008_s5 + $0x18] sm:$0xff] %vm232_vm0, %v625_v38  ;;  %634 = vst.msk [vmem:[%s1008_s5 + $0x20] sm:$0xff] %vm232_vm0, %v626_v39 }
 0x143   : > { %635 = vst.msk [vmem:[%s1008_s5 + $0x28] sm:$0xff] %vm232_vm0, %v627_v40  ;;  %636 = vst.msk [vmem:[%s1008_s5 + $0x30] sm:$0xff] %vm232_vm0, %v628_v41 }
 0x144   : > { %637 = vst.msk [vmem:[%s1008_s5 + $0x38] sm:$0xff] %vm232_vm0, %v629_v42 }
 0x145 PF: > { %s13_s14 = sadd.s32 1, %s896_s14   ;;  %s1156_s12 = smov %s892_s13 }
 0x146   : > { %p10_p5 = scmp.ge.s32.totalorder %s13_s14, 4   ;;  %s1157_s13 = smov %s1159_s15 }
 0x148   :  { %12 = sbr.rel (!%p10_p5) target bundleno = 2 (0x2), region = 73 }

// kernel: _lambda_.19
= control target key start
LH: loop header
LB: loop body
LE: loop exit
PB: predicated region body
PF: predicated region fallthrough
CT: control target
= control target key end

     0   :  { %s948_s12 = smov 0   ;;  %s950_s13 = smov 0   ;;  %s1106_s0 = inlined_call_operand.vmem [shape: bf16[32,512], index: 0, kind: input, shape index: {}]   ;;  %s1107_s1 = inlined_call_operand.vmem [shape: bf16[512,64], index: 1, kind: input, shape index: {}]   ;;  %s1108_s2 = inlined_call_operand.vmem [shape: f32[1,64], index: 2, kind: input, shape index: {}]   ;;  %s1109_s3 = inlined_call_operand.vmem [shape: f32[32,64], index: 3, kind: output, shape index: {}]  }
   0x1   :  { %s952_s14 = smov 0  }
   0x2 LB: > { %s25_s15 = sadd.s32 1, %s921_s13  ;;  %p748_p0 = scmp.ge.s32.totalorder %s925_s14, 1  ;;  %s925_s14 = sphi %s952_s14, %s13_s14   ;;  %s921_s13 = sphi %s950_s13, %s1111_s13   ;;  %s917_s12 = sphi %s948_s12, %s1110_s12  }
   0x3   : > { %p27_p1 = scmp.ge.s32.totalorder %s25_s15, 2  ;;  %p169_p2 = scmp.lt.s32.totalorder %s925_s14, 3 }
   0x5   : > { %s1113_s15 = smov (%p27_p1, %s25_s15), 0  ;;  %p170_p3 = pnand %p748_p0, %p169_p2 }
   0x6   : > { %s749_s18 = sshll.u32 (!%p170_p3), %s917_s12, 1 }
   0x7   : > { %173 = sbr.rel (%p170_p3) target bundleno = 307 (0x133), region = 32  ;;  %p205_p4 = scmp.lt.s32.totalorder (!%p170_p3), %s749_s18, 3 }
   0xc   : > { %v863_v0 = vld [vmem:[%s1107_s1 + $0x78] sm:$0xff]   ;;  %vm232_vm0 = vcmask 523264   ;;  %v867_v4 = vld [vmem:[%s1107_s1 + $0x70] sm:$0xff]   ;;  %s1115_s18 = smov (!%p205_p4, %s749_s18), 3  ;;  %v871_v8 = vld [vmem:[%s1107_s1 + $0x68] sm:$0xff]   ;;  %v927_v9 = vmov 0.0  }
   0xd   : > { %v864_v1 = vld [vmem:[%s1107_s1 + $0xf8] sm:$0xff]   ;;  %794 = vmatprep.subr.bf16.mxu0 %v863_v0  ;;  %v868_v5 = vld [vmem:[%s1107_s1 + $0xf0] sm:$0xff]   ;;  %s753_s4 = sshll.u32 %s1115_s18, 3  ;;  %v872_v10 = vld [vmem:[%s1107_s1 + $0xe8] sm:$0xff]   ;;  %s793_s30 = sshll.u32 %s1115_s18, 4 }
   0xe   : > { %v865_v2 = vld [vmem:[%s1107_s1 + $0x38] sm:$0xff]   ;;  %816 = vmatprep.subr.bf16.mxu1 %v864_v1  ;;  %v869_v6 = vld [vmem:[%s1107_s1 + $0x30] sm:$0xff]   ;;  %s996_s9 = scalar_lea.vmem %s1109_s3, %s753_s4  ;;  %v873_v11 = vld [vmem:[%s1107_s1 + $0x28] sm:$0xff]   ;;  %s212_s16 = scalar_lea.vmem %s1106_s0, %s793_s30 }
   0xf   : > { %v866_v3 = vld [vmem:[%s1107_s1 + $0xb8] sm:$0xff]   ;;  %795 = vmatpush3.bf16.msra.mxu0 %v865_v2  ;;  %v870_v7 = vld [vmem:[%s1107_s1 + $0xb0] sm:$0xff]   ;;  %233 = vst.msk [vmem:[%s996_s9] sm:$0xff] %vm232_vm0, %v927_v9  ;;  %234 = vst.msk [vmem:[%s996_s9 + $0x8] sm:$0xff] %vm232_vm0, %v927_v9 }
  0x10   : > { %817 = vmatpush3.bf16.msra.mxu1 %v866_v3  ;;  %796 = vmatprep.subr.bf16.mxu0 %v867_v4  ;;  %v874_v12 = vld [vmem:[%s1107_s1 + $0xa8] sm:$0xff]   ;;  %v875_v13 = vld [vmem:[%s1107_s1 + $0x60] sm:$0xff]   ;;  %v879_v17 = vld [vmem:[%s1107_s1 + $0x58] sm:$0xff]  }
  0x11   : > { %818 = vmatprep.subr.bf16.mxu1 %v868_v5  ;;  %v876_v14 = vld [vmem:[%s1107_s1 + $0xe0] sm:$0xff]   ;;  %v880_v18 = vld [vmem:[%s1107_s1 + $0xd8] sm:$0xff]   ;;  %v883_v21 = vld [vmem:[%s1107_s1 + $0x50] sm:$0xff]  }
  0x12   : > { %v877_v15 = vld [vmem:[%s1107_s1 + $0x20] sm:$0xff]   ;;  %v881_v19 = vld [vmem:[%s1107_s1 + $0x18] sm:$0xff]   ;;  %v884_v22 = vld [vmem:[%s1107_s1 + $0xd0] sm:$0xff]  }
  0x13   : > { %797 = vmatpush3.bf16.msra.mxu0 %v869_v6  ;;  %v878_v16 = vld [vmem:[%s1107_s1 + $0xa0] sm:$0xff]   ;;  %v882_v20 = vld [vmem:[%s1107_s1 + $0x98] sm:$0xff]   ;;  %v885_v23 = vld [vmem:[%s1107_s1 + $0x10] sm:$0xff]  }
  0x14   : > { %819 = vmatpush3.bf16.msra.mxu1 %v870_v7  ;;  %798 = vmatprep.subr.bf16.mxu0 %v871_v8  ;;  %v886_v24 = vld [vmem:[%s1107_s1 + $0x90] sm:$0xff]   ;;  %v887_v25 = vld [vmem:[%s1107_s1 + $0x48] sm:$0xff]   ;;  %v891_v29 = vld [vmem:[%s1107_s1 + $0x40] sm:$0xff]  }
  0x15   : > { %820 = vmatprep.subr.bf16.mxu1 %v872_v10  ;;  %v888_v26 = vld [vmem:[%s1107_s1 + $0xc8] sm:$0xff]   ;;  %v892_v30 = vld [vmem:[%s1107_s1 + $0xc0] sm:$0xff]  }
  0x16   : > { %v889_v27 = vld [vmem:[%s1107_s1 + $0x8] sm:$0xff]   ;;  %v893_v31 = vld [vmem:[%s1107_s1] sm:$0xff]  }
  0x17   : > { %799 = vmatpush3.bf16.msra.mxu0 %v873_v11  ;;  %v890_v28 = vld [vmem:[%s1107_s1 + $0x88] sm:$0xff]   ;;  %v894_v32 = vld [vmem:[%s1107_s1 + $0x80] sm:$0xff]  }
  0x18   : > { %821 = vmatpush3.bf16.msra.mxu1 %v874_v12  ;;  %800 = vmatprep.subr.bf16.mxu0 %v875_v13  ;;  %v895_v33 = vld [vmem:[%s212_s16] ss:$16 sps:$4 sm:$0xff]   ;;  %v897_v34 = vld [vmem:[%s212_s16 + $0x4] ss:$16 sps:$4 sm:$0xff]   ;;  %v898_v35 = vld [vmem:[%s212_s16 + $0x8] ss:$16 sps:$4 sm:$0xff]  }
  0x19   : > { %822 = vmatprep.subr.bf16.mxu1 %v876_v14  ;;  %v900_v36 = vld [vmem:[%s212_s16 + $0xc] ss:$16 sps:$4 sm:$0xff]   ;;  %549 = vmatprep.mubr.bf16.mxu0 %v897_v34  ;;  %v235_v44 = vld [vmem:[%s996_s9] sm:$0xff] }
  0x1a   : > { %590 = vmatprep.mubr.bf16.mxu1 %v900_v36  ;;  %v236_v49 = vld [vmem:[%s996_s9 + $0x8] sm:$0xff]  ;;  %v790_v55 = vld [vmem:[%s1108_s2] ss:$0 sm:$0xff] }
  0x1b   : > { %801 = vmatpush3.bf16.msra.mxu0 %v877_v15 }
  0x1c   : > { %823 = vmatpush3.bf16.msra.mxu1 %v878_v16  ;;  %802 = vmatprep.subr.bf16.mxu0 %v879_v17 }
  0x1d   : > { %824 = vmatprep.subr.bf16.mxu1 %v880_v18 }
  0x1f   : > { %803 = vmatpush3.bf16.msra.mxu0 %v881_v19 }
  0x20   : > { %825 = vmatpush3.bf16.msra.mxu1 %v882_v20  ;;  %804 = vmatprep.subr.bf16.mxu0 %v883_v21 }
  0x21   : > { %826 = vmatprep.subr.bf16.mxu1 %v884_v22 }
  0x23   : > { %805 = vmatpush3.bf16.msra.mxu0 %v885_v23 }
  0x24   : > { %827 = vmatpush3.bf16.msra.mxu1 %v886_v24  ;;  %806 = vmatprep.subr.bf16.mxu0 %v887_v25 }
  0x25   : > { %828 = vmatprep.subr.bf16.mxu1 %v888_v26 }
  0x27   : > { %807 = vmatpush3.bf16.msra.mxu0 %v889_v27 }
  0x28   : > { %829 = vmatpush3.bf16.msra.mxu1 %v890_v28  ;;  %808 = vmatprep.subr.bf16.mxu0 %v891_v29 }
  0x29   : > { %830 = vmatprep.subr.bf16.mxu1 %v892_v30 }
  0x2b   : > { %809 = vmatpush3.bf16.msra.mxu0 %v893_v31 }
  0x2c   : > { %831 = vmatpush3.bf16.msra.mxu1 %v894_v32 }
  0x2e   : > { %550 = vmatmul.mubr.bf16.vlgmr.msra.gmra.mxu0 %v895_v33 }
  0x2f   : > { %591 = vmatmul.mubr.bf16.vlgmr.msra.gmra.mxu1 %v898_v35 }
  0xee   : > { %v810_v37 = vpop.f32.mrf.mxu0 }
  0xef   : > { %v832_v38 = vpop.f32.mrf.mxu1 }
  0xf0   : > { %v811_v39 = vpop.f32.mrf.mxu0 }
  0xf1   : > { %v812_v40 = vadd.f32 %v811_v39, %v810_v37  ;;  %v833_v41 = vpop.f32.mrf.mxu1 }
  0xf2   : > { %v834_v42 = vadd.f32 %v833_v41, %v832_v38  ;;  %v813_v43 = vpop.f32.mrf.mxu0 }
  0xf3   : > { %v835_v45 = vpop.f32.mrf.mxu1 }
  0xf4   : > { %v593_v46 = vadd.f32 %v834_v42, %v812_v40  ;;  %v814_v47 = vpop.f32.mrf.mxu0 }
  0xf5   : > { %v815_v48 = vadd.f32 %v814_v47, %v813_v43  ;;  %v836_v50 = vpop.f32.mrf.mxu1 }
  0xf6   : > { %v599_v51 = vadd.f32 %v593_v46, %v235_v44  ;;  %v837_v52 = vadd.f32 %v836_v50, %v835_v45 }
  0xf8   : > { %v596_v53 = vadd.f32 %v837_v52, %v815_v48  ;;  %602 = vst.msk [vmem:[%s996_s9] sm:$0xff] %vm232_vm0, %v599_v51 }
  0xfa   : > { %v600_v54 = vadd.f32 %v596_v53, %v236_v49 }
  0xfc   : > { %603 = vst.msk [vmem:[%s996_s9 + $0x8] sm:$0xff] %vm232_vm0, %v600_v54 }
  0xff   : > { %v607_v56 = vld [vmem:[%s996_s9] sm:$0xff] }
 0x100   : > { %v616_v58 = vadd.f32 %v790_v55, %v607_v56 }
 0x102   : > { %v618_v60 = vsel %vm232_vm0, %v616_v58, 0.0  ;;  %v628_v62 = vmul.f32 %v616_v58, %v616_v58 }
 0x103   : > { %v608_v57 = vld [vmem:[%s996_s9 + $0x8] sm:$0xff] }
 0x104   : > { %v617_v59 = vadd.f32 %v790_v55, %v608_v57  ;;  %v630_v1 = vsel %vm232_vm0, %v628_v62, 0.0 }
 0x106   : > { %v619_v61 = vsel %vm232_vm0, %v617_v59, 0.0  ;;  %v629_v63 = vmul.f32 %v617_v59, %v617_v59 }
 0x107   : > { %v620_v0 = vadd.f32 %v619_v61, %v618_v60 }
 0x108   : > { %v631_v2 = vsel %vm232_vm0, %v629_v63, 0.0 }
 0x109   : > { %v621_v3 = vrot.slane %v620_v0, 4  ;;  %v632_v4 = vadd.f32 %v631_v2, %v630_v1 }
 0x10b   : > { %v622_v5 = vadd.f32 %v621_v3, %v620_v0  ;;  %v633_v6 = vrot.slane %v632_v4, 4 }
 0x10d   : > { %v623_v7 = vrot.slane %v622_v5, 2  ;;  %v634_v8 = vadd.f32 %v633_v6, %v632_v4 }
 0x10f   : > { %v624_v9 = vadd.f32 %v623_v7, %v622_v5  ;;  %v635_v10 = vrot.slane %v634_v8, 2 }
 0x111   : > { %v625_v11 = vrot.slane %v624_v9, 1  ;;  %v636_v12 = vadd.f32 %v635_v10, %v634_v8 }
 0x113   : > { %v626_v13 = vadd.f32 %v625_v11, %v624_v9  ;;  %v637_v14 = vrot.slane %v636_v12, 1 }
 0x115   : > { %v627_v15 = vmul.f32 0.0625, %v626_v13  ;;  %v638_v16 = vadd.f32 %v637_v14, %v636_v12 }
 0x117   : > { %v639_v17 = vmul.f32 0.0625, %v638_v16  ;;  %v640_v18 = vmul.f32 %v627_v15, %v627_v15  ;;  %v643_v22 = vsub.f32 %v616_v58, %v627_v15  ;;  %v644_v23 = vsub.f32 %v617_v59, %v627_v15 }
 0x119   : > { %v641_v19 = vsub.f32 %v639_v17, %v640_v18 }
 0x11b   : > { %v642_v20 = vmax.f32 %v641_v19, 0.0 }
 0x11d   : > { %v645_v21 = vadd.f32 1e-05, %v642_v20 }
 0x11f   : > { %901 = vrsqrt.f32 %v645_v21 }
 0x12c   : > { %v902_v24 = vpop.eup %901 }
 0x12d   : > { %v647_v25 = vmul.f32 %v902_v24, %v643_v22  ;;  %v648_v26 = vmul.f32 %v902_v24, %v644_v23 }
 0x12f   : > { %vm649_vm1 = vcmp.ge.f32.partialorder %v647_v25, 0.0  ;;  %vm650_vm2 = vcmp.ge.f32.partialorder %v648_v26, 0.0  ;;  %v651_v27 = vmul.f32 0.2, %v647_v25  ;;  %v652_v28 = vmul.f32 0.2, %v648_v26 }
 0x131   : > { %v653_v29 = vsel %vm649_vm1, %v647_v25, %v651_v27  ;;  %v654_v30 = vsel %vm650_vm2, %v648_v26, %v652_v28 }
 0x132   : > { %655 = vst.msk [vmem:[%s996_s9] sm:$0xff] %vm232_vm0, %v653_v29  ;;  %656 = vst.msk [vmem:[%s996_s9 + $0x8] sm:$0xff] %vm232_vm0, %v654_v30 }
 0x133 PF: > { %s13_s14 = sadd.s32 1, %s925_s14   ;;  %s1110_s12 = smov %s921_s13 }
 0x134   : > { %p10_p5 = scmp.ge.s32.totalorder %s13_s14, 4   ;;  %s1111_s13 = smov %s1113_s15 }
 0x136   :  { %12 = sbr.rel (!%p10_p5) target bundleno = 2 (0x2), region = 73 }

// kernel: _lambda_.20
= control target key start
LH: loop header
LB: loop body
LE: loop exit
PB: predicated region body
PF: predicated region fallthrough
CT: control target
= control target key end

     0   :  { %s2263_s12 = smov 0   ;;  %s2649_s0 = inlined_call_operand.vmem [shape: bf16[2,6,6,64], index: 0, kind: input, shape index: {}]   ;;  %s2650_s1 = inlined_call_operand.vmem [shape: bf16[16,64,128], index: 1, kind: input, shape index: {}]   ;;  %s2651_s2 = inlined_call_operand.vmem [shape: f32[1,128], index: 2, kind: input, shape index: {}]   ;;  %s2652_s3 = inlined_call_operand.vmem [shape: f32[2,3,3,128], index: 3, kind: output, shape index: {}]  }
   0x1 LB: > { %s1641_s13 = sadd.s32 4294967295, %s2235_s12   ;;  %p1645_p0 = scmp.ge.s32.totalorder %s2235_s12, 1  ;;  %s2235_s12 = sphi %s2263_s12, %s13_s12  }
   0x2   : > { %p137_p1 = scmp.lt.s32.totalorder %s2235_s12, 3 }
   0x4   : > { %p138_p2 = pnand %p1645_p0, %p137_p1 }
   0x5   : > { %p161_p3 = scmp.lt.s32.totalorder (!%p138_p2), %s1641_s13, 1  ;;  %s2286_s24 = smov (!%p138_p2), 0  }
   0x6   : > { %141 = sbr.rel (%p138_p2) target bundleno = 401 (0x191), region = 32 }
   0xb   : > { %v2274_v0 = vld [vmem:[%s2651_s2] ss:$0 sm:$0xff]  ;;  %s2654_s13 = smov (!%p161_p3, %s1641_s13), 1 }
   0xc   : > { %s2135_s16 = smul.u32 24, %s2654_s13 }
   0xd   : > { %s2136_s17 = smul.u32 12, %s2654_s13 }
   0xe   : > { %s2279_s20 = scalar_lea.vmem %s2649_s0, %s2135_s16 }
   0xf   : > { %s2284_s23 = scalar_lea.vmem %s2652_s3, %s2136_s17 }
  0x10 LB: >> { %v2155_v1 = vld [vmem:[%s2650_s1 + $0x38] sm:$0xff]   ;;  %v2241_v2 = vmov 0.0   ;;  %v2157_v4 = vld [vmem:[%s2650_s1 + $0x30] sm:$0xff]   ;;  %vm2242_vm0 = vmmov 0   ;;  %s1648_s4 = sshll.u32 %s2239_s24, 2  ;;  %v2159_v6 = vld [vmem:[%s2650_s1 + $0x28] sm:$0xff]   ;;  %s2239_s24 = sphi %s2286_s24, %s178_s24  }
  0x11   : >> { %1943 = vmatprep.subr.bf16.mxu0 %v2241_v2  ;;  %1955 = vmatprep.subr.bf16.mxu1 %v2241_v2  ;;  %v2156_v3 = vld [vmem:[%s2650_s1 + $0x18] sm:$0xff]   ;;  %v2158_v5 = vld [vmem:[%s2650_s1 + $0x10] sm:$0xff]   ;;  %s2315_s7 = scalar_lea.vmem %s2279_s20, %s1648_s4  ;;  %v2160_v7 = vld [vmem:[%s2650_s1 + $0x8] sm:$0xff]   ;;  %vm233_vm1 = vcmask 523264   ;;  %s1488_s25 = scalar_lea.vmem %s2284_s23, %s1648_s4 }
  0x12   : >> { %1944 = vmatpush3.bf16.msra.mxu0 %v2155_v1  ;;  %1951 = vmatprep.mubr.msk.bf16.mxu0 %vm2242_vm0, %v2241_v2  ;;  %v181_v8 = vld [vmem:[%s2315_s7] sm:$0x7]  ;;  %v2164_v15 = vld [vmem:[%s2650_s1 + $0x58] sm:$0xff]   ;;  %v2166_v18 = vld [vmem:[%s2650_s1 + $0x50] sm:$0xff]   ;;  %s178_s24 = sadd.s32 1, %s2239_s24  }
  0x13   : >> { %1956 = vmatpush3.bf16.msra.mxu1 %v2156_v3  ;;  %1945 = vmatprep.subr.bf16.mxu0 %v2241_v2  ;;  %v1657_v9 = vcombine.low %v181_v8, %v181_v8  ;;  %v2161_v10 = vld [vmem:[%s2650_s1 + $0x20] sm:$0xff]   ;;  %v2165_v17 = vld [vmem:[%s2650_s1 + $0x78] sm:$0xff]   ;;  %v2167_v19 = vld [vmem:[%s2650_s1 + $0x70] sm:$0xff]   ;;  %p175_p4 = scmp.ge.s32.totalorder %s178_s24, 3  }
  0x14   : >> { %1957 = vmatprep.subr.bf16.mxu1 %v2241_v2  ;;  %1963 = vmatprep.mubr.msk.bf16.mxu1 %vm2242_vm0, %v2241_v2  ;;  %v2162_v11 = vld [vmem:[%s2650_s1] sm:$0xff]   ;;  %v2168_v20 = vld [vmem:[%s2650_s1 + $0x48] sm:$0xff]   ;;  %v2172_v27 = vld [vmem:[%s2650_s1 + $0x98] sm:$0xff]   ;;  %vm1493_vm2 = vcmask (%p175_p4), 1042432  }
  0x15   : >> { %v203_v12 = vshrl.u32 %v1657_v9, 16  ;;  %v205_v13 = vshll.u32 %v1657_v9, 16  ;;  %v2169_v21 = vld [vmem:[%s2650_s1 + $0x68] sm:$0xff]   ;;  %v2170_v24 = vld [vmem:[%s2650_s1 + $0x40] sm:$0xff]   ;;  %v353_v26 = vrot.slane %v1657_v9, 1  ;;  %v2173_v29 = vld [vmem:[%s2650_s1 + $0xb8] sm:$0xff]  }
  0x16   : >> { %1946 = vmatpush3.bf16.msra.mxu0 %v2157_v4  ;;  %v2171_v25 = vld [vmem:[%s2650_s1 + $0x60] sm:$0xff]   ;;  %v2174_v31 = vld [vmem:[%s2650_s1 + $0x90] sm:$0xff]   ;;  %v2176_v34 = vld [vmem:[%s2650_s1 + $0x88] sm:$0xff]  }
  0x17   : >> { %1958 = vmatpush3.bf16.msra.mxu1 %v2158_v5  ;;  %1947 = vmatprep.subr.bf16.mxu0 %v2241_v2  ;;  %v207_v14 = vrot.slane %v205_v13, 1  ;;  %v431_v22 = vrot.slane %v203_v12, 1  ;;  %v432_v23 = vrot.slane %v205_v13, 2  ;;  %v1695_v30 = vld [vmem:[%s2315_s7 + $0x4] sm:$0x7]  ;;  %v2175_v33 = vld [vmem:[%s2650_s1 + $0xb0] sm:$0xff]  }
  0x18   : >> { %1959 = vmatprep.subr.bf16.mxu1 %v2241_v2  ;;  %v2386_v32 = vcombine.low %v1695_v30, %v1695_v30  ;;  %v2177_v36 = vld [vmem:[%s2650_s1 + $0xa8] sm:$0xff]   ;;  %v2178_v37 = vld [vmem:[%s2650_s1 + $0x80] sm:$0xff]   ;;  %v2181_v42 = vld [vmem:[%s2650_s1 + $0xd8] sm:$0xff]  }
  0x19   : >> { %v208_v16 = vor.u32 %v207_v14, %v203_v12  ;;  %v433_v28 = vor.u32 %v432_v23, %v431_v22  ;;  %v2179_v40 = vld [vmem:[%s2650_s1 + $0xa0] sm:$0xff]   ;;  %v2182_v43 = vld [vmem:[%s2650_s1 + $0xf8] sm:$0xff]   ;;  %v2183_v44 = vld [vmem:[%s2650_s1 + $0xd0] sm:$0xff]  }
  0x1a   : >> { %1948 = vmatpush3.bf16.msra.mxu0 %v2159_v6  ;;  %v598_v35 = vshll.u32 %v2386_v32, 16  ;;  %v596_v38 = vshrl.u32 %v2386_v32, 16  ;;  %v2184_v45 = vld [vmem:[%s2650_s1 + $0xf0] sm:$0xff]   ;;  %v2185_v46 = vld [vmem:[%s2650_s1 + $0xc8] sm:$0xff]   ;;  %v2187_v50 = vld [vmem:[%s2650_s1 + $0xc0] sm:$0xff]   ;;  %v679_v52 = vrot.slane %v2386_v32, 1 }
  0x1b   : >> { %1960 = vmatpush3.bf16.msra.mxu1 %v2160_v7  ;;  %1949 = vmatprep.subr.bf16.mxu0 %v2241_v2  ;;  %v2186_v47 = vld [vmem:[%s2650_s1 + $0xe8] sm:$0xff]   ;;  %v2188_v51 = vld [vmem:[%s2650_s1 + $0xe0] sm:$0xff]   ;;  %v2189_v53 = vld [vmem:[%s2650_s1 + $0x118] sm:$0xff]  }
  0x1c   : >> { %1961 = vmatprep.subr.bf16.mxu1 %v2241_v2  ;;  %v600_v39 = vrot.slane %v598_v35, 1  ;;  %v757_v48 = vrot.slane %v596_v38, 1  ;;  %v758_v49 = vrot.slane %v598_v35, 2  ;;  %v2190_v55 = vld [vmem:[%s2650_s1 + $0x138] sm:$0xff]   ;;  %v1750_v56 = vld [vmem:[%s2315_s7 + $0x8] sm:$0x7] }
  0x1d   : >> { %v2191_v57 = vld [vmem:[%s2650_s1 + $0x110] sm:$0xff]   ;;  %v2468_v58 = vcombine.low %v1750_v56, %v1750_v56  ;;  %v2193_v60 = vld [vmem:[%s2650_s1 + $0x108] sm:$0xff]   ;;  %v2195_v63 = vld [vmem:[%s2650_s1 + $0x100] sm:$0xff]  }
  0x1e   : >> { %1950 = vmatpush3.bf16.msra.mxu0 %v2161_v10  ;;  %v601_v41 = vor.u32 %v600_v39, %v596_v38  ;;  %v759_v54 = vor.u32 %v758_v49, %v757_v48  ;;  %v2192_v59 = vld [vmem:[%s2650_s1 + $0x130] sm:$0xff]   ;;  %v2194_v62 = vld [vmem:[%s2650_s1 + $0x128] sm:$0xff]   ;;  %v2196_v4 = vld [vmem:[%s2650_s1 + $0x120] sm:$0xff]  }
  0x1f   : >> { %1962 = vmatpush3.bf16.msra.mxu1 %v2162_v11  ;;  %1967 = vmatprep.subr.bf16.mxu0 %v2241_v2  ;;  %v924_v61 = vshll.u32 %v2468_v58, 16  ;;  %v922_v1 = vshrl.u32 %v2468_v58, 16  ;;  %v2198_v6 = vld [vmem:[%s2650_s1 + $0x158] sm:$0xff]   ;;  %v2201_v9 = vld [vmem:[%s2650_s1 + $0x170] sm:$0xff]   ;;  %v2202_v10 = vld [vmem:[%s2650_s1 + $0x148] sm:$0xff]  }
  0x20   : >> { %1979 = vmatprep.subr.bf16.mxu1 %v2241_v2  ;;  %v2199_v7 = vld [vmem:[%s2650_s1 + $0x178] sm:$0xff]   ;;  %v2203_v11 = vld [vmem:[%s2650_s1 + $0x168] sm:$0xff]   ;;  %v2204_v14 = vld [vmem:[%s2650_s1 + $0x140] sm:$0xff]  }
  0x21   : >> { %1952 = vmatmul.mubr.msk.bf16.vlgmr.msra.gmra.mxu0 %vm233_vm1, %v208_v16  ;;  %v926_v3 = vrot.slane %v924_v61, 1  ;;  %v1083_v12 = vrot.slane %v922_v1, 1  ;;  %v1084_v13 = vrot.slane %v924_v61, 2  ;;  %v1005_v16 = vrot.slane %v2468_v58, 1  ;;  %v2209_v23 = vld [vmem:[%s2650_s1 + $0x1b0] sm:$0xff]   ;;  %v2215_v32 = vld [vmem:[%s2650_s1 + $0x1d8] sm:$0xff]  }
  0x22   : >> { %1964 = vmatmul.mubr.msk.bf16.vlgmr.msra.gmra.mxu1 %vm233_vm1, %v181_v8  ;;  %1968 = vmatpush3.bf16.msra.mxu0 %v2164_v15  ;;  %v2200_v8 = vld [vmem:[%s2650_s1 + $0x150] sm:$0xff]   ;;  %v2205_v15 = vld [vmem:[%s2650_s1 + $0x160] sm:$0xff]  }
  0x23   : >> { %1980 = vmatpush3.bf16.msra.mxu1 %v2165_v17  ;;  %1969 = vmatprep.subr.bf16.mxu0 %v2241_v2  ;;  %v927_v5 = vor.u32 %v926_v3, %v922_v1  ;;  %v1085_v17 = vor.u32 %v1084_v13, %v1083_v12  ;;  %v2218_v35 = vld [vmem:[%s2650_s1 + $0x1f0] sm:$0xff]  }
  0x24   : >> { %1981 = vmatprep.subr.bf16.mxu1 %v2241_v2  ;;  %1975 = vmatprep.mubr.msk.bf16.mxu0 %vm2242_vm0, %v2241_v2 }
  0x25   : >> { %1987 = vmatprep.mubr.msk.bf16.mxu1 %vm2242_vm0, %v2241_v2 }
  0x26   : >> { %1970 = vmatpush3.bf16.msra.mxu0 %v2166_v18  ;;  %v2206_v18 = vld [vmem:[%s2650_s1 + $0x198] sm:$0xff]  }
  0x27   : >> { %1982 = vmatpush3.bf16.msra.mxu1 %v2167_v19  ;;  %1971 = vmatprep.subr.bf16.mxu0 %v2241_v2  ;;  %v2207_v19 = vld [vmem:[%s2650_s1 + $0x1b8] sm:$0xff]  }
  0x28   : >> { %1983 = vmatprep.subr.bf16.mxu1 %v2241_v2 }
  0x2a   : >> { %1972 = vmatpush3.bf16.msra.mxu0 %v2168_v20  ;;  %v1805_v20 = vld [vmem:[%s2315_s7 + $0xc] sm:$0x7] }
  0x2b   : >> { %1984 = vmatpush3.bf16.msra.mxu1 %v2169_v21  ;;  %1973 = vmatprep.subr.bf16.mxu0 %v2241_v2  ;;  %v2208_v21 = vld [vmem:[%s2650_s1 + $0x190] sm:$0xff]   ;;  %v1827_v22 = vcombine.low %v1805_v20, %v1805_v20 }
  0x2c   : >> { %1985 = vmatprep.subr.bf16.mxu1 %v2241_v2 }
  0x2e   : >> { %1974 = vmatpush3.bf16.msra.mxu0 %v2170_v24  ;;  %v2210_v24 = vld [vmem:[%s2650_s1 + $0x188] sm:$0xff]  }
  0x2f   : >> { %1986 = vmatpush3.bf16.msra.mxu1 %v2171_v25  ;;  %1991 = vmatprep.subr.bf16.mxu0 %v2241_v2  ;;  %v1250_v25 = vshll.u32 %v1827_v22, 16 }
  0x30   : >> { %2003 = vmatprep.subr.bf16.mxu1 %v2241_v2 }
  0x31   : >> { %1976 = vmatmul.mubr.msk.bf16.vlgmr.msra.gmra.mxu0 %vm233_vm1, %v353_v26  ;;  %v2211_v26 = vld [vmem:[%s2650_s1 + $0x1a8] sm:$0xff]   ;;  %v1410_v39 = vrot.slane %v1250_v25, 2 }
  0x32   : >> { %1988 = vmatmul.mubr.msk.bf16.vlgmr.msra.gmra.mxu1 %vm233_vm1, %v433_v28  ;;  %1992 = vmatpush3.bf16.msra.mxu0 %v2172_v27  ;;  %v2212_v27 = vld [vmem:[%s2650_s1 + $0x180] sm:$0xff]   ;;  %v1248_v28 = vshrl.u32 %v1827_v22, 16 }
  0x33   : >> { %2004 = vmatpush3.bf16.msra.mxu1 %v2173_v29  ;;  %1993 = vmatprep.subr.bf16.mxu0 %v2241_v2  ;;  %v1252_v29 = vrot.slane %v1250_v25, 1 }
  0x34   : >> { %2005 = vmatprep.subr.bf16.mxu1 %v2241_v2  ;;  %1999 = vmatprep.mubr.msk.bf16.mxu0 %vm2242_vm0, %v2241_v2  ;;  %v1409_v38 = vrot.slane %v1248_v28, 1 }
  0x35   : >> { %2011 = vmatprep.mubr.msk.bf16.mxu1 %vm2242_vm0, %v2241_v2 }
  0x36   : >> { %1994 = vmatpush3.bf16.msra.mxu0 %v2174_v31  ;;  %v1253_v31 = vor.u32 %v1252_v29, %v1248_v28 }
  0x37   : >> { %2006 = vmatpush3.bf16.msra.mxu1 %v2175_v33  ;;  %1995 = vmatprep.subr.bf16.mxu0 %v2241_v2  ;;  %v2216_v33 = vld [vmem:[%s2650_s1 + $0x1f8] sm:$0xff]  }
  0x38   : >> { %2007 = vmatprep.subr.bf16.mxu1 %v2241_v2 }
  0x3a   : >> { %1996 = vmatpush3.bf16.msra.mxu0 %v2176_v34  ;;  %v2217_v34 = vld [vmem:[%s2650_s1 + $0x1d0] sm:$0xff]  }
  0x3b   : >> { %2008 = vmatpush3.bf16.msra.mxu1 %v2177_v36  ;;  %1997 = vmatprep.subr.bf16.mxu0 %v2241_v2  ;;  %v2219_v36 = vld [vmem:[%s2650_s1 + $0x1c8] sm:$0xff]  }
  0x3c   : >> { %2009 = vmatprep.subr.bf16.mxu1 %v2241_v2 }
  0x3e   : >> { %1998 = vmatpush3.bf16.msra.mxu0 %v2178_v37  ;;  %v2220_v37 = vld [vmem:[%s2650_s1 + $0x1e8] sm:$0xff]  }
  0x3f   : >> { %2010 = vmatpush3.bf16.msra.mxu1 %v2179_v40  ;;  %2015 = vmatprep.subr.bf16.mxu0 %v2241_v2  ;;  %v2221_v40 = vld [vmem:[%s2650_s1 + $0x1c0] sm:$0xff]  }
  0x40   : >> { %2027 = vmatprep.subr.bf16.mxu1 %v2241_v2 }
  0x41   : >> { %2000 = vmatmul.mubr.msk.bf16.vlgmr.msra.gmra.mxu0 %vm233_vm1, %v1695_v30  ;;  %v2213_v30 = vld [vmem:[%s2650_s1 + $0x1a0] sm:$0xff]  }
  0x42   : >> { %2012 = vmatmul.mubr.msk.bf16.vlgmr.msra.gmra.mxu1 %vm233_vm1, %v601_v41  ;;  %2016 = vmatpush3.bf16.msra.mxu0 %v2181_v42  ;;  %v2222_v41 = vld [vmem:[%s2650_s1 + $0x1e0] sm:$0xff]   ;;  %v1331_v42 = vrot.slane %v1827_v22, 1 }
  0x43   : >> { %2028 = vmatpush3.bf16.msra.mxu1 %v2182_v43  ;;  %2017 = vmatprep.subr.bf16.mxu0 %v2241_v2  ;;  %v1411_v43 = vor.u32 %v1410_v39, %v1409_v38 }
  0x44   : >> { %2029 = vmatprep.subr.bf16.mxu1 %v2241_v2  ;;  %2023 = vmatprep.mubr.msk.bf16.mxu0 %vm2242_vm0, %v2241_v2 }
  0x45   : >> { %2035 = vmatprep.mubr.msk.bf16.mxu1 %vm2242_vm0, %v2241_v2 }
  0x46   : >> { %2018 = vmatpush3.bf16.msra.mxu0 %v2183_v44 }
  0x47   : >> { %2030 = vmatpush3.bf16.msra.mxu1 %v2184_v45  ;;  %2019 = vmatprep.subr.bf16.mxu0 %v2241_v2 }
  0x48   : >> { %2031 = vmatprep.subr.bf16.mxu1 %v2241_v2 }
  0x4a   : >> { %2020 = vmatpush3.bf16.msra.mxu0 %v2185_v46 }
  0x4b   : >> { %2032 = vmatpush3.bf16.msra.mxu1 %v2186_v47  ;;  %2021 = vmatprep.subr.bf16.mxu0 %v2241_v2 }
  0x4c   : >> { %2033 = vmatprep.subr.bf16.mxu1 %v2241_v2 }
  0x4e   : >> { %2022 = vmatpush3.bf16.msra.mxu0 %v2187_v50 }
  0x4f   : >> { %2034 = vmatpush3.bf16.msra.mxu1 %v2188_v51  ;;  %2039 = vmatprep.subr.bf16.mxu0 %v2241_v2 }
  0x50   : >> { %2051 = vmatprep.subr.bf16.mxu1 %v2241_v2 }
  0x51   : >> { %2024 = vmatmul.mubr.msk.bf16.vlgmr.msra.gmra.mxu0 %vm233_vm1, %v679_v52 }
  0x52   : >> { %2036 = vmatmul.mubr.msk.bf16.vlgmr.msra.gmra.mxu1 %vm233_vm1, %v759_v54  ;;  %2040 = vmatpush3.bf16.msra.mxu0 %v2189_v53 }
  0x53   : >> { %2052 = vmatpush3.bf16.msra.mxu1 %v2190_v55  ;;  %2041 = vmatprep.subr.bf16.mxu0 %v2241_v2 }
  0x54   : >> { %2053 = vmatprep.subr.bf16.mxu1 %v2241_v2  ;;  %2047 = vmatprep.mubr.msk.bf16.mxu0 %vm2242_vm0, %v2241_v2 }
  0x55   : >> { %2059 = vmatprep.mubr.msk.bf16.mxu1 %vm2242_vm0, %v2241_v2 }
  0x56   : >> { %2042 = vmatpush3.bf16.msra.mxu0 %v2191_v57 }
  0x57   : >> { %2054 = vmatpush3.bf16.msra.mxu1 %v2192_v59  ;;  %2043 = vmatprep.subr.bf16.mxu0 %v2241_v2 }
  0x58   : >> { %2055 = vmatprep.subr.bf16.mxu1 %v2241_v2 }
  0x5a   : >> { %2044 = vmatpush3.bf16.msra.mxu0 %v2193_v60 }
  0x5b   : >> { %2056 = vmatpush3.bf16.msra.mxu1 %v2194_v62  ;;  %2045 = vmatprep.subr.bf16.mxu0 %v2241_v2 }
  0x5c   : >> { %2057 = vmatprep.subr.bf16.mxu1 %v2241_v2 }
  0x5e   : >> { %2046 = vmatpush3.bf16.msra.mxu0 %v2195_v63 }
  0x5f   : >> { %2058 = vmatpush3.bf16.msra.mxu1 %v2196_v4  ;;  %2063 = vmatprep.subr.bf16.mxu0 %v2241_v2 }
  0x60   : >> { %2075 = vmatprep.subr.bf16.mxu1 %v2241_v2 }
  0x61   : >> { %2048 = vmatmul.mubr.msk.bf16.vlgmr.msra.gmra.mxu0 %vm233_vm1, %v1750_v56 }
  0x62   : >> { %2060 = vmatmul.mubr.msk.bf16.vlgmr.msra.gmra.mxu1 %vm233_vm1, %v927_v5  ;;  %2064 = vmatpush3.bf16.msra.mxu0 %v2198_v6 }
  0x63   : >> { %2076 = vmatpush3.bf16.msra.mxu1 %v2199_v7  ;;  %2065 = vmatprep.subr.bf16.mxu0 %v2241_v2 }
  0x64   : >> { %2077 = vmatprep.subr.bf16.mxu1 %v2241_v2  ;;  %2071 = vmatprep.mubr.msk.bf16.mxu0 %vm2242_vm0, %v2241_v2 }
  0x65   : >> { %2083 = vmatprep.mubr.msk.bf16.mxu1 %vm2242_vm0, %v2241_v2 }
  0x66   : >> { %2066 = vmatpush3.bf16.msra.mxu0 %v2200_v8 }
  0x67   : >> { %2078 = vmatpush3.bf16.msra.mxu1 %v2201_v9  ;;  %2067 = vmatprep.subr.bf16.mxu0 %v2241_v2 }
  0x68   : >> { %2079 = vmatprep.subr.bf16.mxu1 %v2241_v2 }
  0x6a   : >> { %2068 = vmatpush3.bf16.msra.mxu0 %v2202_v10 }
  0x6b   : >> { %2080 = vmatpush3.bf16.msra.mxu1 %v2203_v11  ;;  %2069 = vmatprep.subr.bf16.mxu0 %v2241_v2 }
  0x6c   : >> { %2081 = vmatprep.subr.bf16.mxu1 %v2241_v2 }
  0x6e   : >> { %2070 = vmatpush3.bf16.msra.mxu0 %v2204_v14 }
  0x6f   : >> { %2082 = vmatpush3.bf16.msra.mxu1 %v2205_v15  ;;  %2087 = vmatprep.subr.bf16.mxu0 %v2241_v2 }
  0x70   : >> { %2099 = vmatprep.subr.bf16.mxu1 %v2241_v2 }
  0x71   : >> { %2072 = vmatmul.mubr.msk.bf16.vlgmr.msra.gmra.mxu0 %vm233_vm1, %v1005_v16 }
  0x72   : >> { %2084 = vmatmul.mubr.msk.bf16.vlgmr.msra.gmra.mxu1 %vm233_vm1, %v1085_v17  ;;  %2088 = vmatpush3.bf16.msra.mxu0 %v2206_v18 }
  0x73   : >> { %2100 = vmatpush3.bf16.msra.mxu1 %v2207_v19  ;;  %2089 = vmatprep.subr.bf16.mxu0 %v2241_v2 }
  0x74   : >> { %2101 = vmatprep.subr.bf16.mxu1 %v2241_v2  ;;  %2095 = vmatprep.mubr.msk.bf16.mxu0 %vm2242_vm0, %v2241_v2 }
  0x75   : >> { %2107 = vmatprep.mubr.msk.bf16.mxu1 %vm2242_vm0, %v2241_v2 }
  0x76   : >> { %2090 = vmatpush3.bf16.msra.mxu0 %v2208_v21 }
  0x77   : >> { %2102 = vmatpush3.bf16.msra.mxu1 %v2209_v23  ;;  %2091 = vmatprep.subr.bf16.mxu0 %v2241_v2 }
  0x78   : >> { %2103 = vmatprep.subr.bf16.mxu1 %v2241_v2 }
  0x7a   : >> { %2092 = vmatpush3.bf16.msra.mxu0 %v2210_v24 }
  0x7b   : >> { %2104 = vmatpush3.bf16.msra.mxu1 %v2211_v26  ;;  %2093 = vmatprep.subr.bf16.mxu0 %v2241_v2 }
  0x7c   : >> { %2105 = vmatprep.subr.bf16.mxu1 %v2241_v2 }
  0x7e   : >> { %2094 = vmatpush3.bf16.msra.mxu0 %v2212_v27 }
  0x7f   : >> { %2106 = vmatpush3.bf16.msra.mxu1 %v2213_v30  ;;  %2111 = vmatprep.subr.bf16.mxu0 %v2241_v2 }
  0x80   : >> { %2123 = vmatprep.subr.bf16.mxu1 %v2241_v2 }
  0x81   : >> { %2096 = vmatmul.mubr.msk.bf16.vlgmr.msra.gmra.mxu0 %vm233_vm1, %v1805_v20 }
  0x82   : >> { %2108 = vmatmul.mubr.msk.bf16.vlgmr.msra.gmra.mxu1 %vm233_vm1, %v1253_v31  ;;  %2112 = vmatpush3.bf16.msra.mxu0 %v2215_v32 }
  0x83   : >> { %2124 = vmatpush3.bf16.msra.mxu1 %v2216_v33  ;;  %2113 = vmatprep.subr.bf16.mxu0 %v2241_v2 }
  0x84   : >> { %2125 = vmatprep.subr.bf16.mxu1 %v2241_v2  ;;  %2119 = vmatprep.mubr.msk.bf16.mxu0 %vm2242_vm0, %v2241_v2 }
  0x85   : >> { %2131 = vmatprep.mubr.msk.bf16.mxu1 %vm2242_vm0, %v2241_v2 }
  0x86   : >> { %2114 = vmatpush3.bf16.msra.mxu0 %v2217_v34 }
  0x87   : >> { %2126 = vmatpush3.bf16.msra.mxu1 %v2218_v35  ;;  %2115 = vmatprep.subr.bf16.mxu0 %v2241_v2 }
  0x88   : >> { %2127 = vmatprep.subr.bf16.mxu1 %v2241_v2 }
  0x8a   : >> { %2116 = vmatpush3.bf16.msra.mxu0 %v2219_v36 }
  0x8b   : >> { %2128 = vmatpush3.bf16.msra.mxu1 %v2220_v37  ;;  %2117 = vmatprep.subr.bf16.mxu0 %v2241_v2 }
  0x8c   : >> { %2129 = vmatprep.subr.bf16.mxu1 %v2241_v2 }
  0x8e   : >> { %2118 = vmatpush3.bf16.msra.mxu0 %v2221_v40 }
  0x8f   : >> { %2130 = vmatpush3.bf16.msra.mxu1 %v2222_v41 }
  0x91   : >> { %2120 = vmatmul.mubr.msk.bf16.vlgmr.msra.gmra.mxu0 %vm233_vm1, %v1331_v42 }
  0x92   : >> { %2132 = vmatmul.mubr.msk.bf16.vlgmr.msra.gmra.mxu1 %vm233_vm1, %v1411_v43 }
  0xe1   : >> { %v271_v44 = vpop.f32.mrf.mxu0 }
  0xe2   : >> { %v338_v45 = vpop.f32.mrf.mxu1 }
  0xe3   : >> { %v339_v46 = vadd.f32 %v338_v45, %v271_v44  ;;  %v1953_v47 = vpop.f32.mrf.mxu0 }
  0xe4   : >> { %v1965_v48 = vpop.f32.mrf.mxu1 }
  0xe5   : >> { %v274_v49 = vpop.f32.mrf.mxu0 }
  0xe6   : >> { %v341_v50 = vpop.f32.mrf.mxu1 }
  0xe7   : >> { %v1954_v51 = vpop.f32.mrf.mxu0 }
  0xe8   : >> { %v1966_v52 = vpop.f32.mrf.mxu1 }
  0xf1   : >> { %v415_v53 = vpop.f32.mrf.mxu0 }
  0xf2   : >> { %v421_v54 = vadd.f32 %v415_v53, %v339_v46  ;;  %v495_v2 = vpop.f32.mrf.mxu1 }
  0xf3   : >> { %v1977_v55 = vpop.f32.mrf.mxu0 }
  0xf4   : >> { %v501_v56 = vadd.f32 %v495_v2, %v421_v54  ;;  %v1989_v57 = vpop.f32.mrf.mxu1 }
  0xf5   : >> { %v418_v58 = vpop.f32.mrf.mxu0 }
  0xf6   : >> { %v498_v59 = vpop.f32.mrf.mxu1 }
  0xf7   : >> { %v1978_v60 = vpop.f32.mrf.mxu0 }
  0xf8   : >> { %v1990_v61 = vpop.f32.mrf.mxu1 }
 0x101   : >> { %v576_v62 = vpop.f32.mrf.mxu0 }
 0x102   : >> { %v663_v63 = vpop.f32.mrf.mxu1  ;;  %v582_v27 = vadd.f32 %v576_v62, %v501_v56 }
 0x103   : >> { %v2001_v1 = vpop.f32.mrf.mxu0 }
 0x104   : >> { %v2013_v3 = vpop.f32.mrf.mxu1  ;;  %v669_v32 = vadd.f32 %v663_v63, %v582_v27 }
 0x105   : >> { %v579_v4 = vpop.f32.mrf.mxu0 }
 0x106   : >> { %v666_v5 = vpop.f32.mrf.mxu1 }
 0x107   : >> { %v2002_v6 = vpop.f32.mrf.mxu0 }
 0x108   : >> { %v2014_v7 = vpop.f32.mrf.mxu1 }
 0x111   : >> { %v741_v8 = vpop.f32.mrf.mxu0 }
 0x112   : >> { %v821_v9 = vpop.f32.mrf.mxu1  ;;  %v747_v34 = vadd.f32 %v741_v8, %v669_v32 }
 0x113   : >> { %v2025_v10 = vpop.f32.mrf.mxu0 }
 0x114   : >> { %v2037_v11 = vpop.f32.mrf.mxu1  ;;  %v827_v35 = vadd.f32 %v821_v9, %v747_v34 }
 0x115   : >> { %v744_v12 = vpop.f32.mrf.mxu0 }
 0x116   : >> { %v824_v13 = vpop.f32.mrf.mxu1 }
 0x117   : >> { %v2026_v14 = vpop.f32.mrf.mxu0 }
 0x118   : >> { %v2038_v15 = vpop.f32.mrf.mxu1 }
 0x121   : >> { %v902_v16 = vpop.f32.mrf.mxu0 }
 0x122   : >> { %v989_v17 = vpop.f32.mrf.mxu1  ;;  %v908_v36 = vadd.f32 %v902_v16, %v827_v35 }
 0x123   : >> { %v2049_v18 = vpop.f32.mrf.mxu0 }
 0x124   : >> { %v2061_v19 = vpop.f32.mrf.mxu1  ;;  %v995_v40 = vadd.f32 %v989_v17, %v908_v36 }
 0x125   : >> { %v905_v20 = vpop.f32.mrf.mxu0 }
 0x126   : >> { %v992_v21 = vpop.f32.mrf.mxu1 }
 0x127   : >> { %v2050_v22 = vpop.f32.mrf.mxu0 }
 0x128   : >> { %v2062_v23 = vpop.f32.mrf.mxu1 }
 0x131   : >> { %v1067_v24 = vpop.f32.mrf.mxu0 }
 0x132   : >> { %v1147_v25 = vpop.f32.mrf.mxu1  ;;  %v1073_v43 = vadd.f32 %v1067_v24, %v995_v40 }
 0x133   : >> { %v2073_v26 = vpop.f32.mrf.mxu0 }
 0x134   : >> { %v2085_v28 = vpop.f32.mrf.mxu1  ;;  %v1153_v47 = vadd.f32 %v1147_v25, %v1073_v43 }
 0x135   : >> { %v1070_v29 = vpop.f32.mrf.mxu0 }
 0x136   : >> { %v1150_v30 = vpop.f32.mrf.mxu1 }
 0x137   : >> { %v2074_v31 = vpop.f32.mrf.mxu0 }
 0x138   : >> { %v2086_v33 = vpop.f32.mrf.mxu1 }
 0x141   : >> { %v1228_v37 = vpop.f32.mrf.mxu0 }
 0x142   : >> { %v1315_v38 = vpop.f32.mrf.mxu1  ;;  %v1234_v48 = vadd.f32 %v1228_v37, %v1153_v47 }
 0x143   : >> { %v2097_v39 = vpop.f32.mrf.mxu0 }
 0x144   : >> { %v2109_v41 = vpop.f32.mrf.mxu1  ;;  %v1321_v49 = vadd.f32 %v1315_v38, %v1234_v48 }
 0x145   : >> { %v1231_v42 = vpop.f32.mrf.mxu0 }
 0x146   : >> { %v1318_v44 = vpop.f32.mrf.mxu1 }
 0x147   : >> { %v2098_v45 = vpop.f32.mrf.mxu0 }
 0x148   : >> { %v2110_v46 = vpop.f32.mrf.mxu1 }
 0x151   : >> { %v1393_v50 = vpop.f32.mrf.mxu0 }
 0x152   : >> { %v1399_v51 = vadd.f32 %v1393_v50, %v1321_v49  ;;  %v1473_v52 = vpop.f32.mrf.mxu1 }
 0x153   : >> { %v2121_v53 = vpop.f32.mrf.mxu0 }
 0x154   : >> { %v1479_v54 = vadd.f32 %v1473_v52, %v1399_v51  ;;  %v2133_v2 = vpop.f32.mrf.mxu1  ;;  %177 = sbr.rel (!%p175_p4) target bundleno = 16 (0x10), region = 89 }
 0x155   : >> { %v1396_v55 = vpop.f32.mrf.mxu0 }
 0x156   : >> { %v1486_v56 = vadd.f32 %v2274_v0, %v1479_v54  ;;  %v1476_v57 = vpop.f32.mrf.mxu1 }
 0x157   : >> { %v2122_v58 = vpop.f32.mrf.mxu0 }
 0x158   : >> { %1489 = vst [vmem:[%s1488_s25] sm:$0x7] %v1486_v56  ;;  %v2134_v59 = vpop.f32.mrf.mxu1 }
 0x15f   : > { %v2623_v60 = vld [vmem:[%s2284_s23] sm:$0x7]  ;;  %v2626_v61 = vld [vmem:[%s2284_s23 + $0x4] sm:$0x7]  ;;  %v2629_v62 = vld [vmem:[%s2284_s23 + $0x8] sm:$0x7] }
 0x160   : > { %v1518_v63 = vmul.f32 %v2623_v60, %v2623_v60  ;;  %v1519_v1 = vmul.f32 %v2626_v61, %v2626_v61  ;;  %v1520_v3 = vmul.f32 %v2629_v62, %v2629_v62  ;;  %v1494_v0 = vsel %vm1493_vm2, %v2623_v60, 0.0 }
 0x161   : > { %v1501_v4 = vsel %vm1493_vm2, %v2626_v61, 0.0  ;;  %v1508_v5 = vsel %vm1493_vm2, %v2629_v62, 0.0  ;;  %v1495_v6 = vrot.slane %v1494_v0, 4 }
 0x162   : > { %v1502_v7 = vrot.slane %v1501_v4, 4  ;;  %v1509_v8 = vrot.slane %v1508_v5, 4  ;;  %v1521_v9 = vsel %vm1493_vm2, %v1518_v63, 0.0  ;;  %v1528_v11 = vsel %vm1493_vm2, %v1519_v1, 0.0 }
 0x163   : > { %v1522_v10 = vrot.slane %v1521_v9, 4  ;;  %v1535_v12 = vsel %vm1493_vm2, %v1520_v3, 0.0  ;;  %v1496_v13 = vadd.f32 %v1495_v6, %v1494_v0  ;;  %v1529_v16 = vrot.slane %v1528_v11, 4 }
 0x164   : > { %v1503_v14 = vadd.f32 %v1502_v7, %v1501_v4  ;;  %v1510_v15 = vadd.f32 %v1509_v8, %v1508_v5  ;;  %v1536_v18 = vrot.slane %v1535_v12, 4 }
 0x165   : > { %v1523_v17 = vadd.f32 %v1522_v10, %v1521_v9  ;;  %v1497_v19 = vrot.slane %v1496_v13, 2  ;;  %v1530_v22 = vadd.f32 %v1529_v16, %v1528_v11 }
 0x166   : > { %v1504_v20 = vrot.slane %v1503_v14, 2  ;;  %v1511_v21 = vrot.slane %v1510_v15, 2  ;;  %v1537_v24 = vadd.f32 %v1536_v18, %v1535_v12 }
 0x167   : > { %v1524_v23 = vrot.slane %v1523_v17, 2  ;;  %v1498_v25 = vadd.f32 %v1497_v19, %v1496_v13  ;;  %v1531_v28 = vrot.slane %v1530_v22, 2 }
 0x168   : > { %v1505_v26 = vadd.f32 %v1504_v20, %v1503_v14  ;;  %v1512_v27 = vadd.f32 %v1511_v21, %v1510_v15  ;;  %v1538_v30 = vrot.slane %v1537_v24, 2 }
 0x169   : > { %v1525_v29 = vadd.f32 %v1524_v23, %v1523_v17  ;;  %v1499_v31 = vrot.slane %v1498_v25, 1  ;;  %v1532_v34 = vadd.f32 %v1531_v28, %v1530_v22 }
 0x16a   : > { %v1506_v32 = vrot.slane %v1505_v26, 1  ;;  %v1513_v33 = vrot.slane %v1512_v27, 1  ;;  %v1539_v36 = vadd.f32 %v1538_v30, %v1537_v24 }
 0x16b   : > { %v1526_v35 = vrot.slane %v1525_v29, 1  ;;  %v1500_v37 = vadd.f32 %v1499_v31, %v1498_v25  ;;  %v1533_v40 = vrot.slane %v1532_v34, 1 }
 0x16c   : > { %v1507_v38 = vadd.f32 %v1506_v32, %v1505_v26  ;;  %v1514_v39 = vadd.f32 %v1513_v33, %v1512_v27  ;;  %v1540_v42 = vrot.slane %v1539_v36, 1 }
 0x16d   : > { %v1527_v41 = vadd.f32 %v1526_v35, %v1525_v29  ;;  %v1534_v44 = vadd.f32 %v1533_v40, %v1532_v34 }
 0x16e   : > { %v1515_v43 = vadd.f32 %v1507_v38, %v1500_v37  ;;  %v1541_v45 = vadd.f32 %v1540_v42, %v1539_v36 }
 0x16f   : > { %v1542_v47 = vadd.f32 %v1534_v44, %v1527_v41 }
 0x170   : > { %v1516_v46 = vadd.f32 %v1515_v43, %v1514_v39 }
 0x171   : > { %v1543_v49 = vadd.f32 %v1542_v47, %v1541_v45 }
 0x172   : > { %v1517_v48 = vmul.f32 0.11111111, %v1516_v46 }
 0x173   : > { %v1544_v50 = vmul.f32 0.11111111, %v1543_v49 }
 0x174   : > { %v1545_v51 = vmul.f32 %v1517_v48, %v1517_v48  ;;  %v1548_v2 = vsub.f32 %v2623_v60, %v1517_v48  ;;  %v1549_v55 = vsub.f32 %v2626_v61, %v1517_v48  ;;  %v1550_v56 = vsub.f32 %v2629_v62, %v1517_v48 }
 0x176   : > { %v1546_v52 = vsub.f32 %v1544_v50, %v1545_v51 }
 0x178   : > { %v1547_v53 = vmax.f32 %v1546_v52, 0.0 }
 0x17a   : > { %v1551_v54 = vadd.f32 1e-05, %v1547_v53 }
 0x17c   : > { %2223 = vrsqrt.f32 %v1551_v54 }
 0x189   : > { %v2224_v57 = vpop.eup %2223 }
 0x18a   : > { %v1553_v58 = vmul.f32 %v2224_v57, %v1548_v2  ;;  %v1554_v59 = vmul.f32 %v2224_v57, %v1549_v55  ;;  %v1555_v63 = vmul.f32 %v2224_v57, %v1550_v56 }
 0x18c   : > { %vm1556_vm3 = vcmp.ge.f32.partialorder %v1553_v58, 0.0  ;;  %v1559_v1 = vmul.f32 0.2, %v1553_v58  ;;  %vm1557_vm4 = vcmp.ge.f32.partialorder %v1554_v59, 0.0  ;;  %v1560_v3 = vmul.f32 0.2, %v1554_v59 }
 0x18d   : > { %vm1558_vm5 = vcmp.ge.f32.partialorder %v1555_v63, 0.0  ;;  %v1561_v0 = vmul.f32 0.2, %v1555_v63 }
 0x18e   : > { %v1562_v4 = vsel %vm1556_vm3, %v1553_v58, %v1559_v1  ;;  %v1563_v5 = vsel %vm1557_vm4, %v1554_v59, %v1560_v3 }
 0x18f   : > { %1565 = vst [vmem:[%s2284_s23] sm:$0x7] %v1562_v4  ;;  %1566 = vst [vmem:[%s2284_s23 + $0x4] sm:$0x7] %v1563_v5  ;;  %v1564_v60 = vsel %vm1558_vm5, %v1555_v63, %v1561_v0 }
 0x190   : > { %1567 = vst [vmem:[%s2284_s23 + $0x8] sm:$0x7] %v1564_v60 }
 0x191 PF: > { %s13_s12 = sadd.s32 1, %s2235_s12  }
 0x192   : > { %p10_p5 = scmp.ge.s32.totalorder %s13_s12, 4  }
 0x194   :  { %12 = sbr.rel (!%p10_p5) target bundleno = 1 (0x1), region = 100 }

// kernel: _lambda_.21
= control target key start
LH: loop header
LB: loop body
LE: loop exit
PB: predicated region body
PF: predicated region fallthrough
CT: control target
= control target key end

     0   :  { %s3089_s14 = smov 0   ;;  %s3707_s0 = inlined_call_operand.vmem [shape: bf16[2,5,5,128], index: 0, kind: input, shape index: {}]   ;;  %s3708_s1 = inlined_call_operand.vmem [shape: bf16[16,128,1], index: 1, kind: input, shape index: {}]   ;;  %s3709_s2 = inlined_call_operand.<no memory space> [shape: f32[1,1], index: 2, kind: input, shape index: {}]   ;;  %s3710_s3 = inlined_call_operand.vmem [shape: f32[2,2,2,1], index: 3, kind: output, shape index: {}]  }
   0x1   :  { %v8_v0 = vstv %s3709_s2 }
   0x2   :  { %9 = vst [vmem:[#allocation2] sm:$0x1] %v8_v0 }
   0x3 LB: > { %s2041_s15 = sadd.s32 4294967295, %s3058_s14   ;;  %p2045_p0 = scmp.ge.s32.totalorder %s3058_s14, 1  ;;  %s3058_s14 = sphi %s3089_s14, %s15_s14  }
   0x4   : > { %p139_p1 = scmp.lt.s32.totalorder %s3058_s14, 3 }
   0x6   : > { %p140_p2 = pnand %p2045_p0, %p139_p1 }
   0x7   : > { %p163_p3 = scmp.lt.s32.totalorder (!%p140_p2), %s2041_s15, 1  ;;  %s3109_s23 = smov (!%p140_p2), 0  }
   0x8   : > { %143 = sbr.rel (%p140_p2) target bundleno = 474 (0x1da), region = 32 }
   0xd   : > { %v3097_v1 = vld [vmem:[#allocation2] ss:$0 sm:$0xff]  ;;  %s3712_s15 = smov (!%p163_p3, %s2041_s15), 1 }
   0xe   : > { %s2897_s2 = smul.u32 20, %s3712_s15  ;;  %s2432_s16 = sshll.u32 %s3712_s15, 2 }
   0xf   : > { %s3102_s19 = scalar_lea.vmem %s3710_s3, %s2432_s16 }
  0x10   : > { %s3107_s22 = scalar_lea.vmem %s3707_s0, %s2897_s2 }
  0x11 LB: >> { %v2916_v2 = vld [vmem:[%s3708_s1 + $0x78] sm:$0xff]   ;;  %v3064_v3 = vmov 0.0   ;;  %v2918_v5 = vld [vmem:[%s3708_s1 + $0x70] sm:$0xff]   ;;  %vm3065_vm0 = vmmov 0   ;;  %v2920_v7 = vld [vmem:[%s3708_s1 + $0x68] sm:$0xff]   ;;  %s2049_s11 = sshll.u32 %s3062_s23, 2  ;;  %s3062_s23 = sphi %s3109_s23, %s180_s23  }
  0x12   : >> { %2577 = vmatprep.subr.bf16.mxu0 %v3064_v3  ;;  %2597 = vmatprep.subr.bf16.mxu1 %v3064_v3  ;;  %v2917_v4 = vld [vmem:[%s3708_s1 + $0x38] sm:$0xff]   ;;  %v2919_v6 = vld [vmem:[%s3708_s1 + $0x30] sm:$0xff]   ;;  %v2921_v8 = vld [vmem:[%s3708_s1 + $0x28] sm:$0xff]   ;;  %s3152_s15 = scalar_lea.vmem %s3107_s22, %s2049_s11  ;;  %s2429_s26 = sshll.u32 %s3062_s23, 1  ;;  %vm1966_vm1 = vcmask 1024  }
  0x13   : >> { %2578 = vmatpush3.bf16.msra.mxu0 %v2916_v2  ;;  %2593 = vmatprep.mubr.msk.bf16.mxu0 %vm3065_vm0, %v3064_v3  ;;  %v2922_v9 = vld [vmem:[%s3708_s1 + $0x60] sm:$0xff]   ;;  %v2924_v11 = vld [vmem:[%s3708_s1 + $0x58] sm:$0xff]   ;;  %v2926_v15 = vld [vmem:[%s3708_s1 + $0x50] sm:$0xff]   ;;  %s1965_s27 = scalar_lea.vmem %s3102_s19, %s2429_s26  ;;  %s180_s23 = sadd.s32 1, %s3062_s23  }
  0x14   : >> { %2598 = vmatpush3.bf16.msra.mxu1 %v2917_v4  ;;  %2579 = vmatprep.subr.bf16.mxu0 %v3064_v3  ;;  %v2923_v10 = vld [vmem:[%s3708_s1 + $0x20] sm:$0xff]   ;;  %v2925_v12 = vld [vmem:[%s3708_s1 + $0x18] sm:$0xff]   ;;  %v2927_v16 = vld [vmem:[%s3708_s1 + $0x10] sm:$0xff]   ;;  %p177_p4 = scmp.ge.s32.totalorder %s180_s23, 2  }
  0x15   : >> { %2599 = vmatprep.subr.bf16.mxu1 %v3064_v3  ;;  %2613 = vmatprep.mubr.msk.bf16.mxu1 %vm3065_vm0, %v3064_v3  ;;  %v183_v13 = vld [vmem:[%s3152_s15] sm:$0x7]  ;;  %v2928_v17 = vld [vmem:[%s3708_s1 + $0x48] sm:$0xff]   ;;  %v2933_v25 = vld [vmem:[%s3708_s1 + $0xb8] sm:$0xff]  }
  0x16   : >> { %v3163_v14 = vcombine.low %v183_v13, %v183_v13  ;;  %v2929_v19 = vld [vmem:[%s3708_s1 + $0x8] sm:$0xff]   ;;  %v2930_v22 = vld [vmem:[%s3708_s1 + $0x40] sm:$0xff]   ;;  %v2934_v26 = vld [vmem:[%s3708_s1 + $0xf8] sm:$0xff]  }
  0x17   : >> { %2580 = vmatpush3.bf16.msra.mxu0 %v2918_v5  ;;  %v2931_v23 = vld [vmem:[%s3708_s1] sm:$0xff]   ;;  %v2935_v27 = vld [vmem:[%s3708_s1 + $0xb0] sm:$0xff]   ;;  %v2937_v29 = vld [vmem:[%s3708_s1 + $0xa8] sm:$0xff]  }
  0x18   : >> { %2600 = vmatpush3.bf16.msra.mxu1 %v2919_v6  ;;  %2581 = vmatprep.subr.bf16.mxu0 %v3064_v3  ;;  %v223_v18 = vshll.u32 %v3163_v14, 16  ;;  %v221_v20 = vshrl.u32 %v3163_v14, 16  ;;  %v2936_v28 = vld [vmem:[%s3708_s1 + $0xf0] sm:$0xff]   ;;  %v2938_v30 = vld [vmem:[%s3708_s1 + $0xe8] sm:$0xff]   ;;  %v2939_v31 = vld [vmem:[%s3708_s1 + $0xa0] sm:$0xff]   ;;  %v421_v43 = vrot.slane %v3163_v14, 1 }
  0x19   : >> { %2601 = vmatprep.subr.bf16.mxu1 %v3064_v3  ;;  %v2940_v32 = vld [vmem:[%s3708_s1 + $0xe0] sm:$0xff]   ;;  %v2941_v33 = vld [vmem:[%s3708_s1 + $0x98] sm:$0xff]   ;;  %v2943_v35 = vld [vmem:[%s3708_s1 + $0x90] sm:$0xff]  }
  0x1a   : >> { %v225_v21 = vrot.slane %v223_v18, 1  ;;  %v2942_v34 = vld [vmem:[%s3708_s1 + $0xd8] sm:$0xff]   ;;  %v2944_v36 = vld [vmem:[%s3708_s1 + $0xd0] sm:$0xff]   ;;  %v2945_v37 = vld [vmem:[%s3708_s1 + $0x88] sm:$0xff]   ;;  %v529_v39 = vrot.slane %v221_v20, 1  ;;  %v530_v41 = vrot.slane %v223_v18, 2 }
  0x1b   : >> { %2582 = vmatpush3.bf16.msra.mxu0 %v2920_v7  ;;  %v2946_v38 = vld [vmem:[%s3708_s1 + $0xc8] sm:$0xff]   ;;  %v2947_v40 = vld [vmem:[%s3708_s1 + $0x80] sm:$0xff]   ;;  %v2949_v45 = vld [vmem:[%s3708_s1 + $0x138] sm:$0xff]  }
  0x1c   : >> { %2602 = vmatpush3.bf16.msra.mxu1 %v2921_v8  ;;  %2583 = vmatprep.subr.bf16.mxu0 %v3064_v3  ;;  %v226_v24 = vor.u32 %v225_v21, %v221_v20  ;;  %v2948_v42 = vld [vmem:[%s3708_s1 + $0xc0] sm:$0xff]   ;;  %v531_v44 = vor.u32 %v530_v41, %v529_v39  ;;  %v2950_v46 = vld [vmem:[%s3708_s1 + $0x178] sm:$0xff]   ;;  %v2951_v47 = vld [vmem:[%s3708_s1 + $0x130] sm:$0xff]  }
  0x1d   : >> { %2603 = vmatprep.subr.bf16.mxu1 %v3064_v3  ;;  %v2952_v48 = vld [vmem:[%s3708_s1 + $0x170] sm:$0xff]   ;;  %v2953_v49 = vld [vmem:[%s3708_s1 + $0x128] sm:$0xff]   ;;  %v2955_v51 = vld [vmem:[%s3708_s1 + $0x120] sm:$0xff]  }
  0x1e   : >> { %v2954_v50 = vld [vmem:[%s3708_s1 + $0x168] sm:$0xff]   ;;  %v2956_v52 = vld [vmem:[%s3708_s1 + $0x160] sm:$0xff]   ;;  %v2957_v53 = vld [vmem:[%s3708_s1 + $0x118] sm:$0xff]  }
  0x1f   : >> { %2584 = vmatpush3.bf16.msra.mxu0 %v2922_v9  ;;  %v2958_v54 = vld [vmem:[%s3708_s1 + $0x158] sm:$0xff]   ;;  %v2132_v55 = vld [vmem:[%s3152_s15 + $0x4] sm:$0x7]  ;;  %v2959_v56 = vld [vmem:[%s3708_s1 + $0x110] sm:$0xff]  }
  0x20   : >> { %2604 = vmatpush3.bf16.msra.mxu1 %v2923_v10  ;;  %2585 = vmatprep.subr.bf16.mxu0 %v3064_v3  ;;  %v3312_v57 = vcombine.low %v2132_v55, %v2132_v55  ;;  %v2960_v58 = vld [vmem:[%s3708_s1 + $0x150] sm:$0xff]   ;;  %v2961_v59 = vld [vmem:[%s3708_s1 + $0x108] sm:$0xff]   ;;  %v2963_v62 = vld [vmem:[%s3708_s1 + $0x100] sm:$0xff]  }
  0x21   : >> { %2605 = vmatprep.subr.bf16.mxu1 %v3064_v3  ;;  %v2962_v61 = vld [vmem:[%s3708_s1 + $0x148] sm:$0xff]   ;;  %v2964_v2 = vld [vmem:[%s3708_s1 + $0x140] sm:$0xff]   ;;  %v2966_v5 = vld [vmem:[%s3708_s1 + $0x1b8] sm:$0xff]  }
  0x22   : >> { %v755_v60 = vshll.u32 %v3312_v57, 16  ;;  %v753_v63 = vshrl.u32 %v3312_v57, 16  ;;  %v2967_v6 = vld [vmem:[%s3708_s1 + $0x1f8] sm:$0xff]   ;;  %v2968_v7 = vld [vmem:[%s3708_s1 + $0x1b0] sm:$0xff]   ;;  %v2970_v9 = vld [vmem:[%s3708_s1 + $0x1a8] sm:$0xff]  }
  0x23   : >> { %2586 = vmatpush3.bf16.msra.mxu0 %v2924_v11  ;;  %v2969_v8 = vld [vmem:[%s3708_s1 + $0x1f0] sm:$0xff]   ;;  %v2971_v10 = vld [vmem:[%s3708_s1 + $0x1e8] sm:$0xff]   ;;  %v2972_v11 = vld [vmem:[%s3708_s1 + $0x1a0] sm:$0xff]  }
  0x24   : >> { %2606 = vmatpush3.bf16.msra.mxu1 %v2925_v12  ;;  %2587 = vmatprep.subr.bf16.mxu0 %v3064_v3  ;;  %v757_v0 = vrot.slane %v755_v60, 1  ;;  %v2973_v12 = vld [vmem:[%s3708_s1 + $0x1e0] sm:$0xff]   ;;  %v2975_v14 = vld [vmem:[%s3708_s1 + $0x1d8] sm:$0xff]   ;;  %v2979_v18 = vld [vmem:[%s3708_s1 + $0x1c8] sm:$0xff]   ;;  %v975_v21 = vrot.slane %v755_v60, 2 }
  0x25   : >> { %2607 = vmatprep.subr.bf16.mxu1 %v3064_v3  ;;  %v2980_v20 = vld [vmem:[%s3708_s1 + $0x180] sm:$0xff]   ;;  %v2994_v39 = vld [vmem:[%s3708_s1 + $0x208] sm:$0xff]  }
  0x26   : >> { %v758_v4 = vor.u32 %v757_v0, %v753_v63  ;;  %v2995_v41 = vld [vmem:[%s3708_s1 + $0x248] sm:$0xff]   ;;  %v3014_v0 = vld [vmem:[%s3708_s1 + $0x2c0] sm:$0xff]  }
  0x27   : >> { %2588 = vmatpush3.bf16.msra.mxu0 %v2926_v15  ;;  %v2976_v15 = vld [vmem:[%s3708_s1 + $0x190] sm:$0xff]   ;;  %v3012_v60 = vld [vmem:[%s3708_s1 + $0x2c8] sm:$0xff]  }
  0x28   : >> { %2608 = vmatpush3.bf16.msra.mxu1 %v2927_v16  ;;  %2589 = vmatprep.subr.bf16.mxu0 %v3064_v3  ;;  %v2977_v16 = vld [vmem:[%s3708_s1 + $0x1d0] sm:$0xff]  }
  0x29   : >> { %2609 = vmatprep.subr.bf16.mxu1 %v3064_v3 }
  0x2b   : >> { %2590 = vmatpush3.bf16.msra.mxu0 %v2928_v17  ;;  %v2978_v17 = vld [vmem:[%s3708_s1 + $0x188] sm:$0xff]  }
  0x2c   : >> { %2610 = vmatpush3.bf16.msra.mxu1 %v2929_v19  ;;  %2591 = vmatprep.subr.bf16.mxu0 %v3064_v3  ;;  %v974_v19 = vrot.slane %v753_v63, 1 }
  0x2d   : >> { %2611 = vmatprep.subr.bf16.mxu1 %v3064_v3 }
  0x2f   : >> { %2592 = vmatpush3.bf16.msra.mxu0 %v2930_v22  ;;  %v2981_v22 = vld [vmem:[%s3708_s1 + $0x1c0] sm:$0xff]  }
  0x30   : >> { %2612 = vmatpush3.bf16.msra.mxu1 %v2931_v23  ;;  %2617 = vmatprep.subr.bf16.mxu0 %v3064_v3  ;;  %v866_v23 = vrot.slane %v3312_v57, 1  ;;  %v3009_v57 = vld [vmem:[%s3708_s1 + $0x290] sm:$0xff]  }
  0x31   : >> { %2637 = vmatprep.subr.bf16.mxu1 %v3064_v3 }
  0x32   : >> { %2594 = vmatmul.mubr.bf16.vlgmr.msra.gmra.mxu0 %v226_v24  ;;  %v976_v24 = vor.u32 %v975_v21, %v974_v19  ;;  %v3027_v19 = vld [vmem:[%s3708_s1 + $0x308] sm:$0xff]  }
  0x33   : >> { %2614 = vmatmul.mubr.bf16.vlgmr.msra.gmra.mxu1 %v183_v13  ;;  %2618 = vmatpush3.bf16.msra.mxu0 %v2933_v25  ;;  %v2974_v13 = vld [vmem:[%s3708_s1 + $0x198] sm:$0xff]   ;;  %v3028_v21 = vld [vmem:[%s3708_s1 + $0x348] sm:$0xff]  }
  0x34   : >> { %2638 = vmatpush3.bf16.msra.mxu1 %v2934_v26  ;;  %2619 = vmatprep.subr.bf16.mxu0 %v3064_v3  ;;  %v2982_v25 = vld [vmem:[%s3708_s1 + $0x238] sm:$0xff]  }
  0x35   : >> { %2639 = vmatprep.subr.bf16.mxu1 %v3064_v3  ;;  %2633 = vmatprep.mubr.msk.bf16.mxu0 %vm3065_vm0, %v3064_v3  ;;  %v2983_v26 = vld [vmem:[%s3708_s1 + $0x278] sm:$0xff]  }
  0x36   : >> { %2653 = vmatprep.mubr.msk.bf16.mxu1 %vm3065_vm0, %v3064_v3 }
  0x37   : >> { %2620 = vmatpush3.bf16.msra.mxu0 %v2935_v27  ;;  %v2984_v27 = vld [vmem:[%s3708_s1 + $0x230] sm:$0xff]  }
  0x38   : >> { %2640 = vmatpush3.bf16.msra.mxu1 %v2936_v28  ;;  %2621 = vmatprep.subr.bf16.mxu0 %v3064_v3  ;;  %v2985_v28 = vld [vmem:[%s3708_s1 + $0x270] sm:$0xff]  }
  0x39   : >> { %2641 = vmatprep.subr.bf16.mxu1 %v3064_v3 }
  0x3b   : >> { %2622 = vmatpush3.bf16.msra.mxu0 %v2937_v29  ;;  %v2986_v29 = vld [vmem:[%s3708_s1 + $0x228] sm:$0xff]  }
  0x3c   : >> { %2642 = vmatpush3.bf16.msra.mxu1 %v2938_v30  ;;  %2623 = vmatprep.subr.bf16.mxu0 %v3064_v3  ;;  %v2987_v30 = vld [vmem:[%s3708_s1 + $0x268] sm:$0xff]  }
  0x3d   : >> { %2643 = vmatprep.subr.bf16.mxu1 %v3064_v3 }
  0x3f   : >> { %2624 = vmatpush3.bf16.msra.mxu0 %v2939_v31  ;;  %v2988_v31 = vld [vmem:[%s3708_s1 + $0x220] sm:$0xff]  }
  0x40   : >> { %2644 = vmatpush3.bf16.msra.mxu1 %v2940_v32  ;;  %2625 = vmatprep.subr.bf16.mxu0 %v3064_v3  ;;  %v2989_v32 = vld [vmem:[%s3708_s1 + $0x260] sm:$0xff]  }
  0x41   : >> { %2645 = vmatprep.subr.bf16.mxu1 %v3064_v3 }
  0x43   : >> { %2626 = vmatpush3.bf16.msra.mxu0 %v2941_v33  ;;  %v2990_v33 = vld [vmem:[%s3708_s1 + $0x218] sm:$0xff]  }
  0x44   : >> { %2646 = vmatpush3.bf16.msra.mxu1 %v2942_v34  ;;  %2627 = vmatprep.subr.bf16.mxu0 %v3064_v3  ;;  %v2991_v34 = vld [vmem:[%s3708_s1 + $0x258] sm:$0xff]  }
  0x45   : >> { %2647 = vmatprep.subr.bf16.mxu1 %v3064_v3 }
  0x47   : >> { %2628 = vmatpush3.bf16.msra.mxu0 %v2943_v35  ;;  %v2231_v35 = vld [vmem:[%s3152_s15 + $0x8] sm:$0x7] }
  0x48   : >> { %2648 = vmatpush3.bf16.msra.mxu1 %v2944_v36  ;;  %2629 = vmatprep.subr.bf16.mxu0 %v3064_v3  ;;  %v2992_v36 = vld [vmem:[%s3708_s1 + $0x210] sm:$0xff]  }
  0x49   : >> { %2649 = vmatprep.subr.bf16.mxu1 %v3064_v3 }
  0x4b   : >> { %2630 = vmatpush3.bf16.msra.mxu0 %v2945_v37  ;;  %v3454_v37 = vcombine.low %v2231_v35, %v2231_v35 }
  0x4c   : >> { %2650 = vmatpush3.bf16.msra.mxu1 %v2946_v38  ;;  %2631 = vmatprep.subr.bf16.mxu0 %v3064_v3  ;;  %v2993_v38 = vld [vmem:[%s3708_s1 + $0x250] sm:$0xff]  }
  0x4d   : >> { %2651 = vmatprep.subr.bf16.mxu1 %v3064_v3 }
  0x4f   : >> { %2632 = vmatpush3.bf16.msra.mxu0 %v2947_v40  ;;  %v1200_v40 = vshll.u32 %v3454_v37, 16 }
  0x50   : >> { %2652 = vmatpush3.bf16.msra.mxu1 %v2948_v42  ;;  %2657 = vmatprep.subr.bf16.mxu0 %v3064_v3  ;;  %v2996_v42 = vld [vmem:[%s3708_s1 + $0x200] sm:$0xff]  }
  0x51   : >> { %2677 = vmatprep.subr.bf16.mxu1 %v3064_v3  ;;  %v1420_v63 = vrot.slane %v1200_v40, 2 }
  0x52   : >> { %2634 = vmatmul.mubr.bf16.vlgmr.msra.gmra.mxu0 %v421_v43  ;;  %v1198_v43 = vshrl.u32 %v3454_v37, 16 }
  0x53   : >> { %2654 = vmatmul.mubr.bf16.vlgmr.msra.gmra.mxu1 %v531_v44  ;;  %2658 = vmatpush3.bf16.msra.mxu0 %v2949_v45  ;;  %v1202_v44 = vrot.slane %v1200_v40, 1  ;;  %v2997_v45 = vld [vmem:[%s3708_s1 + $0x240] sm:$0xff]   ;;  %v3037_v40 = vld [vmem:[%s3708_s1 + $0x3e8] sm:$0xff]  }
  0x54   : >> { %2678 = vmatpush3.bf16.msra.mxu1 %v2950_v46  ;;  %2659 = vmatprep.subr.bf16.mxu0 %v3064_v3 }
  0x55   : >> { %2679 = vmatprep.subr.bf16.mxu1 %v3064_v3  ;;  %2673 = vmatprep.mubr.msk.bf16.mxu0 %vm3065_vm0, %v3064_v3  ;;  %v1203_v46 = vor.u32 %v1202_v44, %v1198_v43  ;;  %v3040_v44 = vld [vmem:[%s3708_s1 + $0x398] sm:$0xff]  }
  0x56   : >> { %2693 = vmatprep.mubr.msk.bf16.mxu1 %vm3065_vm0, %v3064_v3 }
  0x57   : >> { %2660 = vmatpush3.bf16.msra.mxu0 %v2951_v47  ;;  %v2999_v47 = vld [vmem:[%s3708_s1 + $0x2b8] sm:$0xff]  }
  0x58   : >> { %2680 = vmatpush3.bf16.msra.mxu1 %v2952_v48  ;;  %2661 = vmatprep.subr.bf16.mxu0 %v3064_v3  ;;  %v3000_v48 = vld [vmem:[%s3708_s1 + $0x2f8] sm:$0xff]  }
  0x59   : >> { %2681 = vmatprep.subr.bf16.mxu1 %v3064_v3 }
  0x5b   : >> { %2662 = vmatpush3.bf16.msra.mxu0 %v2953_v49  ;;  %v3001_v49 = vld [vmem:[%s3708_s1 + $0x2b0] sm:$0xff]  }
  0x5c   : >> { %2682 = vmatpush3.bf16.msra.mxu1 %v2954_v50  ;;  %2663 = vmatprep.subr.bf16.mxu0 %v3064_v3  ;;  %v3002_v50 = vld [vmem:[%s3708_s1 + $0x2f0] sm:$0xff]  }
  0x5d   : >> { %2683 = vmatprep.subr.bf16.mxu1 %v3064_v3 }
  0x5f   : >> { %2664 = vmatpush3.bf16.msra.mxu0 %v2955_v51  ;;  %v3003_v51 = vld [vmem:[%s3708_s1 + $0x2a8] sm:$0xff]  }
  0x60   : >> { %2684 = vmatpush3.bf16.msra.mxu1 %v2956_v52  ;;  %2665 = vmatprep.subr.bf16.mxu0 %v3064_v3  ;;  %v3004_v52 = vld [vmem:[%s3708_s1 + $0x2e8] sm:$0xff]  }
  0x61   : >> { %2685 = vmatprep.subr.bf16.mxu1 %v3064_v3 }
  0x63   : >> { %2666 = vmatpush3.bf16.msra.mxu0 %v2957_v53  ;;  %v3005_v53 = vld [vmem:[%s3708_s1 + $0x2a0] sm:$0xff]  }
  0x64   : >> { %2686 = vmatpush3.bf16.msra.mxu1 %v2958_v54  ;;  %2667 = vmatprep.subr.bf16.mxu0 %v3064_v3  ;;  %v3006_v54 = vld [vmem:[%s3708_s1 + $0x2e0] sm:$0xff]  }
  0x65   : >> { %2687 = vmatprep.subr.bf16.mxu1 %v3064_v3 }
  0x67   : >> { %2668 = vmatpush3.bf16.msra.mxu0 %v2959_v56  ;;  %v3008_v56 = vld [vmem:[%s3708_s1 + $0x2d8] sm:$0xff]  }
  0x68   : >> { %2688 = vmatpush3.bf16.msra.mxu1 %v2960_v58  ;;  %2669 = vmatprep.subr.bf16.mxu0 %v3064_v3  ;;  %v3010_v58 = vld [vmem:[%s3708_s1 + $0x2d0] sm:$0xff]  }
  0x69   : >> { %2689 = vmatprep.subr.bf16.mxu1 %v3064_v3 }
  0x6b   : >> { %2670 = vmatpush3.bf16.msra.mxu0 %v2961_v59  ;;  %v3011_v59 = vld [vmem:[%s3708_s1 + $0x288] sm:$0xff]  }
  0x6c   : >> { %2690 = vmatpush3.bf16.msra.mxu1 %v2962_v61  ;;  %2671 = vmatprep.subr.bf16.mxu0 %v3064_v3  ;;  %v3013_v61 = vld [vmem:[%s3708_s1 + $0x280] sm:$0xff]  }
  0x6d   : >> { %2691 = vmatprep.subr.bf16.mxu1 %v3064_v3 }
  0x6f   : >> { %2672 = vmatpush3.bf16.msra.mxu0 %v2963_v62  ;;  %v1419_v62 = vrot.slane %v1198_v43, 1  ;;  %v3039_v43 = vld [vmem:[%s3708_s1 + $0x3e0] sm:$0xff]  }
  0x70   : >> { %2692 = vmatpush3.bf16.msra.mxu1 %v2964_v2  ;;  %2697 = vmatprep.subr.bf16.mxu0 %v3064_v3  ;;  %v1311_v2 = vrot.slane %v3454_v37, 1 }
  0x71   : >> { %2717 = vmatprep.subr.bf16.mxu1 %v3064_v3 }
  0x72   : >> { %2674 = vmatmul.mubr.bf16.vlgmr.msra.gmra.mxu0 %v2132_v55  ;;  %v3007_v55 = vld [vmem:[%s3708_s1 + $0x298] sm:$0xff]  }
  0x73   : >> { %2694 = vmatmul.mubr.bf16.vlgmr.msra.gmra.mxu1 %v758_v4  ;;  %2698 = vmatpush3.bf16.msra.mxu0 %v2966_v5  ;;  %v1421_v4 = vor.u32 %v1420_v63, %v1419_v62  ;;  %v3015_v5 = vld [vmem:[%s3708_s1 + $0x338] sm:$0xff]  }
  0x74   : >> { %2718 = vmatpush3.bf16.msra.mxu1 %v2967_v6  ;;  %2699 = vmatprep.subr.bf16.mxu0 %v3064_v3  ;;  %v3016_v6 = vld [vmem:[%s3708_s1 + $0x378] sm:$0xff]  }
  0x75   : >> { %2719 = vmatprep.subr.bf16.mxu1 %v3064_v3  ;;  %2713 = vmatprep.mubr.msk.bf16.mxu0 %vm3065_vm0, %v3064_v3 }
  0x76   : >> { %2733 = vmatprep.mubr.msk.bf16.mxu1 %vm3065_vm0, %v3064_v3 }
  0x77   : >> { %2700 = vmatpush3.bf16.msra.mxu0 %v2968_v7  ;;  %v3017_v7 = vld [vmem:[%s3708_s1 + $0x330] sm:$0xff]  }
  0x78   : >> { %2720 = vmatpush3.bf16.msra.mxu1 %v2969_v8  ;;  %2701 = vmatprep.subr.bf16.mxu0 %v3064_v3  ;;  %v3018_v8 = vld [vmem:[%s3708_s1 + $0x370] sm:$0xff]  }
  0x79   : >> { %2721 = vmatprep.subr.bf16.mxu1 %v3064_v3 }
  0x7b   : >> { %2702 = vmatpush3.bf16.msra.mxu0 %v2970_v9  ;;  %v3019_v9 = vld [vmem:[%s3708_s1 + $0x328] sm:$0xff]  }
  0x7c   : >> { %2722 = vmatpush3.bf16.msra.mxu1 %v2971_v10  ;;  %2703 = vmatprep.subr.bf16.mxu0 %v3064_v3  ;;  %v3020_v10 = vld [vmem:[%s3708_s1 + $0x368] sm:$0xff]  }
  0x7d   : >> { %2723 = vmatprep.subr.bf16.mxu1 %v3064_v3 }
  0x7f   : >> { %2704 = vmatpush3.bf16.msra.mxu0 %v2972_v11  ;;  %v3021_v11 = vld [vmem:[%s3708_s1 + $0x320] sm:$0xff]  }
  0x80   : >> { %2724 = vmatpush3.bf16.msra.mxu1 %v2973_v12  ;;  %2705 = vmatprep.subr.bf16.mxu0 %v3064_v3  ;;  %v3022_v12 = vld [vmem:[%s3708_s1 + $0x360] sm:$0xff]  }
  0x81   : >> { %2725 = vmatprep.subr.bf16.mxu1 %v3064_v3 }
  0x83   : >> { %2706 = vmatpush3.bf16.msra.mxu0 %v2974_v13  ;;  %v3023_v13 = vld [vmem:[%s3708_s1 + $0x318] sm:$0xff]  }
  0x84   : >> { %2726 = vmatpush3.bf16.msra.mxu1 %v2975_v14  ;;  %2707 = vmatprep.subr.bf16.mxu0 %v3064_v3  ;;  %v3024_v14 = vld [vmem:[%s3708_s1 + $0x358] sm:$0xff]  }
  0x85   : >> { %2727 = vmatprep.subr.bf16.mxu1 %v3064_v3 }
  0x87   : >> { %2708 = vmatpush3.bf16.msra.mxu0 %v2976_v15  ;;  %v2330_v15 = vld [vmem:[%s3152_s15 + $0xc] sm:$0x7] }
  0x88   : >> { %2728 = vmatpush3.bf16.msra.mxu1 %v2977_v16  ;;  %2709 = vmatprep.subr.bf16.mxu0 %v3064_v3  ;;  %v3025_v16 = vld [vmem:[%s3708_s1 + $0x310] sm:$0xff]  }
  0x89   : >> { %2729 = vmatprep.subr.bf16.mxu1 %v3064_v3 }
  0x8b   : >> { %2710 = vmatpush3.bf16.msra.mxu0 %v2978_v17  ;;  %v3596_v17 = vcombine.low %v2330_v15, %v2330_v15 }
  0x8c   : >> { %2730 = vmatpush3.bf16.msra.mxu1 %v2979_v18  ;;  %2711 = vmatprep.subr.bf16.mxu0 %v3064_v3  ;;  %v3026_v18 = vld [vmem:[%s3708_s1 + $0x350] sm:$0xff]  }
  0x8d   : >> { %2731 = vmatprep.subr.bf16.mxu1 %v3064_v3 }
  0x8f   : >> { %2712 = vmatpush3.bf16.msra.mxu0 %v2980_v20  ;;  %v1645_v20 = vshll.u32 %v3596_v17, 16 }
  0x90   : >> { %2732 = vmatpush3.bf16.msra.mxu1 %v2981_v22  ;;  %2737 = vmatprep.subr.bf16.mxu0 %v3064_v3  ;;  %v3029_v22 = vld [vmem:[%s3708_s1 + $0x300] sm:$0xff]  }
  0x91   : >> { %2757 = vmatprep.subr.bf16.mxu1 %v3064_v3 }
  0x92   : >> { %2714 = vmatmul.mubr.bf16.vlgmr.msra.gmra.mxu0 %v866_v23  ;;  %v1643_v23 = vshrl.u32 %v3596_v17, 16 }
  0x93   : >> { %2734 = vmatmul.mubr.bf16.vlgmr.msra.gmra.mxu1 %v976_v24  ;;  %2738 = vmatpush3.bf16.msra.mxu0 %v2982_v25  ;;  %v1647_v24 = vrot.slane %v1645_v20, 1  ;;  %v3030_v25 = vld [vmem:[%s3708_s1 + $0x340] sm:$0xff]  }
  0x94   : >> { %2758 = vmatpush3.bf16.msra.mxu1 %v2983_v26  ;;  %2739 = vmatprep.subr.bf16.mxu0 %v3064_v3 }
  0x95   : >> { %2759 = vmatprep.subr.bf16.mxu1 %v3064_v3  ;;  %2753 = vmatprep.mubr.msk.bf16.mxu0 %vm3065_vm0, %v3064_v3  ;;  %v1648_v26 = vor.u32 %v1647_v24, %v1643_v23 }
  0x96   : >> { %2773 = vmatprep.mubr.msk.bf16.mxu1 %vm3065_vm0, %v3064_v3 }
  0x97   : >> { %2740 = vmatpush3.bf16.msra.mxu0 %v2984_v27  ;;  %v3032_v27 = vld [vmem:[%s3708_s1 + $0x3b8] sm:$0xff]  }
  0x98   : >> { %2760 = vmatpush3.bf16.msra.mxu1 %v2985_v28  ;;  %2741 = vmatprep.subr.bf16.mxu0 %v3064_v3  ;;  %v3033_v28 = vld [vmem:[%s3708_s1 + $0x3f8] sm:$0xff]  }
  0x99   : >> { %2761 = vmatprep.subr.bf16.mxu1 %v3064_v3 }
  0x9b   : >> { %2742 = vmatpush3.bf16.msra.mxu0 %v2986_v29 }
  0x9c   : >> { %2762 = vmatpush3.bf16.msra.mxu1 %v2987_v30  ;;  %2743 = vmatprep.subr.bf16.mxu0 %v3064_v3 }
  0x9d   : >> { %2763 = vmatprep.subr.bf16.mxu1 %v3064_v3 }
  0x9f   : >> { %2744 = vmatpush3.bf16.msra.mxu0 %v2988_v31  ;;  %v3034_v31 = vld [vmem:[%s3708_s1 + $0x3b0] sm:$0xff]  }
  0xa0   : >> { %2764 = vmatpush3.bf16.msra.mxu1 %v2989_v32  ;;  %2745 = vmatprep.subr.bf16.mxu0 %v3064_v3 }
  0xa1   : >> { %2765 = vmatprep.subr.bf16.mxu1 %v3064_v3 }
  0xa3   : >> { %2746 = vmatpush3.bf16.msra.mxu0 %v2990_v33 }
  0xa4   : >> { %2766 = vmatpush3.bf16.msra.mxu1 %v2991_v34  ;;  %2747 = vmatprep.subr.bf16.mxu0 %v3064_v3  ;;  %v3035_v34 = vld [vmem:[%s3708_s1 + $0x3f0] sm:$0xff]  }
  0xa5   : >> { %2767 = vmatprep.subr.bf16.mxu1 %v3064_v3 }
  0xa7   : >> { %2748 = vmatpush3.bf16.msra.mxu0 %v2992_v36 }
  0xa8   : >> { %2768 = vmatpush3.bf16.msra.mxu1 %v2993_v38  ;;  %2749 = vmatprep.subr.bf16.mxu0 %v3064_v3  ;;  %v3036_v38 = vld [vmem:[%s3708_s1 + $0x3a8] sm:$0xff]  }
  0xa9   : >> { %2769 = vmatprep.subr.bf16.mxu1 %v3064_v3 }
  0xab   : >> { %2750 = vmatpush3.bf16.msra.mxu0 %v2994_v39 }
  0xac   : >> { %2770 = vmatpush3.bf16.msra.mxu1 %v2995_v41  ;;  %2751 = vmatprep.subr.bf16.mxu0 %v3064_v3 }
  0xad   : >> { %2771 = vmatprep.subr.bf16.mxu1 %v3064_v3 }
  0xaf   : >> { %2752 = vmatpush3.bf16.msra.mxu0 %v2996_v42  ;;  %v3038_v42 = vld [vmem:[%s3708_s1 + $0x3a0] sm:$0xff]  }
  0xb0   : >> { %2772 = vmatpush3.bf16.msra.mxu1 %v2997_v45  ;;  %2777 = vmatprep.subr.bf16.mxu0 %v3064_v3  ;;  %v3041_v45 = vld [vmem:[%s3708_s1 + $0x3d8] sm:$0xff]  }
  0xb1   : >> { %2797 = vmatprep.subr.bf16.mxu1 %v3064_v3 }
  0xb2   : >> { %2754 = vmatmul.mubr.bf16.vlgmr.msra.gmra.mxu0 %v2231_v35 }
  0xb3   : >> { %2774 = vmatmul.mubr.bf16.vlgmr.msra.gmra.mxu1 %v1203_v46  ;;  %2778 = vmatpush3.bf16.msra.mxu0 %v2999_v47  ;;  %v3042_v46 = vld [vmem:[%s3708_s1 + $0x390] sm:$0xff]  }
  0xb4   : >> { %2798 = vmatpush3.bf16.msra.mxu1 %v3000_v48  ;;  %2779 = vmatprep.subr.bf16.mxu0 %v3064_v3  ;;  %v3043_v47 = vld [vmem:[%s3708_s1 + $0x3d0] sm:$0xff]   ;;  %v3044_v48 = vld [vmem:[%s3708_s1 + $0x388] sm:$0xff]  }
  0xb5   : >> { %2799 = vmatprep.subr.bf16.mxu1 %v3064_v3  ;;  %2793 = vmatprep.mubr.msk.bf16.mxu0 %vm3065_vm0, %v3064_v3 }
  0xb6   : >> { %2813 = vmatprep.mubr.msk.bf16.mxu1 %vm3065_vm0, %v3064_v3 }
  0xb7   : >> { %2780 = vmatpush3.bf16.msra.mxu0 %v3001_v49  ;;  %v3045_v49 = vld [vmem:[%s3708_s1 + $0x3c8] sm:$0xff]  }
  0xb8   : >> { %2800 = vmatpush3.bf16.msra.mxu1 %v3002_v50  ;;  %2781 = vmatprep.subr.bf16.mxu0 %v3064_v3  ;;  %v3046_v50 = vld [vmem:[%s3708_s1 + $0x380] sm:$0xff]  }
  0xb9   : >> { %2801 = vmatprep.subr.bf16.mxu1 %v3064_v3 }
  0xbb   : >> { %2782 = vmatpush3.bf16.msra.mxu0 %v3003_v51  ;;  %v1864_v51 = vrot.slane %v1643_v23, 1 }
  0xbc   : >> { %2802 = vmatpush3.bf16.msra.mxu1 %v3004_v52  ;;  %2783 = vmatprep.subr.bf16.mxu0 %v3064_v3  ;;  %v1865_v52 = vrot.slane %v1645_v20, 2 }
  0xbd   : >> { %2803 = vmatprep.subr.bf16.mxu1 %v3064_v3 }
  0xbf   : >> { %2784 = vmatpush3.bf16.msra.mxu0 %v3005_v53  ;;  %v3047_v53 = vld [vmem:[%s3708_s1 + $0x3c0] sm:$0xff]  }
  0xc0   : >> { %2804 = vmatpush3.bf16.msra.mxu1 %v3006_v54  ;;  %2785 = vmatprep.subr.bf16.mxu0 %v3064_v3  ;;  %v1756_v54 = vrot.slane %v3596_v17, 1 }
  0xc1   : >> { %2805 = vmatprep.subr.bf16.mxu1 %v3064_v3 }
  0xc3   : >> { %2786 = vmatpush3.bf16.msra.mxu0 %v3007_v55  ;;  %v1866_v55 = vor.u32 %v1865_v52, %v1864_v51 }
  0xc4   : >> { %2806 = vmatpush3.bf16.msra.mxu1 %v3008_v56  ;;  %2787 = vmatprep.subr.bf16.mxu0 %v3064_v3 }
  0xc5   : >> { %2807 = vmatprep.subr.bf16.mxu1 %v3064_v3 }
  0xc7   : >> { %2788 = vmatpush3.bf16.msra.mxu0 %v3009_v57 }
  0xc8   : >> { %2808 = vmatpush3.bf16.msra.mxu1 %v3010_v58  ;;  %2789 = vmatprep.subr.bf16.mxu0 %v3064_v3 }
  0xc9   : >> { %2809 = vmatprep.subr.bf16.mxu1 %v3064_v3 }
  0xcb   : >> { %2790 = vmatpush3.bf16.msra.mxu0 %v3011_v59 }
  0xcc   : >> { %2810 = vmatpush3.bf16.msra.mxu1 %v3012_v60  ;;  %2791 = vmatprep.subr.bf16.mxu0 %v3064_v3 }
  0xcd   : >> { %2811 = vmatprep.subr.bf16.mxu1 %v3064_v3 }
  0xcf   : >> { %2792 = vmatpush3.bf16.msra.mxu0 %v3013_v61 }
  0xd0   : >> { %2812 = vmatpush3.bf16.msra.mxu1 %v3014_v0  ;;  %2817 = vmatprep.subr.bf16.mxu0 %v3064_v3 }
  0xd1   : >> { %2837 = vmatprep.subr.bf16.mxu1 %v3064_v3 }
  0xd2   : >> { %2794 = vmatmul.mubr.bf16.vlgmr.msra.gmra.mxu0 %v1311_v2 }
  0xd3   : >> { %2814 = vmatmul.mubr.bf16.vlgmr.msra.gmra.mxu1 %v1421_v4  ;;  %2818 = vmatpush3.bf16.msra.mxu0 %v3015_v5 }
  0xd4   : >> { %2838 = vmatpush3.bf16.msra.mxu1 %v3016_v6  ;;  %2819 = vmatprep.subr.bf16.mxu0 %v3064_v3 }
  0xd5   : >> { %2839 = vmatprep.subr.bf16.mxu1 %v3064_v3  ;;  %2833 = vmatprep.mubr.msk.bf16.mxu0 %vm3065_vm0, %v3064_v3 }
  0xd6   : >> { %2853 = vmatprep.mubr.msk.bf16.mxu1 %vm3065_vm0, %v3064_v3 }
  0xd7   : >> { %2820 = vmatpush3.bf16.msra.mxu0 %v3017_v7 }
  0xd8   : >> { %2840 = vmatpush3.bf16.msra.mxu1 %v3018_v8  ;;  %2821 = vmatprep.subr.bf16.mxu0 %v3064_v3 }
  0xd9   : >> { %2841 = vmatprep.subr.bf16.mxu1 %v3064_v3 }
  0xdb   : >> { %2822 = vmatpush3.bf16.msra.mxu0 %v3019_v9 }
  0xdc   : >> { %2842 = vmatpush3.bf16.msra.mxu1 %v3020_v10  ;;  %2823 = vmatprep.subr.bf16.mxu0 %v3064_v3 }
  0xdd   : >> { %2843 = vmatprep.subr.bf16.mxu1 %v3064_v3 }
  0xdf   : >> { %2824 = vmatpush3.bf16.msra.mxu0 %v3021_v11 }
  0xe0   : >> { %2844 = vmatpush3.bf16.msra.mxu1 %v3022_v12  ;;  %2825 = vmatprep.subr.bf16.mxu0 %v3064_v3 }
  0xe1   : >> { %2845 = vmatprep.subr.bf16.mxu1 %v3064_v3 }
  0xe3   : >> { %2826 = vmatpush3.bf16.msra.mxu0 %v3023_v13 }
  0xe4   : >> { %2846 = vmatpush3.bf16.msra.mxu1 %v3024_v14  ;;  %2827 = vmatprep.subr.bf16.mxu0 %v3064_v3 }
  0xe5   : >> { %2847 = vmatprep.subr.bf16.mxu1 %v3064_v3 }
  0xe7   : >> { %2828 = vmatpush3.bf16.msra.mxu0 %v3025_v16 }
  0xe8   : >> { %2848 = vmatpush3.bf16.msra.mxu1 %v3026_v18  ;;  %2829 = vmatprep.subr.bf16.mxu0 %v3064_v3 }
  0xe9   : >> { %2849 = vmatprep.subr.bf16.mxu1 %v3064_v3 }
  0xeb   : >> { %2830 = vmatpush3.bf16.msra.mxu0 %v3027_v19 }
  0xec   : >> { %2850 = vmatpush3.bf16.msra.mxu1 %v3028_v21  ;;  %2831 = vmatprep.subr.bf16.mxu0 %v3064_v3 }
  0xed   : >> { %2851 = vmatprep.subr.bf16.mxu1 %v3064_v3 }
  0xef   : >> { %2832 = vmatpush3.bf16.msra.mxu0 %v3029_v22 }
  0xf0   : >> { %2852 = vmatpush3.bf16.msra.mxu1 %v3030_v25  ;;  %2857 = vmatprep.subr.bf16.mxu0 %v3064_v3 }
  0xf1   : >> { %2877 = vmatprep.subr.bf16.mxu1 %v3064_v3 }
  0xf2   : >> { %v310_v29 = vpop.f32.mrf.mxu0  ;;  %2834 = vmatmul.mubr.bf16.vlgmr.msra.gmra.mxu0 %v2330_v15 }
  0xf3   : >> { %v398_v30 = vpop.f32.mrf.mxu1  ;;  %2854 = vmatmul.mubr.bf16.vlgmr.msra.gmra.mxu1 %v1648_v26  ;;  %2858 = vmatpush3.bf16.msra.mxu0 %v3032_v27 }
  0xf4   : >> { %v399_v32 = vadd.f32 %v398_v30, %v310_v29  ;;  %2878 = vmatpush3.bf16.msra.mxu1 %v3033_v28  ;;  %v2595_v33 = vpop.f32.mrf.mxu0  ;;  %2859 = vmatprep.subr.bf16.mxu0 %v3064_v3 }
  0xf5   : >> { %v2615_v35 = vpop.f32.mrf.mxu1  ;;  %2879 = vmatprep.subr.bf16.mxu1 %v3064_v3  ;;  %2873 = vmatprep.mubr.msk.bf16.mxu0 %vm3065_vm0, %v3064_v3 }
  0xf6   : >> { %v313_v36 = vpop.f32.mrf.mxu0  ;;  %2893 = vmatprep.mubr.msk.bf16.mxu1 %vm3065_vm0, %v3064_v3 }
  0xf7   : >> { %v401_v37 = vpop.f32.mrf.mxu1  ;;  %2860 = vmatpush3.bf16.msra.mxu0 %v3034_v31 }
  0xf8   : >> { %2880 = vmatpush3.bf16.msra.mxu1 %v3035_v34  ;;  %v2596_v39 = vpop.f32.mrf.mxu0  ;;  %2861 = vmatprep.subr.bf16.mxu0 %v3064_v3 }
  0xf9   : >> { %v2616_v41 = vpop.f32.mrf.mxu1  ;;  %2881 = vmatprep.subr.bf16.mxu1 %v3064_v3 }
  0xfb   : >> { %2862 = vmatpush3.bf16.msra.mxu0 %v3036_v38 }
  0xfc   : >> { %2882 = vmatpush3.bf16.msra.mxu1 %v3037_v40  ;;  %2863 = vmatprep.subr.bf16.mxu0 %v3064_v3 }
  0xfd   : >> { %2883 = vmatprep.subr.bf16.mxu1 %v3064_v3 }
  0xff   : >> { %2864 = vmatpush3.bf16.msra.mxu0 %v3038_v42 }
 0x100   : >> { %2884 = vmatpush3.bf16.msra.mxu1 %v3039_v43  ;;  %2865 = vmatprep.subr.bf16.mxu0 %v3064_v3 }
 0x101   : >> { %2885 = vmatprep.subr.bf16.mxu1 %v3064_v3 }
 0x103   : >> { %2866 = vmatpush3.bf16.msra.mxu0 %v3040_v44 }
 0x104   : >> { %2886 = vmatpush3.bf16.msra.mxu1 %v3041_v45  ;;  %2867 = vmatprep.subr.bf16.mxu0 %v3064_v3 }
 0x105   : >> { %2887 = vmatprep.subr.bf16.mxu1 %v3064_v3 }
 0x107   : >> { %2868 = vmatpush3.bf16.msra.mxu0 %v3042_v46 }
 0x108   : >> { %2888 = vmatpush3.bf16.msra.mxu1 %v3043_v47  ;;  %2869 = vmatprep.subr.bf16.mxu0 %v3064_v3 }
 0x109   : >> { %2889 = vmatprep.subr.bf16.mxu1 %v3064_v3 }
 0x10b   : >> { %2870 = vmatpush3.bf16.msra.mxu0 %v3044_v48 }
 0x10c   : >> { %2890 = vmatpush3.bf16.msra.mxu1 %v3045_v49  ;;  %2871 = vmatprep.subr.bf16.mxu0 %v3064_v3 }
 0x10d   : >> { %2891 = vmatprep.subr.bf16.mxu1 %v3064_v3 }
 0x10f   : >> { %2872 = vmatpush3.bf16.msra.mxu0 %v3046_v50 }
 0x110   : >> { %2892 = vmatpush3.bf16.msra.mxu1 %v3047_v53 }
 0x112   : >> { %v505_v56 = vpop.f32.mrf.mxu0  ;;  %2874 = vmatmul.mubr.bf16.vlgmr.msra.gmra.mxu0 %v1756_v54 }
 0x113   : >> { %v511_v57 = vadd.f32 %v505_v56, %v399_v32  ;;  %v615_v58 = vpop.f32.mrf.mxu1  ;;  %2894 = vmatmul.mubr.bf16.vlgmr.msra.gmra.mxu1 %v1866_v55 }
 0x114   : >> { %v2635_v59 = vpop.f32.mrf.mxu0 }
 0x115   : >> { %v621_v60 = vadd.f32 %v615_v58, %v511_v57  ;;  %v2655_v61 = vpop.f32.mrf.mxu1 }
 0x116   : >> { %v508_v62 = vpop.f32.mrf.mxu0 }
 0x117   : >> { %v618_v63 = vpop.f32.mrf.mxu1 }
 0x118   : >> { %v2636_v0 = vpop.f32.mrf.mxu0 }
 0x119   : >> { %v2656_v2 = vpop.f32.mrf.mxu1 }
 0x132   : >> { %v725_v4 = vpop.f32.mrf.mxu0 }
 0x133   : >> { %v731_v5 = vadd.f32 %v725_v4, %v621_v60  ;;  %v842_v3 = vpop.f32.mrf.mxu1 }
 0x134   : >> { %v2675_v6 = vpop.f32.mrf.mxu0 }
 0x135   : >> { %v848_v7 = vadd.f32 %v842_v3, %v731_v5  ;;  %v2695_v8 = vpop.f32.mrf.mxu1 }
 0x136   : >> { %v728_v9 = vpop.f32.mrf.mxu0 }
 0x137   : >> { %v845_v10 = vpop.f32.mrf.mxu1 }
 0x138   : >> { %v2676_v11 = vpop.f32.mrf.mxu0 }
 0x139   : >> { %v2696_v12 = vpop.f32.mrf.mxu1 }
 0x152   : >> { %v950_v13 = vpop.f32.mrf.mxu0 }
 0x153   : >> { %v956_v14 = vadd.f32 %v950_v13, %v848_v7  ;;  %v1060_v15 = vpop.f32.mrf.mxu1 }
 0x154   : >> { %v2715_v16 = vpop.f32.mrf.mxu0 }
 0x155   : >> { %v1066_v17 = vadd.f32 %v1060_v15, %v956_v14  ;;  %v2735_v18 = vpop.f32.mrf.mxu1 }
 0x156   : >> { %v953_v19 = vpop.f32.mrf.mxu0 }
 0x157   : >> { %v1063_v20 = vpop.f32.mrf.mxu1 }
 0x158   : >> { %v2716_v21 = vpop.f32.mrf.mxu0 }
 0x159   : >> { %v2736_v22 = vpop.f32.mrf.mxu1 }
 0x172   : >> { %v1170_v23 = vpop.f32.mrf.mxu0 }
 0x173   : >> { %v1176_v24 = vadd.f32 %v1170_v23, %v1066_v17  ;;  %v1287_v25 = vpop.f32.mrf.mxu1 }
 0x174   : >> { %v2755_v26 = vpop.f32.mrf.mxu0 }
 0x175   : >> { %v1293_v27 = vadd.f32 %v1287_v25, %v1176_v24  ;;  %v2775_v28 = vpop.f32.mrf.mxu1 }
 0x176   : >> { %v1173_v29 = vpop.f32.mrf.mxu0 }
 0x177   : >> { %v1290_v30 = vpop.f32.mrf.mxu1 }
 0x178   : >> { %v2756_v31 = vpop.f32.mrf.mxu0 }
 0x179   : >> { %v2776_v32 = vpop.f32.mrf.mxu1 }
 0x192   : >> { %v1395_v33 = vpop.f32.mrf.mxu0 }
 0x193   : >> { %v1505_v34 = vpop.f32.mrf.mxu1  ;;  %v1401_v49 = vadd.f32 %v1395_v33, %v1293_v27 }
 0x194   : >> { %v2795_v35 = vpop.f32.mrf.mxu0 }
 0x195   : >> { %v2815_v36 = vpop.f32.mrf.mxu1  ;;  %v1511_v50 = vadd.f32 %v1505_v34, %v1401_v49 }
 0x196   : >> { %v1398_v37 = vpop.f32.mrf.mxu0 }
 0x197   : >> { %v1508_v38 = vpop.f32.mrf.mxu1 }
 0x198   : >> { %v2796_v39 = vpop.f32.mrf.mxu0 }
 0x199   : >> { %v2816_v40 = vpop.f32.mrf.mxu1 }
 0x1b2   : >> { %v1615_v41 = vpop.f32.mrf.mxu0 }
 0x1b3   : >> { %v1732_v42 = vpop.f32.mrf.mxu1  ;;  %v1621_v51 = vadd.f32 %v1615_v41, %v1511_v50 }
 0x1b4   : >> { %v2835_v43 = vpop.f32.mrf.mxu0 }
 0x1b5   : >> { %v2855_v44 = vpop.f32.mrf.mxu1  ;;  %v1738_v52 = vadd.f32 %v1732_v42, %v1621_v51 }
 0x1b6   : >> { %v1618_v45 = vpop.f32.mrf.mxu0 }
 0x1b7   : >> { %v1735_v46 = vpop.f32.mrf.mxu1 }
 0x1b8   : >> { %v2836_v47 = vpop.f32.mrf.mxu0 }
 0x1b9   : >> { %v2856_v48 = vpop.f32.mrf.mxu1 }
 0x1d2   : >> { %v1840_v53 = vpop.f32.mrf.mxu0 }
 0x1d3   : >> { %v1846_v54 = vadd.f32 %v1840_v53, %v1738_v52  ;;  %v1950_v55 = vpop.f32.mrf.mxu1 }
 0x1d4   : >> { %v2875_v56 = vpop.f32.mrf.mxu0 }
 0x1d5   : >> { %v1956_v57 = vadd.f32 %v1950_v55, %v1846_v54  ;;  %v2895_v58 = vpop.f32.mrf.mxu1  ;;  %179 = sbr.rel (!%p177_p4) target bundleno = 17 (0x11), region = 89 }
 0x1d6   : >> { %v1843_v59 = vpop.f32.mrf.mxu0 }
 0x1d7   : >> { %v1963_v60 = vadd.f32 %v3097_v1, %v1956_v57  ;;  %v1953_v61 = vpop.f32.mrf.mxu1 }
 0x1d8   : >> { %v2876_v62 = vpop.f32.mrf.mxu0 }
 0x1d9   : >> { %1967 = vst.msk [vmem:[%s1965_s27] sm:$0x3] %vm1966_vm1, %v1963_v60  ;;  %v2896_v63 = vpop.f32.mrf.mxu1 }
 0x1da PF: > { %s15_s14 = sadd.s32 1, %s3058_s14  }
 0x1db   : > { %p12_p5 = scmp.ge.s32.totalorder %s15_s14, 4  }
 0x1dd   :  { %14 = sbr.rel (!%p12_p5) target bundleno = 3 (0x3), region = 100 }

</bundles_post_ra>
